<compile_context>
chip_gen: v5e
topology: v5e:2x2
jax: 0.10.0
libtpu: 0.0.40
codegen_flags: <defaults>
</compile_context>

<pallas_src>
import math
from functools import partial

import jax
import jax.numpy as jnp
from jax.experimental import pallas as pl
from jax.experimental.pallas import tpu as pltpu


def _round_up(x, m):
    return ((x + m - 1) // m) * m


def _pick_tile(size, max_tile, granule):
    """Largest tile <= max_tile (multiple of `granule`) dividing `size` (size % granule == 0)."""
    t = min(max_tile, size)
    while size % t:
        t -= granule
    return t


# ------------------ Tiled Linear: bf16 MXU matmul, f32 accumulator, fused bias ------------------
def _linear_kernel(x_ref, w_ref, b_ref, o_ref, acc_ref):
    k = pl.program_id(2)

    @pl.when(k == 0)
    def _():
        acc_ref[...] = jnp.zeros_like(acc_ref)

    a = x_ref[...].astype(jnp.bfloat16)          # per-tile cast (no wrapper-side HBM pass)
    acc_ref[...] += jnp.dot(a, w_ref[...], preferred_element_type=jnp.float32)

    @pl.when(k == pl.num_programs(2) - 1)
    def _():
        o_ref[...] = (acc_ref[...] + b_ref[...]).astype(o_ref.dtype)   # bias once, on flush


def _linear_small_k_kernel(x_ref, w_ref, b_ref, o_ref):
    a = x_ref[...].astype(jnp.bfloat16)
    acc = jnp.dot(a, w_ref[...], preferred_element_type=jnp.float32)
    o_ref[...] = (acc + b_ref[...]).astype(o_ref.dtype)


def linear(x2d, wb, bb, *, out_dtype, tm_max=1024, tn_max=512, tk_max=512):
    """y = x2d @ wb + bb.  wb is pre-padded bf16 (K, Np), bb is f32 (1, Np), Np % 128 == 0."""
    M, K = x2d.shape
    Kw, Np = wb.shape
    assert Kw == K and Np % 128 == 0
    assert M % 8 == 0, "B*H*W must be a multiple of 8"

    tm = _pick_tile(M, tm_max, 8)
    tn = _pick_tile(Np, tn_max, 128)

    x_bytes = M * K * x2d.dtype.itemsize
    w_bytes = K * Np * wb.dtype.itemsize
    o_bytes = M * Np * jnp.dtype(out_dtype).itemsize
    cost = pl.CostEstimate(
        flops=2 * M * K * Np, transcendentals=0,
        bytes_accessed=x_bytes * (Np // tn) + w_bytes * (M // tm) + o_bytes)

    if K % 128 == 0:
        tk = _pick_tile(K, tk_max, 128)
        grid = (M // tm, Np // tn, K // tk)
        return pl.pallas_call(
            _linear_kernel,
            out_shape=jax.ShapeDtypeStruct((M, Np), out_dtype),
            grid=grid,
            in_specs=[
                pl.BlockSpec((tm, tk), lambda i, j, k: (i, k)),
                pl.BlockSpec((tk, tn), lambda i, j, k: (k, j)),
                pl.BlockSpec((1, tn), lambda i, j, k: (0, j)),
            ],
            out_specs=pl.BlockSpec((tm, tn), lambda i, j, k: (i, j)),
            scratch_shapes=[pltpu.VMEM((tm, tn), jnp.float32)],
            compiler_params=pltpu.CompilerParams(
                dimension_semantics=("parallel", "parallel", "arbitrary"),
                vmem_limit_bytes=32 * 1024 * 1024),
            cost_estimate=cost,
        )(x2d, wb, bb)

    # small / non-128-multiple contraction dim: single K block (block dim == full array dim),
    # so the activation never needs wrapper-side K padding.
    grid = (M // tm, Np // tn)
    return pl.pallas_call(
        _linear_small_k_kernel,
        out_shape=jax.ShapeDtypeStruct((M, Np), out_dtype),
        grid=grid,
        in_specs=[
            pl.BlockSpec((tm, K), lambda i, j: (i, 0)),
            pl.BlockSpec((K, tn), lambda i, j: (0, j)),
            pl.BlockSpec((1, tn), lambda i, j: (0, j)),
        ],
        out_specs=pl.BlockSpec((tm, tn), lambda i, j: (i, j)),
        compiler_params=pltpu.CompilerParams(
            dimension_semantics=("parallel", "parallel"),
            vmem_limit_bytes=32 * 1024 * 1024),
        cost_estimate=cost,
    )(x2d, wb, bb)


# --------- Depthwise 3x3 conv + bias + exact GELU (NHWC), H-strip tiled with 1-row halos --------
def _dwconv_gelu_kernel(x_ref, top_ref, bot_ref, w_ref, b_ref, o_ref):
    # x_ref: (1, R, W, tc) strip; top_ref/bot_ref: (1, 1, W, tc) halo rows (clamped at border);
    # w_ref: (3, 3, tc); b_ref: (1, tc)
    s = pl.program_id(2)
    ns = pl.num_programs(2)
    R, W, C = x_ref.shape[1], x_ref.shape[2], x_ref.shape[3]
    f32 = jnp.float32

    # Image-border halo rows are zero (padding=1 zero padding); interior halos come from the
    # neighbouring strip via the clamped index maps, so just zero-scale at the borders.
    top = top_ref[0].astype(f32) * (s != 0).astype(f32)
    bot = bot_ref[0].astype(f32) * (s != ns - 1).astype(f32)

    xs = jnp.concatenate([top, x_ref[0].astype(f32), bot], axis=0)      # (R+2, W, C)
    zc = jnp.zeros((R + 2, 1, C), f32)
    xp = jnp.concatenate([zc, xs, zc], axis=1)                          # (R+2, W+2, C)

    w = w_ref[...].astype(f32)
    wvec = [[w[kh, kw].reshape(1, 1, C) for kw in range(3)] for kh in range(3)]  # hoisted bcasts

    acc = jnp.zeros((R, W, C), f32)
    # kw outer: only ONE horizontally-shifted slab is live at a time; the vertical taps are
    # cheap leading-axis slices of it.
    for kw in range(3):
        col = xp[:, kw:kw + W, :]                                       # (R+2, W, C)
        for kh in range(3):
            acc = acc + col[kh:kh + R] * wvec[kh][kw]

    y = acc + b_ref[0].astype(f32).reshape(1, 1, C)
    # exact erf-based GELU (torch.nn.GELU default); f32 math is portable across v5e/v6e/v7x.
    # TODO(synk): gate bf16 tap math + tanh-approx GELU on chip generation (v6e/v7x only).
    y = 0.5 * y * (1.0 + jax.lax.erf(y * (1.0 / math.sqrt(2.0))))
    o_ref[0] = y.astype(o_ref.dtype)


def dwconv_gelu(x_img, w, b, *, rows_max=32, tc_max=128):
    B, H, W, C = x_img.shape
    assert C % 128 == 0
    tc = _pick_tile(C, tc_max, 128)
    rows = _pick_tile(H, rows_max, 1)
    ns = H // rows
    grid = (B, C // tc, ns)

    strip_map = lambda b_, c_, s_: (b_, s_, 0, c_)
    top_map = lambda b_, c_, s_: (b_, jnp.maximum(s_ * rows - 1, 0), 0, c_)
    bot_map = lambda b_, c_, s_: (b_, jnp.minimum((s_ + 1) * rows, H - 1), 0, c_)

    # TODO(synk): on bandwidth-starved v5e, fuse this stage into fc2's K loop
    #             (pltpu.emit_pipeline) to remove the hidden-tensor HBM round trip.
    return pl.pallas_call(
        _dwconv_gelu_kernel,
        out_shape=jax.ShapeDtypeStruct((B, H, W, C), x_img.dtype),
        grid=grid,
        in_specs=[
            pl.BlockSpec((1, rows, W, tc), strip_map),
            pl.BlockSpec((1, 1, W, tc), top_map),
            pl.BlockSpec((1, 1, W, tc), bot_map),
            pl.BlockSpec((3, 3, tc), lambda b_, c_, s_: (0, 0, c_)),
            pl.BlockSpec((1, tc), lambda b_, c_, s_: (0, c_)),
        ],
        out_specs=pl.BlockSpec((1, rows, W, tc), strip_map),
        compiler_params=pltpu.CompilerParams(
            dimension_semantics=("parallel", "parallel", "parallel"),
            vmem_limit_bytes=32 * 1024 * 1024),
        cost_estimate=pl.CostEstimate(
            flops=2 * 9 * B * H * W * C,
            transcendentals=B * H * W * C,
            bytes_accessed=2 * B * H * W * C * x_img.dtype.itemsize + 10 * C * 4),
    )(x_img, x_img, x_img, w, b)


# -------------------------- One-time weight preparation (pad + cast) ----------------------------
def prepare_params(params):
    hidden = params["fc1_w"].shape[1]
    out_f = params["fc2_w"].shape[1]
    hidden_p = _round_up(hidden, 128)   # lane-dense hidden channels (padded channels stay 0)
    out_p = _round_up(out_f, 128)
    fc1_w = jnp.pad(params["fc1_w"], ((0, 0), (0, hidden_p - hidden))).astype(jnp.bfloat16)
    fc1_b = jnp.pad(params["fc1_b"], (0, hidden_p - hidden)).astype(jnp.float32).reshape(1, hidden_p)
    fc2_w = jnp.pad(params["fc2_w"], ((0, hidden_p - hidden), (0, out_p - out_f))).astype(jnp.bfloat16)
    fc2_b = jnp.pad(params["fc2_b"], (0, out_p - out_f)).astype(jnp.float32).reshape(1, out_p)
    dw_w = jnp.pad(params["dw_w"], ((0, 0), (0, 0), (0, hidden_p - hidden))).astype(jnp.float32)
    dw_b = jnp.pad(params["dw_b"], (0, hidden_p - hidden)).astype(jnp.float32).reshape(1, hidden_p)
    return dict(fc1_w=fc1_w, fc1_b=fc1_b, fc2_w=fc2_w, fc2_b=fc2_b, dw_w=dw_w, dw_b=dw_b)


# ---------------------------------------- Mlp forward -------------------------------------------
def mlp_forward(x, prep, height, width, out_features):
    B, N, Cin = x.shape
    assert N == height * width
    M = B * N
    hidden_p = prep["fc1_w"].shape[1]

    # fc1 -> bf16 hidden, channel dim kept padded to hidden_p (no slice copy of the big tensor)
    h = linear(x.reshape(M, Cin), prep["fc1_w"], prep["fc1_b"], out_dtype=jnp.bfloat16)

    # DWConv 3x3 (groups=hidden) + bias + GELU, fused; H-strip tiled, halos handled in-kernel
    h = dwconv_gelu(h.reshape(B, height, width, hidden_p), prep["dw_w"], prep["dw_b"])
    # dropout p=0.0 -> identity

    # fc2 (contraction dim already == hidden_p; fc2 weight rows were zero-padded at prepare time)
    out = linear(h.reshape(M, hidden_p), prep["fc2_w"], prep["fc2_b"], out_dtype=x.dtype)
    # dropout p=0.0 -> identity
    return out[:, :out_features].reshape(B, N, out_features)


# ------------------------------------- pure-JAX reference ---------------------------------------
def mlp_reference(x, params, height, width):
    B, N, Cin = x.shape
    hidden = params["fc1_w"].shape[1]
    h = x @ params["fc1_w"] + params["fc1_b"]
    h_img = h.reshape(B, height, width, hidden)
    dw = jax.lax.conv_general_dilated(
        h_img,
        params["dw_w"].reshape(3, 3, 1, hidden),
        window_strides=(1, 1),
        padding="SAME",
        dimension_numbers=("NHWC", "HWIO", "NHWC"),
        feature_group_count=hidden,
    ) + params["dw_b"]
    g = 0.5 * dw * (1.0 + jax.lax.erf(dw / jnp.sqrt(2.0)))
    g = g.reshape(B, N, hidden)
    return g @ params["fc2_w"] + params["fc2_b"]


# --------------------------------------------- main ---------------------------------------------
def init_params(key, in_features, hidden_features, out_features):
    k1, k2, k3 = jax.random.split(key, 3)
    # nn.Linear: trunc_normal(std=0.02) weights, zero bias (stored as (in, out))
    fc1_w = 0.02 * jax.random.normal(k1, (in_features, hidden_features), jnp.float32)
    fc1_b = jnp.zeros((hidden_features,), jnp.float32)
    fc2_w = 0.02 * jax.random.normal(k2, (hidden_features, out_features), jnp.float32)
    fc2_b = jnp.zeros((out_features,), jnp.float32)
    # depthwise Conv2d(dim, dim, 3, groups=dim): normal(0, sqrt(2/fan_out)), fan_out = 9
    dw_w = math.sqrt(2.0 / 9.0) * jax.random.normal(k3, (3, 3, hidden_features), jnp.float32)
    dw_b = jnp.zeros((hidden_features,), jnp.float32)
    return dict(fc1_w=fc1_w, fc1_b=fc1_b, fc2_w=fc2_w, fc2_b=fc2_b, dw_w=dw_w, dw_b=dw_b)


if __name__ == "__main__":
    B, H, W = 2, 16, 16
    in_features, hidden_features = 4, 32
    out_features = in_features
    N = H * W

    key = jax.random.PRNGKey(0)
    kx, kp = jax.random.split(key)
    x = jax.random.normal(kx, (B, N, in_features), jnp.float32)
    params = init_params(kp, in_features, hidden_features, out_features)
    prep = prepare_params(params)   # one-time weight pad/cast, outside the per-call path

    fwd = jax.jit(mlp_forward, static_argnames=("height", "width", "out_features"))
    out = fwd(x, prep, height=H, width=W, out_features=out_features)
    out = jax.block_until_ready(out)

    ref = mlp_reference(x, params, H, W)
    assert out.shape == (B, N, out_features)
    # bf16 matmul operands / bf16 intermediate storage -> compare with bf16-level tolerance
    assert jnp.allclose(out, ref, atol=2e-3, rtol=2e-2), "mismatch vs reference"

    print("KERNEL_OK")
</pallas_src>

<mosaic_0001>
module attributes {stable_mosaic.version = 11 : i64} {
  func.func @_dwconv_gelu_kernel(%arg0: i32, %arg1: i32, %arg2: i32, %arg3: memref<1x16x16x128xbf16, #tpu.memory_space<vmem>>, %arg4: memref<1x1x16x128xbf16, #tpu.memory_space<vmem>>, %arg5: memref<1x1x16x128xbf16, #tpu.memory_space<vmem>>, %arg6: memref<3x3x128xf32, #tpu.memory_space<vmem>>, %arg7: memref<1x128xf32, #tpu.memory_space<vmem>>, %arg8: memref<1x16x16x128xbf16, #tpu.memory_space<vmem>>) attributes {dimension_semantics = [#tpu.dimension_semantics<parallel>, #tpu.dimension_semantics<parallel>, #tpu.dimension_semantics<parallel>], iteration_bounds = array<i64: 2, 1, 1>, scalar_prefetch = 0 : i64, scratch_operands = 0 : i64, tpu.core_type = #tpu.core_type<tc>, window_params = [{transform_indices = @transform_0, window_bounds = array<i64: 1, 16, 16, 128>}, {transform_indices = @transform_1, window_bounds = array<i64: 1, 1, 16, 128>}, {transform_indices = @transform_2, window_bounds = array<i64: 1, 1, 16, 128>}, {transform_indices = @transform_3, window_bounds = array<i64: 3, 3, 128>}, {transform_indices = @transform_4, window_bounds = array<i64: 1, 128>}, {transform_indices = @transform_5, window_bounds = array<i64: 1, 16, 16, 128>}]} {
    %c0 = arith.constant 0 : index
    %c0_0 = arith.constant 0 : index
    %c0_1 = arith.constant 0 : index
    %c0_2 = arith.constant 0 : index
    %0 = vector.load %arg4[%c0, %c0_0, %c0_1, %c0_2] : memref<1x1x16x128xbf16, #tpu.memory_space<vmem>>, vector<1x1x16x128xbf16>
    %1 = vector.shape_cast %0 : vector<1x1x16x128xbf16> to vector<1x16x128xbf16>
    %2 = arith.extf %1 : vector<1x16x128xbf16> to vector<1x16x128xf32>
    %c0_i32 = arith.constant 0 : i32
    %3 = arith.cmpi ne, %arg2, %c0_i32 : i32
    %4 = arith.extui %3 : i1 to i32
    %5 = arith.sitofp %4 : i32 to f32
    %6 = vector.broadcast %5 : f32 to vector<1x16x128xf32>
    %7 = arith.mulf %2, %6 : vector<1x16x128xf32>
    %c0_3 = arith.constant 0 : index
    %c0_4 = arith.constant 0 : index
    %c0_5 = arith.constant 0 : index
    %c0_6 = arith.constant 0 : index
    %8 = vector.load %arg5[%c0_3, %c0_4, %c0_5, %c0_6] : memref<1x1x16x128xbf16, #tpu.memory_space<vmem>>, vector<1x1x16x128xbf16>
    %9 = vector.shape_cast %8 : vector<1x1x16x128xbf16> to vector<1x16x128xbf16>
    %10 = arith.extf %9 : vector<1x16x128xbf16> to vector<1x16x128xf32>
    %c0_i32_7 = arith.constant 0 : i32
    %11 = arith.cmpi ne, %arg2, %c0_i32_7 : i32
    %12 = arith.extui %11 : i1 to i32
    %13 = arith.sitofp %12 : i32 to f32
    %14 = vector.broadcast %13 : f32 to vector<1x16x128xf32>
    %15 = arith.mulf %10, %14 : vector<1x16x128xf32>
    %c0_8 = arith.constant 0 : index
    %c0_9 = arith.constant 0 : index
    %c0_10 = arith.constant 0 : index
    %c0_11 = arith.constant 0 : index
    %16 = vector.load %arg3[%c0_8, %c0_9, %c0_10, %c0_11] : memref<1x16x16x128xbf16, #tpu.memory_space<vmem>>, vector<1x16x16x128xbf16>
    %17 = vector.shape_cast %16 : vector<1x16x16x128xbf16> to vector<16x16x128xbf16>
    %18 = arith.extf %17 : vector<16x16x128xbf16> to vector<16x16x128xf32>
    %19 = tpu.concatenate %7, %18, %15 in 0 : vector<1x16x128xf32>, vector<16x16x128xf32>, vector<1x16x128xf32> -> vector<18x16x128xf32>
    %cst = arith.constant 0.000000e+00 : f32
    %20 = vector.broadcast %cst : f32 to vector<18x1x128xf32>
    %21 = tpu.concatenate %20, %19, %20 in 1 : vector<18x1x128xf32>, vector<18x16x128xf32>, vector<18x1x128xf32> -> vector<18x18x128xf32>
    %c0_12 = arith.constant 0 : index
    %c0_13 = arith.constant 0 : index
    %c0_14 = arith.constant 0 : index
    %22 = vector.load %arg6[%c0_12, %c0_13, %c0_14] : memref<3x3x128xf32, #tpu.memory_space<vmem>>, vector<3x3x128xf32>
    %23 = vector.extract_strided_slice %22 {offsets = [0, 0, 0], sizes = [1, 1, 128], strides = [1, 1, 1]} : vector<3x3x128xf32> to vector<1x1x128xf32>
    %24 = vector.shape_cast %23 : vector<1x1x128xf32> to vector<128xf32>
    %25 = vector.shape_cast %24 : vector<128xf32> to vector<1x1x128xf32>
    %26 = vector.extract_strided_slice %22 {offsets = [0, 1, 0], sizes = [1, 1, 128], strides = [1, 1, 1]} : vector<3x3x128xf32> to vector<1x1x128xf32>
    %27 = vector.shape_cast %26 : vector<1x1x128xf32> to vector<128xf32>
    %28 = vector.shape_cast %27 : vector<128xf32> to vector<1x1x128xf32>
    %29 = vector.extract_strided_slice %22 {offsets = [0, 2, 0], sizes = [1, 1, 128], strides = [1, 1, 1]} : vector<3x3x128xf32> to vector<1x1x128xf32>
    %30 = vector.shape_cast %29 : vector<1x1x128xf32> to vector<128xf32>
    %31 = vector.shape_cast %30 : vector<128xf32> to vector<1x1x128xf32>
    %32 = vector.extract_strided_slice %22 {offsets = [1, 0, 0], sizes = [1, 1, 128], strides = [1, 1, 1]} : vector<3x3x128xf32> to vector<1x1x128xf32>
    %33 = vector.shape_cast %32 : vector<1x1x128xf32> to vector<128xf32>
    %34 = vector.shape_cast %33 : vector<128xf32> to vector<1x1x128xf32>
    %35 = vector.extract_strided_slice %22 {offsets = [1, 1, 0], sizes = [1, 1, 128], strides = [1, 1, 1]} : vector<3x3x128xf32> to vector<1x1x128xf32>
    %36 = vector.shape_cast %35 : vector<1x1x128xf32> to vector<128xf32>
    %37 = vector.shape_cast %36 : vector<128xf32> to vector<1x1x128xf32>
    %38 = vector.extract_strided_slice %22 {offsets = [1, 2, 0], sizes = [1, 1, 128], strides = [1, 1, 1]} : vector<3x3x128xf32> to vector<1x1x128xf32>
    %39 = vector.shape_cast %38 : vector<1x1x128xf32> to vector<128xf32>
    %40 = vector.shape_cast %39 : vector<128xf32> to vector<1x1x128xf32>
    %41 = vector.extract_strided_slice %22 {offsets = [2, 0, 0], sizes = [1, 1, 128], strides = [1, 1, 1]} : vector<3x3x128xf32> to vector<1x1x128xf32>
    %42 = vector.shape_cast %41 : vector<1x1x128xf32> to vector<128xf32>
    %43 = vector.shape_cast %42 : vector<128xf32> to vector<1x1x128xf32>
    %44 = vector.extract_strided_slice %22 {offsets = [2, 1, 0], sizes = [1, 1, 128], strides = [1, 1, 1]} : vector<3x3x128xf32> to vector<1x1x128xf32>
    %45 = vector.shape_cast %44 : vector<1x1x128xf32> to vector<128xf32>
    %46 = vector.shape_cast %45 : vector<128xf32> to vector<1x1x128xf32>
    %47 = vector.extract_strided_slice %22 {offsets = [2, 2, 0], sizes = [1, 1, 128], strides = [1, 1, 1]} : vector<3x3x128xf32> to vector<1x1x128xf32>
    %48 = vector.shape_cast %47 : vector<1x1x128xf32> to vector<128xf32>
    %49 = vector.shape_cast %48 : vector<128xf32> to vector<1x1x128xf32>
    %cst_15 = arith.constant 0.000000e+00 : f32
    %50 = vector.broadcast %cst_15 : f32 to vector<16x16x128xf32>
    %51 = vector.extract_strided_slice %21 {offsets = [0, 0, 0], sizes = [18, 16, 128], strides = [1, 1, 1]} : vector<18x18x128xf32> to vector<18x16x128xf32>
    %52 = vector.extract_strided_slice %51 {offsets = [0, 0, 0], sizes = [16, 16, 128], strides = [1, 1, 1]} : vector<18x16x128xf32> to vector<16x16x128xf32>
    %53 = vector.broadcast %25 : vector<1x1x128xf32> to vector<16x16x128xf32>
    %54 = arith.mulf %52, %53 : vector<16x16x128xf32>
    %55 = arith.addf %50, %54 : vector<16x16x128xf32>
    %56 = vector.extract_strided_slice %51 {offsets = [1, 0, 0], sizes = [16, 16, 128], strides = [1, 1, 1]} : vector<18x16x128xf32> to vector<16x16x128xf32>
    %57 = vector.broadcast %34 : vector<1x1x128xf32> to vector<16x16x128xf32>
    %58 = arith.mulf %56, %57 : vector<16x16x128xf32>
    %59 = arith.addf %55, %58 : vector<16x16x128xf32>
    %60 = vector.extract_strided_slice %51 {offsets = [2, 0, 0], sizes = [16, 16, 128], strides = [1, 1, 1]} : vector<18x16x128xf32> to vector<16x16x128xf32>
    %61 = vector.broadcast %43 : vector<1x1x128xf32> to vector<16x16x128xf32>
    %62 = arith.mulf %60, %61 : vector<16x16x128xf32>
    %63 = arith.addf %59, %62 : vector<16x16x128xf32>
    %64 = vector.extract_strided_slice %21 {offsets = [0, 1, 0], sizes = [18, 16, 128], strides = [1, 1, 1]} : vector<18x18x128xf32> to vector<18x16x128xf32>
    %65 = vector.extract_strided_slice %64 {offsets = [0, 0, 0], sizes = [16, 16, 128], strides = [1, 1, 1]} : vector<18x16x128xf32> to vector<16x16x128xf32>
    %66 = vector.broadcast %28 : vector<1x1x128xf32> to vector<16x16x128xf32>
    %67 = arith.mulf %65, %66 : vector<16x16x128xf32>
    %68 = arith.addf %63, %67 : vector<16x16x128xf32>
    %69 = vector.extract_strided_slice %64 {offsets = [1, 0, 0], sizes = [16, 16, 128], strides = [1, 1, 1]} : vector<18x16x128xf32> to vector<16x16x128xf32>
    %70 = vector.broadcast %37 : vector<1x1x128xf32> to vector<16x16x128xf32>
    %71 = arith.mulf %69, %70 : vector<16x16x128xf32>
    %72 = arith.addf %68, %71 : vector<16x16x128xf32>
    %73 = vector.extract_strided_slice %64 {offsets = [2, 0, 0], sizes = [16, 16, 128], strides = [1, 1, 1]} : vector<18x16x128xf32> to vector<16x16x128xf32>
    %74 = vector.broadcast %46 : vector<1x1x128xf32> to vector<16x16x128xf32>
    %75 = arith.mulf %73, %74 : vector<16x16x128xf32>
    %76 = arith.addf %72, %75 : vector<16x16x128xf32>
    %77 = vector.extract_strided_slice %21 {offsets = [0, 2, 0], sizes = [18, 16, 128], strides = [1, 1, 1]} : vector<18x18x128xf32> to vector<18x16x128xf32>
    %78 = vector.extract_strided_slice %77 {offsets = [0, 0, 0], sizes = [16, 16, 128], strides = [1, 1, 1]} : vector<18x16x128xf32> to vector<16x16x128xf32>
    %79 = vector.broadcast %31 : vector<1x1x128xf32> to vector<16x16x128xf32>
    %80 = arith.mulf %78, %79 : vector<16x16x128xf32>
    %81 = arith.addf %76, %80 : vector<16x16x128xf32>
    %82 = vector.extract_strided_slice %77 {offsets = [1, 0, 0], sizes = [16, 16, 128], strides = [1, 1, 1]} : vector<18x16x128xf32> to vector<16x16x128xf32>
    %83 = vector.broadcast %40 : vector<1x1x128xf32> to vector<16x16x128xf32>
    %84 = arith.mulf %82, %83 : vector<16x16x128xf32>
    %85 = arith.addf %81, %84 : vector<16x16x128xf32>
    %86 = vector.extract_strided_slice %77 {offsets = [2, 0, 0], sizes = [16, 16, 128], strides = [1, 1, 1]} : vector<18x16x128xf32> to vector<16x16x128xf32>
    %87 = vector.broadcast %49 : vector<1x1x128xf32> to vector<16x16x128xf32>
    %88 = arith.mulf %86, %87 : vector<16x16x128xf32>
    %89 = arith.addf %85, %88 : vector<16x16x128xf32>
    %c0_16 = arith.constant 0 : index
    %c0_17 = arith.constant 0 : index
    %90 = vector.load %arg7[%c0_16, %c0_17] : memref<1x128xf32, #tpu.memory_space<vmem>>, vector<1x128xf32>
    %91 = vector.shape_cast %90 : vector<1x128xf32> to vector<128xf32>
    %92 = vector.shape_cast %91 : vector<128xf32> to vector<1x1x128xf32>
    %93 = vector.broadcast %92 : vector<1x1x128xf32> to vector<16x16x128xf32>
    %94 = arith.addf %89, %93 : vector<16x16x128xf32>
    %cst_18 = arith.constant 5.000000e-01 : f32
    %95 = vector.broadcast %cst_18 : f32 to vector<16x16x128xf32>
    %96 = arith.mulf %95, %94 : vector<16x16x128xf32>
    %cst_19 = arith.constant 0.707106769 : f32
    %97 = vector.broadcast %cst_19 : f32 to vector<16x16x128xf32>
    %98 = arith.mulf %94, %97 : vector<16x16x128xf32>
    %99 = math.erf %98 : vector<16x16x128xf32>
    %cst_20 = arith.constant 1.000000e+00 : f32
    %100 = vector.broadcast %cst_20 : f32 to vector<16x16x128xf32>
    %101 = arith.addf %100, %99 : vector<16x16x128xf32>
    %102 = arith.mulf %96, %101 : vector<16x16x128xf32>
    %103 = arith.truncf %102 : vector<16x16x128xf32> to vector<16x16x128xbf16>
    %c0_21 = arith.constant 0 : index
    %c0_22 = arith.constant 0 : index
    %c0_23 = arith.constant 0 : index
    %c0_24 = arith.constant 0 : index
    %104 = vector.load %arg8[%c0_21, %c0_22, %c0_23, %c0_24] : memref<1x16x16x128xbf16, #tpu.memory_space<vmem>>, vector<1x16x16x128xbf16>
    %105 = vector.shape_cast %104 : vector<1x16x16x128xbf16> to vector<16x16x128xbf16>
    %106 = vector.shape_cast %103 : vector<16x16x128xbf16> to vector<1x16x16x128xbf16>
    tpu.vector_store %arg8[%c0_21, %c0_22, %c0_23, %c0_24], %106 {strides = array<i32>} : memref<1x16x16x128xbf16, #tpu.memory_space<vmem>>, vector<1x16x16x128xbf16>,
    return
  }
  func.func @transform_0(%arg0: i32, %arg1: i32, %arg2: i32) -> (i32, i32, i32, i32) {
    %c0_i32 = arith.constant 0 : i32
    %c0_i32_0 = arith.constant 0 : i32
    return %arg0, %arg2, %c0_i32, %arg1 : i32, i32, i32, i32
  }
  func.func @transform_1(%arg0: i32, %arg1: i32, %arg2: i32) -> (i32, i32, i32, i32) {
    %c16_i32 = arith.constant 16 : i32
    %0 = arith.muli %arg2, %c16_i32 : i32
    %c1_i32 = arith.constant 1 : i32
    %1 = arith.subi %0, %c1_i32 : i32
    %c0_i32 = arith.constant 0 : i32
    %2 = arith.maxsi %1, %c0_i32 : i32
    %c0_i32_0 = arith.constant 0 : i32
    %c0_i32_1 = arith.constant 0 : i32
    return %arg0, %2, %c0_i32_0, %arg1 : i32, i32, i32, i32
  }
  func.func @transform_2(%arg0: i32, %arg1: i32, %arg2: i32) -> (i32, i32, i32, i32) {
    %c1_i32 = arith.constant 1 : i32
    %0 = arith.addi %arg2, %c1_i32 : i32
    %c16_i32 = arith.constant 16 : i32
    %1 = arith.muli %0, %c16_i32 : i32
    %c15_i32 = arith.constant 15 : i32
    %2 = arith.minsi %1, %c15_i32 : i32
    %c0_i32 = arith.constant 0 : i32
    %c0_i32_0 = arith.constant 0 : i32
    return %arg0, %2, %c0_i32, %arg1 : i32, i32, i32, i32
  }
  func.func @transform_3(%arg0: i32, %arg1: i32, %arg2: i32) -> (i32, i32, i32) {
    %c0_i32 = arith.constant 0 : i32
    %c0_i32_0 = arith.constant 0 : i32
    %c0_i32_1 = arith.constant 0 : i32
    return %c0_i32, %c0_i32_0, %arg1 : i32, i32, i32
  }
  func.func @transform_4(%arg0: i32, %arg1: i32, %arg2: i32) -> (i32, i32) {
    %c0_i32 = arith.constant 0 : i32
    %c0_i32_0 = arith.constant 0 : i32
    return %c0_i32, %arg1 : i32, i32
  }
  func.func @transform_5(%arg0: i32, %arg1: i32, %arg2: i32) -> (i32, i32, i32, i32) {
    %c0_i32 = arith.constant 0 : i32
    %c0_i32_0 = arith.constant 0 : i32
    return %arg0, %arg2, %c0_i32, %arg1 : i32, i32, i32, i32
  }
}

module attributes {stable_mosaic.version = 11 : i64} {
  func.func @_linear_small_k_kernel(%arg0: i32, %arg1: i32, %arg2: memref<512x4xf32, #tpu.memory_space<vmem>>, %arg3: memref<4x128xbf16, #tpu.memory_space<vmem>>, %arg4: memref<1x128xf32, #tpu.memory_space<vmem>>, %arg5: memref<512x128xbf16, #tpu.memory_space<vmem>>) attributes {dimension_semantics = [#tpu.dimension_semantics<parallel>, #tpu.dimension_semantics<parallel>], iteration_bounds = array<i64: 1, 1>, scalar_prefetch = 0 : i64, scratch_operands = 0 : i64, tpu.core_type = #tpu.core_type<tc>, window_params = [{transform_indices = @transform_0, window_bounds = array<i64: 512, 4>}, {transform_indices = @transform_1, window_bounds = array<i64: 4, 128>}, {transform_indices = @transform_2, window_bounds = array<i64: 1, 128>}, {transform_indices = @transform_3, window_bounds = array<i64: 512, 128>}]} {
    %c0 = arith.constant 0 : index
    %c0_0 = arith.constant 0 : index
    %0 = vector.load %arg2[%c0, %c0_0] : memref<512x4xf32, #tpu.memory_space<vmem>>, vector<512x4xf32>
    %1 = arith.truncf %0 : vector<512x4xf32> to vector<512x4xbf16>
    %c0_1 = arith.constant 0 : index
    %c0_2 = arith.constant 0 : index
    %2 = vector.load %arg3[%c0_1, %c0_2] : memref<4x128xbf16, #tpu.memory_space<vmem>>, vector<4x128xbf16>
    %cst = arith.constant dense<0.000000e+00> : vector<512x128xf32>
    %3 = tpu.matmul %1, %2, %cst {dimension_numbers = #tpu.dot_dimension_numbers<[1], [0], [0], [1], [0, 0, 1, 1], [], []>} : vector<512x4xbf16>, vector<4x128xbf16>, vector<512x128xf32> -> vector<512x128xf32>
    %c0_3 = arith.constant 0 : index
    %c0_4 = arith.constant 0 : index
    %4 = vector.load %arg4[%c0_3, %c0_4] : memref<1x128xf32, #tpu.memory_space<vmem>>, vector<1x128xf32>
    %5 = vector.broadcast %4 : vector<1x128xf32> to vector<512x128xf32>
    %6 = arith.addf %3, %5 : vector<512x128xf32>
    %7 = arith.truncf %6 : vector<512x128xf32> to vector<512x128xbf16>
    %c0_5 = arith.constant 0 : index
    %c0_6 = arith.constant 0 : index
    %8 = vector.load %arg5[%c0_5, %c0_6] : memref<512x128xbf16, #tpu.memory_space<vmem>>, vector<512x128xbf16>
    tpu.vector_store %arg5[%c0_5, %c0_6], %7 {strides = array<i32>} : memref<512x128xbf16, #tpu.memory_space<vmem>>, vector<512x128xbf16>,
    return
  }
  func.func @transform_0(%arg0: i32, %arg1: i32) -> (i32, i32) {
    %c0_i32 = arith.constant 0 : i32
    %c0_i32_0 = arith.constant 0 : i32
    return %arg0, %c0_i32 : i32, i32
  }
  func.func @transform_1(%arg0: i32, %arg1: i32) -> (i32, i32) {
    %c0_i32 = arith.constant 0 : i32
    %c0_i32_0 = arith.constant 0 : i32
    return %c0_i32, %arg1 : i32, i32
  }
  func.func @transform_2(%arg0: i32, %arg1: i32) -> (i32, i32) {
    %c0_i32 = arith.constant 0 : i32
    %c0_i32_0 = arith.constant 0 : i32
    return %c0_i32, %arg1 : i32, i32
  }
  func.func @transform_3(%arg0: i32, %arg1: i32) -> (i32, i32) {
    %c0_i32 = arith.constant 0 : i32
    return %arg0, %arg1 : i32, i32
  }
}

module attributes {stable_mosaic.version = 11 : i64} {
  func.func @_linear_kernel(%arg0: i32, %arg1: i32, %arg2: i32, %arg3: memref<512x128xbf16, #tpu.memory_space<vmem>>, %arg4: memref<128x128xbf16, #tpu.memory_space<vmem>>, %arg5: memref<1x128xf32, #tpu.memory_space<vmem>>, %arg6: memref<512x128xf32, #tpu.memory_space<vmem>>, %arg7: memref<512x128xf32, #tpu.memory_space<vmem>>) attributes {dimension_semantics = [#tpu.dimension_semantics<parallel>, #tpu.dimension_semantics<parallel>, #tpu.dimension_semantics<arbitrary>], iteration_bounds = array<i64: 1, 1, 1>, scalar_prefetch = 0 : i64, scratch_operands = 1 : i64, tpu.core_type = #tpu.core_type<tc>, window_params = [{transform_indices = @transform_0, window_bounds = array<i64: 512, 128>}, {transform_indices = @transform_1, window_bounds = array<i64: 128, 128>}, {transform_indices = @transform_2, window_bounds = array<i64: 1, 128>}, {transform_indices = @transform_3, window_bounds = array<i64: 512, 128>}]} {
    %c0_i32 = arith.constant 0 : i32
    %0 = arith.cmpi eq, %arg2, %c0_i32 : i32
    %1 = arith.extui %0 : i1 to i32
    %c0_i32_0 = arith.constant 0 : i32
    %2 = arith.cmpi ne, %1, %c0_i32_0 : i32
    scf.if %2 {
      %cst_10 = arith.constant 0.000000e+00 : f32
      %12 = vector.broadcast %cst_10 : f32 to vector<512x128xf32>
      %c0_11 = arith.constant 0 : index
      %c0_12 = arith.constant 0 : index
      %13 = vector.load %arg7[%c0_11, %c0_12] : memref<512x128xf32, #tpu.memory_space<vmem>>, vector<512x128xf32>
      tpu.vector_store %arg7[%c0_11, %c0_12], %12 {strides = array<i32>} : memref<512x128xf32, #tpu.memory_space<vmem>>, vector<512x128xf32>,
    } else {
    }
    %c0 = arith.constant 0 : index
    %c0_1 = arith.constant 0 : index
    %3 = vector.load %arg3[%c0, %c0_1] : memref<512x128xbf16, #tpu.memory_space<vmem>>, vector<512x128xbf16>
    %c0_2 = arith.constant 0 : index
    %c0_3 = arith.constant 0 : index
    %4 = vector.load %arg7[%c0_2, %c0_3] : memref<512x128xf32, #tpu.memory_space<vmem>>, vector<512x128xf32>
    %c0_4 = arith.constant 0 : index
    %c0_5 = arith.constant 0 : index
    %5 = vector.load %arg4[%c0_4, %c0_5] : memref<128x128xbf16, #tpu.memory_space<vmem>>, vector<128x128xbf16>
    %cst = arith.constant dense<0.000000e+00> : vector<512x128xf32>
    %6 = tpu.matmul %3, %5, %cst {dimension_numbers = #tpu.dot_dimension_numbers<[1], [0], [0], [1], [0, 0, 1, 1], [], []>} : vector<512x128xbf16>, vector<128x128xbf16>, vector<512x128xf32> -> vector<512x128xf32>
    %7 = arith.addf %4, %6 : vector<512x128xf32>
    %c0_6 = arith.constant 0 : index
    %c0_7 = arith.constant 0 : index
    %8 = vector.load %arg7[%c0_6, %c0_7] : memref<512x128xf32, #tpu.memory_space<vmem>>, vector<512x128xf32>
    tpu.vector_store %arg7[%c0_6, %c0_7], %7 {strides = array<i32>} : memref<512x128xf32, #tpu.memory_space<vmem>>, vector<512x128xf32>,
    %c0_i32_8 = arith.constant 0 : i32
    %9 = arith.cmpi eq, %arg2, %c0_i32_8 : i32
    %10 = arith.extui %9 : i1 to i32
    %c0_i32_9 = arith.constant 0 : i32
    %11 = arith.cmpi ne, %10, %c0_i32_9 : i32
    scf.if %11 {
      %c0_10 = arith.constant 0 : index
      %c0_11 = arith.constant 0 : index
      %12 = vector.load %arg7[%c0_10, %c0_11] : memref<512x128xf32, #tpu.memory_space<vmem>>, vector<512x128xf32>
      %c0_12 = arith.constant 0 : index
      %c0_13 = arith.constant 0 : index
      %13 = vector.load %arg5[%c0_12, %c0_13] : memref<1x128xf32, #tpu.memory_space<vmem>>, vector<1x128xf32>
      %14 = vector.broadcast %13 : vector<1x128xf32> to vector<512x128xf32>
      %15 = arith.addf %12, %14 : vector<512x128xf32>
      %c0_14 = arith.constant 0 : index
      %c0_15 = arith.constant 0 : index
      %16 = vector.load %arg6[%c0_14, %c0_15] : memref<512x128xf32, #tpu.memory_space<vmem>>, vector<512x128xf32>
      tpu.vector_store %arg6[%c0_14, %c0_15], %15 {strides = array<i32>} : memref<512x128xf32, #tpu.memory_space<vmem>>, vector<512x128xf32>,
    } else {
    }
    return
  }
  func.func @transform_0(%arg0: i32, %arg1: i32, %arg2: i32) -> (i32, i32) {
    %c0_i32 = arith.constant 0 : i32
    return %arg0, %arg2 : i32, i32
  }
  func.func @transform_1(%arg0: i32, %arg1: i32, %arg2: i32) -> (i32, i32) {
    %c0_i32 = arith.constant 0 : i32
    return %arg2, %arg1 : i32, i32
  }
  func.func @transform_2(%arg0: i32, %arg1: i32, %arg2: i32) -> (i32, i32) {
    %c0_i32 = arith.constant 0 : i32
    %c0_i32_0 = arith.constant 0 : i32
    return %c0_i32, %arg1 : i32, i32
  }
  func.func @transform_3(%arg0: i32, %arg1: i32, %arg2: i32) -> (i32, i32) {
    %c0_i32 = arith.constant 0 : i32
    return %arg0, %arg1 : i32, i32
  }
}

</mosaic_0001>

<bundles_post_ra>
// kernel: mlp_forward.3
= control target key start
LH: loop header
LB: loop body
LE: loop exit
PB: predicated region body
PF: predicated region fallthrough
CT: control target
= control target key end

     0   :  { %vm213_vm0 = vcmask 1041408   ;;  %vm116_vm1 = vcmask 31744   ;;  %s1157_s1 = inlined_call_operand.vmem [shape: bf16[4,128], index: 1, kind: input, shape index: {}]   ;;  %s1158_s0 = inlined_call_operand.vmem [shape: f32[512,4], index: 0, kind: input, shape index: {}]   ;;  %s1159_s2 = inlined_call_operand.vmem [shape: f32[1,128], index: 2, kind: input, shape index: {}]   ;;  %s1160_s3 = inlined_call_operand.vmem [shape: bf16[512,128], index: 3, kind: output, shape index: {}]  }
   0x1   :  { %v111_v0 = vld [vmem:[%s1157_s1] sm:$0x3]  ;;  %v16_v2 = vld [vmem:[%s1158_s0 + $0x8] sm:$0xff]  ;;  %v17_v14 = vld [vmem:[%s1158_s0 + $0x10] sm:$0xff] }
   0x2   :  { %v15_v1 = vld [vmem:[%s1158_s0] sm:$0xff]  ;;  %v215_v3 = vsel %vm213_vm0, %v111_v0, 0  ;;  %v32_v6 = vld [vmem:[%s1158_s0 + $0x88] sm:$0xff]  ;;  %v18_v15 = vld [vmem:[%s1158_s0 + $0x18] sm:$0xff] }
   0x3   :  { %v79_v4 = vpack.c.bf16 %v16_v2, %v15_v1  ;;  %v31_v5 = vld [vmem:[%s1158_s0 + $0x80] sm:$0xff]  ;;  %224 = vmatpush.bf16.msra.mxu0 %v215_v3  ;;  %741 = vmatpush.bf16.msra.mxu1 %v215_v3  ;;  %v48_v9 = vld [vmem:[%s1158_s0 + $0x108] sm:$0xff]  ;;  %v33_v16 = vld [vmem:[%s1158_s0 + $0x90] sm:$0xff]  ;;  %v80_v22 = vpack.c.bf16 %v18_v15, %v17_v14 }
   0x4   :  { %v47_v7 = vld [vmem:[%s1158_s0 + $0x100] sm:$0xff]  ;;  %v87_v8 = vpack.c.bf16 %v32_v6, %v31_v5  ;;  %v64_v11 = vld [vmem:[%s1158_s0 + $0x188] sm:$0xff]  ;;  %742 = vmatpush.bf16.msra.mxu2 %v215_v3  ;;  %743 = vmatpush.bf16.msra.mxu3 %v215_v3  ;;  %v34_v17 = vld [vmem:[%s1158_s0 + $0x98] sm:$0xff] }
   0x5   :  { %v63_v10 = vld [vmem:[%s1158_s0 + $0x180] sm:$0xff]  ;;  %v95_v12 = vpack.c.bf16 %v48_v9, %v47_v7  ;;  %v49_v18 = vld [vmem:[%s1158_s0 + $0x110] sm:$0xff]  ;;  %v50_v19 = vld [vmem:[%s1158_s0 + $0x118] sm:$0xff]  ;;  %v88_v23 = vpack.c.bf16 %v34_v17, %v33_v16 }
   0x6   :  { %v103_v13 = vpack.c.bf16 %v64_v11, %v63_v10  ;;  %518 = vmatmul.msk.bf16.vlgmr.msra.gmra.mxu0 %vm116_vm1, %v79_v4  ;;  %526 = vmatmul.msk.bf16.vlgmr.msra.gmra.mxu1 %vm116_vm1, %v87_v8  ;;  %v65_v20 = vld [vmem:[%s1158_s0 + $0x190] sm:$0xff]  ;;  %v66_v21 = vld [vmem:[%s1158_s0 + $0x198] sm:$0xff]  ;;  %v96_v24 = vpack.c.bf16 %v50_v19, %v49_v18  ;;  %v19_v26 = vld [vmem:[%s1158_s0 + $0x20] sm:$0xff] }
   0x7   :  { %534 = vmatmul.msk.bf16.vlgmr.msra.gmra.mxu2 %vm116_vm1, %v95_v12  ;;  %v104_v25 = vpack.c.bf16 %v66_v21, %v65_v20  ;;  %v20_v27 = vld [vmem:[%s1158_s0 + $0x28] sm:$0xff]  ;;  %v35_v28 = vld [vmem:[%s1158_s0 + $0xa0] sm:$0xff]  ;;  %v21_v38 = vld [vmem:[%s1158_s0 + $0x30] sm:$0xff] }
   0x8   :  { %542 = vmatmul.msk.bf16.vlgmr.msra.gmra.mxu3 %vm116_vm1, %v103_v13  ;;  %v36_v29 = vld [vmem:[%s1158_s0 + $0xa8] sm:$0xff]  ;;  %v51_v30 = vld [vmem:[%s1158_s0 + $0x120] sm:$0xff]  ;;  %v81_v34 = vpack.c.bf16 %v20_v27, %v19_v26  ;;  %v22_v39 = vld [vmem:[%s1158_s0 + $0x38] sm:$0xff] }
   0x9   :  { %v52_v31 = vld [vmem:[%s1158_s0 + $0x128] sm:$0xff]  ;;  %v67_v32 = vld [vmem:[%s1158_s0 + $0x1a0] sm:$0xff]  ;;  %v89_v35 = vpack.c.bf16 %v36_v29, %v35_v28  ;;  %v37_v40 = vld [vmem:[%s1158_s0 + $0xb0] sm:$0xff]  ;;  %v82_v46 = vpack.c.bf16 %v22_v39, %v21_v38 }
   0xa   :  { %v68_v33 = vld [vmem:[%s1158_s0 + $0x1a8] sm:$0xff]  ;;  %v97_v36 = vpack.c.bf16 %v52_v31, %v51_v30  ;;  %v38_v41 = vld [vmem:[%s1158_s0 + $0xb8] sm:$0xff]  ;;  %v53_v42 = vld [vmem:[%s1158_s0 + $0x130] sm:$0xff] }
   0xb   :  { %v105_v37 = vpack.c.bf16 %v68_v33, %v67_v32  ;;  %v54_v43 = vld [vmem:[%s1158_s0 + $0x138] sm:$0xff]  ;;  %v69_v44 = vld [vmem:[%s1158_s0 + $0x1b0] sm:$0xff]  ;;  %v90_v47 = vpack.c.bf16 %v38_v41, %v37_v40  ;;  %v23_v50 = vld [vmem:[%s1158_s0 + $0x40] sm:$0xff] }
   0xc   :  { %v70_v45 = vld [vmem:[%s1158_s0 + $0x1b8] sm:$0xff]  ;;  %v98_v48 = vpack.c.bf16 %v54_v43, %v53_v42  ;;  %v24_v51 = vld [vmem:[%s1158_s0 + $0x48] sm:$0xff]  ;;  %v39_v52 = vld [vmem:[%s1158_s0 + $0xc0] sm:$0xff] }
   0xd   :  { %v106_v49 = vpack.c.bf16 %v70_v45, %v69_v44  ;;  %v40_v53 = vld [vmem:[%s1158_s0 + $0xc8] sm:$0xff]  ;;  %v55_v54 = vld [vmem:[%s1158_s0 + $0x140] sm:$0xff]  ;;  %v83_v58 = vpack.c.bf16 %v24_v51, %v23_v50  ;;  %v25_v62 = vld [vmem:[%s1158_s0 + $0x50] sm:$0xff] }
   0xe   :  { %v56_v55 = vld [vmem:[%s1158_s0 + $0x148] sm:$0xff]  ;;  %v71_v56 = vld [vmem:[%s1158_s0 + $0x1c0] sm:$0xff]  ;;  %v91_v59 = vpack.c.bf16 %v40_v53, %v39_v52  ;;  %v26_v63 = vld [vmem:[%s1158_s0 + $0x58] sm:$0xff] }
   0xf   :  { %v72_v57 = vld [vmem:[%s1158_s0 + $0x1c8] sm:$0xff]  ;;  %v99_v60 = vpack.c.bf16 %v56_v55, %v55_v54  ;;  %v41_v0 = vld [vmem:[%s1158_s0 + $0xd0] sm:$0xff]  ;;  %v42_v1 = vld [vmem:[%s1158_s0 + $0xd8] sm:$0xff]  ;;  %v84_v6 = vpack.c.bf16 %v26_v63, %v25_v62 }
  0x10   :  { %v107_v61 = vpack.c.bf16 %v72_v57, %v71_v56  ;;  %v57_v2 = vld [vmem:[%s1158_s0 + $0x150] sm:$0xff]  ;;  %v58_v3 = vld [vmem:[%s1158_s0 + $0x158] sm:$0xff]  ;;  %v92_v7 = vpack.c.bf16 %v42_v1, %v41_v0  ;;  %v27_v10 = vld [vmem:[%s1158_s0 + $0x60] sm:$0xff] }
  0x11   :  { %v73_v4 = vld [vmem:[%s1158_s0 + $0x1d0] sm:$0xff]  ;;  %v74_v5 = vld [vmem:[%s1158_s0 + $0x1d8] sm:$0xff]  ;;  %v100_v8 = vpack.c.bf16 %v58_v3, %v57_v2  ;;  %v28_v11 = vld [vmem:[%s1158_s0 + $0x68] sm:$0xff] }
  0x12   :  { %v108_v9 = vpack.c.bf16 %v74_v5, %v73_v4  ;;  %v43_v12 = vld [vmem:[%s1158_s0 + $0xe0] sm:$0xff]  ;;  %v44_v13 = vld [vmem:[%s1158_s0 + $0xe8] sm:$0xff]  ;;  %v85_v18 = vpack.c.bf16 %v28_v11, %v27_v10  ;;  %v61_v26 = vld [vmem:[%s1158_s0 + $0x170] sm:$0xff] }
  0x13   :  { %v59_v14 = vld [vmem:[%s1158_s0 + $0x160] sm:$0xff]  ;;  %v60_v15 = vld [vmem:[%s1158_s0 + $0x168] sm:$0xff]  ;;  %v93_v19 = vpack.c.bf16 %v44_v13, %v43_v12  ;;  %v62_v27 = vld [vmem:[%s1158_s0 + $0x178] sm:$0xff] }
  0x14   :  { %v75_v16 = vld [vmem:[%s1158_s0 + $0x1e0] sm:$0xff]  ;;  %v76_v17 = vld [vmem:[%s1158_s0 + $0x1e8] sm:$0xff]  ;;  %v101_v20 = vpack.c.bf16 %v60_v15, %v59_v14  ;;  %v77_v28 = vld [vmem:[%s1158_s0 + $0x1f0] sm:$0xff]  ;;  %v102_v32 = vpack.c.bf16 %v62_v27, %v61_v26 }
  0x15   :  { %v109_v21 = vpack.c.bf16 %v76_v17, %v75_v16  ;;  %v78_v29 = vld [vmem:[%s1158_s0 + $0x1f8] sm:$0xff] }
  0x16   :  { %519 = vmatmul.msk.bf16.gmra.mxu0 %vm116_vm1, %v80_v22  ;;  %527 = vmatmul.msk.bf16.gmra.mxu1 %vm116_vm1, %v88_v23  ;;  %v29_v22 = vld [vmem:[%s1158_s0 + $0x70] sm:$0xff]  ;;  %v30_v23 = vld [vmem:[%s1158_s0 + $0x78] sm:$0xff]  ;;  %v110_v33 = vpack.c.bf16 %v78_v29, %v77_v28 }
  0x17   :  { %535 = vmatmul.msk.bf16.gmra.mxu2 %vm116_vm1, %v96_v24  ;;  %v45_v24 = vld [vmem:[%s1158_s0 + $0xf0] sm:$0xff]  ;;  %v86_v30 = vpack.c.bf16 %v30_v23, %v29_v22 }
  0x18   :  { %543 = vmatmul.msk.bf16.gmra.mxu3 %vm116_vm1, %v104_v25  ;;  %v46_v25 = vld [vmem:[%s1158_s0 + $0xf8] sm:$0xff] }
  0x19   :  { %v94_v31 = vpack.c.bf16 %v46_v25, %v45_v24 }
  0x26   :  { %520 = vmatmul.msk.bf16.gmra.mxu0 %vm116_vm1, %v81_v34  ;;  %528 = vmatmul.msk.bf16.gmra.mxu1 %vm116_vm1, %v89_v35 }
  0x27   :  { %536 = vmatmul.msk.bf16.gmra.mxu2 %vm116_vm1, %v97_v36  ;;  %v995_v36 = vld [vmem:[%s1159_s2] ss:$0 sm:$0xff] }
  0x28   :  { %544 = vmatmul.msk.bf16.gmra.mxu3 %vm116_vm1, %v105_v37 }
  0x36   :  { %521 = vmatmul.msk.bf16.gmra.mxu0 %vm116_vm1, %v82_v46  ;;  %529 = vmatmul.msk.bf16.gmra.mxu1 %vm116_vm1, %v90_v47 }
  0x37   :  { %537 = vmatmul.msk.bf16.gmra.mxu2 %vm116_vm1, %v98_v48 }
  0x38   :  { %545 = vmatmul.msk.bf16.gmra.mxu3 %vm116_vm1, %v106_v49 }
  0x46   :  { %522 = vmatmul.msk.bf16.gmra.mxu0 %vm116_vm1, %v83_v58  ;;  %530 = vmatmul.msk.bf16.gmra.mxu1 %vm116_vm1, %v91_v59 }
  0x47   :  { %538 = vmatmul.msk.bf16.gmra.mxu2 %vm116_vm1, %v99_v60 }
  0x48   :  { %546 = vmatmul.msk.bf16.gmra.mxu3 %vm116_vm1, %v107_v61 }
  0x56   :  { %523 = vmatmul.msk.bf16.gmra.mxu0 %vm116_vm1, %v84_v6  ;;  %531 = vmatmul.msk.bf16.gmra.mxu1 %vm116_vm1, %v92_v7 }
  0x57   :  { %539 = vmatmul.msk.bf16.gmra.mxu2 %vm116_vm1, %v100_v8 }
  0x58   :  { %547 = vmatmul.msk.bf16.gmra.mxu3 %vm116_vm1, %v108_v9 }
  0x66   :  { %524 = vmatmul.msk.bf16.gmra.mxu0 %vm116_vm1, %v85_v18  ;;  %532 = vmatmul.msk.bf16.gmra.mxu1 %vm116_vm1, %v93_v19 }
  0x67   :  { %540 = vmatmul.msk.bf16.gmra.mxu2 %vm116_vm1, %v101_v20 }
  0x68   :  { %548 = vmatmul.msk.bf16.gmra.mxu3 %vm116_vm1, %v109_v21 }
  0x76   :  { %525 = vmatmul.msk.bf16.gmra.mxu0 %vm116_vm1, %v86_v30  ;;  %533 = vmatmul.msk.bf16.gmra.mxu1 %vm116_vm1, %v94_v31 }
  0x77   :  { %541 = vmatmul.msk.bf16.gmra.mxu2 %vm116_vm1, %v102_v32 }
  0x78   :  { %549 = vmatmul.msk.bf16.gmra.mxu3 %vm116_vm1, %v110_v33 }
  0x83   :  { %v226_v34 = vpop.f32.mrf.mxu0  ;;  %v266_v35 = vpop.f32.mrf.mxu1 }
  0x84   :  { %v227_v41 = vadd.f32 %v995_v36, %v226_v34  ;;  %v267_v42 = vadd.f32 %v995_v36, %v266_v35 }
  0x8a   :  { %v306_v37 = vpop.f32.mrf.mxu2 }
  0x8b   :  { %v346_v38 = vpop.f32.mrf.mxu3  ;;  %v228_v39 = vpop.f32.mrf.mxu0  ;;  %v307_v49 = vadd.f32 %v995_v36, %v306_v37 }
  0x8c   :  { %v268_v40 = vpop.f32.mrf.mxu1  ;;  %v229_v43 = vadd.f32 %v995_v36, %v228_v39  ;;  %v347_v50 = vadd.f32 %v995_v36, %v346_v38 }
  0x8d   :  { %v269_v44 = vadd.f32 %v995_v36, %v268_v40 }
  0x8e   :  { %v553_v45 = vpack.c.bf16 %v229_v43, %v227_v41 }
  0x8f   :  { %v593_v46 = vpack.c.bf16 %v269_v44, %v267_v42 }
  0x90   :  { %554 = vst [vmem:[%s1160_s3] sm:$0xff] %v553_v45  }
  0x91   :  { %717 = vst [vmem:[%s1160_s3 + $0x40] sm:$0xff] %v593_v46  }
  0x92   :  { %v308_v47 = vpop.f32.mrf.mxu2 }
  0x93   :  { %v348_v48 = vpop.f32.mrf.mxu3  ;;  %v309_v51 = vadd.f32 %v995_v36, %v308_v47  ;;  %v231_v53 = vpop.f32.mrf.mxu0 }
  0x94   :  { %v349_v52 = vadd.f32 %v995_v36, %v348_v48  ;;  %v271_v54 = vpop.f32.mrf.mxu1  ;;  %v232_v61 = vadd.f32 %v995_v36, %v231_v53 }
  0x95   :  { %v633_v55 = vpack.c.bf16 %v309_v51, %v307_v49  ;;  %v272_v62 = vadd.f32 %v995_v36, %v271_v54 }
  0x96   :  { %v673_v56 = vpack.c.bf16 %v349_v52, %v347_v50 }
  0x97   :  { %725 = vst [vmem:[%s1160_s3 + $0x80] sm:$0xff] %v633_v55  }
  0x98   :  { %733 = vst [vmem:[%s1160_s3 + $0xc0] sm:$0xff] %v673_v56  }
  0x9a   :  { %v311_v57 = vpop.f32.mrf.mxu2 }
  0x9b   :  { %v351_v58 = vpop.f32.mrf.mxu3  ;;  %v233_v59 = vpop.f32.mrf.mxu0  ;;  %v312_v5 = vadd.f32 %v995_v36, %v311_v57 }
  0x9c   :  { %v273_v60 = vpop.f32.mrf.mxu1  ;;  %v234_v63 = vadd.f32 %v995_v36, %v233_v59  ;;  %v352_v6 = vadd.f32 %v995_v36, %v351_v58 }
  0x9d   :  { %v274_v0 = vadd.f32 %v995_v36, %v273_v60 }
  0x9e   :  { %v558_v1 = vpack.c.bf16 %v234_v63, %v232_v61 }
  0x9f   :  { %v598_v2 = vpack.c.bf16 %v274_v0, %v272_v62 }
  0xa0   :  { %710 = vst [vmem:[%s1160_s3 + $0x8] sm:$0xff] %v558_v1  }
  0xa1   :  { %718 = vst [vmem:[%s1160_s3 + $0x48] sm:$0xff] %v598_v2  }
  0xa2   :  { %v313_v3 = vpop.f32.mrf.mxu2 }
  0xa3   :  { %v353_v4 = vpop.f32.mrf.mxu3  ;;  %v314_v7 = vadd.f32 %v995_v36, %v313_v3  ;;  %v236_v9 = vpop.f32.mrf.mxu0 }
  0xa4   :  { %v354_v8 = vadd.f32 %v995_v36, %v353_v4  ;;  %v276_v10 = vpop.f32.mrf.mxu1  ;;  %v237_v17 = vadd.f32 %v995_v36, %v236_v9 }
  0xa5   :  { %v638_v11 = vpack.c.bf16 %v314_v7, %v312_v5  ;;  %v277_v18 = vadd.f32 %v995_v36, %v276_v10 }
  0xa6   :  { %v678_v12 = vpack.c.bf16 %v354_v8, %v352_v6 }
  0xa7   :  { %726 = vst [vmem:[%s1160_s3 + $0x88] sm:$0xff] %v638_v11  }
  0xa8   :  { %734 = vst [vmem:[%s1160_s3 + $0xc8] sm:$0xff] %v678_v12  }
  0xaa   :  { %v316_v13 = vpop.f32.mrf.mxu2 }
  0xab   :  { %v356_v14 = vpop.f32.mrf.mxu3  ;;  %v238_v15 = vpop.f32.mrf.mxu0  ;;  %v317_v25 = vadd.f32 %v995_v36, %v316_v13 }
  0xac   :  { %v278_v16 = vpop.f32.mrf.mxu1  ;;  %v239_v19 = vadd.f32 %v995_v36, %v238_v15  ;;  %v357_v26 = vadd.f32 %v995_v36, %v356_v14 }
  0xad   :  { %v279_v20 = vadd.f32 %v995_v36, %v278_v16 }
  0xae   :  { %v563_v21 = vpack.c.bf16 %v239_v19, %v237_v17 }
  0xaf   :  { %v603_v22 = vpack.c.bf16 %v279_v20, %v277_v18 }
  0xb0   :  { %711 = vst [vmem:[%s1160_s3 + $0x10] sm:$0xff] %v563_v21  }
  0xb1   :  { %719 = vst [vmem:[%s1160_s3 + $0x50] sm:$0xff] %v603_v22  }
  0xb2   :  { %v318_v23 = vpop.f32.mrf.mxu2 }
  0xb3   :  { %v358_v24 = vpop.f32.mrf.mxu3  ;;  %v319_v27 = vadd.f32 %v995_v36, %v318_v23  ;;  %v241_v29 = vpop.f32.mrf.mxu0 }
  0xb4   :  { %v359_v28 = vadd.f32 %v995_v36, %v358_v24  ;;  %v281_v30 = vpop.f32.mrf.mxu1  ;;  %v242_v38 = vadd.f32 %v995_v36, %v241_v29 }
  0xb5   :  { %v643_v31 = vpack.c.bf16 %v319_v27, %v317_v25  ;;  %v282_v39 = vadd.f32 %v995_v36, %v281_v30 }
  0xb6   :  { %v683_v32 = vpack.c.bf16 %v359_v28, %v357_v26 }
  0xb7   :  { %727 = vst [vmem:[%s1160_s3 + $0x90] sm:$0xff] %v643_v31  }
  0xb8   :  { %735 = vst [vmem:[%s1160_s3 + $0xd0] sm:$0xff] %v683_v32  }
  0xba   :  { %v321_v33 = vpop.f32.mrf.mxu2 }
  0xbb   :  { %v361_v34 = vpop.f32.mrf.mxu3  ;;  %v243_v35 = vpop.f32.mrf.mxu0  ;;  %v322_v46 = vadd.f32 %v995_v36, %v321_v33 }
  0xbc   :  { %v283_v37 = vpop.f32.mrf.mxu1  ;;  %v244_v40 = vadd.f32 %v995_v36, %v243_v35  ;;  %v362_v47 = vadd.f32 %v995_v36, %v361_v34 }
  0xbd   :  { %v284_v41 = vadd.f32 %v995_v36, %v283_v37 }
  0xbe   :  { %v568_v42 = vpack.c.bf16 %v244_v40, %v242_v38 }
  0xbf   :  { %v608_v43 = vpack.c.bf16 %v284_v41, %v282_v39 }
  0xc0   :  { %712 = vst [vmem:[%s1160_s3 + $0x18] sm:$0xff] %v568_v42  }
  0xc1   :  { %720 = vst [vmem:[%s1160_s3 + $0x58] sm:$0xff] %v608_v43  }
  0xc2   :  { %v323_v44 = vpop.f32.mrf.mxu2 }
  0xc3   :  { %v363_v45 = vpop.f32.mrf.mxu3  ;;  %v324_v48 = vadd.f32 %v995_v36, %v323_v44  ;;  %v246_v50 = vpop.f32.mrf.mxu0 }
  0xc4   :  { %v364_v49 = vadd.f32 %v995_v36, %v363_v45  ;;  %v286_v51 = vpop.f32.mrf.mxu1  ;;  %v247_v58 = vadd.f32 %v995_v36, %v246_v50 }
  0xc5   :  { %v648_v52 = vpack.c.bf16 %v324_v48, %v322_v46  ;;  %v287_v59 = vadd.f32 %v995_v36, %v286_v51 }
  0xc6   :  { %v688_v53 = vpack.c.bf16 %v364_v49, %v362_v47 }
  0xc7   :  { %728 = vst [vmem:[%s1160_s3 + $0x98] sm:$0xff] %v648_v52  }
  0xc8   :  { %736 = vst [vmem:[%s1160_s3 + $0xd8] sm:$0xff] %v688_v53  }
  0xca   :  { %v326_v54 = vpop.f32.mrf.mxu2 }
  0xcb   :  { %v366_v55 = vpop.f32.mrf.mxu3  ;;  %v248_v56 = vpop.f32.mrf.mxu0  ;;  %v327_v2 = vadd.f32 %v995_v36, %v326_v54 }
  0xcc   :  { %v288_v57 = vpop.f32.mrf.mxu1  ;;  %v249_v60 = vadd.f32 %v995_v36, %v248_v56  ;;  %v367_v3 = vadd.f32 %v995_v36, %v366_v55 }
  0xcd   :  { %v289_v61 = vadd.f32 %v995_v36, %v288_v57 }
  0xce   :  { %v573_v62 = vpack.c.bf16 %v249_v60, %v247_v58 }
  0xcf   :  { %v613_v63 = vpack.c.bf16 %v289_v61, %v287_v59 }
  0xd0   :  { %713 = vst [vmem:[%s1160_s3 + $0x20] sm:$0xff] %v573_v62  }
  0xd1   :  { %721 = vst [vmem:[%s1160_s3 + $0x60] sm:$0xff] %v613_v63  }
  0xd2   :  { %v328_v0 = vpop.f32.mrf.mxu2 }
  0xd3   :  { %v368_v1 = vpop.f32.mrf.mxu3  ;;  %v329_v4 = vadd.f32 %v995_v36, %v328_v0  ;;  %v251_v6 = vpop.f32.mrf.mxu0 }
  0xd4   :  { %v369_v5 = vadd.f32 %v995_v36, %v368_v1  ;;  %v291_v7 = vpop.f32.mrf.mxu1  ;;  %v252_v14 = vadd.f32 %v995_v36, %v251_v6 }
  0xd5   :  { %v653_v8 = vpack.c.bf16 %v329_v4, %v327_v2  ;;  %v292_v15 = vadd.f32 %v995_v36, %v291_v7 }
  0xd6   :  { %v693_v9 = vpack.c.bf16 %v369_v5, %v367_v3 }
  0xd7   :  { %729 = vst [vmem:[%s1160_s3 + $0xa0] sm:$0xff] %v653_v8  }
  0xd8   :  { %737 = vst [vmem:[%s1160_s3 + $0xe0] sm:$0xff] %v693_v9  }
  0xda   :  { %v331_v10 = vpop.f32.mrf.mxu2 }
  0xdb   :  { %v371_v11 = vpop.f32.mrf.mxu3  ;;  %v253_v12 = vpop.f32.mrf.mxu0  ;;  %v332_v22 = vadd.f32 %v995_v36, %v331_v10 }
  0xdc   :  { %v293_v13 = vpop.f32.mrf.mxu1  ;;  %v254_v16 = vadd.f32 %v995_v36, %v253_v12  ;;  %v372_v23 = vadd.f32 %v995_v36, %v371_v11 }
  0xdd   :  { %v294_v17 = vadd.f32 %v995_v36, %v293_v13 }
  0xde   :  { %v578_v18 = vpack.c.bf16 %v254_v16, %v252_v14 }
  0xdf   :  { %v618_v19 = vpack.c.bf16 %v294_v17, %v292_v15 }
  0xe0   :  { %714 = vst [vmem:[%s1160_s3 + $0x28] sm:$0xff] %v578_v18  }
  0xe1   :  { %722 = vst [vmem:[%s1160_s3 + $0x68] sm:$0xff] %v618_v19  }
  0xe2   :  { %v333_v20 = vpop.f32.mrf.mxu2 }
  0xe3   :  { %v373_v21 = vpop.f32.mrf.mxu3  ;;  %v334_v24 = vadd.f32 %v995_v36, %v333_v20  ;;  %v256_v26 = vpop.f32.mrf.mxu0 }
  0xe4   :  { %v374_v25 = vadd.f32 %v995_v36, %v373_v21  ;;  %v296_v27 = vpop.f32.mrf.mxu1  ;;  %v257_v34 = vadd.f32 %v995_v36, %v256_v26 }
  0xe5   :  { %v658_v28 = vpack.c.bf16 %v334_v24, %v332_v22  ;;  %v297_v35 = vadd.f32 %v995_v36, %v296_v27 }
  0xe6   :  { %v698_v29 = vpack.c.bf16 %v374_v25, %v372_v23 }
  0xe7   :  { %730 = vst [vmem:[%s1160_s3 + $0xa8] sm:$0xff] %v658_v28  }
  0xe8   :  { %738 = vst [vmem:[%s1160_s3 + $0xe8] sm:$0xff] %v698_v29  }
  0xea   :  { %v336_v30 = vpop.f32.mrf.mxu2 }
  0xeb   :  { %v376_v31 = vpop.f32.mrf.mxu3  ;;  %v258_v32 = vpop.f32.mrf.mxu0  ;;  %v337_v43 = vadd.f32 %v995_v36, %v336_v30 }
  0xec   :  { %v298_v33 = vpop.f32.mrf.mxu1  ;;  %v259_v37 = vadd.f32 %v995_v36, %v258_v32  ;;  %v377_v44 = vadd.f32 %v995_v36, %v376_v31 }
  0xed   :  { %v299_v38 = vadd.f32 %v995_v36, %v298_v33 }
  0xee   :  { %v583_v39 = vpack.c.bf16 %v259_v37, %v257_v34 }
  0xef   :  { %v623_v40 = vpack.c.bf16 %v299_v38, %v297_v35 }
  0xf0   :  { %715 = vst [vmem:[%s1160_s3 + $0x30] sm:$0xff] %v583_v39  }
  0xf1   :  { %723 = vst [vmem:[%s1160_s3 + $0x70] sm:$0xff] %v623_v40  }
  0xf2   :  { %v338_v41 = vpop.f32.mrf.mxu2 }
  0xf3   :  { %v378_v42 = vpop.f32.mrf.mxu3  ;;  %v339_v45 = vadd.f32 %v995_v36, %v338_v41  ;;  %v261_v47 = vpop.f32.mrf.mxu0 }
  0xf4   :  { %v379_v46 = vadd.f32 %v995_v36, %v378_v42  ;;  %v301_v48 = vpop.f32.mrf.mxu1  ;;  %v262_v55 = vadd.f32 %v995_v36, %v261_v47 }
  0xf5   :  { %v663_v49 = vpack.c.bf16 %v339_v45, %v337_v43  ;;  %v302_v56 = vadd.f32 %v995_v36, %v301_v48 }
  0xf6   :  { %v703_v50 = vpack.c.bf16 %v379_v46, %v377_v44 }
  0xf7   :  { %731 = vst [vmem:[%s1160_s3 + $0xb0] sm:$0xff] %v663_v49  }
  0xf8   :  { %739 = vst [vmem:[%s1160_s3 + $0xf0] sm:$0xff] %v703_v50  }
  0xfa   :  { %v341_v51 = vpop.f32.mrf.mxu2 }
  0xfb   :  { %v381_v52 = vpop.f32.mrf.mxu3  ;;  %v263_v53 = vpop.f32.mrf.mxu0  ;;  %v342_v63 = vadd.f32 %v995_v36, %v341_v51 }
  0xfc   :  { %v303_v54 = vpop.f32.mrf.mxu1  ;;  %v264_v57 = vadd.f32 %v995_v36, %v263_v53  ;;  %v382_v0 = vadd.f32 %v995_v36, %v381_v52 }
  0xfd   :  { %v304_v58 = vadd.f32 %v995_v36, %v303_v54 }
  0xfe   :  { %v588_v59 = vpack.c.bf16 %v264_v57, %v262_v55 }
  0xff   :  { %v628_v60 = vpack.c.bf16 %v304_v58, %v302_v56 }
 0x100   :  { %716 = vst [vmem:[%s1160_s3 + $0x38] sm:$0xff] %v588_v59  }
 0x101   :  { %724 = vst [vmem:[%s1160_s3 + $0x78] sm:$0xff] %v628_v60  }
 0x102   :  { %v343_v61 = vpop.f32.mrf.mxu2 }
 0x103   :  { %v383_v62 = vpop.f32.mrf.mxu3  ;;  %v344_v1 = vadd.f32 %v995_v36, %v343_v61 }
 0x104   :  { %v384_v2 = vadd.f32 %v995_v36, %v383_v62 }
 0x105   :  { %v668_v3 = vpack.c.bf16 %v344_v1, %v342_v63 }
 0x106   :  { %v708_v4 = vpack.c.bf16 %v384_v2, %v382_v0 }
 0x107   :  { %732 = vst [vmem:[%s1160_s3 + $0xb8] sm:$0xff] %v668_v3  }
 0x108   :  { %740 = vst [vmem:[%s1160_s3 + $0xf8] sm:$0xff] %v708_v4  }

// kernel: mlp_forward.5
= control target key start
LH: loop header
LB: loop body
LE: loop exit
PB: predicated region body
PF: predicated region fallthrough
CT: control target
= control target key end

     0   :  { %s1592_s1 = inlined_call_operand.vmem [shape: bf16[128,128], index: 1, kind: input, shape index: {}]   ;;  %s1593_s2 = inlined_call_operand.vmem [shape: f32[1,128], index: 2, kind: input, shape index: {}]   ;;  %s1594_s0 = inlined_call_operand.vmem [shape: bf16[512,128], index: 0, kind: input, shape index: {}]   ;;  %s1595_s3 = inlined_call_operand.vmem [shape: f32[512,128], index: 3, kind: output, shape index: {}]  }
   0x1   :  { %v1165_v0 = vld [vmem:[%s1592_s1 + $0x38] sm:$0xff]  ;;  %v1164_v1 = vld [vmem:[%s1592_s1 + $0x30] sm:$0xff]  ;;  %v1163_v2 = vld [vmem:[%s1592_s1 + $0x28] sm:$0xff] }
   0x2   :  { %466 = vmatpush.bf16.msra.mxu0 %v1165_v0  ;;  %1166 = vmatpush.bf16.msra.mxu1 %v1165_v0  ;;  %v1162_v3 = vld [vmem:[%s1592_s1 + $0x20] sm:$0xff]  ;;  %v1161_v4 = vld [vmem:[%s1592_s1 + $0x18] sm:$0xff]  ;;  %v1160_v5 = vld [vmem:[%s1592_s1 + $0x10] sm:$0xff] }
   0x3   :  { %1167 = vmatpush.bf16.msra.mxu2 %v1165_v0  ;;  %1168 = vmatpush.bf16.msra.mxu3 %v1165_v0  ;;  %v1159_v6 = vld [vmem:[%s1592_s1 + $0x8] sm:$0xff]  ;;  %v1158_v7 = vld [vmem:[%s1592_s1] sm:$0xff]  ;;  %v1128_v16 = vld [vmem:[%s1594_s0 + $0x10] sm:$0xff] }
   0x4   :  { %v1126_v8 = vld [vmem:[%s1594_s0] sm:$0xff]  ;;  %v1127_v12 = vld [vmem:[%s1594_s0 + $0x8] sm:$0xff]  ;;  %v1136_v17 = vld [vmem:[%s1594_s0 + $0x50] sm:$0xff] }
   0x5   :  { %v1134_v9 = vld [vmem:[%s1594_s0 + $0x40] sm:$0xff]  ;;  %v1135_v13 = vld [vmem:[%s1594_s0 + $0x48] sm:$0xff]  ;;  %v1144_v18 = vld [vmem:[%s1594_s0 + $0x90] sm:$0xff] }
   0x6   :  { %467 = vmatpush.bf16.msra.mxu0 %v1164_v1  ;;  %1169 = vmatpush.bf16.msra.mxu1 %v1164_v1  ;;  %v1142_v10 = vld [vmem:[%s1594_s0 + $0x80] sm:$0xff]  ;;  %v1143_v14 = vld [vmem:[%s1594_s0 + $0x88] sm:$0xff]  ;;  %v1152_v19 = vld [vmem:[%s1594_s0 + $0xd0] sm:$0xff] }
   0x7   :  { %1170 = vmatpush.bf16.msra.mxu2 %v1164_v1  ;;  %1171 = vmatpush.bf16.msra.mxu3 %v1164_v1  ;;  %v1150_v11 = vld [vmem:[%s1594_s0 + $0xc0] sm:$0xff]  ;;  %v1151_v15 = vld [vmem:[%s1594_s0 + $0xc8] sm:$0xff]  ;;  %v1129_v20 = vld [vmem:[%s1594_s0 + $0x18] sm:$0xff] }
   0x8   :  { %v1137_v21 = vld [vmem:[%s1594_s0 + $0x58] sm:$0xff]  ;;  %v1130_v24 = vld [vmem:[%s1594_s0 + $0x20] sm:$0xff]  ;;  %v1131_v28 = vld [vmem:[%s1594_s0 + $0x28] sm:$0xff] }
   0x9   :  { %v1145_v22 = vld [vmem:[%s1594_s0 + $0x98] sm:$0xff]  ;;  %v1138_v25 = vld [vmem:[%s1594_s0 + $0x60] sm:$0xff]  ;;  %v1139_v29 = vld [vmem:[%s1594_s0 + $0x68] sm:$0xff] }
   0xa   :  { %468 = vmatpush.bf16.msra.mxu0 %v1163_v2  ;;  %1172 = vmatpush.bf16.msra.mxu1 %v1163_v2  ;;  %v1153_v23 = vld [vmem:[%s1594_s0 + $0xd8] sm:$0xff]  ;;  %v1146_v26 = vld [vmem:[%s1594_s0 + $0xa0] sm:$0xff]  ;;  %v1147_v30 = vld [vmem:[%s1594_s0 + $0xa8] sm:$0xff] }
   0xb   :  { %1173 = vmatpush.bf16.msra.mxu2 %v1163_v2  ;;  %1174 = vmatpush.bf16.msra.mxu3 %v1163_v2  ;;  %v1154_v27 = vld [vmem:[%s1594_s0 + $0xe0] sm:$0xff]  ;;  %v1155_v31 = vld [vmem:[%s1594_s0 + $0xe8] sm:$0xff]  ;;  %v1132_v32 = vld [vmem:[%s1594_s0 + $0x30] sm:$0xff] }
   0xc   :  { %v1140_v33 = vld [vmem:[%s1594_s0 + $0x70] sm:$0xff]  ;;  %v1133_v36 = vld [vmem:[%s1594_s0 + $0x38] sm:$0xff]  ;;  %v1334_v40 = vld [vmem:[%s1593_s2] ss:$0 sm:$0xff] }
   0xd   :  { %v1148_v34 = vld [vmem:[%s1594_s0 + $0xb0] sm:$0xff]  ;;  %v1141_v37 = vld [vmem:[%s1594_s0 + $0x78] sm:$0xff] }
   0xe   :  { %469 = vmatpush.bf16.msra.mxu0 %v1162_v3  ;;  %1175 = vmatpush.bf16.msra.mxu1 %v1162_v3  ;;  %v1156_v35 = vld [vmem:[%s1594_s0 + $0xf0] sm:$0xff]  ;;  %v1149_v38 = vld [vmem:[%s1594_s0 + $0xb8] sm:$0xff] }
   0xf   :  { %1176 = vmatpush.bf16.msra.mxu2 %v1162_v3  ;;  %1177 = vmatpush.bf16.msra.mxu3 %v1162_v3  ;;  %v1157_v39 = vld [vmem:[%s1594_s0 + $0xf8] sm:$0xff] }
  0x12   :  { %470 = vmatpush.bf16.msra.mxu0 %v1161_v4  ;;  %1178 = vmatpush.bf16.msra.mxu1 %v1161_v4 }
  0x13   :  { %1179 = vmatpush.bf16.msra.mxu2 %v1161_v4  ;;  %1180 = vmatpush.bf16.msra.mxu3 %v1161_v4 }
  0x16   :  { %471 = vmatpush.bf16.msra.mxu0 %v1160_v5  ;;  %1181 = vmatpush.bf16.msra.mxu1 %v1160_v5 }
  0x17   :  { %1182 = vmatpush.bf16.msra.mxu2 %v1160_v5  ;;  %1183 = vmatpush.bf16.msra.mxu3 %v1160_v5 }
  0x1a   :  { %472 = vmatpush.bf16.msra.mxu0 %v1159_v6  ;;  %1184 = vmatpush.bf16.msra.mxu1 %v1159_v6 }
  0x1b   :  { %1185 = vmatpush.bf16.msra.mxu2 %v1159_v6  ;;  %1186 = vmatpush.bf16.msra.mxu3 %v1159_v6 }
  0x1e   :  { %473 = vmatpush.bf16.msra.mxu0 %v1158_v7  ;;  %1187 = vmatpush.bf16.msra.mxu1 %v1158_v7 }
  0x1f   :  { %1188 = vmatpush.bf16.msra.mxu2 %v1158_v7  ;;  %1189 = vmatpush.bf16.msra.mxu3 %v1158_v7 }
  0x21   :  { %474 = vmatmul.bf16.vlgmr.msra.gmra.mxu0 %v1126_v8  ;;  %514 = vmatmul.bf16.vlgmr.msra.gmra.mxu1 %v1134_v9 }
  0x22   :  { %554 = vmatmul.bf16.vlgmr.msra.gmra.mxu2 %v1142_v10  ;;  %594 = vmatmul.bf16.vlgmr.msra.gmra.mxu3 %v1150_v11 }
  0x31   :  { %479 = vmatmul.bf16.gmra.mxu0 %v1127_v12  ;;  %519 = vmatmul.bf16.gmra.mxu1 %v1135_v13 }
  0x32   :  { %559 = vmatmul.bf16.gmra.mxu2 %v1143_v14  ;;  %599 = vmatmul.bf16.gmra.mxu3 %v1151_v15 }
  0x41   :  { %484 = vmatmul.bf16.gmra.mxu0 %v1128_v16  ;;  %524 = vmatmul.bf16.gmra.mxu1 %v1136_v17 }
  0x42   :  { %564 = vmatmul.bf16.gmra.mxu2 %v1144_v18  ;;  %604 = vmatmul.bf16.gmra.mxu3 %v1152_v19 }
  0x51   :  { %489 = vmatmul.bf16.gmra.mxu0 %v1129_v20  ;;  %529 = vmatmul.bf16.gmra.mxu1 %v1137_v21 }
  0x52   :  { %569 = vmatmul.bf16.gmra.mxu2 %v1145_v22  ;;  %609 = vmatmul.bf16.gmra.mxu3 %v1153_v23 }
  0x61   :  { %494 = vmatmul.bf16.gmra.mxu0 %v1130_v24  ;;  %534 = vmatmul.bf16.gmra.mxu1 %v1138_v25 }
  0x62   :  { %574 = vmatmul.bf16.gmra.mxu2 %v1146_v26  ;;  %614 = vmatmul.bf16.gmra.mxu3 %v1154_v27 }
  0x71   :  { %499 = vmatmul.bf16.gmra.mxu0 %v1131_v28  ;;  %539 = vmatmul.bf16.gmra.mxu1 %v1139_v29 }
  0x72   :  { %579 = vmatmul.bf16.gmra.mxu2 %v1147_v30  ;;  %619 = vmatmul.bf16.gmra.mxu3 %v1155_v31 }
  0x81   :  { %504 = vmatmul.bf16.gmra.mxu0 %v1132_v32  ;;  %544 = vmatmul.bf16.gmra.mxu1 %v1140_v33 }
  0x82   :  { %584 = vmatmul.bf16.gmra.mxu2 %v1148_v34  ;;  %624 = vmatmul.bf16.gmra.mxu3 %v1156_v35 }
  0x91   :  { %509 = vmatmul.bf16.gmra.mxu0 %v1133_v36  ;;  %549 = vmatmul.bf16.gmra.mxu1 %v1141_v37 }
  0x92   :  { %589 = vmatmul.bf16.gmra.mxu2 %v1149_v38  ;;  %629 = vmatmul.bf16.gmra.mxu3 %v1157_v39 }
  0x9e   :  { %v475_v41 = vpop.f32.mrf.mxu0  ;;  %v515_v42 = vpop.f32.mrf.mxu1 }
  0x9f   :  { %v834_v43 = vadd.f32 %v1334_v40, %v475_v41  ;;  %v850_v44 = vadd.f32 %v1334_v40, %v515_v42 }
  0xa1   :  { %898 = vst [vmem:[%s1595_s3] sm:$0xff] %v834_v43 }
  0xa2   :  { %914 = vst [vmem:[%s1595_s3 + $0x80] sm:$0xff] %v850_v44 }
  0xa5   :  { %v555_v45 = vpop.f32.mrf.mxu2  ;;  %v595_v46 = vpop.f32.mrf.mxu3 }
  0xa6   :  { %v866_v47 = vadd.f32 %v1334_v40, %v555_v45  ;;  %v882_v48 = vadd.f32 %v1334_v40, %v595_v46  ;;  %v477_v49 = vpop.f32.mrf.mxu0  ;;  %v517_v50 = vpop.f32.mrf.mxu1 }
  0xa7   :  { %v835_v51 = vadd.f32 %v1334_v40, %v477_v49  ;;  %v851_v52 = vadd.f32 %v1334_v40, %v517_v50 }
  0xa8   :  { %930 = vst [vmem:[%s1595_s3 + $0x100] sm:$0xff] %v866_v47 }
  0xa9   :  { %946 = vst [vmem:[%s1595_s3 + $0x180] sm:$0xff] %v882_v48 }
  0xaa   :  { %899 = vst [vmem:[%s1595_s3 + $0x8] sm:$0xff] %v835_v51 }
  0xab   :  { %915 = vst [vmem:[%s1595_s3 + $0x88] sm:$0xff] %v851_v52 }
  0xad   :  { %v557_v53 = vpop.f32.mrf.mxu2  ;;  %v597_v54 = vpop.f32.mrf.mxu3 }
  0xae   :  { %v867_v55 = vadd.f32 %v1334_v40, %v557_v53  ;;  %v883_v56 = vadd.f32 %v1334_v40, %v597_v54  ;;  %v480_v57 = vpop.f32.mrf.mxu0  ;;  %v520_v58 = vpop.f32.mrf.mxu1 }
  0xaf   :  { %v836_v59 = vadd.f32 %v1334_v40, %v480_v57  ;;  %v852_v60 = vadd.f32 %v1334_v40, %v520_v58 }
  0xb0   :  { %931 = vst [vmem:[%s1595_s3 + $0x108] sm:$0xff] %v867_v55 }
  0xb1   :  { %947 = vst [vmem:[%s1595_s3 + $0x188] sm:$0xff] %v883_v56 }
  0xb2   :  { %900 = vst [vmem:[%s1595_s3 + $0x10] sm:$0xff] %v836_v59 }
  0xb3   :  { %916 = vst [vmem:[%s1595_s3 + $0x90] sm:$0xff] %v852_v60 }
  0xb5   :  { %v560_v61 = vpop.f32.mrf.mxu2  ;;  %v600_v62 = vpop.f32.mrf.mxu3 }
  0xb6   :  { %v868_v63 = vadd.f32 %v1334_v40, %v560_v61  ;;  %v884_v0 = vadd.f32 %v1334_v40, %v600_v62  ;;  %v482_v1 = vpop.f32.mrf.mxu0  ;;  %v522_v2 = vpop.f32.mrf.mxu1 }
  0xb7   :  { %v837_v3 = vadd.f32 %v1334_v40, %v482_v1  ;;  %v853_v4 = vadd.f32 %v1334_v40, %v522_v2 }
  0xb8   :  { %932 = vst [vmem:[%s1595_s3 + $0x110] sm:$0xff] %v868_v63 }
  0xb9   :  { %948 = vst [vmem:[%s1595_s3 + $0x190] sm:$0xff] %v884_v0 }
  0xba   :  { %901 = vst [vmem:[%s1595_s3 + $0x18] sm:$0xff] %v837_v3 }
  0xbb   :  { %917 = vst [vmem:[%s1595_s3 + $0x98] sm:$0xff] %v853_v4 }
  0xbd   :  { %v562_v5 = vpop.f32.mrf.mxu2  ;;  %v602_v6 = vpop.f32.mrf.mxu3 }
  0xbe   :  { %v869_v7 = vadd.f32 %v1334_v40, %v562_v5  ;;  %v885_v8 = vadd.f32 %v1334_v40, %v602_v6  ;;  %v485_v9 = vpop.f32.mrf.mxu0  ;;  %v525_v10 = vpop.f32.mrf.mxu1 }
  0xbf   :  { %v838_v11 = vadd.f32 %v1334_v40, %v485_v9  ;;  %v854_v12 = vadd.f32 %v1334_v40, %v525_v10 }
  0xc0   :  { %933 = vst [vmem:[%s1595_s3 + $0x118] sm:$0xff] %v869_v7 }
  0xc1   :  { %949 = vst [vmem:[%s1595_s3 + $0x198] sm:$0xff] %v885_v8 }
  0xc2   :  { %902 = vst [vmem:[%s1595_s3 + $0x20] sm:$0xff] %v838_v11 }
  0xc3   :  { %918 = vst [vmem:[%s1595_s3 + $0xa0] sm:$0xff] %v854_v12 }
  0xc5   :  { %v565_v13 = vpop.f32.mrf.mxu2  ;;  %v605_v14 = vpop.f32.mrf.mxu3 }
  0xc6   :  { %v870_v15 = vadd.f32 %v1334_v40, %v565_v13  ;;  %v886_v16 = vadd.f32 %v1334_v40, %v605_v14  ;;  %v487_v17 = vpop.f32.mrf.mxu0  ;;  %v527_v18 = vpop.f32.mrf.mxu1 }
  0xc7   :  { %v839_v19 = vadd.f32 %v1334_v40, %v487_v17  ;;  %v855_v20 = vadd.f32 %v1334_v40, %v527_v18 }
  0xc8   :  { %934 = vst [vmem:[%s1595_s3 + $0x120] sm:$0xff] %v870_v15 }
  0xc9   :  { %950 = vst [vmem:[%s1595_s3 + $0x1a0] sm:$0xff] %v886_v16 }
  0xca   :  { %903 = vst [vmem:[%s1595_s3 + $0x28] sm:$0xff] %v839_v19 }
  0xcb   :  { %919 = vst [vmem:[%s1595_s3 + $0xa8] sm:$0xff] %v855_v20 }
  0xcd   :  { %v567_v21 = vpop.f32.mrf.mxu2  ;;  %v607_v22 = vpop.f32.mrf.mxu3 }
  0xce   :  { %v871_v23 = vadd.f32 %v1334_v40, %v567_v21  ;;  %v887_v24 = vadd.f32 %v1334_v40, %v607_v22  ;;  %v490_v25 = vpop.f32.mrf.mxu0  ;;  %v530_v26 = vpop.f32.mrf.mxu1 }
  0xcf   :  { %v840_v27 = vadd.f32 %v1334_v40, %v490_v25  ;;  %v856_v28 = vadd.f32 %v1334_v40, %v530_v26 }
  0xd0   :  { %935 = vst [vmem:[%s1595_s3 + $0x128] sm:$0xff] %v871_v23 }
  0xd1   :  { %951 = vst [vmem:[%s1595_s3 + $0x1a8] sm:$0xff] %v887_v24 }
  0xd2   :  { %904 = vst [vmem:[%s1595_s3 + $0x30] sm:$0xff] %v840_v27 }
  0xd3   :  { %920 = vst [vmem:[%s1595_s3 + $0xb0] sm:$0xff] %v856_v28 }
  0xd5   :  { %v570_v29 = vpop.f32.mrf.mxu2  ;;  %v610_v30 = vpop.f32.mrf.mxu3 }
  0xd6   :  { %v872_v31 = vadd.f32 %v1334_v40, %v570_v29  ;;  %v888_v32 = vadd.f32 %v1334_v40, %v610_v30  ;;  %v492_v33 = vpop.f32.mrf.mxu0  ;;  %v532_v34 = vpop.f32.mrf.mxu1 }
  0xd7   :  { %v841_v35 = vadd.f32 %v1334_v40, %v492_v33  ;;  %v857_v36 = vadd.f32 %v1334_v40, %v532_v34 }
  0xd8   :  { %936 = vst [vmem:[%s1595_s3 + $0x130] sm:$0xff] %v872_v31 }
  0xd9   :  { %952 = vst [vmem:[%s1595_s3 + $0x1b0] sm:$0xff] %v888_v32 }
  0xda   :  { %905 = vst [vmem:[%s1595_s3 + $0x38] sm:$0xff] %v841_v35 }
  0xdb   :  { %921 = vst [vmem:[%s1595_s3 + $0xb8] sm:$0xff] %v857_v36 }
  0xdd   :  { %v572_v37 = vpop.f32.mrf.mxu2  ;;  %v612_v38 = vpop.f32.mrf.mxu3 }
  0xde   :  { %v873_v39 = vadd.f32 %v1334_v40, %v572_v37  ;;  %v889_v41 = vadd.f32 %v1334_v40, %v612_v38  ;;  %v495_v42 = vpop.f32.mrf.mxu0  ;;  %v535_v43 = vpop.f32.mrf.mxu1 }
  0xdf   :  { %v842_v44 = vadd.f32 %v1334_v40, %v495_v42  ;;  %v858_v45 = vadd.f32 %v1334_v40, %v535_v43 }
  0xe0   :  { %937 = vst [vmem:[%s1595_s3 + $0x138] sm:$0xff] %v873_v39 }
  0xe1   :  { %953 = vst [vmem:[%s1595_s3 + $0x1b8] sm:$0xff] %v889_v41 }
  0xe2   :  { %906 = vst [vmem:[%s1595_s3 + $0x40] sm:$0xff] %v842_v44 }
  0xe3   :  { %922 = vst [vmem:[%s1595_s3 + $0xc0] sm:$0xff] %v858_v45 }
  0xe5   :  { %v575_v46 = vpop.f32.mrf.mxu2  ;;  %v615_v47 = vpop.f32.mrf.mxu3 }
  0xe6   :  { %v874_v48 = vadd.f32 %v1334_v40, %v575_v46  ;;  %v890_v49 = vadd.f32 %v1334_v40, %v615_v47  ;;  %v497_v50 = vpop.f32.mrf.mxu0  ;;  %v537_v51 = vpop.f32.mrf.mxu1 }
  0xe7   :  { %v843_v52 = vadd.f32 %v1334_v40, %v497_v50  ;;  %v859_v53 = vadd.f32 %v1334_v40, %v537_v51 }
  0xe8   :  { %938 = vst [vmem:[%s1595_s3 + $0x140] sm:$0xff] %v874_v48 }
  0xe9   :  { %954 = vst [vmem:[%s1595_s3 + $0x1c0] sm:$0xff] %v890_v49 }
  0xea   :  { %907 = vst [vmem:[%s1595_s3 + $0x48] sm:$0xff] %v843_v52 }
  0xeb   :  { %923 = vst [vmem:[%s1595_s3 + $0xc8] sm:$0xff] %v859_v53 }
  0xed   :  { %v577_v54 = vpop.f32.mrf.mxu2  ;;  %v617_v55 = vpop.f32.mrf.mxu3 }
  0xee   :  { %v875_v56 = vadd.f32 %v1334_v40, %v577_v54  ;;  %v891_v57 = vadd.f32 %v1334_v40, %v617_v55  ;;  %v500_v58 = vpop.f32.mrf.mxu0  ;;  %v540_v59 = vpop.f32.mrf.mxu1 }
  0xef   :  { %v844_v60 = vadd.f32 %v1334_v40, %v500_v58  ;;  %v860_v61 = vadd.f32 %v1334_v40, %v540_v59 }
  0xf0   :  { %939 = vst [vmem:[%s1595_s3 + $0x148] sm:$0xff] %v875_v56 }
  0xf1   :  { %955 = vst [vmem:[%s1595_s3 + $0x1c8] sm:$0xff] %v891_v57 }
  0xf2   :  { %908 = vst [vmem:[%s1595_s3 + $0x50] sm:$0xff] %v844_v60 }
  0xf3   :  { %924 = vst [vmem:[%s1595_s3 + $0xd0] sm:$0xff] %v860_v61 }
  0xf5   :  { %v580_v62 = vpop.f32.mrf.mxu2  ;;  %v620_v63 = vpop.f32.mrf.mxu3 }
  0xf6   :  { %v876_v0 = vadd.f32 %v1334_v40, %v580_v62  ;;  %v892_v1 = vadd.f32 %v1334_v40, %v620_v63  ;;  %v502_v2 = vpop.f32.mrf.mxu0  ;;  %v542_v3 = vpop.f32.mrf.mxu1 }
  0xf7   :  { %v845_v4 = vadd.f32 %v1334_v40, %v502_v2  ;;  %v861_v5 = vadd.f32 %v1334_v40, %v542_v3 }
  0xf8   :  { %940 = vst [vmem:[%s1595_s3 + $0x150] sm:$0xff] %v876_v0 }
  0xf9   :  { %956 = vst [vmem:[%s1595_s3 + $0x1d0] sm:$0xff] %v892_v1 }
  0xfa   :  { %909 = vst [vmem:[%s1595_s3 + $0x58] sm:$0xff] %v845_v4 }
  0xfb   :  { %925 = vst [vmem:[%s1595_s3 + $0xd8] sm:$0xff] %v861_v5 }
  0xfd   :  { %v582_v6 = vpop.f32.mrf.mxu2  ;;  %v622_v7 = vpop.f32.mrf.mxu3 }
  0xfe   :  { %v877_v8 = vadd.f32 %v1334_v40, %v582_v6  ;;  %v893_v9 = vadd.f32 %v1334_v40, %v622_v7  ;;  %v505_v10 = vpop.f32.mrf.mxu0  ;;  %v545_v11 = vpop.f32.mrf.mxu1 }
  0xff   :  { %v846_v12 = vadd.f32 %v1334_v40, %v505_v10  ;;  %v862_v13 = vadd.f32 %v1334_v40, %v545_v11 }
 0x100   :  { %941 = vst [vmem:[%s1595_s3 + $0x158] sm:$0xff] %v877_v8 }
 0x101   :  { %957 = vst [vmem:[%s1595_s3 + $0x1d8] sm:$0xff] %v893_v9 }
 0x102   :  { %910 = vst [vmem:[%s1595_s3 + $0x60] sm:$0xff] %v846_v12 }
 0x103   :  { %926 = vst [vmem:[%s1595_s3 + $0xe0] sm:$0xff] %v862_v13 }
 0x105   :  { %v585_v14 = vpop.f32.mrf.mxu2  ;;  %v625_v15 = vpop.f32.mrf.mxu3 }
 0x106   :  { %v878_v16 = vadd.f32 %v1334_v40, %v585_v14  ;;  %v894_v17 = vadd.f32 %v1334_v40, %v625_v15  ;;  %v507_v18 = vpop.f32.mrf.mxu0  ;;  %v547_v19 = vpop.f32.mrf.mxu1 }
 0x107   :  { %v847_v20 = vadd.f32 %v1334_v40, %v507_v18  ;;  %v863_v21 = vadd.f32 %v1334_v40, %v547_v19 }
 0x108   :  { %942 = vst [vmem:[%s1595_s3 + $0x160] sm:$0xff] %v878_v16 }
 0x109   :  { %958 = vst [vmem:[%s1595_s3 + $0x1e0] sm:$0xff] %v894_v17 }
 0x10a   :  { %911 = vst [vmem:[%s1595_s3 + $0x68] sm:$0xff] %v847_v20 }
 0x10b   :  { %927 = vst [vmem:[%s1595_s3 + $0xe8] sm:$0xff] %v863_v21 }
 0x10d   :  { %v587_v22 = vpop.f32.mrf.mxu2  ;;  %v627_v23 = vpop.f32.mrf.mxu3 }
 0x10e   :  { %v879_v24 = vadd.f32 %v1334_v40, %v587_v22  ;;  %v895_v25 = vadd.f32 %v1334_v40, %v627_v23  ;;  %v510_v26 = vpop.f32.mrf.mxu0  ;;  %v550_v27 = vpop.f32.mrf.mxu1 }
 0x10f   :  { %v848_v28 = vadd.f32 %v1334_v40, %v510_v26  ;;  %v864_v29 = vadd.f32 %v1334_v40, %v550_v27 }
 0x110   :  { %943 = vst [vmem:[%s1595_s3 + $0x168] sm:$0xff] %v879_v24 }
 0x111   :  { %959 = vst [vmem:[%s1595_s3 + $0x1e8] sm:$0xff] %v895_v25 }
 0x112   :  { %912 = vst [vmem:[%s1595_s3 + $0x70] sm:$0xff] %v848_v28 }
 0x113   :  { %928 = vst [vmem:[%s1595_s3 + $0xf0] sm:$0xff] %v864_v29 }
 0x115   :  { %v590_v30 = vpop.f32.mrf.mxu2  ;;  %v630_v31 = vpop.f32.mrf.mxu3 }
 0x116   :  { %v880_v32 = vadd.f32 %v1334_v40, %v590_v30  ;;  %v896_v33 = vadd.f32 %v1334_v40, %v630_v31  ;;  %v512_v34 = vpop.f32.mrf.mxu0  ;;  %v552_v35 = vpop.f32.mrf.mxu1 }
 0x117   :  { %v849_v36 = vadd.f32 %v1334_v40, %v512_v34  ;;  %v865_v37 = vadd.f32 %v1334_v40, %v552_v35 }
 0x118   :  { %944 = vst [vmem:[%s1595_s3 + $0x170] sm:$0xff] %v880_v32 }
 0x119   :  { %960 = vst [vmem:[%s1595_s3 + $0x1f0] sm:$0xff] %v896_v33 }
 0x11a   :  { %913 = vst [vmem:[%s1595_s3 + $0x78] sm:$0xff] %v849_v36 }
 0x11b   :  { %929 = vst [vmem:[%s1595_s3 + $0xf8] sm:$0xff] %v865_v37 }
 0x11d   :  { %v592_v38 = vpop.f32.mrf.mxu2  ;;  %v632_v39 = vpop.f32.mrf.mxu3 }
 0x11e   :  { %v881_v41 = vadd.f32 %v1334_v40, %v592_v38  ;;  %v897_v42 = vadd.f32 %v1334_v40, %v632_v39 }
 0x120   :  { %945 = vst [vmem:[%s1595_s3 + $0x178] sm:$0xff] %v881_v41 }
 0x121   :  { %961 = vst [vmem:[%s1595_s3 + $0x1f8] sm:$0xff] %v897_v42 }

// kernel: mlp_forward.4
= control target key start
LH: loop header
LB: loop body
LE: loop exit
PB: predicated region body
PF: predicated region fallthrough
CT: control target
= control target key end

     0   :  { %s4457_s18 = smov 0   ;;  %s4459_s19 = smov 0   ;;  %s9216_s0 = inlined_call_operand.vmem [shape: bf16[2,16,16,128], index: 0, kind: input, shape index: {}, may-alias: {0,1,2}]   ;;  %s9217_s1 = inlined_call_operand.vmem [shape: bf16[2,16,16,128], index: 1, kind: input, shape index: {}, may-alias: {0,1,2}]   ;;  %s9218_s2 = inlined_call_operand.vmem [shape: bf16[2,16,16,128], index: 2, kind: input, shape index: {}, may-alias: {0,1,2}]   ;;  %s9219_s3 = inlined_call_operand.vmem [shape: f32[3,3,128], index: 3, kind: input, shape index: {}]   ;;  %s9220_s4 = inlined_call_operand.vmem [shape: f32[1,128], index: 4, kind: input, shape index: {}]   ;;  %s9221_s5 = inlined_call_operand.vmem [shape: bf16[2,16,16,128], index: 5, kind: output, shape index: {}]  }
   0x1   :  { %s4461_s20 = smov 0  }
   0x2 LB: > { %s34_s21 = sadd.s32 1, %s4421_s19  ;;  %p4080_p0 = scmp.ge.s32.totalorder %s4425_s20, 1  ;;  %s4425_s20 = sphi %s4461_s20, %s15_s20   ;;  %s4421_s19 = sphi %s4459_s19, %s10274_s19   ;;  %s4417_s18 = sphi %s4457_s18, %s10273_s18  }
   0x3   : > { %p36_p1 = scmp.ge.s32.totalorder %s34_s21, 2  ;;  %p314_p2 = scmp.lt.s32.totalorder %s4425_s20, 3 }
   0x5   : > { %s10276_s21 = smov (%p36_p1, %s34_s21), 0  ;;  %p315_p3 = pnand %p4080_p0, %p314_p2 }
   0x7   : > { %318 = sbr.rel (%p315_p3) target bundleno = 779 (0x30b), region = 40 }
   0xc   : > { %p398_p4 = scmp.lt.s32.totalorder %s4417_s18, 1  ;;  %v4495_v3 = vld [vmem:[%s9219_s3] sm:$0x7]  ;;  %vm588_vm0 = vcmask 1040384   ;;  %vm1028_vm1 = vcmask 1046528   ;;  %vm1752_vm2 = vcmask 1045504  }
   0xd   : > { %v4506_v14 = vperm.slane %v4495_v3, 0 }
   0xe   : > { %s10278_s18 = smov (!%p398_p4, %s4417_s18), 1 }
   0xf   : > { %s4475_s22 = sshll.u32 %s10278_s18, 7 }
  0x10   : > { %s4126_s23 = sadd.s32 120, %s4475_s22  ;;  %s426_s26 = scalar_lea.vmem %s9217_s1, %s4475_s22 }
  0x11   : > { %s446_s29 = scalar_lea.vmem %s9218_s2, %s4126_s23  ;;  %s4489_s7 = scalar_lea.vmem %s9216_s0, %s4475_s22  ;;  %v4129_v0 = vld [vmem:[%s426_s26] sm:$0xff]  }
  0x12   : > { %v4133_v1 = vld [vmem:[%s446_s29] sm:$0xff]   ;;  %v4130_v4 = vunpack.c.l.bf16 %v4129_v0  ;;  %v4131_v5 = vunpack.c.h.bf16 %v4129_v0  ;;  %v4281_v6 = vld [vmem:[%s4489_s7 + $0x8] sm:$0xff]   ;;  %v4282_v7 = vld [vmem:[%s4489_s7 + $0x10] sm:$0xff]   ;;  %s9164_s28 = scalar_lea.vmem %s9221_s5, %s4475_s22 }
  0x13   : > { %v4137_v2 = vld [vmem:[%s4489_s7] sm:$0xff]   ;;  %v4134_v8 = vunpack.c.l.bf16 %v4133_v1  ;;  %v4135_v9 = vunpack.c.h.bf16 %v4133_v1  ;;  %v4500_v10 = vld [vmem:[%s4489_s7 + $0x18] sm:$0xff]   ;;  %v4142_v15 = vunpack.c.l.bf16 %v4281_v6  ;;  %v4143_v16 = vunpack.c.h.bf16 %v4281_v6  ;;  %v4285_v19 = vld [vmem:[%s4489_s7 + $0x28] sm:$0xff]  }
  0x14   : > { %v4138_v11 = vunpack.c.l.bf16 %v4137_v2  ;;  %v4139_v12 = vunpack.c.h.bf16 %v4137_v2  ;;  %v4503_v13 = vld [vmem:[%s4489_s7 + $0x20] sm:$0xff]   ;;  %v4146_v17 = vunpack.c.l.bf16 %v4282_v7  ;;  %v4147_v18 = vunpack.c.h.bf16 %v4282_v7  ;;  %v4286_v20 = vld [vmem:[%s4489_s7 + $0x30] sm:$0xff]   ;;  %v4287_v25 = vld [vmem:[%s4489_s7 + $0x38] sm:$0xff]  }
  0x15   : > { %v4510_v21 = vmul.f32 0.0, %v4130_v4  ;;  %v4512_v22 = vmul.f32 0.0, %v4131_v5  ;;  %v4150_v23 = vunpack.c.l.bf16 %v4500_v10  ;;  %v4151_v24 = vunpack.c.h.bf16 %v4500_v10  ;;  %v4288_v26 = vld [vmem:[%s4489_s7 + $0x40] sm:$0xff]   ;;  %v4289_v31 = vld [vmem:[%s4489_s7 + $0x48] sm:$0xff]   ;;  %v4290_v32 = vld [vmem:[%s4489_s7 + $0x50] sm:$0xff]  }
  0x16   : > { %v4518_v27 = vmul.f32 0.0, %v4134_v8  ;;  %v4520_v28 = vmul.f32 0.0, %v4135_v9  ;;  %v4154_v29 = vunpack.c.l.bf16 %v4503_v13  ;;  %v4155_v30 = vunpack.c.h.bf16 %v4503_v13  ;;  %v4291_v45 = vld [vmem:[%s4489_s7 + $0x58] sm:$0xff]   ;;  %v4292_v46 = vld [vmem:[%s4489_s7 + $0x60] sm:$0xff]   ;;  %v4293_v47 = vld [vmem:[%s4489_s7 + $0x68] sm:$0xff]  }
  0x17   : > { %v4158_v33 = vunpack.c.l.bf16 %v4285_v19  ;;  %v4159_v34 = vunpack.c.h.bf16 %v4285_v19  ;;  %v4162_v35 = vunpack.c.l.bf16 %v4286_v20  ;;  %v4163_v36 = vunpack.c.h.bf16 %v4286_v20  ;;  %v4294_v48 = vld [vmem:[%s4489_s7 + $0x70] sm:$0xff]   ;;  %v4295_v53 = vld [vmem:[%s4489_s7 + $0x78] sm:$0xff]  }
  0x18   : > { %v4166_v37 = vunpack.c.l.bf16 %v4287_v25  ;;  %v4167_v38 = vunpack.c.h.bf16 %v4287_v25  ;;  %v4170_v39 = vunpack.c.l.bf16 %v4288_v26  ;;  %v4171_v40 = vunpack.c.h.bf16 %v4288_v26 }
  0x19   : > { %v4174_v41 = vunpack.c.l.bf16 %v4289_v31  ;;  %v4175_v42 = vunpack.c.h.bf16 %v4289_v31  ;;  %v4178_v43 = vunpack.c.l.bf16 %v4290_v32  ;;  %v4179_v44 = vunpack.c.h.bf16 %v4290_v32 }
  0x1a   : > { %v589_v49 = vrot.slane %v4510_v21, 7  ;;  %v590_v50 = vrot.slane %v4512_v22, 7  ;;  %v4532_v51 = vrot.slane %v4138_v11, 7  ;;  %v4534_v52 = vrot.slane %v4139_v12, 7 }
  0x1b   : > { %v595_v54 = vrot.slane %v4142_v15, 7  ;;  %v4537_v55 = vrot.slane %v4143_v16, 7  ;;  %v598_v56 = vrot.slane %v4146_v17, 7  ;;  %v4539_v57 = vrot.slane %v4147_v18, 7 }
  0x1c   : > { %v4182_v58 = vunpack.c.l.bf16 %v4291_v45  ;;  %v4183_v59 = vunpack.c.h.bf16 %v4291_v45  ;;  %v4186_v60 = vunpack.c.l.bf16 %v4292_v46  ;;  %v4187_v61 = vunpack.c.h.bf16 %v4292_v46 }
  0x1d   : > { %v4190_v62 = vunpack.c.l.bf16 %v4293_v47  ;;  %v4191_v63 = vunpack.c.h.bf16 %v4293_v47  ;;  %v4194_v0 = vunpack.c.l.bf16 %v4294_v48  ;;  %v4195_v1 = vunpack.c.h.bf16 %v4294_v48 }
  0x1e   : > { %v4198_v2 = vunpack.c.l.bf16 %v4295_v53  ;;  %v4199_v4 = vunpack.c.h.bf16 %v4295_v53  ;;  %v4546_v5 = vsel %vm588_vm0, %v589_v49, %v590_v50  ;;  %v4551_v6 = vsel %vm588_vm0, %v4532_v51, %v4534_v52 }
  0x1f   : > { %9323 = vst [vmem:[#allocation2_spill] sm:$0xff] %v4546_v5  ;;  %v4555_v7 = vsel %vm588_vm0, %v595_v54, %v4537_v55  ;;  %v4559_v8 = vsel %vm588_vm0, %v598_v56, %v4539_v57  ;;  %v601_v9 = vrot.slane %v4150_v23, 7  ;;  %v4561_v10 = vrot.slane %v4151_v24, 7 }
  0x20   : > { %9324 = vst [vmem:[#allocation3_spill] sm:$0xff] %v4551_v6  ;;  %v604_v11 = vrot.slane %v4154_v29, 7  ;;  %v605_v12 = vrot.slane %v4155_v30, 7  ;;  %v607_v13 = vrot.slane %v4158_v33, 7  ;;  %v608_v15 = vrot.slane %v4159_v34, 7 }
  0x21   : > { %9325 = vst [vmem:[#allocation4_spill] sm:$0xff] %v4555_v7  ;;  %v610_v16 = vrot.slane %v4162_v35, 7  ;;  %v611_v17 = vrot.slane %v4163_v36, 7  ;;  %v613_v18 = vrot.slane %v4166_v37, 7  ;;  %v614_v19 = vrot.slane %v4167_v38, 7 }
  0x22   : > { %9326 = vst [vmem:[#allocation5_spill] sm:$0xff] %v4559_v8  ;;  %v616_v20 = vrot.slane %v4170_v39, 7  ;;  %v617_v25 = vrot.slane %v4171_v40, 7  ;;  %v619_v26 = vrot.slane %v4174_v41, 7  ;;  %v620_v31 = vrot.slane %v4175_v42, 7 }
  0x23   : > { %v622_v32 = vrot.slane %v4178_v43, 7  ;;  %v623_v45 = vrot.slane %v4179_v44, 7  ;;  %v625_v46 = vrot.slane %v4182_v58, 7  ;;  %v626_v47 = vrot.slane %v4183_v59, 7 }
  0x24   : > { %v628_v48 = vrot.slane %v4186_v60, 7  ;;  %v629_v23 = vrot.slane %v4187_v61, 7  ;;  %v631_v24 = vrot.slane %v4190_v62, 7  ;;  %v632_v53 = vrot.slane %v4191_v63, 7 }
  0x25   : > { %v634_v29 = vrot.slane %v4194_v0, 7  ;;  %v635_v30 = vrot.slane %v4195_v1, 7  ;;  %v637_v33 = vrot.slane %v4198_v2, 7  ;;  %v638_v34 = vrot.slane %v4199_v4, 7 }
  0x26   : > { %v4565_v35 = vsel %vm588_vm0, %v601_v9, %v4561_v10  ;;  %v4568_v36 = vsel %vm588_vm0, %v604_v11, %v605_v12  ;;  %v640_v37 = vrot.slane %v4518_v27, 7  ;;  %v641_v38 = vrot.slane %v4520_v28, 7 }
  0x27   : > { %9327 = vst [vmem:[#allocation6_spill] sm:$0xff] %v4565_v35  ;;  %v4573_v39 = vsel %vm588_vm0, %v607_v13, %v608_v15  ;;  %v4576_v40 = vsel %vm588_vm0, %v610_v16, %v611_v17  ;;  %v4579_v41 = vsel %vm588_vm0, %v613_v18, %v614_v19  ;;  %v4582_v42 = vsel %vm588_vm0, %v616_v20, %v617_v25 }
  0x28   : > { %9328 = vst [vmem:[#allocation7_spill] sm:$0xff] %v4568_v36  ;;  %v4585_v43 = vsel %vm588_vm0, %v619_v26, %v620_v31  ;;  %v4588_v44 = vsel %vm588_vm0, %v622_v32, %v623_v45  ;;  %v4591_v27 = vsel %vm588_vm0, %v625_v46, %v626_v47  ;;  %v4594_v28 = vsel %vm588_vm0, %v628_v48, %v629_v23 }
  0x29   : > { %9329 = vst [vmem:[#allocation8_spill] sm:$0xff] %v4573_v39  ;;  %v4597_v58 = vsel %vm588_vm0, %v631_v24, %v632_v53  ;;  %v4600_v59 = vsel %vm588_vm0, %v634_v29, %v635_v30  ;;  %v4603_v60 = vsel %vm588_vm0, %v637_v33, %v638_v34  ;;  %v4608_v61 = vsel %vm588_vm0, 0.0, %v589_v49 }
  0x2a   : > { %9330 = vst [vmem:[#allocation9_spill] sm:$0xff] %v4576_v40  ;;  %v4611_v62 = vsel %vm588_vm0, %v640_v37, %v641_v38  ;;  %v4615_v63 = vsel %vm588_vm0, 0.0, %v4532_v51  ;;  %v4618_v0 = vsel %vm588_vm0, 0.0, %v595_v54  ;;  %v4621_v1 = vsel %vm588_vm0, 0.0, %v598_v56 }
  0x2b   : > { %9331 = vst [vmem:[#allocation10_spill] sm:$0xff] %v4579_v41  ;;  %v4624_v2 = vsel %vm588_vm0, 0.0, %v601_v9  ;;  %v4627_v21 = vsel %vm588_vm0, 0.0, %v604_v11  ;;  %v4630_v49 = vsel %vm588_vm0, 0.0, %v607_v13  ;;  %v4633_v4 = vsel %vm588_vm0, 0.0, %v610_v16 }
  0x2c   : > { %9332 = vst [vmem:[#allocation11_spill] sm:$0xff] %v4582_v42  ;;  %v4636_v51 = vsel %vm588_vm0, 0.0, %v613_v18  ;;  %v4639_v54 = vsel %vm588_vm0, 0.0, %v616_v20  ;;  %v4642_v56 = vsel %vm588_vm0, 0.0, %v619_v26  ;;  %v4645_v9 = vsel %vm588_vm0, 0.0, %v622_v32 }
  0x2d   : > { %9333 = vst [vmem:[#allocation12_spill] sm:$0xff] %v4585_v43  ;;  %v4648_v11 = vsel %vm588_vm0, 0.0, %v625_v46  ;;  %v4651_v13 = vsel %vm588_vm0, 0.0, %v628_v48  ;;  %v4654_v16 = vsel %vm588_vm0, 0.0, %v631_v24  ;;  %v4657_v18 = vsel %vm588_vm0, 0.0, %v634_v29 }
  0x2e   : > { %9334 = vst [vmem:[#allocation13_spill] sm:$0xff] %v4588_v44  ;;  %v4660_v20 = vsel %vm588_vm0, 0.0, %v637_v33  ;;  %v4663_v26 = vsel %vm588_vm0, 0.0, %v640_v37  ;;  %v4668_v32 = vsel %vm588_vm0, %v590_v50, 0.0  ;;  %v4672_v46 = vsel %vm588_vm0, %v4534_v52, 0.0 }
  0x2f   : > { %9335 = vst [vmem:[#allocation14_spill] sm:$0xff] %v4591_v27  ;;  %v4676_v48 = vsel %vm588_vm0, %v4537_v55, 0.0  ;;  %v4680_v24 = vsel %vm588_vm0, %v4539_v57, 0.0  ;;  %v4684_v29 = vsel %vm588_vm0, %v4561_v10, 0.0  ;;  %v4687_v22 = vsel %vm588_vm0, %v605_v12, 0.0 }
  0x30   : > { %9336 = vst [vmem:[#allocation15_spill] sm:$0xff] %v4594_v28  ;;  %v4690_v50 = vsel %vm588_vm0, %v608_v15, 0.0  ;;  %v4693_v52 = vsel %vm588_vm0, %v611_v17, 0.0  ;;  %v4696_v55 = vsel %vm588_vm0, %v614_v19, 0.0  ;;  %v4699_v33 = vsel %vm588_vm0, %v617_v25, 0.0 }
  0x31   : > { %9337 = vst [vmem:[#allocation16_spill] sm:$0xff] %v4597_v58  ;;  %v4702_v57 = vsel %vm588_vm0, %v620_v31, 0.0  ;;  %v4705_v10 = vsel %vm588_vm0, %v623_v45, 0.0  ;;  %v4708_v12 = vsel %vm588_vm0, %v626_v47, 0.0  ;;  %v4711_v15 = vsel %vm588_vm0, %v629_v23, 0.0 }
  0x32   : > { %9338 = vst [vmem:[#allocation17_spill] sm:$0xff] %v4600_v59  ;;  %v4714_v17 = vsel %vm588_vm0, %v632_v53, 0.0  ;;  %v4717_v19 = vsel %vm588_vm0, %v635_v30, 0.0  ;;  %v4720_v25 = vsel %vm588_vm0, %v638_v34, 0.0  ;;  %v4723_v31 = vsel %vm588_vm0, %v641_v38, 0.0 }
  0x33   : > { %9339 = vst [vmem:[#allocation18_spill] sm:$0xff] %v4603_v60  ;;  %v4727_v45 = vmul.f32 %v4506_v14, %v4608_v61  ;;  %v4731_v47 = vmul.f32 %v4506_v14, %v4546_v5  ;;  %v4735_v23 = vmul.f32 %v4506_v14, %v4615_v63  ;;  %v4739_v53 = vmul.f32 %v4506_v14, %v4551_v6  ;;  %v4744_v30 = vld [vmem:[%s9219_s3 + $0x4] sm:$0x7] }
  0x34   : > { %9340 = vst [vmem:[#allocation19_spill] sm:$0xff] %v4608_v61  ;;  %v4748_v34 = vmul.f32 %v4506_v14, %v4618_v0  ;;  %v4752_v37 = vmul.f32 %v4506_v14, %v4555_v7  ;;  %v4756_v38 = vmul.f32 %v4506_v14, %v4621_v1  ;;  %v4834_v5 = vmul.f32 %v4506_v14, %v4648_v11 }
  0x35   : > { %9341 = vst [vmem:[#allocation20_spill] sm:$0xff] %v4611_v62  ;;  %v4838_v61 = vmul.f32 %v4506_v14, %v4591_v27  ;;  %v4842_v62 = vmul.f32 %v4506_v14, %v4651_v13 }
  0x36   : > { %9342 = vst [vmem:[#allocation21_spill] sm:$0xff] %v4615_v63 }
  0x37   : > { %9343 = vst [vmem:[#allocation22_spill] sm:$0xff] %v4618_v0 }
  0x38   : > { %9344 = vst [vmem:[#allocation23_spill] sm:$0xff] %v4621_v1 }
  0x39   : > { %9345 = vst [vmem:[#allocation24_spill] sm:$0xff] %v4624_v2 }
  0x3a   : > { %9346 = vst [vmem:[#allocation25_spill] sm:$0xff] %v4627_v21 }
  0x3b   : > { %9347 = vst [vmem:[#allocation26_spill] sm:$0xff] %v4630_v49 }
  0x3c   : > { %9348 = vst [vmem:[#allocation27_spill] sm:$0xff] %v4633_v4 }
  0x3d   : > { %9349 = vst [vmem:[#allocation28_spill] sm:$0xff] %v4636_v51 }
  0x3e   : > { %9350 = vst [vmem:[#allocation29_spill] sm:$0xff] %v4639_v54 }
  0x3f   : > { %9351 = vst [vmem:[#allocation30_spill] sm:$0xff] %v4642_v56 }
  0x40   : > { %9352 = vst [vmem:[#allocation31_spill] sm:$0xff] %v4645_v9 }
  0x41   : > { %9353 = vst [vmem:[#allocation32_spill] sm:$0xff] %v4648_v11 }
  0x42   : > { %9354 = vst [vmem:[#allocation33_spill] sm:$0xff] %v4651_v13 }
  0x43   : > { %9355 = vst [vmem:[#allocation34_spill] sm:$0xff] %v4654_v16 }
  0x44   : > { %9356 = vst [vmem:[#allocation35_spill] sm:$0xff] %v4657_v18 }
  0x45   : > { %9357 = vst [vmem:[#allocation36_spill] sm:$0xff] %v4660_v20 }
  0x46   : > { %9358 = vst [vmem:[#allocation37_spill] sm:$0xff] %v4663_v26  ;;  %v4846_v26 = vmul.f32 %v4506_v14, %v4594_v28 }
  0x47   : > { %9359 = vst [vmem:[#allocation38_spill] sm:$0xff] %v4668_v32  ;;  %v4830_v32 = vmul.f32 %v4506_v14, %v4588_v44 }
  0x48   : > { %9360 = vst [vmem:[#allocation39_spill] sm:$0xff] %v4672_v46  ;;  %v4822_v46 = vmul.f32 %v4506_v14, %v4585_v43 }
  0x49   : > { %9361 = vst [vmem:[#allocation40_spill] sm:$0xff] %v4676_v48  ;;  %v4818_v48 = vmul.f32 %v4506_v14, %v4642_v56 }
  0x4a   : > { %9362 = vst [vmem:[#allocation41_spill] sm:$0xff] %v4680_v24  ;;  %v4814_v24 = vmul.f32 %v4506_v14, %v4582_v42 }
  0x4b   : > { %9363 = vst [vmem:[#allocation42_spill] sm:$0xff] %v4684_v29  ;;  %v4810_v29 = vld [vmem:[%s9219_s3 + $0x8] sm:$0x7] }
  0x4c   : > { %9364 = vst [vmem:[#allocation43_spill] sm:$0xff] %v4687_v22  ;;  %v801_v22 = vperm.slane %v4744_v30, 0 }
  0x4d   : > { %9365 = vst [vmem:[#allocation44_spill] sm:$0xff] %v4690_v50  ;;  %v4804_v50 = vmul.f32 %v4506_v14, %v4639_v54 }
  0x4e   : > { %9366 = vst [vmem:[#allocation45_spill] sm:$0xff] %v4693_v52  ;;  %v4800_v52 = vmul.f32 %v4506_v14, %v4579_v41 }
  0x4f   : > { %9367 = vst [vmem:[#allocation46_spill] sm:$0xff] %v4696_v55  ;;  %v4796_v55 = vmul.f32 %v4506_v14, %v4636_v51 }
  0x50   : > { %9368 = vst [vmem:[#allocation47_spill] sm:$0xff] %v4699_v33  ;;  %v4792_v33 = vmul.f32 %v4506_v14, %v4576_v40 }
  0x51   : > { %9369 = vst [vmem:[#allocation48_spill] sm:$0xff] %v4702_v57  ;;  %v4788_v57 = vmul.f32 %v4506_v14, %v4633_v4 }
  0x52   : > { %9370 = vst [vmem:[#allocation49_spill] sm:$0xff] %v4705_v10  ;;  %v4784_v10 = vmul.f32 %v4506_v14, %v4573_v39 }
  0x53   : > { %9371 = vst [vmem:[#allocation50_spill] sm:$0xff] %v4708_v12  ;;  %v4780_v12 = vmul.f32 %v4506_v14, %v4630_v49 }
  0x54   : > { %9372 = vst [vmem:[#allocation51_spill] sm:$0xff] %v4711_v15  ;;  %v4776_v15 = vmul.f32 %v4506_v14, %v4568_v36 }
  0x55   : > { %9373 = vst [vmem:[#allocation52_spill] sm:$0xff] %v4714_v17  ;;  %v4772_v17 = vmul.f32 %v4506_v14, %v4627_v21 }
  0x56   : > { %9374 = vst [vmem:[#allocation53_spill] sm:$0xff] %v4717_v19  ;;  %v4768_v19 = vmul.f32 %v4506_v14, %v4565_v35 }
  0x57   : > { %9375 = vst [vmem:[#allocation54_spill] sm:$0xff] %v4720_v25  ;;  %v4764_v25 = vmul.f32 %v4506_v14, %v4624_v2 }
  0x58   : > { %9376 = vst [vmem:[#allocation55_spill] sm:$0xff] %v4723_v31  ;;  %v4760_v31 = vmul.f32 %v4506_v14, %v4559_v8 }
  0x59   : > { %9377 = vst [vmem:[#allocation56_spill] sm:$0xff] %v4744_v30  ;;  %v4826_v30 = vmul.f32 %v4506_v14, %v4645_v9 }
  0x5a   : > { %9378 = vst [vmem:[#allocation57_spill] sm:$0xff] %v4810_v29 }
  0x5b   : > { %9379 = vst [vmem:[#allocation58_spill] sm:$0xff] %v4814_v24  ;;  %v807_v24 = vmul.f32 %v801_v22, %v4559_v8  ;;  %v817_v8 = vmul.f32 %v801_v22, %v4579_v41  ;;  %v827_v41 = vmul.f32 %v801_v22, %v4594_v28 }
  0x5c   : > { %9380 = vst [vmem:[#allocation59_spill] sm:$0xff] %v4818_v48  ;;  %v805_v48 = vmul.f32 %v801_v22, %v4555_v7  ;;  %v815_v7 = vmul.f32 %v801_v22, %v4576_v40  ;;  %v825_v40 = vmul.f32 %v801_v22, %v4591_v27 }
  0x5d   : > { %9381 = vst [vmem:[#allocation60_spill] sm:$0xff] %v4822_v46  ;;  %v4869_v46 = vperm.slane %v4495_v3, 1  ;;  %v812_v3 = vmul.f32 %v801_v22, %v4630_v49  ;;  %v822_v49 = vmul.f32 %v801_v22, %v4645_v9  ;;  %v832_v9 = vmul.f32 %v801_v22, %v4660_v20 }
  0x5e   : > { %9382 = vst [vmem:[#allocation61_spill] sm:$0xff] %v4826_v30  ;;  %v4850_v30 = vmul.f32 %v4506_v14, %v4654_v16 }
  0x5f   : > { %9383 = vst [vmem:[#allocation62_spill] sm:$0xff] %v4830_v32  ;;  %v4854_v32 = vmul.f32 %v4506_v14, %v4597_v58 }
  0x60   : > { %9384 = vst [vmem:[#allocation63_spill] sm:$0xff] %v4834_v5  ;;  %v4858_v5 = vmul.f32 %v4506_v14, %v4657_v18 }
  0x61   : > { %9385 = vst [vmem:[#allocation64_spill] sm:$0xff] %v4838_v61  ;;  %v4862_v61 = vmul.f32 %v4506_v14, %v4600_v59  ;;  %v808_v14 = vmul.f32 %v801_v22, %v4624_v2  ;;  %v818_v2 = vmul.f32 %v801_v22, %v4639_v54  ;;  %v828_v54 = vmul.f32 %v801_v22, %v4654_v16 }
  0x62   : > { %9386 = vst [vmem:[#allocation65_spill] sm:$0xff] %v4842_v62  ;;  %v802_v62 = vmul.f32 %v801_v22, %v4615_v63  ;;  %v809_v63 = vmul.f32 %v801_v22, %v4565_v35  ;;  %v819_v35 = vmul.f32 %v801_v22, %v4582_v42  ;;  %v829_v42 = vmul.f32 %v801_v22, %v4597_v58 }
  0x63   : > { %9387 = vst [vmem:[#allocation66_spill] sm:$0xff] %v4846_v26  ;;  %v4866_v26 = vperm.slane %v4810_v29, 0  ;;  %v810_v29 = vmul.f32 %v801_v22, %v4627_v21  ;;  %v820_v21 = vmul.f32 %v801_v22, %v4642_v56  ;;  %v830_v56 = vmul.f32 %v801_v22, %v4657_v18 }
  0x64   : > { %9388 = vst [vmem:[#allocation67_spill] sm:$0xff] %v4850_v30  ;;  %v803_v30 = vmul.f32 %v801_v22, %v4551_v6  ;;  %v813_v6 = vmul.f32 %v801_v22, %v4573_v39  ;;  %v823_v39 = vmul.f32 %v801_v22, %v4588_v44  ;;  %v833_v44 = vmul.f32 %v801_v22, %v4603_v60 }
  0x65   : > { %9389 = vst [vmem:[#allocation68_spill] sm:$0xff] %v4854_v32  ;;  %v804_v32 = vmul.f32 %v801_v22, %v4618_v0  ;;  %v4912_v16 = vadd.f32 %v805_v48, %v4739_v53  ;;  %v4933_v48 = vadd.f32 %v812_v3, %v4772_v17  ;;  %v4954_v17 = vadd.f32 %v819_v35, %v4800_v52  ;;  %v9420_v3 = vld [vmem:[#allocation7_spill] sm:$0xff] }
  0x66   : > { %9390 = vst [vmem:[#allocation69_spill] sm:$0xff] %v4858_v5  ;;  %v806_v5 = vmul.f32 %v801_v22, %v4621_v1  ;;  %v816_v1 = vmul.f32 %v801_v22, %v4636_v51  ;;  %v826_v51 = vmul.f32 %v801_v22, %v4651_v13  ;;  %v4906_v27 = vadd.f32 %v803_v30, %v4731_v47 }
  0x67   : > { %9391 = vst [vmem:[#allocation70_spill] sm:$0xff] %v4866_v26  ;;  %v811_v26 = vmul.f32 %v801_v22, %v4568_v36  ;;  %v821_v36 = vmul.f32 %v801_v22, %v4585_v43  ;;  %v831_v43 = vmul.f32 %v801_v22, %v4600_v59  ;;  %v4909_v28 = vadd.f32 %v804_v32, %v4735_v23  ;;  %v9398_v35 = vld [vmem:[#allocation63_spill] sm:$0xff] }
  0x68   : > { %9392 = vst [vmem:[#allocation71_spill] sm:$0xff] %v4869_v46  ;;  %v814_v46 = vmul.f32 %v801_v22, %v4633_v4  ;;  %v824_v4 = vmul.f32 %v801_v22, %v4648_v11  ;;  %v4903_v11 = vadd.f32 %v802_v62, %v4727_v45  ;;  %v4915_v18 = vadd.f32 %v806_v5, %v4748_v34 }
  0x69   : > { %v4918_v59 = vadd.f32 %v807_v24, %v4752_v37  ;;  %v4921_v22 = vadd.f32 %v808_v14, %v4756_v38  ;;  %v4924_v62 = vadd.f32 %v809_v63, %v4760_v31  ;;  %v4927_v45 = vadd.f32 %v810_v29, %v4764_v25 }
  0x6a   : > { %v4930_v32 = vadd.f32 %v811_v26, %v4768_v19  ;;  %v4936_v5 = vadd.f32 %v813_v6, %v4776_v15  ;;  %v4939_v24 = vadd.f32 %v814_v46, %v4780_v12  ;;  %v4942_v47 = vadd.f32 %v815_v7, %v4784_v10  ;;  %v9393_v46 = vld [vmem:[#allocation58_spill] sm:$0xff]  ;;  %v9394_v7 = vld [vmem:[#allocation59_spill] sm:$0xff] }
  0x6b   : > { %v4945_v63 = vadd.f32 %v816_v1, %v4788_v57  ;;  %v4948_v29 = vadd.f32 %v817_v8, %v4792_v33  ;;  %v4951_v26 = vadd.f32 %v818_v2, %v4796_v55  ;;  %v4957_v6 = vadd.f32 %v820_v21, %v4804_v50  ;;  %v9395_v1 = vld [vmem:[#allocation60_spill] sm:$0xff]  ;;  %v9396_v8 = vld [vmem:[#allocation61_spill] sm:$0xff]  ;;  %v9397_v2 = vld [vmem:[#allocation62_spill] sm:$0xff] }
  0x6c   : > { %v4960_v12 = vadd.f32 %v821_v36, %v9393_v46  ;;  %v4963_v10 = vadd.f32 %v822_v49, %v9394_v7  ;;  %v4966_v57 = vadd.f32 %v823_v39, %v9395_v1  ;;  %v4969_v33 = vadd.f32 %v824_v4, %v9396_v8  ;;  %v9400_v21 = vld [vmem:[#allocation64_spill] sm:$0xff]  ;;  %v9402_v36 = vld [vmem:[#allocation65_spill] sm:$0xff]  ;;  %v9404_v49 = vld [vmem:[#allocation66_spill] sm:$0xff] }
  0x6d   : > { %v4972_v55 = vadd.f32 %v825_v40, %v9397_v2  ;;  %v4975_v52 = vadd.f32 %v826_v51, %v9398_v35  ;;  %v4978_v50 = vadd.f32 %v827_v41, %v9400_v21  ;;  %v4981_v15 = vadd.f32 %v828_v54, %v9402_v36  ;;  %v9406_v39 = vld [vmem:[#allocation67_spill] sm:$0xff]  ;;  %v9408_v4 = vld [vmem:[#allocation68_spill] sm:$0xff]  ;;  %v9410_v40 = vld [vmem:[#allocation69_spill] sm:$0xff] }
  0x6e   : > { %v4984_v19 = vadd.f32 %v829_v42, %v9404_v49  ;;  %v4987_v25 = vadd.f32 %v830_v56, %v9406_v39  ;;  %v4990_v31 = vadd.f32 %v831_v43, %v9408_v4  ;;  %v4993_v23 = vadd.f32 %v832_v9, %v9410_v40  ;;  %v9413_v41 = vld [vmem:[#allocation70_spill] sm:$0xff]  ;;  %v9414_v54 = vld [vmem:[#allocation4_spill] sm:$0xff]  ;;  %v9415_v42 = vld [vmem:[#allocation23_spill] sm:$0xff] }
  0x6f   : > { %9399 = vst [vmem:[#allocation58_spill] sm:$0xff] %v4975_v52  ;;  %v4996_v51 = vadd.f32 %v833_v44, %v4862_v61  ;;  %v867_v53 = vmul.f32 %v9413_v41, %v4618_v0  ;;  %v868_v30 = vmul.f32 %v9413_v41, %v9414_v54  ;;  %v869_v34 = vmul.f32 %v9413_v41, %v9415_v42  ;;  %v9416_v56 = vld [vmem:[#allocation5_spill] sm:$0xff]  ;;  %v9417_v43 = vld [vmem:[#allocation24_spill] sm:$0xff]  ;;  %v9418_v9 = vld [vmem:[#allocation6_spill] sm:$0xff] }
  0x70   : > { %9401 = vst [vmem:[#allocation59_spill] sm:$0xff] %v4978_v50  ;;  %v870_v37 = vmul.f32 %v9413_v41, %v9416_v56  ;;  %v871_v38 = vmul.f32 %v9413_v41, %v9417_v43  ;;  %v872_v14 = vmul.f32 %v9413_v41, %v9418_v9  ;;  %v9419_v44 = vld [vmem:[#allocation25_spill] sm:$0xff]  ;;  %v874_v46 = vmul.f32 %v9413_v41, %v9420_v3  ;;  %v9421_v7 = vld [vmem:[#allocation26_spill] sm:$0xff]  ;;  %v9422_v8 = vld [vmem:[#allocation8_spill] sm:$0xff] }
  0x71   : > { %9403 = vst [vmem:[#allocation60_spill] sm:$0xff] %v4981_v15  ;;  %v873_v61 = vmul.f32 %v9413_v41, %v9419_v44  ;;  %v875_v1 = vmul.f32 %v9413_v41, %v9421_v7  ;;  %v876_v2 = vmul.f32 %v9413_v41, %v9422_v8  ;;  %v9423_v35 = vld [vmem:[#allocation27_spill] sm:$0xff]  ;;  %v9424_v36 = vld [vmem:[#allocation9_spill] sm:$0xff]  ;;  %v9425_v39 = vld [vmem:[#allocation28_spill] sm:$0xff] }
  0x72   : > { %9405 = vst [vmem:[#allocation61_spill] sm:$0xff] %v4984_v19  ;;  %v877_v21 = vmul.f32 %v9413_v41, %v9423_v35  ;;  %v878_v49 = vmul.f32 %v9413_v41, %v9424_v36  ;;  %v879_v4 = vmul.f32 %v9413_v41, %v9425_v39  ;;  %v9426_v40 = vld [vmem:[#allocation10_spill] sm:$0xff]  ;;  %v9427_v9 = vld [vmem:[#allocation29_spill] sm:$0xff]  ;;  %v9428_v43 = vld [vmem:[#allocation11_spill] sm:$0xff] }
  0x73   : > { %9407 = vst [vmem:[#allocation62_spill] sm:$0xff] %v4987_v25  ;;  %v880_v44 = vmul.f32 %v9413_v41, %v9426_v40  ;;  %v881_v3 = vmul.f32 %v9413_v41, %v9427_v9  ;;  %v882_v7 = vmul.f32 %v9413_v41, %v9428_v43  ;;  %v9429_v56 = vld [vmem:[#allocation30_spill] sm:$0xff]  ;;  %v9430_v42 = vld [vmem:[#allocation12_spill] sm:$0xff]  ;;  %v9431_v54 = vld [vmem:[#allocation31_spill] sm:$0xff]  ;;  %v889_v43 = vmul.f32 %v9413_v41, %v4651_v13 }
  0x74   : > { %9409 = vst [vmem:[#allocation63_spill] sm:$0xff] %v4990_v31  ;;  %v883_v8 = vmul.f32 %v9413_v41, %v9429_v56  ;;  %v884_v35 = vmul.f32 %v9413_v41, %v9430_v42  ;;  %v885_v36 = vmul.f32 %v9413_v41, %v9431_v54  ;;  %v9432_v0 = vld [vmem:[#allocation13_spill] sm:$0xff]  ;;  %v9435_v31 = vld [vmem:[#allocation15_spill] sm:$0xff]  ;;  %v9436_v25 = vld [vmem:[#allocation34_spill] sm:$0xff]  ;;  %v892_v54 = vmul.f32 %v9413_v41, %v4597_v58 }
  0x75   : > { %9411 = vst [vmem:[#allocation64_spill] sm:$0xff] %v4993_v23  ;;  %v886_v39 = vmul.f32 %v9413_v41, %v9432_v0  ;;  %v9434_v23 = vld [vmem:[#allocation14_spill] sm:$0xff]  ;;  %v890_v56 = vmul.f32 %v9413_v41, %v9435_v31  ;;  %v891_v42 = vmul.f32 %v9413_v41, %v9436_v25  ;;  %v9437_v19 = vld [vmem:[#allocation35_spill] sm:$0xff]  ;;  %v9438_v15 = vld [vmem:[#allocation17_spill] sm:$0xff]  ;;  %v896_v13 = vmul.f32 %v9413_v41, %v4603_v60 }
  0x76   : > { %9412 = vst [vmem:[#allocation65_spill] sm:$0xff] %v4996_v51  ;;  %v9433_v51 = vld [vmem:[#allocation32_spill] sm:$0xff]  ;;  %v888_v9 = vmul.f32 %v9413_v41, %v9434_v23  ;;  %v893_v0 = vmul.f32 %v9413_v41, %v9437_v19  ;;  %v895_v23 = vmul.f32 %v9413_v41, %v4660_v20  ;;  %v9439_v50 = vld [vmem:[#allocation37_spill] sm:$0xff]  ;;  %v5063_v58 = vadd.f32 %v867_v53, %v4903_v11 }
  0x77   : > { %v887_v40 = vmul.f32 %v9413_v41, %v9433_v51  ;;  %v894_v51 = vmul.f32 %v9413_v41, %v9438_v15  ;;  %v897_v31 = vmul.f32 %v9413_v41, %v9439_v50  ;;  %v9440_v52 = vld [vmem:[#allocation20_spill] sm:$0xff]  ;;  %v5066_v19 = vadd.f32 %v868_v30, %v4906_v27 }
  0x78   : > { %v898_v25 = vmul.f32 %v9413_v41, %v9440_v52  ;;  %v5069_v15 = vadd.f32 %v869_v34, %v4909_v28  ;;  %v5072_v20 = vadd.f32 %v870_v37, %v4912_v16  ;;  %v5075_v60 = vadd.f32 %v871_v38, %v4915_v18 }
  0x79   : > { %v5078_v50 = vadd.f32 %v872_v14, %v4918_v59  ;;  %v5081_v41 = vadd.f32 %v873_v61, %v4921_v22  ;;  %v5084_v11 = vadd.f32 %v874_v46, %v4924_v62  ;;  %v5087_v27 = vadd.f32 %v875_v1, %v4927_v45  ;;  %v9475_v14 = vld [vmem:[#allocation71_spill] sm:$0xff]  ;;  %v9481_v1 = vld [vmem:[#allocation22_spill] sm:$0xff] }
  0x7a   : > { %v5090_v28 = vadd.f32 %v876_v2, %v4930_v32  ;;  %v5093_v16 = vadd.f32 %v877_v21, %v4933_v48  ;;  %v5096_v18 = vadd.f32 %v878_v49, %v4936_v5  ;;  %v5099_v59 = vadd.f32 %v879_v4, %v4939_v24  ;;  %v9482_v2 = vld [vmem:[#allocation4_spill] sm:$0xff]  ;;  %v9484_v49 = vld [vmem:[#allocation23_spill] sm:$0xff]  ;;  %v9485_v4 = vld [vmem:[#allocation5_spill] sm:$0xff] }
  0x7b   : > { %9441 = vst [vmem:[#allocation66_spill] sm:$0xff] %v5084_v11  ;;  %v5102_v22 = vadd.f32 %v880_v44, %v4942_v47  ;;  %v5105_v62 = vadd.f32 %v881_v3, %v4945_v63  ;;  %v5108_v45 = vadd.f32 %v882_v7, %v4948_v29  ;;  %v5111_v32 = vadd.f32 %v883_v8, %v4951_v26  ;;  %v9483_v21 = vld [vmem:[#allocation40_spill] sm:$0xff] }
  0x7c   : > { %9442 = vst [vmem:[#allocation67_spill] sm:$0xff] %v5087_v27  ;;  %v5114_v48 = vadd.f32 %v884_v35, %v4954_v17  ;;  %v5117_v5 = vadd.f32 %v885_v36, %v4957_v6  ;;  %v5120_v24 = vadd.f32 %v886_v39, %v4960_v12  ;;  %v5123_v47 = vadd.f32 %v887_v40, %v4963_v10  ;;  %v9458_v17 = vld [vmem:[#allocation58_spill] sm:$0xff]  ;;  %v9460_v6 = vld [vmem:[#allocation59_spill] sm:$0xff]  ;;  %v9462_v12 = vld [vmem:[#allocation60_spill] sm:$0xff] }
  0x7d   : > { %9443 = vst [vmem:[#allocation68_spill] sm:$0xff] %v5090_v28  ;;  %v5126_v63 = vadd.f32 %v888_v9, %v4966_v57  ;;  %v5129_v29 = vadd.f32 %v889_v43, %v4969_v33  ;;  %v5132_v26 = vadd.f32 %v890_v56, %v4972_v55  ;;  %v5135_v53 = vadd.f32 %v891_v42, %v9458_v17  ;;  %v9464_v10 = vld [vmem:[#allocation61_spill] sm:$0xff]  ;;  %v9466_v57 = vld [vmem:[#allocation62_spill] sm:$0xff]  ;;  %v9468_v33 = vld [vmem:[#allocation63_spill] sm:$0xff] }
  0x7e   : > { %9444 = vst [vmem:[#allocation69_spill] sm:$0xff] %v5093_v16  ;;  %v5138_v30 = vadd.f32 %v892_v54, %v9460_v6  ;;  %v5141_v34 = vadd.f32 %v893_v0, %v9462_v12  ;;  %v5144_v37 = vadd.f32 %v894_v51, %v9464_v10  ;;  %v5147_v38 = vadd.f32 %v895_v23, %v9466_v57  ;;  %v9470_v55 = vld [vmem:[#allocation64_spill] sm:$0xff]  ;;  %v9472_v42 = vld [vmem:[#allocation65_spill] sm:$0xff]  ;;  %v9474_v54 = vld [vmem:[#allocation19_spill] sm:$0xff] }
  0x7f   : > { %9445 = vst [vmem:[#allocation70_spill] sm:$0xff] %v5096_v18  ;;  %v5150_v43 = vadd.f32 %v896_v13, %v9468_v33  ;;  %v5153_v56 = vadd.f32 %v897_v31, %v9470_v55  ;;  %v5156_v9 = vadd.f32 %v898_v25, %v9472_v42  ;;  %v932_v44 = vmul.f32 %v9475_v14, %v9474_v54  ;;  %v9476_v0 = vld [vmem:[#allocation2_spill] sm:$0xff]  ;;  %v9478_v23 = vld [vmem:[#allocation21_spill] sm:$0xff]  ;;  %v9479_v13 = vld [vmem:[#allocation3_spill] sm:$0xff] }
  0x80   : > { %9446 = vst [vmem:[#allocation72_spill] sm:$0xff] %v5099_v59  ;;  %v933_v61 = vmul.f32 %v9475_v14, %v9476_v0  ;;  %v9477_v51 = vld [vmem:[#allocation38_spill] sm:$0xff]  ;;  %v935_v46 = vmul.f32 %v9475_v14, %v9478_v23  ;;  %v5168_v7 = vmul.f32 %v9475_v14, %v9479_v13  ;;  %v9480_v31 = vld [vmem:[#allocation39_spill] sm:$0xff]  ;;  %v5176_v8 = vmul.f32 %v9475_v14, %v9481_v1  ;;  %v9486_v17 = vld [vmem:[#allocation41_spill] sm:$0xff] }
  0x81   : > { %9447 = vst [vmem:[#allocation73_spill] sm:$0xff] %v5102_v22  ;;  %v934_v3 = vmul.f32 %v9475_v14, %v9477_v51  ;;  %v5172_v25 = vmul.f32 %v9475_v14, %v9480_v31  ;;  %v5180_v35 = vmul.f32 %v9475_v14, %v9482_v2  ;;  %v5184_v36 = vmul.f32 %v9475_v14, %v9483_v21  ;;  %v9487_v12 = vld [vmem:[#allocation24_spill] sm:$0xff]  ;;  %v9488_v57 = vld [vmem:[#allocation6_spill] sm:$0xff]  ;;  %v9490_v51 = vld [vmem:[#allocation25_spill] sm:$0xff] }
  0x82   : > { %9448 = vst [vmem:[#allocation74_spill] sm:$0xff] %v5105_v62  ;;  %v5188_v39 = vmul.f32 %v9475_v14, %v9484_v49  ;;  %v5192_v40 = vmul.f32 %v9475_v14, %v9485_v4  ;;  %v5196_v6 = vmul.f32 %v9475_v14, %v9486_v17  ;;  %v5200_v10 = vmul.f32 %v9475_v14, %v9487_v12  ;;  %v9489_v55 = vld [vmem:[#allocation42_spill] sm:$0xff]  ;;  %v9491_v54 = vld [vmem:[#allocation7_spill] sm:$0xff]  ;;  %v9494_v49 = vld [vmem:[#allocation8_spill] sm:$0xff] }
  0x83   : > { %9449 = vst [vmem:[#allocation75_spill] sm:$0xff] %v5108_v45  ;;  %v5204_v33 = vmul.f32 %v9475_v14, %v9488_v57  ;;  %v5208_v42 = vmul.f32 %v9475_v14, %v9489_v55  ;;  %v5212_v0 = vmul.f32 %v9475_v14, %v9490_v51  ;;  %v5216_v52 = vmul.f32 %v9475_v14, %v9491_v54  ;;  %v9492_v17 = vld [vmem:[#allocation43_spill] sm:$0xff]  ;;  %v9493_v4 = vld [vmem:[#allocation26_spill] sm:$0xff]  ;;  %v9495_v21 = vld [vmem:[#allocation44_spill] sm:$0xff] }
  0x84   : > { %9450 = vst [vmem:[#allocation76_spill] sm:$0xff] %v5111_v32  ;;  %v5220_v12 = vmul.f32 %v9475_v14, %v9492_v17  ;;  %v5224_v57 = vmul.f32 %v9475_v14, %v9493_v4  ;;  %v5228_v55 = vmul.f32 %v9475_v14, %v9494_v49  ;;  %v5232_v51 = vmul.f32 %v9475_v14, %v9495_v21  ;;  %v9496_v2 = vld [vmem:[#allocation27_spill] sm:$0xff]  ;;  %v9497_v1 = vld [vmem:[#allocation9_spill] sm:$0xff]  ;;  %v9499_v13 = vld [vmem:[#allocation28_spill] sm:$0xff] }
  0x85   : > { %9451 = vst [vmem:[#allocation77_spill] sm:$0xff] %v5114_v48  ;;  %v5236_v54 = vmul.f32 %v9475_v14, %v9496_v2  ;;  %v5240_v17 = vmul.f32 %v9475_v14, %v9497_v1  ;;  %v9498_v31 = vld [vmem:[#allocation45_spill] sm:$0xff]  ;;  %v5248_v49 = vmul.f32 %v9475_v14, %v9499_v13  ;;  %v9500_v23 = vld [vmem:[#allocation10_spill] sm:$0xff]  ;;  %v1030_v48 = vrot.slane %v933_v61, 1  ;;  %v9518_v61 = vld [vmem:[#allocation16_spill] sm:$0xff] }
  0x86   : > { %9452 = vst [vmem:[#allocation78_spill] sm:$0xff] %v5117_v5  ;;  %v5244_v4 = vmul.f32 %v9475_v14, %v9498_v31  ;;  %v5252_v21 = vmul.f32 %v9475_v14, %v9500_v23  ;;  %v1029_v5 = vrot.slane %v932_v44, 1  ;;  %v1034_v32 = vrot.slane %v935_v46, 1  ;;  %v9514_v45 = vld [vmem:[#allocation33_spill] sm:$0xff]  ;;  %v9519_v46 = vld [vmem:[#allocation52_spill] sm:$0xff] }
  0x87   : > { %9453 = vst [vmem:[#allocation79_spill] sm:$0xff] %v5120_v24  ;;  %v9513_v24 = vld [vmem:[#allocation50_spill] sm:$0xff]  ;;  %v5309_v62 = vmul.f32 %v9475_v14, %v9514_v45  ;;  %v9520_v45 = vld [vmem:[#allocation35_spill] sm:$0xff]  ;;  %v9521_v18 = vld [vmem:[#allocation17_spill] sm:$0xff]  ;;  %v1042_v11 = vrot.slane %v5184_v36, 1  ;;  %v1059_v36 = vrot.slane %v5224_v57, 1 }
  0x88   : > { %9454 = vst [vmem:[#allocation80_spill] sm:$0xff] %v5123_v47  ;;  %v9512_v47 = vld [vmem:[#allocation14_spill] sm:$0xff]  ;;  %v9522_v16 = vld [vmem:[#allocation53_spill] sm:$0xff]  ;;  %v5344_v28 = vsel %vm1028_vm1, %v1029_v5, %v1030_v48  ;;  %v1047_v5 = vrot.slane %v5196_v6, 1  ;;  %v1070_v57 = vrot.slane %v5252_v21, 1 }
  0x89   : > { %9455 = vst [vmem:[#allocation81_spill] sm:$0xff] %v5126_v63  ;;  %v9511_v63 = vld [vmem:[#allocation32_spill] sm:$0xff] }
  0x8a   : > { %9456 = vst [vmem:[#allocation82_spill] sm:$0xff] %v5129_v29  ;;  %v9510_v29 = vld [vmem:[#allocation49_spill] sm:$0xff] }
  0x8b   : > { %9457 = vst [vmem:[#allocation83_spill] sm:$0xff] %v5132_v26  ;;  %v9509_v26 = vld [vmem:[#allocation13_spill] sm:$0xff] }
  0x8c   : > { %9459 = vst [vmem:[#allocation58_spill] sm:$0xff] %v5135_v53  ;;  %v9508_v53 = vld [vmem:[#allocation31_spill] sm:$0xff] }
  0x8d   : > { %9461 = vst [vmem:[#allocation59_spill] sm:$0xff] %v5138_v30  ;;  %v9507_v30 = vld [vmem:[#allocation48_spill] sm:$0xff] }
  0x8e   : > { %9463 = vst [vmem:[#allocation60_spill] sm:$0xff] %v5141_v34  ;;  %v9506_v34 = vld [vmem:[#allocation12_spill] sm:$0xff] }
  0x8f   : > { %9465 = vst [vmem:[#allocation61_spill] sm:$0xff] %v5144_v37  ;;  %v9505_v37 = vld [vmem:[#allocation30_spill] sm:$0xff] }
  0x90   : > { %9467 = vst [vmem:[#allocation62_spill] sm:$0xff] %v5147_v38  ;;  %v9504_v38 = vld [vmem:[#allocation47_spill] sm:$0xff]  ;;  %v5272_v23 = vmul.f32 %v9475_v14, %v9505_v37  ;;  %v5292_v37 = vmul.f32 %v9475_v14, %v9510_v29  ;;  %v1035_v29 = vrot.slane %v5168_v7, 1  ;;  %v5329_v7 = vmul.f32 %v9475_v14, %v9519_v46 }
  0x91   : > { %9469 = vst [vmem:[#allocation63_spill] sm:$0xff] %v5150_v43  ;;  %v9503_v43 = vld [vmem:[#allocation11_spill] sm:$0xff]  ;;  %v5268_v13 = vmul.f32 %v9475_v14, %v9504_v38  ;;  %v5288_v38 = vmul.f32 %v9475_v14, %v9509_v26  ;;  %v1032_v26 = vrot.slane %v934_v3, 1  ;;  %v5325_v3 = vmul.f32 %v9475_v14, %v9518_v61 }
  0x92   : > { %9471 = vst [vmem:[#allocation64_spill] sm:$0xff] %v5153_v56  ;;  %v9502_v56 = vld [vmem:[#allocation29_spill] sm:$0xff]  ;;  %v5264_v31 = vmul.f32 %v9475_v14, %v9503_v43  ;;  %v5284_v43 = vmul.f32 %v9475_v14, %v9508_v53  ;;  %v5304_v53 = vmul.f32 %v9475_v14, %v9513_v24  ;;  %v9517_v24 = vld [vmem:[#allocation34_spill] sm:$0xff]  ;;  %v1037_v61 = vrot.slane %v5172_v25, 1 }
  0x93   : > { %9473 = vst [vmem:[#allocation65_spill] sm:$0xff] %v5156_v9  ;;  %v9501_v9 = vld [vmem:[#allocation46_spill] sm:$0xff]  ;;  %v5260_v1 = vmul.f32 %v9475_v14, %v9502_v56  ;;  %v5280_v56 = vmul.f32 %v9475_v14, %v9507_v30  ;;  %v5300_v30 = vmul.f32 %v9475_v14, %v9512_v47  ;;  %v9516_v47 = vld [vmem:[#allocation51_spill] sm:$0xff]  ;;  %v5321_v44 = vmul.f32 %v9475_v14, %v9517_v24 }
  0x94   : > { %v5256_v2 = vmul.f32 %v9475_v14, %v9501_v9  ;;  %v5276_v9 = vmul.f32 %v9475_v14, %v9506_v34  ;;  %v5296_v34 = vmul.f32 %v9475_v14, %v9511_v63  ;;  %v9515_v63 = vld [vmem:[#allocation15_spill] sm:$0xff]  ;;  %v5317_v59 = vmul.f32 %v9475_v14, %v9516_v47 }
  0x95   : > { %v5313_v22 = vmul.f32 %v9475_v14, %v9515_v63  ;;  %v5333_v63 = vmul.f32 %v9475_v14, %v9520_v45  ;;  %v5337_v47 = vmul.f32 %v9475_v14, %v9521_v18  ;;  %v5341_v24 = vmul.f32 %v9475_v14, %v9522_v16 }
  0x96   : > { %v1039_v46 = vrot.slane %v5176_v8, 1  ;;  %v5349_v27 = vsel %vm1028_vm1, %v1030_v48, %v1032_v26  ;;  %v5352_v45 = vsel %vm1028_vm1, %v1034_v32, %v1035_v29  ;;  %v1040_v18 = vrot.slane %v5180_v35, 1 }
  0x97   : > { %v1044_v14 = vrot.slane %v5188_v39, 1  ;;  %v1045_v16 = vrot.slane %v5192_v40, 1  ;;  %v1049_v25 = vrot.slane %v5200_v10, 1  ;;  %v1050_v8 = vrot.slane %v5204_v33, 1 }
  0x98   : > { %v1052_v48 = vrot.slane %v5208_v42, 1  ;;  %v1054_v26 = vrot.slane %v5212_v0, 1  ;;  %v1055_v32 = vrot.slane %v5216_v52, 1  ;;  %v1057_v35 = vrot.slane %v5220_v12, 1 }
  0x99   : > { %v1060_v39 = vrot.slane %v5228_v55, 1  ;;  %v1062_v40 = vrot.slane %v5232_v51, 1  ;;  %v1038_v6 = vsel %vm1028_vm1, %v1035_v29, %v1037_v61  ;;  %v1064_v10 = vrot.slane %v5236_v54, 1 }
  0x9a   : > { %v1065_v33 = vrot.slane %v5240_v17, 1  ;;  %v1067_v42 = vrot.slane %v5244_v4, 1  ;;  %v1041_v0 = vsel %vm1028_vm1, %v1039_v46, %v1040_v18  ;;  %v1043_v52 = vsel %vm1028_vm1, %v1040_v18, %v1042_v11 }
  0x9b   : > { %v1069_v12 = vrot.slane %v5248_v49, 1  ;;  %v1046_v55 = vsel %vm1028_vm1, %v1044_v14, %v1045_v16  ;;  %v1048_v51 = vsel %vm1028_vm1, %v1045_v16, %v1047_v5  ;;  %v1051_v29 = vsel %vm1028_vm1, %v1049_v25, %v1050_v8 }
  0x9c   : > { %v1053_v54 = vsel %vm1028_vm1, %v1050_v8, %v1052_v48  ;;  %v1056_v17 = vsel %vm1028_vm1, %v1054_v26, %v1055_v32  ;;  %v1058_v4 = vsel %vm1028_vm1, %v1055_v32, %v1057_v35  ;;  %v1061_v61 = vsel %vm1028_vm1, %v1059_v36, %v1060_v39 }
  0x9d   : > { %v1063_v11 = vsel %vm1028_vm1, %v1060_v39, %v1062_v40  ;;  %v1066_v18 = vsel %vm1028_vm1, %v1064_v10, %v1065_v33  ;;  %v1068_v21 = vsel %vm1028_vm1, %v1065_v33, %v1067_v42  ;;  %v1072_v49 = vrot.slane %v5256_v2, 1 }
  0x9e   : > { %v1074_v16 = vrot.slane %v5260_v1, 1  ;;  %v1071_v46 = vsel %vm1028_vm1, %v1069_v12, %v1070_v57  ;;  %v1075_v14 = vrot.slane %v5264_v31, 1  ;;  %v1077_v5 = vrot.slane %v5268_v13, 1 }
  0x9f   : > { %v1079_v25 = vrot.slane %v5272_v23, 1  ;;  %v1080_v8 = vrot.slane %v5276_v9, 1  ;;  %v1082_v48 = vrot.slane %v5280_v56, 1  ;;  %v1084_v26 = vrot.slane %v5284_v43, 1 }
  0xa0   : > { %v1085_v32 = vrot.slane %v5288_v38, 1  ;;  %v1087_v2 = vrot.slane %v5292_v37, 1  ;;  %v1089_v1 = vrot.slane %v5296_v34, 1  ;;  %v1090_v35 = vrot.slane %v5300_v30, 1 }
  0xa1   : > { %v1092_v31 = vrot.slane %v5304_v53, 1  ;;  %v1094_v13 = vrot.slane %v5309_v62, 1  ;;  %v1095_v23 = vrot.slane %v5313_v22, 1  ;;  %v1097_v9 = vrot.slane %v5317_v59, 1 }
  0xa2   : > { %v1099_v56 = vrot.slane %v5321_v44, 1  ;;  %v1100_v43 = vrot.slane %v5325_v3, 1  ;;  %v1102_v38 = vrot.slane %v5329_v7, 1  ;;  %v1104_v37 = vrot.slane %v5333_v63, 1 }
  0xa3   : > { %v1105_v34 = vrot.slane %v5337_v47, 1  ;;  %v1073_v30 = vsel %vm1028_vm1, %v1070_v57, %v1072_v49  ;;  %v1076_v53 = vsel %vm1028_vm1, %v1074_v16, %v1075_v14  ;;  %v1078_v62 = vsel %vm1028_vm1, %v1075_v14, %v1077_v5 }
  0xa4   : > { %v1107_v22 = vrot.slane %v5341_v24, 1  ;;  %v1081_v59 = vsel %vm1028_vm1, %v1079_v25, %v1080_v8  ;;  %v1083_v44 = vsel %vm1028_vm1, %v1080_v8, %v1082_v48  ;;  %v1086_v3 = vsel %vm1028_vm1, %v1084_v26, %v1085_v32 }
  0xa5   : > { %v1088_v7 = vsel %vm1028_vm1, %v1085_v32, %v1087_v2  ;;  %v1091_v63 = vsel %vm1028_vm1, %v1089_v1, %v1090_v35  ;;  %v1093_v47 = vsel %vm1028_vm1, %v1090_v35, %v1092_v31  ;;  %v1096_v36 = vsel %vm1028_vm1, %v1094_v13, %v1095_v23 }
  0xa6   : > { %v1098_v39 = vsel %vm1028_vm1, %v1095_v23, %v1097_v9  ;;  %v1101_v40 = vsel %vm1028_vm1, %v1099_v56, %v1100_v43  ;;  %v1103_v24 = vsel %vm1028_vm1, %v1100_v43, %v1102_v38  ;;  %v1106_v10 = vsel %vm1028_vm1, %v1104_v37, %v1105_v34  ;;  %v9556_v23 = vld [vmem:[#allocation83_spill] sm:$0xff]  ;;  %v9558_v56 = vld [vmem:[#allocation58_spill] sm:$0xff] }
  0xa7   : > { %v5425_v33 = vadd.f32 %v5344_v28, %v5063_v58  ;;  %v1108_v42 = vsel %vm1028_vm1, %v1105_v34, %v1107_v22  ;;  %v5430_v12 = vadd.f32 %v5349_v27, %v5066_v19  ;;  %v5434_v57 = vadd.f32 %v5352_v45, %v5069_v15  ;;  %v9523_v28 = vld [vmem:[#allocation66_spill] sm:$0xff]  ;;  %v9525_v19 = vld [vmem:[#allocation67_spill] sm:$0xff]  ;;  %v9527_v15 = vld [vmem:[#allocation68_spill] sm:$0xff] }
  0xa8   : > { %v5437_v49 = vadd.f32 %v1038_v6, %v5072_v20  ;;  %v5440_v16 = vadd.f32 %v1041_v0, %v5075_v60  ;;  %v5443_v14 = vadd.f32 %v1043_v52, %v5078_v50  ;;  %v5446_v58 = vadd.f32 %v1046_v55, %v5081_v41  ;;  %v9529_v20 = vld [vmem:[#allocation69_spill] sm:$0xff]  ;;  %v9531_v60 = vld [vmem:[#allocation70_spill] sm:$0xff]  ;;  %v9533_v50 = vld [vmem:[#allocation72_spill] sm:$0xff] }
  0xa9   : > { %v5449_v5 = vadd.f32 %v1048_v51, %v9523_v28  ;;  %v5452_v27 = vadd.f32 %v1051_v29, %v9525_v19  ;;  %v5455_v45 = vadd.f32 %v1053_v54, %v9527_v15  ;;  %v5458_v6 = vadd.f32 %v1056_v17, %v9529_v20  ;;  %v9535_v41 = vld [vmem:[#allocation73_spill] sm:$0xff]  ;;  %v9537_v51 = vld [vmem:[#allocation74_spill] sm:$0xff]  ;;  %v9539_v29 = vld [vmem:[#allocation75_spill] sm:$0xff] }
  0xaa   : > { %v5461_v0 = vadd.f32 %v1058_v4, %v9531_v60  ;;  %v5464_v52 = vadd.f32 %v1061_v61, %v9533_v50  ;;  %v5467_v55 = vadd.f32 %v1063_v11, %v9535_v41  ;;  %v5470_v25 = vadd.f32 %v1066_v18, %v9537_v51  ;;  %v9541_v54 = vld [vmem:[#allocation76_spill] sm:$0xff]  ;;  %v9543_v17 = vld [vmem:[#allocation77_spill] sm:$0xff]  ;;  %v9545_v4 = vld [vmem:[#allocation78_spill] sm:$0xff] }
  0xab   : > { %9524 = vst [vmem:[#allocation71_spill] sm:$0xff] %v5449_v5  ;;  %v5473_v8 = vadd.f32 %v1068_v21, %v9539_v29  ;;  %v5476_v48 = vadd.f32 %v1071_v46, %v9541_v54  ;;  %v5479_v26 = vadd.f32 %v1073_v30, %v9543_v17  ;;  %v5482_v32 = vadd.f32 %v1076_v53, %v9545_v4  ;;  %v9547_v61 = vld [vmem:[#allocation56_spill] sm:$0xff]  ;;  %v9548_v11 = vld [vmem:[#allocation79_spill] sm:$0xff]  ;;  %v9552_v21 = vld [vmem:[#allocation81_spill] sm:$0xff] }
  0xac   : > { %9526 = vst [vmem:[#allocation66_spill] sm:$0xff] %v5452_v27  ;;  %v5485_v2 = vperm.slane %v9547_v61, 1  ;;  %v5488_v1 = vadd.f32 %v1078_v62, %v9548_v11  ;;  %v9550_v18 = vld [vmem:[#allocation80_spill] sm:$0xff]  ;;  %v5494_v31 = vadd.f32 %v1083_v44, %v9552_v21  ;;  %v9554_v46 = vld [vmem:[#allocation82_spill] sm:$0xff]  ;;  %v5500_v9 = vadd.f32 %v1088_v7, %v9556_v23  ;;  %v9560_v38 = vld [vmem:[#allocation59_spill] sm:$0xff] }
  0xad   : > { %9528 = vst [vmem:[#allocation67_spill] sm:$0xff] %v5455_v45  ;;  %v5491_v35 = vadd.f32 %v1081_v59, %v9550_v18  ;;  %v5497_v13 = vadd.f32 %v1086_v3, %v9554_v46  ;;  %v5503_v43 = vadd.f32 %v1091_v63, %v9558_v56  ;;  %v5506_v37 = vadd.f32 %v1093_v47, %v9560_v38  ;;  %v9562_v34 = vld [vmem:[#allocation60_spill] sm:$0xff]  ;;  %v9564_v53 = vld [vmem:[#allocation61_spill] sm:$0xff]  ;;  %v9566_v22 = vld [vmem:[#allocation62_spill] sm:$0xff] }
  0xae   : > { %9530 = vst [vmem:[#allocation68_spill] sm:$0xff] %v5458_v6  ;;  %v5509_v30 = vadd.f32 %v1096_v36, %v9562_v34  ;;  %v5512_v62 = vadd.f32 %v1098_v39, %v9564_v53  ;;  %v5515_v59 = vadd.f32 %v1101_v40, %v9566_v22  ;;  %v9568_v44 = vld [vmem:[#allocation63_spill] sm:$0xff]  ;;  %v9570_v7 = vld [vmem:[#allocation64_spill] sm:$0xff]  ;;  %v9572_v63 = vld [vmem:[#allocation65_spill] sm:$0xff] }
  0xaf   : > { %9532 = vst [vmem:[#allocation69_spill] sm:$0xff] %v5461_v0  ;;  %v5518_v3 = vadd.f32 %v1103_v24, %v9568_v44  ;;  %v5521_v28 = vadd.f32 %v1106_v10, %v9570_v7  ;;  %v5524_v19 = vadd.f32 %v1108_v42, %v9572_v63  ;;  %v9574_v47 = vld [vmem:[#allocation21_spill] sm:$0xff]  ;;  %v9575_v36 = vld [vmem:[#allocation3_spill] sm:$0xff]  ;;  %v9577_v40 = vld [vmem:[#allocation22_spill] sm:$0xff] }
  0xb0   : > { %9534 = vst [vmem:[#allocation70_spill] sm:$0xff] %v5464_v52  ;;  %v1174_v15 = vmul.f32 %v5485_v2, %v9574_v47  ;;  %v1175_v20 = vmul.f32 %v5485_v2, %v9575_v36  ;;  %v9576_v39 = vld [vmem:[#allocation39_spill] sm:$0xff]  ;;  %v1177_v50 = vmul.f32 %v5485_v2, %v9577_v40  ;;  %v9578_v24 = vld [vmem:[#allocation4_spill] sm:$0xff]  ;;  %v9581_v54 = vld [vmem:[#allocation5_spill] sm:$0xff] }
  0xb1   : > { %9536 = vst [vmem:[#allocation72_spill] sm:$0xff] %v5467_v55  ;;  %v1176_v60 = vmul.f32 %v5485_v2, %v9576_v39  ;;  %v5536_v41 = vmul.f32 %v5485_v2, %v9578_v24  ;;  %v9579_v10 = vld [vmem:[#allocation40_spill] sm:$0xff]  ;;  %v9580_v51 = vld [vmem:[#allocation23_spill] sm:$0xff]  ;;  %v5548_v17 = vmul.f32 %v5485_v2, %v9581_v54  ;;  %v9582_v4 = vld [vmem:[#allocation41_spill] sm:$0xff] }
  0xb2   : > { %9538 = vst [vmem:[#allocation73_spill] sm:$0xff] %v5470_v25  ;;  %v5540_v42 = vmul.f32 %v5485_v2, %v9579_v10  ;;  %v5544_v29 = vmul.f32 %v5485_v2, %v9580_v51  ;;  %v5552_v61 = vmul.f32 %v5485_v2, %v9582_v4  ;;  %v9583_v11 = vld [vmem:[#allocation24_spill] sm:$0xff]  ;;  %v9584_v21 = vld [vmem:[#allocation6_spill] sm:$0xff]  ;;  %v9586_v38 = vld [vmem:[#allocation25_spill] sm:$0xff] }
  0xb3   : > { %9540 = vst [vmem:[#allocation74_spill] sm:$0xff] %v5473_v8  ;;  %v5556_v18 = vmul.f32 %v5485_v2, %v9583_v11  ;;  %v5560_v46 = vmul.f32 %v5485_v2, %v9584_v21  ;;  %v9585_v23 = vld [vmem:[#allocation42_spill] sm:$0xff]  ;;  %v5568_v34 = vmul.f32 %v5485_v2, %v9586_v38  ;;  %v9587_v53 = vld [vmem:[#allocation7_spill] sm:$0xff]  ;;  %v9590_v36 = vld [vmem:[#allocation8_spill] sm:$0xff]  ;;  %v1276_v52 = vrot.slane %v5536_v41, 1 }
  0xb4   : > { %9542 = vst [vmem:[#allocation75_spill] sm:$0xff] %v5476_v48  ;;  %v5564_v56 = vmul.f32 %v5485_v2, %v9585_v23  ;;  %v5572_v22 = vmul.f32 %v5485_v2, %v9587_v53  ;;  %v9588_v44 = vld [vmem:[#allocation43_spill] sm:$0xff]  ;;  %v9589_v63 = vld [vmem:[#allocation26_spill] sm:$0xff]  ;;  %v5584_v47 = vmul.f32 %v5485_v2, %v9590_v36  ;;  %v9591_v23 = vld [vmem:[#allocation44_spill] sm:$0xff]  ;;  %v1271_v48 = vrot.slane %v1175_v20, 1 }
  0xb5   : > { %9544 = vst [vmem:[#allocation76_spill] sm:$0xff] %v5479_v26  ;;  %v5576_v7 = vmul.f32 %v5485_v2, %v9588_v44  ;;  %v5580_v39 = vmul.f32 %v5485_v2, %v9589_v63  ;;  %v5588_v38 = vmul.f32 %v5485_v2, %v9591_v23  ;;  %v9592_v21 = vld [vmem:[#allocation27_spill] sm:$0xff]  ;;  %v9593_v11 = vld [vmem:[#allocation9_spill] sm:$0xff]  ;;  %v9595_v54 = vld [vmem:[#allocation28_spill] sm:$0xff]  ;;  %v1270_v26 = vrot.slane %v1174_v15, 1 }
  0xb6   : > { %9546 = vst [vmem:[#allocation77_spill] sm:$0xff] %v5482_v32  ;;  %v5592_v53 = vmul.f32 %v5485_v2, %v9592_v21  ;;  %v5596_v44 = vmul.f32 %v5485_v2, %v9593_v11  ;;  %v9594_v4 = vld [vmem:[#allocation45_spill] sm:$0xff]  ;;  %v5604_v36 = vmul.f32 %v5485_v2, %v9595_v54  ;;  %v9596_v51 = vld [vmem:[#allocation10_spill] sm:$0xff]  ;;  %v9599_v40 = vld [vmem:[#allocation11_spill] sm:$0xff]  ;;  %v1278_v45 = vrot.slane %v5540_v42, 1 }
  0xb7   : > { %9549 = vst [vmem:[#allocation78_spill] sm:$0xff] %v5488_v1  ;;  %v5600_v63 = vmul.f32 %v5485_v2, %v9594_v4  ;;  %v5608_v23 = vmul.f32 %v5485_v2, %v9596_v51  ;;  %v9597_v10 = vld [vmem:[#allocation46_spill] sm:$0xff]  ;;  %v9598_v24 = vld [vmem:[#allocation29_spill] sm:$0xff]  ;;  %v5620_v4 = vmul.f32 %v5485_v2, %v9599_v40  ;;  %v9612_v1 = vld [vmem:[#allocation51_spill] sm:$0xff]  ;;  %v5714_v27 = vsel %vm1028_vm1, %v1270_v26, %v1271_v48 }
  0xb8   : > { %9551 = vst [vmem:[#allocation56_spill] sm:$0xff] %v5491_v35  ;;  %v5612_v21 = vmul.f32 %v5485_v2, %v9597_v10  ;;  %v5616_v11 = vmul.f32 %v5485_v2, %v9598_v24  ;;  %v9611_v35 = vld [vmem:[#allocation15_spill] sm:$0xff]  ;;  %v9613_v32 = vld [vmem:[#allocation34_spill] sm:$0xff]  ;;  %v9614_v8 = vld [vmem:[#allocation16_spill] sm:$0xff]  ;;  %v1283_v5 = vrot.slane %v5552_v61, 1  ;;  %v1288_v42 = vrot.slane %v5564_v56, 1 }
  0xb9   : > { %9553 = vst [vmem:[#allocation79_spill] sm:$0xff] %v5494_v31  ;;  %v9610_v31 = vld [vmem:[#allocation33_spill] sm:$0xff]  ;;  %v5680_v25 = vmul.f32 %v5485_v2, %v9614_v8  ;;  %v9619_v8 = vld [vmem:[#allocation36_spill] sm:$0xff]  ;;  %v9621_v41 = vld [vmem:[#allocation54_spill] sm:$0xff]  ;;  %v1291_v26 = vrot.slane %v5572_v22, 1  ;;  %v1298_v61 = vrot.slane %v5588_v38, 1 }
  0xba   : > { %9555 = vst [vmem:[#allocation80_spill] sm:$0xff] %v5497_v13  ;;  %v9609_v13 = vld [vmem:[#allocation50_spill] sm:$0xff]  ;;  %v9618_v20 = vld [vmem:[#allocation53_spill] sm:$0xff]  ;;  %v5701_v6 = vmul.f32 %v5485_v2, %v9619_v8  ;;  %v1281_v8 = vrot.slane %v5548_v17, 1  ;;  %v1296_v17 = vrot.slane %v5584_v47, 1  ;;  %v1305_v56 = vrot.slane %v5604_v36, 1 }
  0xbb   : > { %9557 = vst [vmem:[#allocation81_spill] sm:$0xff] %v5500_v9  ;;  %v9608_v9 = vld [vmem:[#allocation14_spill] sm:$0xff]  ;;  %v1308_v22 = vrot.slane %v5612_v21, 1  ;;  %v1310_v47 = vrot.slane %v5616_v11, 1  ;;  %v1311_v38 = vrot.slane %v5620_v4, 1 }
  0xbc   : > { %9559 = vst [vmem:[#allocation82_spill] sm:$0xff] %v5503_v43  ;;  %v9607_v43 = vld [vmem:[#allocation32_spill] sm:$0xff] }
  0xbd   : > { %9561 = vst [vmem:[#allocation83_spill] sm:$0xff] %v5506_v37  ;;  %v9606_v37 = vld [vmem:[#allocation49_spill] sm:$0xff]  ;;  %v1312_v11 = vsel %vm1028_vm1, %v1310_v47, %v1311_v38 }
  0xbe   : > { %9563 = vst [vmem:[#allocation58_spill] sm:$0xff] %v5509_v30  ;;  %v9605_v30 = vld [vmem:[#allocation13_spill] sm:$0xff] }
  0xbf   : > { %9565 = vst [vmem:[#allocation59_spill] sm:$0xff] %v5512_v62  ;;  %v9604_v62 = vld [vmem:[#allocation31_spill] sm:$0xff] }
  0xc0   : > { %9567 = vst [vmem:[#allocation60_spill] sm:$0xff] %v5515_v59  ;;  %v9603_v59 = vld [vmem:[#allocation48_spill] sm:$0xff]  ;;  %v5640_v40 = vmul.f32 %v5485_v2, %v9604_v62  ;;  %v5660_v62 = vmul.f32 %v5485_v2, %v9609_v13  ;;  %v1273_v13 = vrot.slane %v1176_v60, 1  ;;  %v5697_v60 = vmul.f32 %v5485_v2, %v9618_v20 }
  0xc1   : > { %9569 = vst [vmem:[#allocation61_spill] sm:$0xff] %v5518_v3  ;;  %v9602_v3 = vld [vmem:[#allocation12_spill] sm:$0xff]  ;;  %v5636_v24 = vmul.f32 %v5485_v2, %v9603_v59  ;;  %v5656_v59 = vmul.f32 %v5485_v2, %v9608_v9  ;;  %v5676_v9 = vmul.f32 %v5485_v2, %v9613_v32  ;;  %v9617_v32 = vld [vmem:[#allocation17_spill] sm:$0xff] }
  0xc2   : > { %9571 = vst [vmem:[#allocation62_spill] sm:$0xff] %v5521_v28  ;;  %v9601_v28 = vld [vmem:[#allocation30_spill] sm:$0xff]  ;;  %v5632_v10 = vmul.f32 %v5485_v2, %v9602_v3  ;;  %v5652_v3 = vmul.f32 %v5485_v2, %v9607_v43  ;;  %v5672_v43 = vmul.f32 %v5485_v2, %v9612_v1  ;;  %v9616_v1 = vld [vmem:[#allocation35_spill] sm:$0xff]  ;;  %v5693_v15 = vmul.f32 %v5485_v2, %v9617_v32 }
  0xc3   : > { %9573 = vst [vmem:[#allocation63_spill] sm:$0xff] %v5524_v19  ;;  %v9600_v19 = vld [vmem:[#allocation47_spill] sm:$0xff]  ;;  %v5628_v51 = vmul.f32 %v5485_v2, %v9601_v28  ;;  %v5648_v28 = vmul.f32 %v5485_v2, %v9606_v37  ;;  %v5668_v37 = vmul.f32 %v5485_v2, %v9611_v35  ;;  %v1275_v35 = vrot.slane %v1177_v50, 1 }
  0xc4   : > { %v5624_v54 = vmul.f32 %v5485_v2, %v9600_v19  ;;  %v5644_v19 = vmul.f32 %v5485_v2, %v9605_v30  ;;  %v5664_v30 = vmul.f32 %v5485_v2, %v9610_v31  ;;  %v9615_v31 = vld [vmem:[#allocation52_spill] sm:$0xff]  ;;  %v5689_v0 = vmul.f32 %v5485_v2, %v9616_v1 }
  0xc5   : > { %v5684_v55 = vmul.f32 %v5485_v2, %v9615_v31  ;;  %v9620_v31 = vld [vmem:[#allocation18_spill] sm:$0xff]  ;;  %v5709_v1 = vmul.f32 %v5485_v2, %v9621_v41  ;;  %v1280_v32 = vrot.slane %v5544_v29, 1  ;;  %v5717_v20 = vsel %vm1028_vm1, %v1271_v48, %v1273_v13 }
  0xc6   : > { %v5705_v50 = vmul.f32 %v5485_v2, %v9620_v31  ;;  %v5722_v31 = vsel %vm1028_vm1, %v1275_v35, %v1276_v52  ;;  %v1285_v2 = vrot.slane %v5556_v18, 1  ;;  %v1286_v41 = vrot.slane %v5560_v46, 1 }
  0xc7   : > { %v1290_v29 = vrot.slane %v5568_v34, 1  ;;  %v1293_v48 = vrot.slane %v5576_v7, 1  ;;  %v1295_v13 = vrot.slane %v5580_v39, 1  ;;  %v1300_v35 = vrot.slane %v5592_v53, 1 }
  0xc8   : > { %v1301_v18 = vrot.slane %v5596_v44, 1  ;;  %v1303_v46 = vrot.slane %v5600_v63, 1  ;;  %v1306_v34 = vrot.slane %v5608_v23, 1  ;;  %v1279_v7 = vsel %vm1028_vm1, %v1276_v52, %v1278_v45 }
  0xc9   : > { %v1282_v39 = vsel %vm1028_vm1, %v1280_v32, %v1281_v8  ;;  %v1284_v53 = vsel %vm1028_vm1, %v1281_v8, %v1283_v5  ;;  %v1287_v44 = vsel %vm1028_vm1, %v1285_v2, %v1286_v41  ;;  %v1289_v63 = vsel %vm1028_vm1, %v1286_v41, %v1288_v42 }
  0xca   : > { %v1313_v36 = vrot.slane %v5624_v54, 1  ;;  %v1292_v23 = vsel %vm1028_vm1, %v1290_v29, %v1291_v26  ;;  %v1294_v21 = vsel %vm1028_vm1, %v1291_v26, %v1293_v48  ;;  %v1297_v45 = vsel %vm1028_vm1, %v1295_v13, %v1296_v17 }
  0xcb   : > { %v1299_v52 = vsel %vm1028_vm1, %v1296_v17, %v1298_v61  ;;  %v1302_v32 = vsel %vm1028_vm1, %v1300_v35, %v1301_v18  ;;  %v1304_v4 = vsel %vm1028_vm1, %v1301_v18, %v1303_v46  ;;  %v1307_v5 = vsel %vm1028_vm1, %v1305_v56, %v1306_v34 }
  0xcc   : > { %v1309_v8 = vsel %vm1028_vm1, %v1306_v34, %v1308_v22  ;;  %v1315_v54 = vrot.slane %v5628_v51, 1  ;;  %v1316_v41 = vrot.slane %v5632_v10, 1  ;;  %v1318_v2 = vrot.slane %v5636_v24, 1 }
  0xcd   : > { %v1314_v42 = vsel %vm1028_vm1, %v1311_v38, %v1313_v36  ;;  %v1320_v29 = vrot.slane %v5640_v40, 1  ;;  %v1321_v26 = vrot.slane %v5644_v19, 1  ;;  %v1323_v48 = vrot.slane %v5648_v28, 1 }
  0xce   : > { %v1325_v13 = vrot.slane %v5652_v3, 1  ;;  %v1326_v17 = vrot.slane %v5656_v59, 1  ;;  %v1328_v61 = vrot.slane %v5660_v62, 1  ;;  %v1330_v51 = vrot.slane %v5664_v30, 1 }
  0xcf   : > { %v1331_v10 = vrot.slane %v5668_v37, 1  ;;  %v1333_v24 = vrot.slane %v5672_v43, 1  ;;  %v1335_v35 = vrot.slane %v5676_v9, 1  ;;  %v1336_v40 = vrot.slane %v5680_v25, 1 }
  0xd0   : > { %v1338_v19 = vrot.slane %v5684_v55, 1  ;;  %v1340_v28 = vrot.slane %v5689_v0, 1  ;;  %v1341_v3 = vrot.slane %v5693_v15, 1  ;;  %v1343_v59 = vrot.slane %v5697_v60, 1 }
  0xd1   : > { %v1317_v62 = vsel %vm1028_vm1, %v1315_v54, %v1316_v41  ;;  %v1345_v30 = vrot.slane %v5701_v6, 1  ;;  %v1346_v37 = vrot.slane %v5705_v50, 1  ;;  %v1348_v43 = vrot.slane %v5709_v1, 1 }
  0xd2   : > { %v1319_v9 = vsel %vm1028_vm1, %v1316_v41, %v1318_v2  ;;  %v1322_v25 = vsel %vm1028_vm1, %v1320_v29, %v1321_v26  ;;  %v1324_v55 = vsel %vm1028_vm1, %v1321_v26, %v1323_v48  ;;  %v1327_v0 = vsel %vm1028_vm1, %v1325_v13, %v1326_v17  ;;  %v9623_v41 = vld [vmem:[#allocation71_spill] sm:$0xff] }
  0xd3   : > { %v1329_v15 = vsel %vm1028_vm1, %v1326_v17, %v1328_v61  ;;  %v1332_v60 = vsel %vm1028_vm1, %v1330_v51, %v1331_v10  ;;  %v1334_v18 = vsel %vm1028_vm1, %v1331_v10, %v1333_v24  ;;  %v1337_v6 = vsel %vm1028_vm1, %v1335_v35, %v1336_v40 }
  0xd4   : > { %v1339_v50 = vsel %vm1028_vm1, %v1336_v40, %v1338_v19  ;;  %v1342_v1 = vsel %vm1028_vm1, %v1340_v28, %v1341_v3  ;;  %v1344_v46 = vsel %vm1028_vm1, %v1341_v3, %v1343_v59  ;;  %v5792_v56 = vadd.f32 %v5714_v27, %v5425_v33  ;;  %v9658_v19 = vld [vmem:[#allocation82_spill] sm:$0xff]  ;;  %v9660_v3 = vld [vmem:[#allocation83_spill] sm:$0xff] }
  0xd5   : > { %v1347_v34 = vsel %vm1028_vm1, %v1345_v30, %v1346_v37  ;;  %v1349_v22 = vsel %vm1028_vm1, %v1346_v37, %v1348_v43  ;;  %v5798_v47 = vadd.f32 %v5717_v20, %v5430_v12  ;;  %v5802_v38 = vadd.f32 %v5722_v31, %v5434_v57  ;;  %v9625_v12 = vld [vmem:[#allocation66_spill] sm:$0xff]  ;;  %v9627_v57 = vld [vmem:[#allocation67_spill] sm:$0xff] }
  0xd6   : > { %v5805_v36 = vadd.f32 %v1279_v7, %v5437_v49  ;;  %v5808_v54 = vadd.f32 %v1282_v39, %v5440_v16  ;;  %v5811_v33 = vadd.f32 %v1284_v53, %v5443_v14  ;;  %v5814_v27 = vadd.f32 %v1287_v44, %v5446_v58  ;;  %v9629_v49 = vld [vmem:[#allocation68_spill] sm:$0xff]  ;;  %v9631_v16 = vld [vmem:[#allocation69_spill] sm:$0xff]  ;;  %v9633_v14 = vld [vmem:[#allocation70_spill] sm:$0xff] }
  0xd7   : > { %v5817_v2 = vadd.f32 %v1289_v63, %v9623_v41  ;;  %v5820_v20 = vadd.f32 %v1292_v23, %v9625_v12  ;;  %v5823_v31 = vadd.f32 %v1294_v21, %v9627_v57  ;;  %v5826_v7 = vadd.f32 %v1297_v45, %v9629_v49  ;;  %v9635_v58 = vld [vmem:[#allocation72_spill] sm:$0xff]  ;;  %v9637_v63 = vld [vmem:[#allocation73_spill] sm:$0xff]  ;;  %v9639_v23 = vld [vmem:[#allocation74_spill] sm:$0xff] }
  0xd8   : > { %9622 = vst [vmem:[#allocation64_spill] sm:$0xff] %v5814_v27  ;;  %v5829_v39 = vadd.f32 %v1299_v52, %v9631_v16  ;;  %v5832_v53 = vadd.f32 %v1302_v32, %v9633_v14  ;;  %v5835_v44 = vadd.f32 %v1304_v4, %v9635_v58  ;;  %v5838_v29 = vadd.f32 %v1307_v5, %v9637_v63  ;;  %v9641_v21 = vld [vmem:[#allocation75_spill] sm:$0xff]  ;;  %v9643_v45 = vld [vmem:[#allocation76_spill] sm:$0xff]  ;;  %v9645_v52 = vld [vmem:[#allocation57_spill] sm:$0xff] }
  0xd9   : > { %9624 = vst [vmem:[#allocation65_spill] sm:$0xff] %v5817_v2  ;;  %v5841_v26 = vadd.f32 %v1309_v8, %v9639_v23  ;;  %v5844_v48 = vadd.f32 %v1312_v11, %v9641_v21  ;;  %v5847_v13 = vadd.f32 %v1314_v42, %v9643_v45  ;;  %v5850_v17 = vperm.slane %v9645_v52, 1  ;;  %v9646_v32 = vld [vmem:[#allocation77_spill] sm:$0xff]  ;;  %v9648_v4 = vld [vmem:[#allocation78_spill] sm:$0xff]  ;;  %v9650_v5 = vld [vmem:[#allocation56_spill] sm:$0xff] }
  0xda   : > { %9626 = vst [vmem:[#allocation71_spill] sm:$0xff] %v5820_v20  ;;  %v5853_v61 = vadd.f32 %v1317_v62, %v9646_v32  ;;  %v5856_v51 = vadd.f32 %v1319_v9, %v9648_v4  ;;  %v5859_v10 = vadd.f32 %v1322_v25, %v9650_v5  ;;  %v9652_v8 = vld [vmem:[#allocation79_spill] sm:$0xff]  ;;  %v9654_v11 = vld [vmem:[#allocation80_spill] sm:$0xff]  ;;  %v9656_v42 = vld [vmem:[#allocation81_spill] sm:$0xff]  ;;  %v5871_v28 = vadd.f32 %v1332_v60, %v9658_v19 }
  0xdb   : > { %9628 = vst [vmem:[#allocation66_spill] sm:$0xff] %v5823_v31  ;;  %v5862_v24 = vadd.f32 %v1324_v55, %v9652_v8  ;;  %v5865_v35 = vadd.f32 %v1327_v0, %v9654_v11  ;;  %v5868_v40 = vadd.f32 %v1329_v15, %v9656_v42  ;;  %v5874_v59 = vadd.f32 %v1334_v18, %v9660_v3  ;;  %v9662_v62 = vld [vmem:[#allocation58_spill] sm:$0xff]  ;;  %v9664_v37 = vld [vmem:[#allocation59_spill] sm:$0xff]  ;;  %v9666_v9 = vld [vmem:[#allocation60_spill] sm:$0xff] }
  0xdc   : > { %9630 = vst [vmem:[#allocation67_spill] sm:$0xff] %v5826_v7  ;;  %v5877_v30 = vadd.f32 %v1337_v6, %v9662_v62  ;;  %v5880_v43 = vadd.f32 %v1339_v50, %v9664_v37  ;;  %v5883_v25 = vadd.f32 %v1342_v1, %v9666_v9  ;;  %v9668_v55 = vld [vmem:[#allocation61_spill] sm:$0xff]  ;;  %v9670_v15 = vld [vmem:[#allocation62_spill] sm:$0xff]  ;;  %v9672_v60 = vld [vmem:[#allocation63_spill] sm:$0xff] }
  0xdd   : > { %9632 = vst [vmem:[#allocation68_spill] sm:$0xff] %v5829_v39  ;;  %v5886_v0 = vadd.f32 %v1344_v46, %v9668_v55  ;;  %v5889_v41 = vadd.f32 %v1347_v34, %v9670_v15  ;;  %v5892_v12 = vadd.f32 %v1349_v22, %v9672_v60  ;;  %v9674_v18 = vld [vmem:[#allocation22_spill] sm:$0xff]  ;;  %v9675_v6 = vld [vmem:[#allocation4_spill] sm:$0xff]  ;;  %v9677_v1 = vld [vmem:[#allocation23_spill] sm:$0xff] }
  0xde   : > { %9634 = vst [vmem:[#allocation69_spill] sm:$0xff] %v5832_v53  ;;  %v1415_v57 = vmul.f32 %v5850_v17, %v9674_v18  ;;  %v1416_v49 = vmul.f32 %v5850_v17, %v9675_v6  ;;  %v9676_v50 = vld [vmem:[#allocation40_spill] sm:$0xff]  ;;  %v5902_v14 = vmul.f32 %v5850_v17, %v9677_v1  ;;  %v9678_v46 = vld [vmem:[#allocation5_spill] sm:$0xff]  ;;  %v9681_v21 = vld [vmem:[#allocation6_spill] sm:$0xff] }
  0xdf   : > { %9636 = vst [vmem:[#allocation70_spill] sm:$0xff] %v5835_v44  ;;  %v1417_v16 = vmul.f32 %v5850_v17, %v9676_v50  ;;  %v5906_v34 = vmul.f32 %v5850_v17, %v9678_v46  ;;  %v9679_v58 = vld [vmem:[#allocation41_spill] sm:$0xff]  ;;  %v9680_v63 = vld [vmem:[#allocation24_spill] sm:$0xff]  ;;  %v5918_v45 = vmul.f32 %v5850_v17, %v9681_v21  ;;  %v9682_v52 = vld [vmem:[#allocation42_spill] sm:$0xff] }
  0xe0   : > { %9638 = vst [vmem:[#allocation72_spill] sm:$0xff] %v5838_v29  ;;  %v5910_v22 = vmul.f32 %v5850_v17, %v9679_v58  ;;  %v5914_v23 = vmul.f32 %v5850_v17, %v9680_v63  ;;  %v5922_v32 = vmul.f32 %v5850_v17, %v9682_v52  ;;  %v9683_v4 = vld [vmem:[#allocation25_spill] sm:$0xff]  ;;  %v9684_v8 = vld [vmem:[#allocation7_spill] sm:$0xff]  ;;  %v9686_v3 = vld [vmem:[#allocation26_spill] sm:$0xff]  ;;  %v1516_v31 = vrot.slane %v5902_v14, 1 }
  0xe1   : > { %9640 = vst [vmem:[#allocation73_spill] sm:$0xff] %v5841_v26  ;;  %v5926_v5 = vmul.f32 %v5850_v17, %v9683_v4  ;;  %v5930_v11 = vmul.f32 %v5850_v17, %v9684_v8  ;;  %v9685_v42 = vld [vmem:[#allocation43_spill] sm:$0xff]  ;;  %v5938_v62 = vmul.f32 %v5850_v17, %v9686_v3  ;;  %v9687_v37 = vld [vmem:[#allocation8_spill] sm:$0xff]  ;;  %v9690_v4 = vld [vmem:[#allocation9_spill] sm:$0xff] }
  0xe2   : > { %9642 = vst [vmem:[#allocation74_spill] sm:$0xff] %v5844_v48  ;;  %v5934_v19 = vmul.f32 %v5850_v17, %v9685_v42  ;;  %v5942_v9 = vmul.f32 %v5850_v17, %v9687_v37  ;;  %v9688_v55 = vld [vmem:[#allocation44_spill] sm:$0xff]  ;;  %v9689_v60 = vld [vmem:[#allocation27_spill] sm:$0xff]  ;;  %v5954_v42 = vmul.f32 %v5850_v17, %v9690_v4  ;;  %v9691_v52 = vld [vmem:[#allocation45_spill] sm:$0xff]  ;;  %v1519_v20 = vrot.slane %v5910_v22, 1 }
  0xe3   : > { %9644 = vst [vmem:[#allocation75_spill] sm:$0xff] %v5847_v13  ;;  %v5946_v15 = vmul.f32 %v5850_v17, %v9688_v55  ;;  %v5950_v8 = vmul.f32 %v5850_v17, %v9689_v60  ;;  %v5958_v3 = vmul.f32 %v5850_v17, %v9691_v52  ;;  %v9692_v21 = vld [vmem:[#allocation28_spill] sm:$0xff]  ;;  %v9693_v63 = vld [vmem:[#allocation10_spill] sm:$0xff]  ;;  %v9695_v46 = vld [vmem:[#allocation29_spill] sm:$0xff]  ;;  %v1512_v13 = vrot.slane %v1416_v49, 1 }
  0xe4   : > { %9647 = vst [vmem:[#allocation76_spill] sm:$0xff] %v5853_v61  ;;  %v5962_v37 = vmul.f32 %v5850_v17, %v9692_v21  ;;  %v5966_v55 = vmul.f32 %v5850_v17, %v9693_v63  ;;  %v9694_v58 = vld [vmem:[#allocation46_spill] sm:$0xff]  ;;  %v5974_v4 = vmul.f32 %v5850_v17, %v9695_v46  ;;  %v9696_v1 = vld [vmem:[#allocation11_spill] sm:$0xff]  ;;  %v9699_v18 = vld [vmem:[#allocation12_spill] sm:$0xff]  ;;  %v1511_v61 = vrot.slane %v1415_v57, 1 }
  0xe5   : > { %9649 = vst [vmem:[#allocation57_spill] sm:$0xff] %v5856_v51  ;;  %v5970_v60 = vmul.f32 %v5850_v17, %v9694_v58  ;;  %v5978_v52 = vmul.f32 %v5850_v17, %v9696_v1  ;;  %v9697_v50 = vld [vmem:[#allocation47_spill] sm:$0xff]  ;;  %v9698_v6 = vld [vmem:[#allocation30_spill] sm:$0xff]  ;;  %v5990_v58 = vmul.f32 %v5850_v17, %v9699_v18  ;;  %v9712_v51 = vld [vmem:[#allocation52_spill] sm:$0xff]  ;;  %v1521_v2 = vrot.slane %v5914_v23, 1 }
  0xe6   : > { %9651 = vst [vmem:[#allocation77_spill] sm:$0xff] %v5859_v10  ;;  %v5982_v21 = vmul.f32 %v5850_v17, %v9697_v50  ;;  %v5986_v63 = vmul.f32 %v5850_v17, %v9698_v6  ;;  %v9711_v10 = vld [vmem:[#allocation16_spill] sm:$0xff]  ;;  %v9713_v48 = vld [vmem:[#allocation35_spill] sm:$0xff]  ;;  %v9718_v49 = vld [vmem:[#allocation54_spill] sm:$0xff]  ;;  %v1524_v27 = vrot.slane %v5922_v32, 1  ;;  %v1527_v14 = vrot.slane %v5930_v11, 1 }
  0xe7   : > { %9653 = vst [vmem:[#allocation78_spill] sm:$0xff] %v5862_v24  ;;  %v9710_v24 = vld [vmem:[#allocation34_spill] sm:$0xff]  ;;  %v6046_v26 = vmul.f32 %v5850_v17, %v9713_v48  ;;  %v9719_v48 = vld [vmem:[#allocation37_spill] sm:$0xff]  ;;  %v9720_v39 = vld [vmem:[#allocation20_spill] sm:$0xff]  ;;  %v1531_v22 = vrot.slane %v5938_v62, 1  ;;  %v1539_v23 = vrot.slane %v5958_v3, 1 }
  0xe8   : > { %9655 = vst [vmem:[#allocation56_spill] sm:$0xff] %v5865_v35  ;;  %v9709_v35 = vld [vmem:[#allocation51_spill] sm:$0xff]  ;;  %v1542_v32 = vrot.slane %v5966_v55, 1  ;;  %v1546_v11 = vrot.slane %v5974_v4, 1  ;;  %v1549_v62 = vrot.slane %v5982_v21, 1  ;;  %v1552_v3 = vrot.slane %v5990_v58, 1 }
  0xe9   : > { %9657 = vst [vmem:[#allocation79_spill] sm:$0xff] %v5868_v40  ;;  %v9708_v40 = vld [vmem:[#allocation15_spill] sm:$0xff] }
  0xea   : > { %9659 = vst [vmem:[#allocation80_spill] sm:$0xff] %v5871_v28  ;;  %v9707_v28 = vld [vmem:[#allocation33_spill] sm:$0xff]  ;;  %v9721_v7 = vld [vmem:[#allocation55_spill] sm:$0xff] }
  0xeb   : > { %9661 = vst [vmem:[#allocation81_spill] sm:$0xff] %v5874_v59  ;;  %v9706_v59 = vld [vmem:[#allocation50_spill] sm:$0xff] }
  0xec   : > { %9663 = vst [vmem:[#allocation82_spill] sm:$0xff] %v5877_v30  ;;  %v9705_v30 = vld [vmem:[#allocation14_spill] sm:$0xff] }
  0xed   : > { %9665 = vst [vmem:[#allocation83_spill] sm:$0xff] %v5880_v43  ;;  %v9704_v43 = vld [vmem:[#allocation32_spill] sm:$0xff] }
  0xee   : > { %9667 = vst [vmem:[#allocation58_spill] sm:$0xff] %v5883_v25  ;;  %v9703_v25 = vld [vmem:[#allocation49_spill] sm:$0xff]  ;;  %v6010_v18 = vmul.f32 %v5850_v17, %v9704_v43  ;;  %v6030_v43 = vmul.f32 %v5850_v17, %v9709_v35 }
  0xef   : > { %9669 = vst [vmem:[#allocation59_spill] sm:$0xff] %v5886_v0  ;;  %v9702_v0 = vld [vmem:[#allocation13_spill] sm:$0xff]  ;;  %v6006_v6 = vmul.f32 %v5850_v17, %v9703_v25  ;;  %v6026_v25 = vmul.f32 %v5850_v17, %v9708_v40  ;;  %v1514_v40 = vrot.slane %v1417_v16, 1  ;;  %v6066_v16 = vmul.f32 %v5850_v17, %v9718_v49 }
  0xf0   : > { %9671 = vst [vmem:[#allocation60_spill] sm:$0xff] %v5889_v41  ;;  %v9701_v41 = vld [vmem:[#allocation31_spill] sm:$0xff]  ;;  %v6002_v50 = vmul.f32 %v5850_v17, %v9702_v0  ;;  %v6022_v0 = vmul.f32 %v5850_v17, %v9707_v28  ;;  %v6042_v28 = vmul.f32 %v5850_v17, %v9712_v51  ;;  %v9714_v35 = vld [vmem:[#allocation17_spill] sm:$0xff]  ;;  %v9717_v51 = vld [vmem:[#allocation18_spill] sm:$0xff]  ;;  %v6084_v49 = vsel %vm1028_vm1, %v1511_v61, %v1512_v13 }
  0xf1   : > { %9673 = vst [vmem:[#allocation61_spill] sm:$0xff] %v5892_v12  ;;  %v9700_v12 = vld [vmem:[#allocation48_spill] sm:$0xff]  ;;  %v5998_v1 = vmul.f32 %v5850_v17, %v9701_v41  ;;  %v6018_v41 = vmul.f32 %v5850_v17, %v9706_v59  ;;  %v6038_v59 = vmul.f32 %v5850_v17, %v9711_v10  ;;  %v6050_v29 = vmul.f32 %v5850_v17, %v9714_v35 }
  0xf2   : > { %v5994_v46 = vmul.f32 %v5850_v17, %v9700_v12  ;;  %v6014_v12 = vmul.f32 %v5850_v17, %v9705_v30  ;;  %v6034_v30 = vmul.f32 %v5850_v17, %v9710_v24  ;;  %v9715_v24 = vld [vmem:[#allocation53_spill] sm:$0xff]  ;;  %v9716_v10 = vld [vmem:[#allocation36_spill] sm:$0xff]  ;;  %v6062_v57 = vmul.f32 %v5850_v17, %v9717_v51 }
  0xf3   : > { %v6054_v44 = vmul.f32 %v5850_v17, %v9715_v24  ;;  %v6058_v53 = vmul.f32 %v5850_v17, %v9716_v10  ;;  %v6070_v35 = vmul.f32 %v5850_v17, %v9719_v48  ;;  %v6074_v24 = vmul.f32 %v5850_v17, %v9720_v39 }
  0xf4   : > { %v6078_v10 = vmul.f32 %v5850_v17, %v9721_v7  ;;  %v1517_v51 = vrot.slane %v5906_v34, 1  ;;  %v6087_v48 = vsel %vm1028_vm1, %v1512_v13, %v1514_v40  ;;  %v1522_v39 = vrot.slane %v5918_v45, 1 }
  0xf5   : > { %v1526_v17 = vrot.slane %v5926_v5, 1  ;;  %v1529_v34 = vrot.slane %v5934_v19, 1  ;;  %v1532_v61 = vrot.slane %v5942_v9, 1  ;;  %v1534_v7 = vrot.slane %v5946_v15, 1 }
  0xf6   : > { %v1536_v13 = vrot.slane %v5950_v8, 1  ;;  %v1537_v40 = vrot.slane %v5954_v42, 1  ;;  %v1541_v45 = vrot.slane %v5962_v37, 1  ;;  %v1544_v5 = vrot.slane %v5970_v60, 1 }
  0xf7   : > { %v1547_v19 = vrot.slane %v5978_v52, 1  ;;  %v1518_v9 = vsel %vm1028_vm1, %v1516_v31, %v1517_v51  ;;  %v1520_v8 = vsel %vm1028_vm1, %v1517_v51, %v1519_v20  ;;  %v1551_v42 = vrot.slane %v5986_v63, 1 }
  0xf8   : > { %v1523_v37 = vsel %vm1028_vm1, %v1521_v2, %v1522_v39  ;;  %v1525_v55 = vsel %vm1028_vm1, %v1522_v39, %v1524_v27  ;;  %v1528_v15 = vsel %vm1028_vm1, %v1526_v17, %v1527_v14  ;;  %v1530_v4 = vsel %vm1028_vm1, %v1527_v14, %v1529_v34 }
  0xf9   : > { %v1533_v52 = vsel %vm1028_vm1, %v1531_v22, %v1532_v61  ;;  %v1535_v21 = vsel %vm1028_vm1, %v1532_v61, %v1534_v7  ;;  %v1538_v31 = vsel %vm1028_vm1, %v1536_v13, %v1537_v40  ;;  %v1540_v20 = vsel %vm1028_vm1, %v1537_v40, %v1539_v23 }
  0xfa   : > { %v1543_v51 = vsel %vm1028_vm1, %v1541_v45, %v1542_v32  ;;  %v1545_v58 = vsel %vm1028_vm1, %v1542_v32, %v1544_v5  ;;  %v1548_v2 = vsel %vm1028_vm1, %v1546_v11, %v1547_v19  ;;  %v1550_v27 = vsel %vm1028_vm1, %v1547_v19, %v1549_v62 }
  0xfb   : > { %v1553_v39 = vsel %vm1028_vm1, %v1551_v42, %v1552_v3  ;;  %v1554_v63 = vrot.slane %v5994_v46, 1  ;;  %v1556_v60 = vrot.slane %v5998_v1, 1  ;;  %v1557_v7 = vrot.slane %v6002_v50, 1 }
  0xfc   : > { %v1559_v17 = vrot.slane %v6006_v6, 1  ;;  %v1561_v14 = vrot.slane %v6010_v18, 1  ;;  %v1562_v34 = vrot.slane %v6014_v12, 1  ;;  %v1564_v22 = vrot.slane %v6018_v41, 1 }
  0xfd   : > { %v1566_v61 = vrot.slane %v6022_v0, 1  ;;  %v1567_v13 = vrot.slane %v6026_v25, 1  ;;  %v1569_v40 = vrot.slane %v6030_v43, 1  ;;  %v1571_v46 = vrot.slane %v6034_v30, 1 }
  0xfe   : > { %v1572_v1 = vrot.slane %v6038_v59, 1  ;;  %v1574_v50 = vrot.slane %v6042_v28, 1  ;;  %v1576_v6 = vrot.slane %v6046_v26, 1  ;;  %v1577_v18 = vrot.slane %v6050_v29, 1 }
  0xff   : > { %v1579_v12 = vrot.slane %v6054_v44, 1  ;;  %v1581_v41 = vrot.slane %v6058_v53, 1  ;;  %v1582_v0 = vrot.slane %v6062_v57, 1  ;;  %v1584_v25 = vrot.slane %v6066_v16, 1 }
 0x100   : > { %v1555_v43 = vsel %vm1028_vm1, %v1552_v3, %v1554_v63  ;;  %v1586_v30 = vrot.slane %v6070_v35, 1  ;;  %v1587_v59 = vrot.slane %v6074_v24, 1  ;;  %v1589_v28 = vrot.slane %v6078_v10, 1 }
 0x101   : > { %v1558_v26 = vsel %vm1028_vm1, %v1556_v60, %v1557_v7  ;;  %v1560_v29 = vsel %vm1028_vm1, %v1557_v7, %v1559_v17  ;;  %v1563_v44 = vsel %vm1028_vm1, %v1561_v14, %v1562_v34  ;;  %v1565_v53 = vsel %vm1028_vm1, %v1562_v34, %v1564_v22  ;;  %v9722_v7 = vld [vmem:[#allocation64_spill] sm:$0xff] }
 0x102   : > { %v1568_v57 = vsel %vm1028_vm1, %v1566_v61, %v1567_v13  ;;  %v1570_v16 = vsel %vm1028_vm1, %v1567_v13, %v1569_v40  ;;  %v1573_v23 = vsel %vm1028_vm1, %v1571_v46, %v1572_v1  ;;  %v1575_v35 = vsel %vm1028_vm1, %v1572_v1, %v1574_v50 }
 0x103   : > { %v1578_v24 = vsel %vm1028_vm1, %v1576_v6, %v1577_v18  ;;  %v1580_v10 = vsel %vm1028_vm1, %v1577_v18, %v1579_v12  ;;  %v1583_v45 = vsel %vm1028_vm1, %v1581_v41, %v1582_v0  ;;  %v1585_v32 = vsel %vm1028_vm1, %v1582_v0, %v1584_v25  ;;  %v9754_v6 = vld [vmem:[#allocation56_spill] sm:$0xff]  ;;  %v9756_v12 = vld [vmem:[#allocation79_spill] sm:$0xff] }
 0x104   : > { %v1588_v5 = vsel %vm1028_vm1, %v1586_v30, %v1587_v59  ;;  %v1590_v11 = vsel %vm1028_vm1, %v1587_v59, %v1589_v28  ;;  %v6163_v19 = vadd.f32 %v6084_v49, %v5792_v56  ;;  %v6167_v62 = vadd.f32 %v6087_v48, %v5798_v47  ;;  %v9724_v56 = vld [vmem:[#allocation65_spill] sm:$0xff]  ;;  %v9726_v47 = vld [vmem:[#allocation71_spill] sm:$0xff]  ;;  %v9758_v0 = vld [vmem:[#allocation80_spill] sm:$0xff] }
 0x105   : > { %v6170_v42 = vadd.f32 %v1518_v9, %v5802_v38  ;;  %v6173_v3 = vadd.f32 %v1520_v8, %v5805_v36  ;;  %v6176_v63 = vadd.f32 %v1523_v37, %v5808_v54  ;;  %v6179_v60 = vadd.f32 %v1525_v55, %v5811_v33  ;;  %v9728_v38 = vld [vmem:[#allocation66_spill] sm:$0xff]  ;;  %v9730_v36 = vld [vmem:[#allocation67_spill] sm:$0xff]  ;;  %v9732_v54 = vld [vmem:[#allocation68_spill] sm:$0xff] }
 0x106   : > { %v6182_v17 = vadd.f32 %v1528_v15, %v9722_v7  ;;  %v6185_v49 = vadd.f32 %v1530_v4, %v9724_v56  ;;  %v6188_v48 = vadd.f32 %v1533_v52, %v9726_v47  ;;  %v6191_v9 = vadd.f32 %v1535_v21, %v9728_v38  ;;  %v9734_v33 = vld [vmem:[#allocation69_spill] sm:$0xff]  ;;  %v9736_v15 = vld [vmem:[#allocation70_spill] sm:$0xff]  ;;  %v9738_v4 = vld [vmem:[#allocation72_spill] sm:$0xff] }
 0x107   : > { %v6194_v8 = vadd.f32 %v1538_v31, %v9730_v36  ;;  %v6197_v37 = vadd.f32 %v1540_v20, %v9732_v54  ;;  %v6200_v55 = vadd.f32 %v1543_v51, %v9734_v33  ;;  %v6203_v14 = vadd.f32 %v1545_v58, %v9736_v15  ;;  %v9740_v52 = vld [vmem:[#allocation73_spill] sm:$0xff]  ;;  %v9742_v21 = vld [vmem:[#allocation74_spill] sm:$0xff]  ;;  %v9744_v51 = vld [vmem:[#allocation75_spill] sm:$0xff] }
 0x108   : > { %9723 = vst [vmem:[#allocation62_spill] sm:$0xff] %v6182_v17  ;;  %v6206_v34 = vadd.f32 %v1548_v2, %v9738_v4  ;;  %v6209_v22 = vadd.f32 %v1550_v27, %v9740_v52  ;;  %v6212_v61 = vadd.f32 %v1553_v39, %v9742_v21  ;;  %v4400_v31 = vld [vmem:[%s9219_s3] sm:$0x7]  ;;  %v6220_v13 = vadd.f32 %v1555_v43, %v9744_v51  ;;  %v9746_v58 = vld [vmem:[#allocation76_spill] sm:$0xff]  ;;  %v9748_v2 = vld [vmem:[#allocation57_spill] sm:$0xff] }
 0x109   : > { %9725 = vst [vmem:[#allocation63_spill] sm:$0xff] %v6185_v49  ;;  %v6217_v20 = vperm.slane %v4400_v31, 2  ;;  %v6223_v40 = vadd.f32 %v1558_v26, %v9746_v58  ;;  %v6226_v46 = vadd.f32 %v1560_v29, %v9748_v2  ;;  %v9750_v27 = vld [vmem:[#allocation77_spill] sm:$0xff]  ;;  %v9752_v39 = vld [vmem:[#allocation78_spill] sm:$0xff]  ;;  %v6235_v18 = vadd.f32 %v1568_v57, %v9754_v6  ;;  %v9764_v26 = vld [vmem:[#allocation83_spill] sm:$0xff] }
 0x10a   : > { %9727 = vst [vmem:[#allocation64_spill] sm:$0xff] %v6188_v48  ;;  %v6229_v1 = vadd.f32 %v1563_v44, %v9750_v27  ;;  %v6232_v50 = vadd.f32 %v1565_v53, %v9752_v39  ;;  %v6238_v41 = vadd.f32 %v1570_v16, %v9756_v12  ;;  %v6241_v25 = vadd.f32 %v1573_v23, %v9758_v0  ;;  %v9760_v43 = vld [vmem:[#allocation81_spill] sm:$0xff]  ;;  %v9762_v59 = vld [vmem:[#allocation82_spill] sm:$0xff]  ;;  %v9768_v57 = vld [vmem:[#allocation59_spill] sm:$0xff] }
 0x10b   : > { %9729 = vst [vmem:[#allocation65_spill] sm:$0xff] %v6191_v9  ;;  %v6244_v30 = vadd.f32 %v1575_v35, %v9760_v43  ;;  %v6247_v28 = vadd.f32 %v1578_v24, %v9762_v59  ;;  %v6250_v29 = vadd.f32 %v1580_v10, %v9764_v26  ;;  %v9766_v44 = vld [vmem:[#allocation58_spill] sm:$0xff]  ;;  %v6256_v7 = vadd.f32 %v1585_v32, %v9768_v57  ;;  %v9770_v16 = vld [vmem:[#allocation60_spill] sm:$0xff]  ;;  %v9772_v23 = vld [vmem:[#allocation61_spill] sm:$0xff] }
 0x10c   : > { %9731 = vst [vmem:[#allocation71_spill] sm:$0xff] %v6194_v8  ;;  %v6253_v53 = vadd.f32 %v1583_v45, %v9766_v44  ;;  %v6259_v56 = vadd.f32 %v1588_v5, %v9770_v16  ;;  %v6262_v47 = vadd.f32 %v1590_v11, %v9772_v23  ;;  %v9774_v35 = vld [vmem:[#allocation19_spill] sm:$0xff]  ;;  %v9775_v24 = vld [vmem:[#allocation2_spill] sm:$0xff]  ;;  %v9777_v45 = vld [vmem:[#allocation21_spill] sm:$0xff] }
 0x10d   : > { %9733 = vst [vmem:[#allocation66_spill] sm:$0xff] %v6197_v37  ;;  %v1656_v38 = vmul.f32 %v6217_v20, %v9774_v35  ;;  %v1657_v36 = vmul.f32 %v6217_v20, %v9775_v24  ;;  %v9776_v10 = vld [vmem:[#allocation38_spill] sm:$0xff]  ;;  %v6272_v33 = vmul.f32 %v6217_v20, %v9777_v45  ;;  %v9778_v32 = vld [vmem:[#allocation3_spill] sm:$0xff]  ;;  %v9781_v21 = vld [vmem:[#allocation4_spill] sm:$0xff] }
 0x10e   : > { %9735 = vst [vmem:[#allocation67_spill] sm:$0xff] %v6200_v55  ;;  %v1658_v54 = vmul.f32 %v6217_v20, %v9776_v10  ;;  %v6276_v5 = vmul.f32 %v6217_v20, %v9778_v32  ;;  %v9779_v15 = vld [vmem:[#allocation39_spill] sm:$0xff]  ;;  %v9780_v4 = vld [vmem:[#allocation22_spill] sm:$0xff]  ;;  %v6288_v31 = vmul.f32 %v6217_v20, %v9781_v21  ;;  %v9782_v51 = vld [vmem:[#allocation40_spill] sm:$0xff] }
 0x10f   : > { %9737 = vst [vmem:[#allocation68_spill] sm:$0xff] %v6203_v14  ;;  %v6280_v11 = vmul.f32 %v6217_v20, %v9779_v15  ;;  %v6284_v52 = vmul.f32 %v6217_v20, %v9780_v4  ;;  %v6292_v58 = vmul.f32 %v6217_v20, %v9782_v51  ;;  %v9783_v2 = vld [vmem:[#allocation23_spill] sm:$0xff]  ;;  %v9784_v39 = vld [vmem:[#allocation5_spill] sm:$0xff]  ;;  %v9786_v43 = vld [vmem:[#allocation24_spill] sm:$0xff]  ;;  %v1758_v9 = vrot.slane %v6272_v33, 2 }
 0x110   : > { %9739 = vst [vmem:[#allocation69_spill] sm:$0xff] %v6206_v34  ;;  %v6296_v27 = vmul.f32 %v6217_v20, %v9783_v2  ;;  %v6300_v6 = vmul.f32 %v6217_v20, %v9784_v39  ;;  %v9785_v12 = vld [vmem:[#allocation41_spill] sm:$0xff]  ;;  %v6308_v59 = vmul.f32 %v6217_v20, %v9786_v43  ;;  %v9787_v26 = vld [vmem:[#allocation6_spill] sm:$0xff]  ;;  %v9790_v24 = vld [vmem:[#allocation7_spill] sm:$0xff]  ;;  %v1764_v49 = vrot.slane %v6288_v31, 2 }
 0x111   : > { %9741 = vst [vmem:[#allocation70_spill] sm:$0xff] %v6209_v22  ;;  %v6304_v0 = vmul.f32 %v6217_v20, %v9785_v12  ;;  %v6312_v44 = vmul.f32 %v6217_v20, %v9787_v26  ;;  %v9788_v57 = vld [vmem:[#allocation42_spill] sm:$0xff]  ;;  %v9789_v23 = vld [vmem:[#allocation25_spill] sm:$0xff]  ;;  %v6324_v10 = vmul.f32 %v6217_v20, %v9790_v24  ;;  %v9791_v12 = vld [vmem:[#allocation43_spill] sm:$0xff]  ;;  %v1766_v17 = vrot.slane %v6292_v58, 2 }
 0x112   : > { %9743 = vst [vmem:[#allocation72_spill] sm:$0xff] %v6212_v61  ;;  %v6316_v16 = vmul.f32 %v6217_v20, %v9788_v57  ;;  %v6320_v35 = vmul.f32 %v6217_v20, %v9789_v23  ;;  %v6328_v43 = vmul.f32 %v6217_v20, %v9791_v12  ;;  %v9792_v39 = vld [vmem:[#allocation26_spill] sm:$0xff]  ;;  %v9793_v2 = vld [vmem:[#allocation8_spill] sm:$0xff]  ;;  %v9795_v21 = vld [vmem:[#allocation27_spill] sm:$0xff]  ;;  %v1769_v33 = vrot.slane %v6300_v6, 2 }
 0x113   : > { %9745 = vst [vmem:[#allocation73_spill] sm:$0xff] %v6220_v13  ;;  %v6332_v26 = vmul.f32 %v6217_v20, %v9792_v39  ;;  %v6336_v57 = vmul.f32 %v6217_v20, %v9793_v2  ;;  %v9794_v51 = vld [vmem:[#allocation44_spill] sm:$0xff]  ;;  %v6344_v24 = vmul.f32 %v6217_v20, %v9795_v21  ;;  %v9796_v4 = vld [vmem:[#allocation9_spill] sm:$0xff]  ;;  %v9799_v45 = vld [vmem:[#allocation10_spill] sm:$0xff]  ;;  %v1754_v13 = vrot.slane %v1657_v36, 2 }
 0x114   : > { %9747 = vst [vmem:[#allocation74_spill] sm:$0xff] %v6223_v40  ;;  %v6340_v23 = vmul.f32 %v6217_v20, %v9794_v51  ;;  %v6348_v12 = vmul.f32 %v6217_v20, %v9796_v4  ;;  %v9797_v15 = vld [vmem:[#allocation45_spill] sm:$0xff]  ;;  %v9798_v32 = vld [vmem:[#allocation28_spill] sm:$0xff]  ;;  %v6360_v51 = vmul.f32 %v6217_v20, %v9799_v45  ;;  %v1753_v40 = vrot.slane %v1656_v38, 2  ;;  %v9816_v14 = vld [vmem:[#allocation34_spill] sm:$0xff] }
 0x115   : > { %9749 = vst [vmem:[#allocation75_spill] sm:$0xff] %v6226_v46  ;;  %v6352_v39 = vmul.f32 %v6217_v20, %v9797_v15  ;;  %v6356_v2 = vmul.f32 %v6217_v20, %v9798_v32  ;;  %v9812_v46 = vld [vmem:[#allocation50_spill] sm:$0xff]  ;;  %v6428_v55 = vmul.f32 %v6217_v20, %v9816_v14  ;;  %v9818_v36 = vld [vmem:[#allocation52_spill] sm:$0xff]  ;;  %v9819_v37 = vld [vmem:[#allocation35_spill] sm:$0xff]  ;;  %v1779_v31 = vrot.slane %v6324_v10, 2 }
 0x116   : > { %9751 = vst [vmem:[#allocation76_spill] sm:$0xff] %v6229_v1  ;;  %v9811_v1 = vld [vmem:[#allocation14_spill] sm:$0xff]  ;;  %v9820_v8 = vld [vmem:[#allocation17_spill] sm:$0xff]  ;;  %v6453_v48 = vsel %vm1752_vm2, %v1753_v40, %v1754_v13  ;;  %v1773_v40 = vrot.slane %v6308_v59, 2  ;;  %v1784_v58 = vrot.slane %v6336_v57, 2  ;;  %v1788_v6 = vrot.slane %v6344_v24, 2 }
 0x117   : > { %9753 = vst [vmem:[#allocation57_spill] sm:$0xff] %v6232_v50  ;;  %v9810_v50 = vld [vmem:[#allocation32_spill] sm:$0xff]  ;;  %v1767_v57 = vsel %vm1752_vm2, %v1764_v49, %v1766_v17 }
 0x118   : > { %9755 = vst [vmem:[#allocation77_spill] sm:$0xff] %v6235_v18  ;;  %v9809_v18 = vld [vmem:[#allocation49_spill] sm:$0xff] }
 0x119   : > { %9757 = vst [vmem:[#allocation78_spill] sm:$0xff] %v6238_v41  ;;  %v9808_v41 = vld [vmem:[#allocation13_spill] sm:$0xff] }
 0x11a   : > { %9759 = vst [vmem:[#allocation56_spill] sm:$0xff] %v6241_v25  ;;  %v9807_v25 = vld [vmem:[#allocation31_spill] sm:$0xff] }
 0x11b   : > { %9761 = vst [vmem:[#allocation79_spill] sm:$0xff] %v6244_v30  ;;  %v9806_v30 = vld [vmem:[#allocation48_spill] sm:$0xff] }
 0x11c   : > { %9763 = vst [vmem:[#allocation80_spill] sm:$0xff] %v6247_v28  ;;  %v9805_v28 = vld [vmem:[#allocation12_spill] sm:$0xff] }
 0x11d   : > { %9765 = vst [vmem:[#allocation81_spill] sm:$0xff] %v6250_v29  ;;  %v9804_v29 = vld [vmem:[#allocation30_spill] sm:$0xff] }
 0x11e   : > { %9767 = vst [vmem:[#allocation82_spill] sm:$0xff] %v6253_v53  ;;  %v9803_v53 = vld [vmem:[#allocation47_spill] sm:$0xff]  ;;  %v6380_v45 = vmul.f32 %v6217_v20, %v9804_v29  ;;  %v6400_v29 = vmul.f32 %v6217_v20, %v9809_v18 }
 0x11f   : > { %9769 = vst [vmem:[#allocation83_spill] sm:$0xff] %v6256_v7  ;;  %v9802_v7 = vld [vmem:[#allocation11_spill] sm:$0xff]  ;;  %v6376_v32 = vmul.f32 %v6217_v20, %v9803_v53  ;;  %v6396_v53 = vmul.f32 %v6217_v20, %v9808_v41  ;;  %v9813_v41 = vld [vmem:[#allocation33_spill] sm:$0xff] }
 0x120   : > { %9771 = vst [vmem:[#allocation58_spill] sm:$0xff] %v6259_v56  ;;  %v9801_v56 = vld [vmem:[#allocation29_spill] sm:$0xff]  ;;  %v6372_v15 = vmul.f32 %v6217_v20, %v9802_v7  ;;  %v6392_v7 = vmul.f32 %v6217_v20, %v9807_v25  ;;  %v6412_v25 = vmul.f32 %v6217_v20, %v9812_v46  ;;  %v6416_v61 = vmul.f32 %v6217_v20, %v9813_v41  ;;  %v9814_v18 = vld [vmem:[#allocation15_spill] sm:$0xff]  ;;  %v9817_v46 = vld [vmem:[#allocation16_spill] sm:$0xff] }
 0x121   : > { %9773 = vst [vmem:[#allocation59_spill] sm:$0xff] %v6262_v47  ;;  %v9800_v47 = vld [vmem:[#allocation46_spill] sm:$0xff]  ;;  %v6368_v4 = vmul.f32 %v6217_v20, %v9801_v56  ;;  %v6388_v56 = vmul.f32 %v6217_v20, %v9806_v30  ;;  %v6408_v30 = vmul.f32 %v6217_v20, %v9811_v1  ;;  %v6420_v22 = vmul.f32 %v6217_v20, %v9814_v18 }
 0x122   : > { %v6364_v21 = vmul.f32 %v6217_v20, %v9800_v47  ;;  %v6384_v47 = vmul.f32 %v6217_v20, %v9805_v28  ;;  %v6404_v28 = vmul.f32 %v6217_v20, %v9810_v50  ;;  %v9815_v50 = vld [vmem:[#allocation51_spill] sm:$0xff]  ;;  %v1756_v1 = vrot.slane %v1658_v54, 2  ;;  %v9821_v54 = vld [vmem:[#allocation53_spill] sm:$0xff] }
 0x123   : > { %v6424_v34 = vmul.f32 %v6217_v20, %v9815_v50  ;;  %v6432_v38 = vmul.f32 %v6217_v20, %v9817_v46  ;;  %v6436_v41 = vmul.f32 %v6217_v20, %v9818_v36  ;;  %v6440_v18 = vmul.f32 %v6217_v20, %v9819_v37 }
 0x124   : > { %v6444_v50 = vmul.f32 %v6217_v20, %v9820_v8  ;;  %v6448_v14 = vmul.f32 %v6217_v20, %v9821_v54  ;;  %v1759_v46 = vrot.slane %v6276_v5, 2  ;;  %v1761_v36 = vrot.slane %v6280_v11, 2 }
 0x125   : > { %v1763_v37 = vrot.slane %v6284_v52, 2  ;;  %v6459_v8 = vsel %vm1752_vm2, %v1754_v13, %v1756_v1  ;;  %v1768_v20 = vrot.slane %v6296_v27, 2  ;;  %v1771_v5 = vrot.slane %v6304_v0, 2 }
 0x126   : > { %v1774_v54 = vrot.slane %v6312_v44, 2  ;;  %v1776_v11 = vrot.slane %v6316_v16, 2  ;;  %v1778_v52 = vrot.slane %v6320_v35, 2  ;;  %v1781_v13 = vrot.slane %v6328_v43, 2 }
 0x127   : > { %v1783_v1 = vrot.slane %v6332_v26, 2  ;;  %v1786_v27 = vrot.slane %v6340_v23, 2  ;;  %v1789_v0 = vrot.slane %v6348_v12, 2  ;;  %v1760_v59 = vsel %vm1752_vm2, %v1758_v9, %v1759_v46 }
 0x128   : > { %v1791_v44 = vrot.slane %v6352_v39, 2  ;;  %v1793_v16 = vrot.slane %v6356_v2, 2  ;;  %v1794_v35 = vrot.slane %v6360_v51, 2  ;;  %v1762_v43 = vsel %vm1752_vm2, %v1759_v46, %v1761_v36 }
 0x129   : > { %v1765_v26 = vsel %vm1752_vm2, %v1763_v37, %v1764_v49  ;;  %v1770_v23 = vsel %vm1752_vm2, %v1768_v20, %v1769_v33  ;;  %v1772_v24 = vsel %vm1752_vm2, %v1769_v33, %v1771_v5  ;;  %v1775_v12 = vsel %vm1752_vm2, %v1773_v40, %v1774_v54 }
 0x12a   : > { %v1777_v9 = vsel %vm1752_vm2, %v1774_v54, %v1776_v11  ;;  %v1780_v39 = vsel %vm1752_vm2, %v1778_v52, %v1779_v31  ;;  %v1782_v2 = vsel %vm1752_vm2, %v1779_v31, %v1781_v13  ;;  %v1785_v51 = vsel %vm1752_vm2, %v1783_v1, %v1784_v58 }
 0x12b   : > { %v1787_v46 = vsel %vm1752_vm2, %v1784_v58, %v1786_v27  ;;  %v1790_v37 = vsel %vm1752_vm2, %v1788_v6, %v1789_v0  ;;  %v1792_v17 = vsel %vm1752_vm2, %v1789_v0, %v1791_v44  ;;  %v1795_v49 = vsel %vm1752_vm2, %v1793_v16, %v1794_v35 }
 0x12c   : > { %v1796_v10 = vrot.slane %v6364_v21, 2  ;;  %v1798_v36 = vrot.slane %v6368_v4, 2  ;;  %v1799_v54 = vrot.slane %v6372_v15, 2  ;;  %v1801_v20 = vrot.slane %v6376_v32, 2 }
 0x12d   : > { %v1803_v33 = vrot.slane %v6380_v45, 2  ;;  %v1804_v5 = vrot.slane %v6384_v47, 2  ;;  %v1806_v40 = vrot.slane %v6388_v56, 2  ;;  %v1808_v11 = vrot.slane %v6392_v7, 2 }
 0x12e   : > { %v1809_v52 = vrot.slane %v6396_v53, 2  ;;  %v1811_v31 = vrot.slane %v6400_v29, 2  ;;  %v1813_v21 = vrot.slane %v6404_v28, 2  ;;  %v1814_v4 = vrot.slane %v6408_v30, 2 }
 0x12f   : > { %v1816_v15 = vrot.slane %v6412_v25, 2  ;;  %v1818_v32 = vrot.slane %v6416_v61, 2  ;;  %v1819_v45 = vrot.slane %v6420_v22, 2  ;;  %v1821_v47 = vrot.slane %v6424_v34, 2 }
 0x130   : > { %v1823_v56 = vrot.slane %v6428_v55, 2  ;;  %v1824_v7 = vrot.slane %v6432_v38, 2  ;;  %v1797_v53 = vsel %vm1752_vm2, %v1794_v35, %v1796_v10  ;;  %v1826_v29 = vrot.slane %v6436_v41, 2 }
 0x131   : > { %v1828_v28 = vrot.slane %v6440_v18, 2  ;;  %v1829_v30 = vrot.slane %v6444_v50, 2  ;;  %v1800_v25 = vsel %vm1752_vm2, %v1798_v36, %v1799_v54  ;;  %v1802_v61 = vsel %vm1752_vm2, %v1799_v54, %v1801_v20  ;;  %v9823_v54 = vld [vmem:[#allocation63_spill] sm:$0xff] }
 0x132   : > { %v1805_v22 = vsel %vm1752_vm2, %v1803_v33, %v1804_v5  ;;  %v1831_v34 = vrot.slane %v6448_v14, 2  ;;  %v1807_v55 = vsel %vm1752_vm2, %v1804_v5, %v1806_v40  ;;  %v1810_v38 = vsel %vm1752_vm2, %v1808_v11, %v1809_v52 }
 0x133   : > { %v1812_v13 = vsel %vm1752_vm2, %v1809_v52, %v1811_v31  ;;  %v1815_v41 = vsel %vm1752_vm2, %v1813_v21, %v1814_v4  ;;  %v1817_v18 = vsel %vm1752_vm2, %v1814_v4, %v1816_v15  ;;  %v1820_v50 = vsel %vm1752_vm2, %v1818_v32, %v1819_v45  ;;  %v9853_v32 = vld [vmem:[#allocation77_spill] sm:$0xff] }
 0x134   : > { %v1822_v1 = vsel %vm1752_vm2, %v1819_v45, %v1821_v47  ;;  %v1825_v58 = vsel %vm1752_vm2, %v1823_v56, %v1824_v7  ;;  %v1827_v27 = vsel %vm1752_vm2, %v1824_v7, %v1826_v29  ;;  %v1830_v14 = vsel %vm1752_vm2, %v1828_v28, %v1829_v30  ;;  %v9855_v47 = vld [vmem:[#allocation78_spill] sm:$0xff]  ;;  %v9857_v7 = vld [vmem:[#allocation56_spill] sm:$0xff]  ;;  %v9859_v29 = vld [vmem:[#allocation79_spill] sm:$0xff] }
 0x135   : > { %v6532_v6 = vadd.f32 %v6453_v48, %v6163_v19  ;;  %v6536_v0 = vadd.f32 %v6459_v8, %v6167_v62  ;;  %v1832_v44 = vsel %vm1752_vm2, %v1829_v30, %v1831_v34  ;;  %v6540_v16 = vadd.f32 %v1760_v59, %v6170_v42  ;;  %v9822_v19 = vld [vmem:[#allocation62_spill] sm:$0xff]  ;;  %v9825_v8 = vld [vmem:[#allocation64_spill] sm:$0xff]  ;;  %v9827_v42 = vld [vmem:[#allocation65_spill] sm:$0xff] }
 0x136   : > { %v6543_v35 = vadd.f32 %v1762_v43, %v6173_v3  ;;  %v6546_v10 = vadd.f32 %v1765_v26, %v6176_v63  ;;  %v6549_v36 = vadd.f32 %v1767_v57, %v6179_v60  ;;  %v6552_v48 = vadd.f32 %v1770_v23, %v9822_v19  ;;  %v9829_v3 = vld [vmem:[#allocation71_spill] sm:$0xff]  ;;  %v9831_v63 = vld [vmem:[#allocation66_spill] sm:$0xff]  ;;  %v9835_v23 = vld [vmem:[#allocation68_spill] sm:$0xff] }
 0x137   : > { %v6555_v62 = vadd.f32 %v1772_v24, %v9823_v54  ;;  %v6558_v20 = vadd.f32 %v1775_v12, %v9825_v8  ;;  %v6561_v59 = vadd.f32 %v1777_v9, %v9827_v42  ;;  %v6564_v43 = vadd.f32 %v1780_v39, %v9829_v3  ;;  %v9833_v60 = vld [vmem:[#allocation67_spill] sm:$0xff]  ;;  %v9837_v24 = vld [vmem:[#allocation69_spill] sm:$0xff]  ;;  %v9839_v12 = vld [vmem:[#allocation70_spill] sm:$0xff] }
 0x138   : > { %v6567_v26 = vadd.f32 %v1782_v2, %v9831_v63  ;;  %v6570_v57 = vadd.f32 %v1785_v51, %v9833_v60  ;;  %v6573_v33 = vadd.f32 %v1787_v46, %v9835_v23  ;;  %v6576_v5 = vadd.f32 %v1790_v37, %v9837_v24  ;;  %v9841_v9 = vld [vmem:[#allocation72_spill] sm:$0xff]  ;;  %v9843_v39 = vld [vmem:[#allocation73_spill] sm:$0xff]  ;;  %v9845_v2 = vld [vmem:[#allocation74_spill] sm:$0xff] }
 0x139   : > { %9824 = vst [vmem:[#allocation60_spill] sm:$0xff] %v6555_v62  ;;  %v6579_v40 = vadd.f32 %v1792_v17, %v9839_v12  ;;  %v6582_v11 = vadd.f32 %v1795_v49, %v9841_v9  ;;  %v6585_v52 = vadd.f32 %v1797_v53, %v9843_v39  ;;  %v6588_v31 = vadd.f32 %v1800_v25, %v9845_v2  ;;  %v9847_v51 = vld [vmem:[#allocation75_spill] sm:$0xff]  ;;  %v4401_v46 = vld [vmem:[%s9219_s3 + $0x4] sm:$0x7]  ;;  %v9849_v17 = vld [vmem:[#allocation76_spill] sm:$0xff] }
 0x13a   : > { %9826 = vst [vmem:[#allocation61_spill] sm:$0xff] %v6558_v20  ;;  %v6591_v21 = vadd.f32 %v1802_v61, %v9847_v51  ;;  %v6596_v37 = vperm.slane %v4401_v46, 2  ;;  %v6599_v4 = vadd.f32 %v1805_v22, %v9849_v17  ;;  %v9851_v49 = vld [vmem:[#allocation57_spill] sm:$0xff]  ;;  %v6605_v45 = vadd.f32 %v1810_v38, %v9853_v32  ;;  %v9861_v30 = vld [vmem:[#allocation80_spill] sm:$0xff]  ;;  %v9865_v34 = vld [vmem:[#allocation82_spill] sm:$0xff] }
 0x13b   : > { %9828 = vst [vmem:[#allocation19_spill] sm:$0xff] %v6561_v59  ;;  %v6602_v15 = vadd.f32 %v1807_v55, %v9851_v49  ;;  %v6608_v56 = vadd.f32 %v1812_v13, %v9855_v47  ;;  %v6611_v53 = vadd.f32 %v1815_v41, %v9857_v7  ;;  %v6614_v28 = vadd.f32 %v1817_v18, %v9859_v29  ;;  %v9863_v61 = vld [vmem:[#allocation81_spill] sm:$0xff]  ;;  %v9867_v38 = vld [vmem:[#allocation83_spill] sm:$0xff]  ;;  %v9869_v13 = vld [vmem:[#allocation58_spill] sm:$0xff] }
 0x13c   : > { %9830 = vst [vmem:[#allocation2_spill] sm:$0xff] %v6564_v43  ;;  %v6617_v25 = vadd.f32 %v1820_v50, %v9861_v30  ;;  %v6620_v22 = vadd.f32 %v1822_v1, %v9863_v61  ;;  %v6623_v55 = vadd.f32 %v1825_v58, %v9865_v34  ;;  %v6626_v19 = vadd.f32 %v1827_v27, %v9867_v38  ;;  %v9871_v41 = vld [vmem:[#allocation59_spill] sm:$0xff]  ;;  %v9873_v18 = vld [vmem:[#allocation21_spill] sm:$0xff]  ;;  %v9876_v58 = vld [vmem:[#allocation22_spill] sm:$0xff] }
 0x13d   : > { %9832 = vst [vmem:[#allocation38_spill] sm:$0xff] %v6567_v26  ;;  %v6629_v54 = vadd.f32 %v1830_v14, %v9869_v13  ;;  %v6632_v8 = vadd.f32 %v1832_v44, %v9871_v41  ;;  %v1898_v42 = vmul.f32 %v6596_v37, %v9873_v18  ;;  %v9874_v50 = vld [vmem:[#allocation3_spill] sm:$0xff]  ;;  %v1901_v60 = vmul.f32 %v6596_v37, %v9876_v58  ;;  %v9877_v27 = vld [vmem:[#allocation4_spill] sm:$0xff]  ;;  %v9880_v9 = vld [vmem:[#allocation5_spill] sm:$0xff] }
 0x13e   : > { %9834 = vst [vmem:[#allocation62_spill] sm:$0xff] %v6570_v57  ;;  %v1899_v3 = vmul.f32 %v6596_v37, %v9874_v50  ;;  %v9875_v1 = vld [vmem:[#allocation39_spill] sm:$0xff]  ;;  %v1902_v23 = vmul.f32 %v6596_v37, %v9877_v27  ;;  %v9878_v14 = vld [vmem:[#allocation40_spill] sm:$0xff]  ;;  %v6652_v39 = vmul.f32 %v6596_v37, %v9880_v9  ;;  %v9881_v2 = vld [vmem:[#allocation41_spill] sm:$0xff] }
 0x13f   : > { %9836 = vst [vmem:[#allocation63_spill] sm:$0xff] %v6573_v33  ;;  %v1900_v63 = vmul.f32 %v6596_v37, %v9875_v1  ;;  %v1903_v24 = vmul.f32 %v6596_v37, %v9878_v14  ;;  %v9879_v44 = vld [vmem:[#allocation23_spill] sm:$0xff]  ;;  %v6656_v51 = vmul.f32 %v6596_v37, %v9881_v2  ;;  %v9882_v46 = vld [vmem:[#allocation24_spill] sm:$0xff]  ;;  %v9883_v49 = vld [vmem:[#allocation6_spill] sm:$0xff] }
 0x140   : > { %9838 = vst [vmem:[#allocation64_spill] sm:$0xff] %v6576_v5  ;;  %v6648_v12 = vmul.f32 %v6596_v37, %v9879_v44  ;;  %v6660_v17 = vmul.f32 %v6596_v37, %v9882_v46  ;;  %v6664_v32 = vmul.f32 %v6596_v37, %v9883_v49  ;;  %v9884_v47 = vld [vmem:[#allocation42_spill] sm:$0xff]  ;;  %v9885_v29 = vld [vmem:[#allocation25_spill] sm:$0xff]  ;;  %v9886_v61 = vld [vmem:[#allocation7_spill] sm:$0xff]  ;;  %v2000_v57 = vrot.slane %v1902_v23, 2 }
 0x141   : > { %9840 = vst [vmem:[#allocation65_spill] sm:$0xff] %v6579_v40  ;;  %v6668_v7 = vmul.f32 %v6596_v37, %v9884_v47  ;;  %v6672_v30 = vmul.f32 %v6596_v37, %v9885_v29  ;;  %v6676_v34 = vmul.f32 %v6596_v37, %v9886_v61  ;;  %v9887_v38 = vld [vmem:[#allocation43_spill] sm:$0xff]  ;;  %v9888_v41 = vld [vmem:[#allocation26_spill] sm:$0xff]  ;;  %v9889_v50 = vld [vmem:[#allocation8_spill] sm:$0xff]  ;;  %v1995_v40 = vrot.slane %v1899_v3, 2 }
 0x142   : > { %9842 = vst [vmem:[#allocation71_spill] sm:$0xff] %v6582_v11  ;;  %v6680_v13 = vmul.f32 %v6596_v37, %v9887_v38  ;;  %v6684_v18 = vmul.f32 %v6596_v37, %v9888_v41  ;;  %v6688_v1 = vmul.f32 %v6596_v37, %v9889_v50  ;;  %v9891_v47 = vld [vmem:[#allocation27_spill] sm:$0xff]  ;;  %v9892_v49 = vld [vmem:[#allocation9_spill] sm:$0xff]  ;;  %v9894_v2 = vld [vmem:[#allocation28_spill] sm:$0xff]  ;;  %v1994_v11 = vrot.slane %v1898_v42, 2 }
 0x143   : > { %9844 = vst [vmem:[#allocation66_spill] sm:$0xff] %v6585_v52  ;;  %v6696_v61 = vmul.f32 %v6596_v37, %v9891_v47  ;;  %v6700_v38 = vmul.f32 %v6596_v37, %v9892_v49  ;;  %v9893_v46 = vld [vmem:[#allocation45_spill] sm:$0xff]  ;;  %v6708_v50 = vmul.f32 %v6596_v37, %v9894_v2  ;;  %v9895_v9 = vld [vmem:[#allocation10_spill] sm:$0xff]  ;;  %v9898_v27 = vld [vmem:[#allocation11_spill] sm:$0xff]  ;;  %v2002_v26 = vrot.slane %v1903_v24, 2 }
 0x144   : > { %9846 = vst [vmem:[#allocation67_spill] sm:$0xff] %v6588_v31  ;;  %v6704_v41 = vmul.f32 %v6596_v37, %v9893_v46  ;;  %v9896_v44 = vld [vmem:[#allocation46_spill] sm:$0xff]  ;;  %v9897_v14 = vld [vmem:[#allocation29_spill] sm:$0xff]  ;;  %v6724_v46 = vmul.f32 %v6596_v37, %v9898_v27  ;;  %v9899_v58 = vld [vmem:[#allocation47_spill] sm:$0xff]  ;;  %v6817_v20 = vsel %vm1752_vm2, %v1994_v11, %v1995_v40  ;;  %v2009_v62 = vrot.slane %v6660_v17, 2 }
 0x145   : > { %9848 = vst [vmem:[#allocation68_spill] sm:$0xff] %v6591_v21  ;;  %v6716_v47 = vmul.f32 %v6596_v37, %v9896_v44  ;;  %v6720_v49 = vmul.f32 %v6596_v37, %v9897_v14  ;;  %v6728_v2 = vmul.f32 %v6596_v37, %v9899_v58  ;;  %v9911_v21 = vld [vmem:[#allocation51_spill] sm:$0xff]  ;;  %v9912_v31 = vld [vmem:[#allocation34_spill] sm:$0xff]  ;;  %v9913_v52 = vld [vmem:[#allocation16_spill] sm:$0xff]  ;;  %v2014_v11 = vrot.slane %v6672_v30, 2 }
 0x146   : > { %9850 = vst [vmem:[#allocation69_spill] sm:$0xff] %v6599_v4  ;;  %v9910_v4 = vld [vmem:[#allocation15_spill] sm:$0xff]  ;;  %v9914_v5 = vld [vmem:[#allocation52_spill] sm:$0xff]  ;;  %v9920_v23 = vld [vmem:[#allocation54_spill] sm:$0xff]  ;;  %v2024_v17 = vrot.slane %v6696_v61, 2 }
 0x147   : > { %9852 = vst [vmem:[#allocation70_spill] sm:$0xff] %v6602_v15  ;;  %v9909_v15 = vld [vmem:[#allocation33_spill] sm:$0xff]  ;;  %v6788_v33 = vmul.f32 %v6596_v37, %v9914_v5  ;;  %v9918_v3 = vld [vmem:[#allocation36_spill] sm:$0xff]  ;;  %v9919_v5 = vld [vmem:[#allocation18_spill] sm:$0xff]  ;;  %v6812_v24 = vmul.f32 %v6596_v37, %v9920_v23  ;;  %v2015_v23 = vrot.slane %v6676_v34, 2  ;;  %v2032_v30 = vrot.slane %v6716_v47, 2 }
 0x148   : > { %9854 = vst [vmem:[#allocation72_spill] sm:$0xff] %v6605_v45  ;;  %v9908_v45 = vld [vmem:[#allocation50_spill] sm:$0xff] }
 0x149   : > { %9856 = vst [vmem:[#allocation73_spill] sm:$0xff] %v6608_v56  ;;  %v9907_v56 = vld [vmem:[#allocation14_spill] sm:$0xff] }
 0x14a   : > { %9858 = vst [vmem:[#allocation74_spill] sm:$0xff] %v6611_v53  ;;  %v9906_v53 = vld [vmem:[#allocation32_spill] sm:$0xff] }
 0x14b   : > { %9860 = vst [vmem:[#allocation75_spill] sm:$0xff] %v6614_v28  ;;  %v9905_v28 = vld [vmem:[#allocation49_spill] sm:$0xff] }
 0x14c   : > { %9862 = vst [vmem:[#allocation76_spill] sm:$0xff] %v6617_v25  ;;  %v9904_v25 = vld [vmem:[#allocation13_spill] sm:$0xff] }
 0x14d   : > { %9864 = vst [vmem:[#allocation57_spill] sm:$0xff] %v6620_v22  ;;  %v9903_v22 = vld [vmem:[#allocation31_spill] sm:$0xff]  ;;  %v6748_v58 = vmul.f32 %v6596_v37, %v9904_v25  ;;  %v6768_v25 = vmul.f32 %v6596_v37, %v9909_v15  ;;  %v1997_v15 = vrot.slane %v1900_v63, 2  ;;  %v6804_v63 = vmul.f32 %v6596_v37, %v9918_v3 }
 0x14e   : > { %9866 = vst [vmem:[#allocation77_spill] sm:$0xff] %v6623_v55  ;;  %v9902_v55 = vld [vmem:[#allocation48_spill] sm:$0xff]  ;;  %v6744_v27 = vmul.f32 %v6596_v37, %v9903_v22  ;;  %v6764_v22 = vmul.f32 %v6596_v37, %v9908_v45  ;;  %v6784_v45 = vmul.f32 %v6596_v37, %v9913_v52  ;;  %v9917_v52 = vld [vmem:[#allocation53_spill] sm:$0xff]  ;;  %v2007_v3 = vrot.slane %v6656_v51, 2 }
 0x14f   : > { %9868 = vst [vmem:[#allocation78_spill] sm:$0xff] %v6626_v19  ;;  %v9901_v19 = vld [vmem:[#allocation12_spill] sm:$0xff]  ;;  %v6740_v14 = vmul.f32 %v6596_v37, %v9902_v55  ;;  %v6760_v55 = vmul.f32 %v6596_v37, %v9907_v56  ;;  %v6780_v56 = vmul.f32 %v6596_v37, %v9912_v31  ;;  %v9916_v31 = vld [vmem:[#allocation17_spill] sm:$0xff]  ;;  %v6800_v42 = vmul.f32 %v6596_v37, %v9917_v52 }
 0x150   : > { %9870 = vst [vmem:[#allocation56_spill] sm:$0xff] %v6629_v54  ;;  %v9900_v54 = vld [vmem:[#allocation30_spill] sm:$0xff]  ;;  %v6736_v44 = vmul.f32 %v6596_v37, %v9901_v19  ;;  %v6756_v19 = vmul.f32 %v6596_v37, %v9906_v53  ;;  %v6776_v53 = vmul.f32 %v6596_v37, %v9911_v21  ;;  %v9915_v21 = vld [vmem:[#allocation35_spill] sm:$0xff]  ;;  %v6796_v59 = vmul.f32 %v6596_v37, %v9916_v31 }
 0x151   : > { %9872 = vst [vmem:[#allocation79_spill] sm:$0xff] %v6632_v8  ;;  %v9890_v8 = vld [vmem:[#allocation44_spill] sm:$0xff]  ;;  %v6792_v43 = vmul.f32 %v6596_v37, %v9915_v21  ;;  %v2004_v21 = vrot.slane %v6648_v12, 2  ;;  %v2005_v31 = vrot.slane %v6652_v39, 2  ;;  %v6820_v52 = vsel %vm1752_vm2, %v1995_v40, %v1997_v15 }
 0x152   : > { %v6692_v29 = vmul.f32 %v6596_v37, %v9890_v8  ;;  %v6712_v8 = vmul.f32 %v6596_v37, %v9895_v9  ;;  %v6732_v9 = vmul.f32 %v6596_v37, %v9900_v54  ;;  %v6752_v54 = vmul.f32 %v6596_v37, %v9905_v28 }
 0x153   : > { %v6772_v28 = vmul.f32 %v6596_v37, %v9910_v4  ;;  %v1999_v4 = vrot.slane %v1901_v60, 2  ;;  %v6808_v60 = vmul.f32 %v6596_v37, %v9919_v5  ;;  %v6828_v37 = vsel %vm1752_vm2, %v2000_v57, %v2002_v26 }
 0x154   : > { %v2010_v12 = vrot.slane %v6664_v32, 2  ;;  %v2012_v39 = vrot.slane %v6668_v7, 2  ;;  %v2017_v40 = vrot.slane %v6680_v13, 2  ;;  %v2019_v15 = vrot.slane %v6684_v18, 2 }
 0x155   : > { %v6825_v5 = vsel %vm1752_vm2, %v1999_v4, %v2000_v57  ;;  %v2020_v51 = vrot.slane %v6688_v1, 2  ;;  %v2022_v4 = vrot.slane %v6692_v29, 2  ;;  %v2025_v26 = vrot.slane %v6700_v38, 2 }
 0x156   : > { %v2027_v57 = vrot.slane %v6704_v41, 2  ;;  %v2029_v32 = vrot.slane %v6708_v50, 2  ;;  %v2030_v7 = vrot.slane %v6712_v8, 2  ;;  %v2006_v34 = vsel %vm1752_vm2, %v2004_v21, %v2005_v31 }
 0x157   : > { %v2008_v13 = vsel %vm1752_vm2, %v2005_v31, %v2007_v3  ;;  %v2034_v18 = vrot.slane %v6720_v49, 2  ;;  %v2035_v29 = vrot.slane %v6724_v46, 2  ;;  %v2011_v61 = vsel %vm1752_vm2, %v2009_v62, %v2010_v12 }
 0x158   : > { %v2013_v38 = vsel %vm1752_vm2, %v2010_v12, %v2012_v39  ;;  %v2016_v41 = vsel %vm1752_vm2, %v2014_v11, %v2015_v23  ;;  %v2037_v50 = vrot.slane %v6728_v2, 2  ;;  %v2018_v8 = vsel %vm1752_vm2, %v2015_v23, %v2017_v40 }
 0x159   : > { %v2021_v47 = vsel %vm1752_vm2, %v2019_v15, %v2020_v51  ;;  %v2023_v21 = vsel %vm1752_vm2, %v2020_v51, %v2022_v4  ;;  %v2026_v31 = vsel %vm1752_vm2, %v2024_v17, %v2025_v26  ;;  %v2028_v49 = vsel %vm1752_vm2, %v2025_v26, %v2027_v57 }
 0x15a   : > { %v2031_v46 = vsel %vm1752_vm2, %v2029_v32, %v2030_v7  ;;  %v2033_v62 = vsel %vm1752_vm2, %v2030_v7, %v2032_v30  ;;  %v2039_v1 = vrot.slane %v6732_v9, 2  ;;  %v2036_v3 = vsel %vm1752_vm2, %v2034_v18, %v2035_v29 }
 0x15b   : > { %v2040_v2 = vrot.slane %v6736_v44, 2  ;;  %v2042_v23 = vrot.slane %v6740_v14, 2  ;;  %v2044_v12 = vrot.slane %v6744_v27, 2  ;;  %v2038_v39 = vsel %vm1752_vm2, %v2035_v29, %v2037_v50 }
 0x15c   : > { %v2045_v11 = vrot.slane %v6748_v58, 2  ;;  %v2047_v40 = vrot.slane %v6752_v54, 2  ;;  %v2049_v15 = vrot.slane %v6756_v19, 2  ;;  %v2050_v51 = vrot.slane %v6760_v55, 2 }
 0x15d   : > { %v2052_v9 = vrot.slane %v6764_v22, 2  ;;  %v2054_v4 = vrot.slane %v6768_v25, 2  ;;  %v2055_v44 = vrot.slane %v6772_v28, 2  ;;  %v2057_v14 = vrot.slane %v6776_v53, 2 }
 0x15e   : > { %v2059_v27 = vrot.slane %v6780_v56, 2  ;;  %v2060_v17 = vrot.slane %v6784_v45, 2  ;;  %v2062_v58 = vrot.slane %v6788_v33, 2  ;;  %v2041_v54 = vsel %vm1752_vm2, %v2039_v1, %v2040_v2 }
 0x15f   : > { %v2064_v19 = vrot.slane %v6792_v43, 2  ;;  %v2065_v55 = vrot.slane %v6796_v59, 2  ;;  %v2067_v22 = vrot.slane %v6800_v42, 2  ;;  %v2043_v25 = vsel %vm1752_vm2, %v2040_v2, %v2042_v23  ;;  %v9924_v2 = vld [vmem:[#allocation61_spill] sm:$0xff] }
 0x160   : > { %v2069_v28 = vrot.slane %v6804_v63, 2  ;;  %v2070_v53 = vrot.slane %v6808_v60, 2  ;;  %v2072_v56 = vrot.slane %v6812_v24, 2  ;;  %v2046_v45 = vsel %vm1752_vm2, %v2044_v12, %v2045_v11 }
 0x161   : > { %v2048_v33 = vsel %vm1752_vm2, %v2045_v11, %v2047_v40  ;;  %v2051_v26 = vsel %vm1752_vm2, %v2049_v15, %v2050_v51  ;;  %v2053_v43 = vsel %vm1752_vm2, %v2050_v51, %v2052_v9  ;;  %v2056_v59 = vsel %vm1752_vm2, %v2054_v4, %v2055_v44 }
 0x162   : > { %v2058_v42 = vsel %vm1752_vm2, %v2055_v44, %v2057_v14  ;;  %v2061_v57 = vsel %vm1752_vm2, %v2059_v27, %v2060_v17  ;;  %v2063_v63 = vsel %vm1752_vm2, %v2060_v17, %v2062_v58  ;;  %v2066_v60 = vsel %vm1752_vm2, %v2064_v19, %v2065_v55  ;;  %v9954_v27 = vld [vmem:[#allocation73_spill] sm:$0xff]  ;;  %v9956_v58 = vld [vmem:[#allocation74_spill] sm:$0xff]  ;;  %v9958_v19 = vld [vmem:[#allocation75_spill] sm:$0xff] }
 0x163   : > { %v2068_v24 = vsel %vm1752_vm2, %v2065_v55, %v2067_v22  ;;  %v6896_v32 = vadd.f32 %v6817_v20, %v6532_v6  ;;  %v6900_v7 = vadd.f32 %v6820_v52, %v6536_v0  ;;  %v2071_v30 = vsel %vm1752_vm2, %v2069_v28, %v2070_v53  ;;  %v9922_v52 = vld [vmem:[#allocation60_spill] sm:$0xff]  ;;  %v9962_v28 = vld [vmem:[#allocation57_spill] sm:$0xff] }
 0x164   : > { %v6904_v18 = vsel %vm1752_vm2, %v2070_v53, %v2072_v56  ;;  %v6908_v29 = vadd.f32 %v6825_v5, %v6540_v16  ;;  %v6912_v50 = vadd.f32 %v6828_v37, %v6543_v35  ;;  %v6915_v6 = vadd.f32 %v2006_v34, %v6546_v10  ;;  %v9926_v16 = vld [vmem:[#allocation19_spill] sm:$0xff]  ;;  %v9928_v35 = vld [vmem:[#allocation2_spill] sm:$0xff]  ;;  %v9960_v22 = vld [vmem:[#allocation76_spill] sm:$0xff] }
 0x165   : > { %9921 = vst [vmem:[#allocation80_spill] sm:$0xff] %v6904_v18  ;;  %v6918_v20 = vadd.f32 %v2008_v13, %v6549_v36  ;;  %v6921_v0 = vadd.f32 %v2011_v61, %v6552_v48  ;;  %v6924_v1 = vadd.f32 %v2013_v38, %v9922_v52  ;;  %v6927_v23 = vadd.f32 %v2016_v41, %v9924_v2  ;;  %v9930_v10 = vld [vmem:[#allocation38_spill] sm:$0xff]  ;;  %v9934_v48 = vld [vmem:[#allocation63_spill] sm:$0xff]  ;;  %v9936_v38 = vld [vmem:[#allocation64_spill] sm:$0xff] }
 0x166   : > { %v6930_v5 = vadd.f32 %v2018_v8, %v9926_v16  ;;  %v6933_v37 = vadd.f32 %v2021_v47, %v9928_v35  ;;  %v6936_v34 = vadd.f32 %v2023_v21, %v9930_v10  ;;  %v9932_v36 = vld [vmem:[#allocation62_spill] sm:$0xff]  ;;  %v6942_v61 = vadd.f32 %v2028_v49, %v9934_v48  ;;  %v9938_v41 = vld [vmem:[#allocation65_spill] sm:$0xff]  ;;  %v9940_v8 = vld [vmem:[#allocation71_spill] sm:$0xff] }
 0x167   : > { %9923 = vst [vmem:[#allocation81_spill] sm:$0xff] %v6924_v1  ;;  %v6939_v13 = vadd.f32 %v2026_v31, %v9932_v36  ;;  %v6945_v12 = vadd.f32 %v2031_v46, %v9936_v38  ;;  %v6948_v11 = vadd.f32 %v2033_v62, %v9938_v41  ;;  %v6951_v40 = vadd.f32 %v2036_v3, %v9940_v8  ;;  %v9942_v47 = vld [vmem:[#allocation66_spill] sm:$0xff]  ;;  %v9944_v21 = vld [vmem:[#allocation67_spill] sm:$0xff]  ;;  %v9946_v46 = vld [vmem:[#allocation68_spill] sm:$0xff] }
 0x168   : > { %9925 = vst [vmem:[#allocation82_spill] sm:$0xff] %v6927_v23  ;;  %v6954_v15 = vadd.f32 %v2038_v39, %v9942_v47  ;;  %v6957_v51 = vadd.f32 %v2041_v54, %v9944_v21  ;;  %v4402_v31 = vld [vmem:[%s9219_s3 + $0x8] sm:$0x7]  ;;  %v6965_v9 = vadd.f32 %v2043_v25, %v9946_v46  ;;  %v9948_v62 = vld [vmem:[#allocation69_spill] sm:$0xff]  ;;  %v9950_v3 = vld [vmem:[#allocation70_spill] sm:$0xff]  ;;  %v6977_v17 = vadd.f32 %v2053_v43, %v9954_v27 }
 0x169   : > { %9927 = vst [vmem:[#allocation83_spill] sm:$0xff] %v6930_v5  ;;  %v6962_v49 = vperm.slane %v4402_v31, 2  ;;  %v6968_v4 = vadd.f32 %v2046_v45, %v9948_v62  ;;  %v6971_v44 = vadd.f32 %v2048_v33, %v9950_v3  ;;  %v9952_v39 = vld [vmem:[#allocation72_spill] sm:$0xff]  ;;  %v6980_v54 = vadd.f32 %v2056_v59, %v9956_v58  ;;  %v9964_v56 = vld [vmem:[#allocation77_spill] sm:$0xff]  ;;  %v9966_v33 = vld [vmem:[#allocation78_spill] sm:$0xff] }
 0x16a   : > { %9929 = vst [vmem:[#allocation58_spill] sm:$0xff] %v6933_v37  ;;  %v6974_v14 = vadd.f32 %v2051_v26, %v9952_v39  ;;  %v6983_v55 = vadd.f32 %v2058_v42, %v9958_v19  ;;  %v6986_v25 = vadd.f32 %v2061_v57, %v9960_v22  ;;  %v6989_v53 = vadd.f32 %v2063_v63, %v9962_v28  ;;  %v9968_v43 = vld [vmem:[#allocation56_spill] sm:$0xff]  ;;  %v9970_v59 = vld [vmem:[#allocation22_spill] sm:$0xff]  ;;  %v9973_v63 = vld [vmem:[#allocation23_spill] sm:$0xff] }
 0x16b   : > { %9931 = vst [vmem:[#allocation59_spill] sm:$0xff] %v6936_v34  ;;  %v6992_v45 = vadd.f32 %v2066_v60, %v9964_v56  ;;  %v6995_v26 = vadd.f32 %v2068_v24, %v9966_v33  ;;  %v6998_v52 = vadd.f32 %v2071_v30, %v9968_v43  ;;  %v2139_v2 = vmul.f32 %v6962_v49, %v9970_v59  ;;  %v9971_v42 = vld [vmem:[#allocation4_spill] sm:$0xff]  ;;  %v9974_v60 = vld [vmem:[#allocation5_spill] sm:$0xff]  ;;  %v9977_v41 = vld [vmem:[#allocation6_spill] sm:$0xff] }
 0x16c   : > { %9933 = vst [vmem:[#allocation21_spill] sm:$0xff] %v6939_v13  ;;  %v2140_v16 = vmul.f32 %v6962_v49, %v9971_v42  ;;  %v9972_v57 = vld [vmem:[#allocation40_spill] sm:$0xff]  ;;  %v2142_v10 = vmul.f32 %v6962_v49, %v9973_v63  ;;  %v2143_v36 = vmul.f32 %v6962_v49, %v9974_v60  ;;  %v9975_v24 = vld [vmem:[#allocation41_spill] sm:$0xff]  ;;  %v7018_v8 = vmul.f32 %v6962_v49, %v9977_v41  ;;  %v9978_v47 = vld [vmem:[#allocation42_spill] sm:$0xff] }
 0x16d   : > { %9935 = vst [vmem:[#allocation3_spill] sm:$0xff] %v6942_v61  ;;  %v2141_v35 = vmul.f32 %v6962_v49, %v9972_v57  ;;  %v2144_v48 = vmul.f32 %v6962_v49, %v9975_v24  ;;  %v9976_v30 = vld [vmem:[#allocation24_spill] sm:$0xff]  ;;  %v7022_v21 = vmul.f32 %v6962_v49, %v9978_v47  ;;  %v9979_v31 = vld [vmem:[#allocation25_spill] sm:$0xff]  ;;  %v9980_v62 = vld [vmem:[#allocation7_spill] sm:$0xff] }
 0x16e   : > { %9937 = vst [vmem:[#allocation39_spill] sm:$0xff] %v6945_v12  ;;  %v7014_v38 = vmul.f32 %v6962_v49, %v9976_v30  ;;  %v7026_v46 = vmul.f32 %v6962_v49, %v9979_v31  ;;  %v7030_v3 = vmul.f32 %v6962_v49, %v9980_v62  ;;  %v9981_v39 = vld [vmem:[#allocation43_spill] sm:$0xff]  ;;  %v9982_v58 = vld [vmem:[#allocation26_spill] sm:$0xff]  ;;  %v9983_v22 = vld [vmem:[#allocation8_spill] sm:$0xff]  ;;  %v2241_v13 = vrot.slane %v2143_v36, 2 }
 0x16f   : > { %9939 = vst [vmem:[#allocation60_spill] sm:$0xff] %v6948_v11  ;;  %v7034_v27 = vmul.f32 %v6962_v49, %v9981_v39  ;;  %v7038_v19 = vmul.f32 %v6962_v49, %v9982_v58  ;;  %v7042_v28 = vmul.f32 %v6962_v49, %v9983_v22  ;;  %v9984_v56 = vld [vmem:[#allocation44_spill] sm:$0xff]  ;;  %v9985_v43 = vld [vmem:[#allocation27_spill] sm:$0xff]  ;;  %v9986_v42 = vld [vmem:[#allocation9_spill] sm:$0xff]  ;;  %v2236_v11 = vrot.slane %v2140_v16, 2 }
 0x170   : > { %9941 = vst [vmem:[#allocation61_spill] sm:$0xff] %v6951_v40  ;;  %v7046_v33 = vmul.f32 %v6962_v49, %v9984_v56  ;;  %v7050_v59 = vmul.f32 %v6962_v49, %v9985_v43  ;;  %v7054_v57 = vmul.f32 %v6962_v49, %v9986_v42  ;;  %v9987_v63 = vld [vmem:[#allocation45_spill] sm:$0xff]  ;;  %v9988_v24 = vld [vmem:[#allocation28_spill] sm:$0xff]  ;;  %v9989_v41 = vld [vmem:[#allocation10_spill] sm:$0xff]  ;;  %v2235_v40 = vrot.slane %v2139_v2, 2 }
 0x171   : > { %9943 = vst [vmem:[#allocation19_spill] sm:$0xff] %v6954_v15  ;;  %v7058_v60 = vmul.f32 %v6962_v49, %v9987_v63  ;;  %v7062_v30 = vmul.f32 %v6962_v49, %v9988_v24  ;;  %v7066_v47 = vmul.f32 %v6962_v49, %v9989_v41  ;;  %v9990_v31 = vld [vmem:[#allocation46_spill] sm:$0xff]  ;;  %v9991_v39 = vld [vmem:[#allocation29_spill] sm:$0xff]  ;;  %v9992_v22 = vld [vmem:[#allocation11_spill] sm:$0xff]  ;;  %v2243_v34 = vrot.slane %v2144_v48, 2 }
 0x172   : > { %9945 = vst [vmem:[#allocation2_spill] sm:$0xff] %v6957_v51  ;;  %v7070_v62 = vmul.f32 %v6962_v49, %v9990_v31  ;;  %v7074_v58 = vmul.f32 %v6962_v49, %v9991_v39  ;;  %v7078_v56 = vmul.f32 %v6962_v49, %v9992_v22  ;;  %v9993_v43 = vld [vmem:[#allocation47_spill] sm:$0xff]  ;;  %v9994_v63 = vld [vmem:[#allocation30_spill] sm:$0xff]  ;;  %v9995_v41 = vld [vmem:[#allocation12_spill] sm:$0xff]  ;;  %v7183_v23 = vsel %vm1752_vm2, %v2235_v40, %v2236_v11 }
 0x173   : > { %9947 = vst [vmem:[#allocation38_spill] sm:$0xff] %v6965_v9  ;;  %v7082_v42 = vmul.f32 %v6962_v49, %v9993_v43  ;;  %v7086_v24 = vmul.f32 %v6962_v49, %v9994_v63  ;;  %v7090_v31 = vmul.f32 %v6962_v49, %v9995_v41  ;;  %v9996_v18 = vld [vmem:[#allocation48_spill] sm:$0xff]  ;;  %v10009_v51 = vld [vmem:[#allocation35_spill] sm:$0xff]  ;;  %v10010_v15 = vld [vmem:[#allocation17_spill] sm:$0xff]  ;;  %v2250_v1 = vrot.slane %v7026_v46, 2 }
 0x174   : > { %9949 = vst [vmem:[#allocation62_spill] sm:$0xff] %v6968_v4  ;;  %v7094_v39 = vmul.f32 %v6962_v49, %v9996_v18  ;;  %v10007_v4 = vld [vmem:[#allocation16_spill] sm:$0xff]  ;;  %v10011_v12 = vld [vmem:[#allocation53_spill] sm:$0xff]  ;;  %v10017_v36 = vld [vmem:[#allocation55_spill] sm:$0xff]  ;;  %v2255_v40 = vrot.slane %v7038_v19, 2  ;;  %v2261_v46 = vrot.slane %v7054_v57, 2 }
 0x175   : > { %9951 = vst [vmem:[#allocation63_spill] sm:$0xff] %v6971_v44  ;;  %v10006_v44 = vld [vmem:[#allocation34_spill] sm:$0xff]  ;;  %v10008_v9 = vld [vmem:[#allocation52_spill] sm:$0xff]  ;;  %v7154_v61 = vmul.f32 %v6962_v49, %v10011_v12  ;;  %v10015_v16 = vld [vmem:[#allocation37_spill] sm:$0xff]  ;;  %v7178_v48 = vmul.f32 %v6962_v49, %v10017_v36  ;;  %v2256_v36 = vrot.slane %v7042_v28, 2  ;;  %v2273_v19 = vrot.slane %v7082_v42, 2 }
 0x176   : > { %9953 = vst [vmem:[#allocation64_spill] sm:$0xff] %v6974_v14  ;;  %v10005_v14 = vld [vmem:[#allocation51_spill] sm:$0xff]  ;;  %v10016_v12 = vld [vmem:[#allocation20_spill] sm:$0xff]  ;;  %v2276_v57 = vrot.slane %v7090_v31, 2 }
 0x177   : > { %9955 = vst [vmem:[#allocation65_spill] sm:$0xff] %v6977_v17  ;;  %v10004_v17 = vld [vmem:[#allocation15_spill] sm:$0xff] }
 0x178   : > { %9957 = vst [vmem:[#allocation71_spill] sm:$0xff] %v6980_v54  ;;  %v10003_v54 = vld [vmem:[#allocation33_spill] sm:$0xff] }
 0x179   : > { %9959 = vst [vmem:[#allocation66_spill] sm:$0xff] %v6983_v55  ;;  %v10002_v55 = vld [vmem:[#allocation50_spill] sm:$0xff] }
 0x17a   : > { %9961 = vst [vmem:[#allocation67_spill] sm:$0xff] %v6986_v25  ;;  %v10001_v25 = vld [vmem:[#allocation14_spill] sm:$0xff] }
 0x17b   : > { %9963 = vst [vmem:[#allocation68_spill] sm:$0xff] %v6989_v53  ;;  %v10000_v53 = vld [vmem:[#allocation32_spill] sm:$0xff]  ;;  %v7114_v18 = vmul.f32 %v6962_v49, %v10001_v25  ;;  %v7134_v25 = vmul.f32 %v6962_v49, %v10006_v44  ;;  %v2238_v44 = vrot.slane %v2141_v35, 2  ;;  %v7170_v35 = vmul.f32 %v6962_v49, %v10015_v16 }
 0x17c   : > { %9965 = vst [vmem:[#allocation69_spill] sm:$0xff] %v6992_v45  ;;  %v9999_v45 = vld [vmem:[#allocation49_spill] sm:$0xff]  ;;  %v7110_v41 = vmul.f32 %v6962_v49, %v10000_v53  ;;  %v7130_v53 = vmul.f32 %v6962_v49, %v10005_v14  ;;  %v7150_v14 = vmul.f32 %v6962_v49, %v10010_v15  ;;  %v10014_v15 = vld [vmem:[#allocation54_spill] sm:$0xff]  ;;  %v2248_v16 = vrot.slane %v7022_v21, 2 }
 0x17d   : > { %9967 = vst [vmem:[#allocation70_spill] sm:$0xff] %v6995_v26  ;;  %v9998_v26 = vld [vmem:[#allocation13_spill] sm:$0xff]  ;;  %v7106_v63 = vmul.f32 %v6962_v49, %v9999_v45  ;;  %v7126_v45 = vmul.f32 %v6962_v49, %v10004_v17  ;;  %v7146_v17 = vmul.f32 %v6962_v49, %v10009_v51  ;;  %v10013_v51 = vld [vmem:[#allocation18_spill] sm:$0xff]  ;;  %v7166_v2 = vmul.f32 %v6962_v49, %v10014_v15 }
 0x17e   : > { %9969 = vst [vmem:[#allocation72_spill] sm:$0xff] %v6998_v52  ;;  %v9997_v52 = vld [vmem:[#allocation31_spill] sm:$0xff]  ;;  %v7102_v43 = vmul.f32 %v6962_v49, %v9998_v26  ;;  %v7122_v26 = vmul.f32 %v6962_v49, %v10003_v54  ;;  %v7142_v54 = vmul.f32 %v6962_v49, %v10008_v9  ;;  %v10012_v9 = vld [vmem:[#allocation36_spill] sm:$0xff]  ;;  %v7162_v5 = vmul.f32 %v6962_v49, %v10013_v51 }
 0x17f   : > { %v7098_v22 = vmul.f32 %v6962_v49, %v9997_v52  ;;  %v7118_v52 = vmul.f32 %v6962_v49, %v10002_v55  ;;  %v7138_v55 = vmul.f32 %v6962_v49, %v10007_v4  ;;  %v2240_v4 = vrot.slane %v2142_v10, 2 }
 0x180   : > { %v7158_v37 = vmul.f32 %v6962_v49, %v10012_v9  ;;  %v7174_v10 = vmul.f32 %v6962_v49, %v10016_v12  ;;  %v2245_v9 = vrot.slane %v7014_v38, 2  ;;  %v2246_v51 = vrot.slane %v7018_v8, 2 }
 0x181   : > { %v7186_v15 = vsel %vm1752_vm2, %v2236_v11, %v2238_v44  ;;  %v7191_v12 = vsel %vm1752_vm2, %v2240_v4, %v2241_v13  ;;  %v7194_v49 = vsel %vm1752_vm2, %v2241_v13, %v2243_v34  ;;  %v2251_v38 = vrot.slane %v7030_v3, 2 }
 0x182   : > { %v2253_v8 = vrot.slane %v7034_v27, 2  ;;  %v2258_v11 = vrot.slane %v7046_v33, 2  ;;  %v2260_v21 = vrot.slane %v7050_v59, 2  ;;  %v2263_v44 = vrot.slane %v7058_v60, 2 }
 0x183   : > { %v2265_v4 = vrot.slane %v7062_v30, 2  ;;  %v2266_v34 = vrot.slane %v7066_v47, 2  ;;  %v2268_v13 = vrot.slane %v7070_v62, 2  ;;  %v2270_v3 = vrot.slane %v7074_v58, 2 }
 0x184   : > { %v2271_v27 = vrot.slane %v7078_v56, 2  ;;  %v2247_v28 = vsel %vm1752_vm2, %v2245_v9, %v2246_v51  ;;  %v2249_v33 = vsel %vm1752_vm2, %v2246_v51, %v2248_v16  ;;  %v2275_v59 = vrot.slane %v7086_v24, 2 }
 0x185   : > { %v2252_v60 = vsel %vm1752_vm2, %v2250_v1, %v2251_v38  ;;  %v2254_v30 = vsel %vm1752_vm2, %v2251_v38, %v2253_v8  ;;  %v2257_v47 = vsel %vm1752_vm2, %v2255_v40, %v2256_v36  ;;  %v2278_v62 = vrot.slane %v7094_v39, 2 }
 0x186   : > { %v2259_v58 = vsel %vm1752_vm2, %v2256_v36, %v2258_v11  ;;  %v2262_v56 = vsel %vm1752_vm2, %v2260_v21, %v2261_v46  ;;  %v2264_v42 = vsel %vm1752_vm2, %v2261_v46, %v2263_v44  ;;  %v2267_v9 = vsel %vm1752_vm2, %v2265_v4, %v2266_v34 }
 0x187   : > { %v2269_v24 = vsel %vm1752_vm2, %v2266_v34, %v2268_v13  ;;  %v2272_v31 = vsel %vm1752_vm2, %v2270_v3, %v2271_v27  ;;  %v2274_v1 = vsel %vm1752_vm2, %v2271_v27, %v2273_v19  ;;  %v2280_v51 = vrot.slane %v7098_v22, 2 }
 0x188   : > { %v2277_v16 = vsel %vm1752_vm2, %v2275_v59, %v2276_v57  ;;  %v2281_v39 = vrot.slane %v7102_v43, 2  ;;  %v2283_v38 = vrot.slane %v7106_v63, 2  ;;  %v2285_v8 = vrot.slane %v7110_v41, 2 }
 0x189   : > { %v2279_v40 = vsel %vm1752_vm2, %v2276_v57, %v2278_v62  ;;  %v2286_v36 = vrot.slane %v7114_v18, 2  ;;  %v2288_v11 = vrot.slane %v7118_v52, 2  ;;  %v2290_v21 = vrot.slane %v7122_v26, 2 }
 0x18a   : > { %v2291_v46 = vrot.slane %v7126_v45, 2  ;;  %v2293_v22 = vrot.slane %v7130_v53, 2  ;;  %v2295_v44 = vrot.slane %v7134_v25, 2  ;;  %v2296_v43 = vrot.slane %v7138_v55, 2 }
 0x18b   : > { %v2298_v63 = vrot.slane %v7142_v54, 2  ;;  %v2300_v41 = vrot.slane %v7146_v17, 2  ;;  %v2301_v4 = vrot.slane %v7150_v14, 2  ;;  %v2303_v18 = vrot.slane %v7154_v61, 2 }
 0x18c   : > { %v2282_v52 = vsel %vm1752_vm2, %v2280_v51, %v2281_v39  ;;  %v2305_v26 = vrot.slane %v7158_v37, 2  ;;  %v2306_v45 = vrot.slane %v7162_v5, 2  ;;  %v2308_v53 = vrot.slane %v7166_v2, 2 }
 0x18d   : > { %v2284_v25 = vsel %vm1752_vm2, %v2281_v39, %v2283_v38  ;;  %v2287_v55 = vsel %vm1752_vm2, %v2285_v8, %v2286_v36  ;;  %v2310_v54 = vrot.slane %v7170_v35, 2  ;;  %v9314_v17 = vrot.slane %v7174_v10, 2 }
 0x18e   : > { %v2289_v14 = vsel %vm1752_vm2, %v2286_v36, %v2288_v11  ;;  %v2292_v61 = vsel %vm1752_vm2, %v2290_v21, %v2291_v46  ;;  %v2294_v34 = vsel %vm1752_vm2, %v2291_v46, %v2293_v22  ;;  %v2297_v37 = vsel %vm1752_vm2, %v2295_v44, %v2296_v43  ;;  %v10019_v36 = vld [vmem:[#allocation82_spill] sm:$0xff]  ;;  %v10022_v22 = vld [vmem:[#allocation59_spill] sm:$0xff] }
 0x18f   : > { %v2299_v5 = vsel %vm1752_vm2, %v2296_v43, %v2298_v63  ;;  %v2302_v2 = vsel %vm1752_vm2, %v2300_v41, %v2301_v4  ;;  %v2304_v13 = vsel %vm1752_vm2, %v2301_v4, %v2303_v18  ;;  %v2307_v35 = vsel %vm1752_vm2, %v2305_v26, %v2306_v45  ;;  %v10021_v21 = vld [vmem:[#allocation58_spill] sm:$0xff]  ;;  %v10024_v43 = vld [vmem:[#allocation3_spill] sm:$0xff] }
 0x190   : > { %v2309_v27 = vsel %vm1752_vm2, %v2306_v45, %v2308_v53  ;;  %v2347_v19 = vadd.f32 %v7183_v23, %v6896_v32  ;;  %v2348_v59 = vadd.f32 %v7186_v15, %v6900_v7  ;;  %v2312_v57 = vsel %vm1752_vm2, %v2310_v54, %v9314_v17  ;;  %v10018_v32 = vld [vmem:[#allocation81_spill] sm:$0xff]  ;;  %v10020_v15 = vld [vmem:[#allocation83_spill] sm:$0xff]  ;;  %v10036_v53 = vld [vmem:[#allocation66_spill] sm:$0xff] }
 0x191   : > { %v2349_v62 = vadd.f32 %v7191_v12, %v6908_v29  ;;  %v2350_v51 = vadd.f32 %v7194_v49, %v6912_v50  ;;  %v2351_v39 = vadd.f32 %v2247_v28, %v6915_v6  ;;  %v2352_v38 = vadd.f32 %v2249_v33, %v6918_v20  ;;  %v10023_v29 = vld [vmem:[#allocation21_spill] sm:$0xff]  ;;  %v10025_v49 = vld [vmem:[#allocation39_spill] sm:$0xff]  ;;  %v10026_v28 = vld [vmem:[#allocation60_spill] sm:$0xff] }
 0x192   : > { %v2353_v8 = vadd.f32 %v2252_v60, %v6921_v0  ;;  %v2354_v23 = vadd.f32 %v2254_v30, %v10018_v32  ;;  %v2355_v7 = vadd.f32 %v2257_v47, %v10019_v36  ;;  %v2356_v11 = vadd.f32 %v2259_v58, %v10020_v15  ;;  %v10027_v33 = vld [vmem:[#allocation61_spill] sm:$0xff]  ;;  %v7287_v60 = vld [vmem:[%s9220_s4] ss:$0 sm:$0xff]  ;;  %v10028_v30 = vld [vmem:[#allocation19_spill] sm:$0xff] }
 0x193   : > { %v2357_v46 = vadd.f32 %v2262_v56, %v10021_v21  ;;  %v2358_v44 = vadd.f32 %v2264_v42, %v10022_v22  ;;  %v2359_v12 = vadd.f32 %v2267_v9, %v10023_v29  ;;  %v2360_v50 = vadd.f32 %v2269_v24, %v10024_v43  ;;  %v10029_v58 = vld [vmem:[#allocation2_spill] sm:$0xff]  ;;  %v10032_v24 = vld [vmem:[#allocation63_spill] sm:$0xff]  ;;  %v10038_v15 = vld [vmem:[#allocation68_spill] sm:$0xff] }
 0x194   : > { %v2361_v6 = vadd.f32 %v2272_v31, %v10025_v49  ;;  %v2362_v20 = vadd.f32 %v2274_v1, %v10026_v28  ;;  %v2363_v0 = vadd.f32 %v2277_v16, %v10027_v33  ;;  %v2364_v47 = vadd.f32 %v2279_v40, %v10028_v30  ;;  %v10030_v42 = vld [vmem:[#allocation38_spill] sm:$0xff]  ;;  %v10033_v31 = vld [vmem:[#allocation64_spill] sm:$0xff]  ;;  %v10034_v1 = vld [vmem:[#allocation65_spill] sm:$0xff] }
 0x195   : > { %v2365_v56 = vadd.f32 %v2282_v52, %v10029_v58  ;;  %v2366_v63 = vadd.f32 %v2284_v25, %v10030_v42  ;;  %v10031_v9 = vld [vmem:[#allocation62_spill] sm:$0xff]  ;;  %v2368_v4 = vadd.f32 %v2289_v14, %v10032_v24  ;;  %v2369_v18 = vadd.f32 %v2292_v61, %v10033_v31  ;;  %v10035_v16 = vld [vmem:[#allocation71_spill] sm:$0xff]  ;;  %v10039_v52 = vld [vmem:[#allocation69_spill] sm:$0xff] }
 0x196   : > { %v2367_v41 = vadd.f32 %v2287_v55, %v10031_v9  ;;  %v2370_v26 = vadd.f32 %v2294_v34, %v10034_v1  ;;  %v2371_v45 = vadd.f32 %v2297_v37, %v10035_v16  ;;  %v2372_v54 = vadd.f32 %v2299_v5, %v10036_v53  ;;  %v10037_v32 = vld [vmem:[#allocation67_spill] sm:$0xff]  ;;  %v10040_v25 = vld [vmem:[#allocation70_spill] sm:$0xff]  ;;  %v10041_v14 = vld [vmem:[#allocation72_spill] sm:$0xff] }
 0x197   : > { %v2373_v36 = vadd.f32 %v2302_v2, %v10037_v32  ;;  %v7300_v40 = vadd.f32 %v2304_v13, %v10038_v15  ;;  %v7303_v21 = vadd.f32 %v2307_v35, %v10039_v52  ;;  %v7306_v55 = vadd.f32 %v2309_v27, %v10040_v25 }
 0x198   : > { %v7309_v22 = vadd.f32 %v2312_v57, %v10041_v14  ;;  %v2383_v61 = vadd.f32 %v7287_v60, %v2347_v19  ;;  %v2384_v34 = vadd.f32 %v7287_v60, %v2348_v59  ;;  %v2385_v37 = vadd.f32 %v7287_v60, %v2349_v62 }
 0x199   : > { %v2386_v5 = vadd.f32 %v7287_v60, %v2350_v51  ;;  %v7316_v2 = vadd.f32 %v7287_v60, %v2351_v39  ;;  %v7319_v13 = vadd.f32 %v7287_v60, %v2352_v38  ;;  %v7322_v35 = vadd.f32 %v7287_v60, %v2353_v8 }
 0x19a   : > { %v7325_v27 = vadd.f32 %v7287_v60, %v2354_v23  ;;  %v7328_v19 = vadd.f32 %v7287_v60, %v2355_v7  ;;  %v7331_v59 = vadd.f32 %v7287_v60, %v2356_v11  ;;  %v7334_v57 = vadd.f32 %v7287_v60, %v2357_v46 }
 0x19b   : > { %v7337_v62 = vadd.f32 %v7287_v60, %v2358_v44  ;;  %v7340_v51 = vadd.f32 %v7287_v60, %v2359_v12  ;;  %v7343_v39 = vadd.f32 %v7287_v60, %v2360_v50  ;;  %v7346_v38 = vadd.f32 %v7287_v60, %v2361_v6 }
 0x19c   : > { %v7349_v8 = vadd.f32 %v7287_v60, %v2362_v20  ;;  %v7352_v23 = vadd.f32 %v7287_v60, %v2363_v0  ;;  %v7355_v7 = vadd.f32 %v7287_v60, %v2364_v47  ;;  %v7358_v11 = vadd.f32 %v7287_v60, %v2365_v56 }
 0x19d   : > { %v7361_v46 = vadd.f32 %v7287_v60, %v2366_v63  ;;  %v7364_v44 = vadd.f32 %v7287_v60, %v2367_v41  ;;  %v7367_v29 = vadd.f32 %v7287_v60, %v2368_v4  ;;  %v7370_v12 = vadd.f32 %v7287_v60, %v2369_v18 }
 0x19e   : > { %v7373_v43 = vadd.f32 %v7287_v60, %v2370_v26  ;;  %v7376_v50 = vadd.f32 %v7287_v60, %v2371_v45  ;;  %v7379_v49 = vadd.f32 %v7287_v60, %v2372_v54  ;;  %v7382_v6 = vadd.f32 %v7287_v60, %v2373_v36 }
 0x19f   : > { %v7384_v28 = vmul.f32 0.5, %v2383_v61  ;;  %v7386_v20 = vmul.f32 0.70710677, %v2383_v61  ;;  %v7388_v33 = vmul.f32 0.70710677, %v2384_v34  ;;  %v7390_v0 = vmul.f32 0.5, %v2384_v34 }
 0x1a0   : > { %v7392_v30 = vmul.f32 0.5, %v2385_v37  ;;  %v7394_v47 = vmul.f32 0.70710677, %v2385_v37  ;;  %v7396_v58 = vmul.f32 0.70710677, %v2386_v5  ;;  %v7398_v56 = vmul.f32 0.5, %v2386_v5 }
 0x1a1   : > { %10042 = vst [vmem:[#allocation73_spill] sm:$0xff] %v7384_v28  ;;  %v7401_v42 = vmul.f32 0.5, %v7316_v2  ;;  %v7404_v63 = vmul.f32 0.5, %v7319_v13  ;;  %v7407_v9 = vmul.f32 0.5, %v7322_v35  ;;  %v7410_v41 = vmul.f32 0.5, %v7325_v27 }
 0x1a2   : > { %10043 = vst [vmem:[#allocation74_spill] sm:$0xff] %v7390_v0  ;;  %v7413_v24 = vmul.f32 0.5, %v7328_v19  ;;  %v7416_v4 = vmul.f32 0.5, %v7331_v59  ;;  %v7419_v31 = vmul.f32 0.5, %v7334_v57  ;;  %v7422_v18 = vmul.f32 0.5, %v7337_v62 }
 0x1a3   : > { %10044 = vst [vmem:[#allocation75_spill] sm:$0xff] %v7392_v30  ;;  %v7425_v1 = vmul.f32 0.5, %v7340_v51  ;;  %v2479_v26 = vmul.f32 %v7386_v20, %v7386_v20  ;;  %v2519_v16 = vmul.f32 %v7388_v33, %v7388_v33  ;;  %v7432_v45 = vmul.f32 0.5, %v7343_v39 }
 0x1a4   : > { %10045 = vst [vmem:[#allocation76_spill] sm:$0xff] %v7398_v56  ;;  %v7435_v53 = vmul.f32 0.5, %v7346_v38  ;;  %v2559_v54 = vmul.f32 %v7394_v47, %v7394_v47  ;;  %v2599_v32 = vmul.f32 %v7396_v58, %v7396_v58  ;;  %v7442_v36 = vmul.f32 0.5, %v7349_v8 }
 0x1a5   : > { %10046 = vst [vmem:[#allocation57_spill] sm:$0xff] %v7401_v42  ;;  %v7445_v15 = vmul.f32 0.5, %v7352_v23  ;;  %v7448_v52 = vmul.f32 0.5, %v7355_v7  ;;  %v7451_v25 = vmul.f32 0.5, %v7358_v11  ;;  %v7454_v14 = vmul.f32 0.5, %v7361_v46 }
 0x1a6   : > { %10047 = vst [vmem:[#allocation77_spill] sm:$0xff] %v7404_v63  ;;  %v7457_v61 = vmul.f32 0.5, %v7364_v44  ;;  %v7460_v34 = vmul.f32 0.5, %v7367_v29  ;;  %v7463_v37 = vmul.f32 0.5, %v7370_v12  ;;  %v7466_v5 = vmul.f32 0.5, %v7373_v43 }
 0x1a7   : > { %10048 = vst [vmem:[#allocation78_spill] sm:$0xff] %v7407_v9  ;;  %v7469_v17 = vmul.f32 0.5, %v7376_v50  ;;  %v7471_v3 = vmin.f32 %v2479_v26, 16.0 }
 0x1a8   : > { %10049 = vst [vmem:[#allocation56_spill] sm:$0xff] %v7410_v41 }
 0x1a9   : > { %10050 = vst [vmem:[#allocation22_spill] sm:$0xff] %v7413_v24  ;;  %v2492_v26 = vmul.f32 3.8918573e-05, %v7471_v3 }
 0x1aa   : > { %10051 = vst [vmem:[#allocation4_spill] sm:$0xff] %v7416_v4 }
 0x1ab   : > { %10052 = vst [vmem:[#allocation40_spill] sm:$0xff] %v7419_v31 }
 0x1ac   : > { %10053 = vst [vmem:[#allocation23_spill] sm:$0xff] %v7422_v18 }
 0x1ad   : > { %10054 = vst [vmem:[#allocation5_spill] sm:$0xff] %v7425_v1 }
 0x1ae   : > { %10055 = vst [vmem:[#allocation41_spill] sm:$0xff] %v7432_v45 }
 0x1af   : > { %10056 = vst [vmem:[#allocation24_spill] sm:$0xff] %v7435_v53  ;;  %v7505_v53 = vadd.f32 %v7287_v60, %v7309_v22 }
 0x1b0   : > { %10057 = vst [vmem:[#allocation6_spill] sm:$0xff] %v7442_v36 }
 0x1b1   : > { %10058 = vst [vmem:[#allocation42_spill] sm:$0xff] %v7445_v15  ;;  %v2493_v15 = vadd.f32 0.001143296, %v2492_v26 }
 0x1b2   : > { %10059 = vst [vmem:[#allocation25_spill] sm:$0xff] %v7448_v52  ;;  %v7483_v52 = vmin.f32 %v2599_v32, 16.0 }
 0x1b3   : > { %10060 = vst [vmem:[#allocation7_spill] sm:$0xff] %v7451_v25  ;;  %v7473_v25 = vmin.f32 %v2519_v16, 16.0  ;;  %v2494_v4 = vmul.f32 %v2493_v15, %v7471_v3  ;;  %v10073_v15 = vld [vmem:[#allocation80_spill] sm:$0xff] }
 0x1b4   : > { %10061 = vst [vmem:[#allocation43_spill] sm:$0xff] %v7454_v14  ;;  %v7476_v14 = vmul.f32 0.5, %v7379_v49  ;;  %v2612_v22 = vmul.f32 3.8918573e-05, %v7483_v52  ;;  %v2601_v63 = vmul.f32 2.1237322e-06, %v7483_v52 }
 0x1b5   : > { %10062 = vst [vmem:[#allocation26_spill] sm:$0xff] %v7457_v61  ;;  %v7479_v61 = vmul.f32 0.5, %v7382_v6  ;;  %v2521_v16 = vmul.f32 2.1237322e-06, %v7473_v25 }
 0x1b6   : > { %10063 = vst [vmem:[#allocation8_spill] sm:$0xff] %v7460_v34  ;;  %v7481_v34 = vmin.f32 %v2559_v54, 16.0 }
 0x1b7   : > { %10064 = vst [vmem:[#allocation44_spill] sm:$0xff] %v7463_v37  ;;  %v2522_v36 = vadd.f32 0.00028619796, %v2521_v16 }
 0x1b8   : > { %10065 = vst [vmem:[#allocation27_spill] sm:$0xff] %v7466_v5  ;;  %v7487_v5 = vadd.f32 %v7287_v60, %v7300_v40  ;;  %v2561_v54 = vmul.f32 2.1237322e-06, %v7481_v34  ;;  %v2572_v32 = vmul.f32 3.8918573e-05, %v7481_v34  ;;  %v7501_v40 = vadd.f32 %v7287_v60, %v7306_v55 }
 0x1b9   : > { %10066 = vst [vmem:[#allocation9_spill] sm:$0xff] %v7469_v17  ;;  %v2481_v17 = vmul.f32 2.1237322e-06, %v7471_v3  ;;  %v2523_v55 = vmul.f32 %v2522_v36, %v7473_v25 }
 0x1ba   : > { %10067 = vst [vmem:[#allocation45_spill] sm:$0xff] %v7476_v14  ;;  %v7494_v14 = vadd.f32 %v7287_v60, %v7303_v21  ;;  %v2562_v21 = vadd.f32 0.00028619796, %v2561_v54  ;;  %v2573_v1 = vadd.f32 0.001143296, %v2572_v32  ;;  %v7508_v18 = vmul.f32 0.5, %v7487_v5 }
 0x1bb   : > { %10068 = vst [vmem:[#allocation28_spill] sm:$0xff] %v7479_v61  ;;  %v2532_v61 = vmul.f32 3.8918573e-05, %v7473_v25  ;;  %v2482_v37 = vadd.f32 0.00028619796, %v2481_v17  ;;  %v7521_v54 = vmul.f32 0.5, %v7501_v40 }
 0x1bc   : > { %10069 = vst [vmem:[#allocation10_spill] sm:$0xff] %v7508_v18  ;;  %v2563_v26 = vmul.f32 %v2562_v21, %v7481_v34  ;;  %v2574_v16 = vmul.f32 %v2573_v1, %v7481_v34  ;;  %v10072_v18 = vld [vmem:[#allocation79_spill] sm:$0xff]  ;;  %v2524_v36 = vadd.f32 0.0036580483, %v2523_v55  ;;  %v7526_v21 = vmul.f32 0.5, %v7505_v53 }
 0x1bd   : > { %v2533_v45 = vadd.f32 0.001143296, %v2532_v61  ;;  %v2483_v31 = vmul.f32 %v2482_v37, %v7471_v3  ;;  %v7518_v61 = vmul.f32 0.5, %v7494_v14  ;;  %10071 = vst [vmem:[#allocation29_spill] sm:$0xff] %v7521_v54  ;;  %v2495_v37 = vadd.f32 0.014752088, %v2494_v4 }
 0x1be   : > { %v2137_v24 = vadd.f32 %v10073_v15, %v10072_v18  ;;  %10074 = vst [vmem:[#allocation11_spill] sm:$0xff] %v7526_v21  ;;  %v2564_v9 = vadd.f32 0.0036580483, %v2563_v26  ;;  %v10075_v18 = vrot.slane %v7178_v48, 2  ;;  %v10076_v55 = vrot.slane %v7174_v10, 2 }
 0x1bf   : > { %v2534_v17 = vmul.f32 %v2533_v45, %v7473_v25  ;;  %10070 = vst [vmem:[#allocation46_spill] sm:$0xff] %v7518_v61  ;;  %v2484_v32 = vadd.f32 0.0036580483, %v2483_v31  ;;  %v2575_v45 = vadd.f32 0.014752088, %v2574_v16  ;;  %v2496_v1 = vmul.f32 %v2495_v37, %v7471_v3 }
 0x1c0   : > { %v2613_v31 = vadd.f32 0.001143296, %v2612_v22  ;;  %v7539_v16 = vmul.f32 0.70710677, %v7316_v2  ;;  %v7542_v26 = vmul.f32 0.70710677, %v7319_v13  ;;  %v2565_v48 = vmul.f32 %v2564_v9, %v7481_v34 }
 0x1c1   : > { %v2535_v41 = vadd.f32 0.014752088, %v2534_v17  ;;  %v2485_v61 = vmul.f32 %v2484_v32, %v7471_v3  ;;  %v2576_v4 = vmul.f32 %v2575_v45, %v7481_v34  ;;  %v2314_v17 = vsel %vm1752_vm2, %v10076_v55, %v10075_v18 }
 0x1c2   : > { %v2497_v37 = vadd.f32 0.112945676, %v2496_v1  ;;  %v2525_v32 = vmul.f32 %v2524_v36, %v7473_v25  ;;  %v2614_v45 = vmul.f32 %v2613_v31, %v7483_v52  ;;  %v7547_v22 = vmul.f32 0.70710677, %v7322_v35 }
 0x1c3   : > { %v2536_v54 = vmul.f32 %v2535_v41, %v7473_v25  ;;  %v2577_v41 = vadd.f32 0.112945676, %v2576_v4  ;;  %v2602_v18 = vadd.f32 0.00028619796, %v2601_v63  ;;  %v2486_v2 = vadd.f32 0.05243302, %v2485_v61 }
 0x1c4   : > { %v2498_v10 = vmul.f32 %v2497_v37, %v7471_v3  ;;  %v2615_v1 = vadd.f32 0.014752088, %v2614_v45  ;;  %v2378_v21 = vadd.f32 %v2314_v17, %v2137_v24  ;;  %v7557_v36 = vmul.f32 0.70710677, %v7328_v19 }
 0x1c5   : > { %v2537_v15 = vadd.f32 0.112945676, %v2536_v54  ;;  %v2578_v13 = vmul.f32 %v2577_v41, %v7481_v34  ;;  %v7554_v54 = vmul.f32 0.70710677, %v7325_v27  ;;  %v7560_v4 = vmul.f32 0.70710677, %v7331_v59 }
 0x1c6   : > { %v2499_v35 = vadd.f32 0.4994258, %v2498_v10  ;;  %v2526_v31 = vadd.f32 0.05243302, %v2525_v32  ;;  %v2616_v63 = vmul.f32 %v2615_v1, %v7483_v52  ;;  %v7564_v61 = vmul.f32 0.70710677, %v7334_v57 }
 0x1c7   : > { %v2538_v55 = vmul.f32 %v2537_v15, %v7473_v25  ;;  %v7567_v37 = vmul.f32 0.70710677, %v7337_v62  ;;  %v2579_v24 = vadd.f32 0.4994258, %v2578_v13  ;;  %v2603_v27 = vmul.f32 %v2602_v18, %v7483_v52 }
 0x1c8   : > { %v2487_v19 = vmul.f32 %v2486_v2, %v7471_v3  ;;  %v2500_v17 = vmul.f32 %v2499_v35, %v7471_v3  ;;  %v2566_v15 = vadd.f32 0.05243302, %v2565_v48  ;;  %v2617_v59 = vadd.f32 0.112945676, %v2616_v63 }
 0x1c9   : > { %v2539_v9 = vadd.f32 0.4994258, %v2538_v55  ;;  %v7573_v32 = vmul.f32 0.70710677, %v7340_v51  ;;  %v7576_v41 = vmul.f32 0.70710677, %v7343_v39  ;;  %v2639_v62 = vmul.f32 %v7539_v16, %v7539_v16 }
 0x1ca   : > { %v7582_v45 = vmul.f32 0.70710677, %v7346_v38  ;;  %v7585_v10 = vmul.f32 0.70710677, %v7349_v8  ;;  %v7588_v48 = vmul.f32 0.70710677, %v7352_v23  ;;  %v2527_v51 = vmul.f32 %v2526_v31, %v7473_v25 }
 0x1cb   : > { %v2540_v57 = vmul.f32 %v2539_v9, %v7473_v25  ;;  %v7592_v18 = vmul.f32 0.70710677, %v7355_v7  ;;  %v7595_v39 = vmul.f32 0.70710677, %v7358_v11  ;;  %v2580_v2 = vmul.f32 %v2579_v24, %v7481_v34 }
 0x1cc   : > { %v2604_v55 = vadd.f32 0.0036580483, %v2603_v27  ;;  %v2488_v13 = vadd.f32 0.18741608, %v2487_v19  ;;  %v7598_v38 = vadd.f32 1.0, %v2500_v17  ;;  %v2567_v8 = vmul.f32 %v2566_v15, %v7481_v34 }
 0x1cd   : > { %v2618_v1 = vmul.f32 %v2617_v59, %v7483_v52  ;;  %v7603_v23 = vmul.f32 0.70710677, %v7361_v46  ;;  %v7606_v35 = vmul.f32 0.70710677, %v7364_v44  ;;  %v7608_v7 = vadd.f32 1.0, %v2540_v57 }
 0x1ce   : > { %v7610_v11 = vmin.f32 %v2639_v62, 16.0  ;;  %v2414_v31 = vadd.f32 %v7287_v60, %v2378_v21  ;;  %v7614_v9 = vmul.f32 0.70710677, %v7367_v29  ;;  %v7617_v63 = vmul.f32 0.70710677, %v7370_v12 }
 0x1cf   : > { %v2528_v24 = vadd.f32 0.18741608, %v2527_v51  ;;  %v7620_v27 = vmul.f32 0.70710677, %v7373_v43  ;;  %v7622_v46 = vadd.f32 1.0, %v2580_v2  ;;  %v2605_v44 = vmul.f32 %v2604_v55, %v7483_v52 }
 0x1d0   : > { %v2679_v19 = vmul.f32 %v7542_v26, %v7542_v26  ;;  %v2489_v17 = vmul.f32 %v2488_v13, %v7471_v3  ;;  %4336 = vrcp.f32 %v7598_v38  ;;  %v2568_v60 = vadd.f32 0.18741608, %v2567_v8 }
 0x1d1   : > { %v2619_v29 = vadd.f32 0.4994258, %v2618_v1  ;;  %v7630_v12 = vmul.f32 0.70710677, %v7376_v50  ;;  %4338 = vrcp.f32 %v7608_v7  ;;  %v2641_v43 = vmul.f32 2.1237322e-06, %v7610_v11 }
 0x1d2   : > { %v2652_v21 = vmul.f32 3.8918573e-05, %v7610_v11  ;;  %v7636_v15 = vmul.f32 0.70710677, %v7379_v49  ;;  %v7639_v59 = vmul.f32 0.70710677, %v7382_v6  ;;  %v2529_v3 = vmul.f32 %v2528_v24, %v7473_v25 }
 0x1d3   : > { %v2620_v57 = vmul.f32 %v2619_v29, %v7483_v52  ;;  %v7644_v62 = vmul.f32 0.70710677, %v7487_v5  ;;  %4340 = vrcp.f32 %v7622_v46  ;;  %v2606_v50 = vadd.f32 0.05243302, %v2605_v44 }
 0x1d4   : > { %10077 = vst [vmem:[#allocation47_spill] sm:$0xff] %v7636_v15  ;;  %v7647_v51 = vmin.f32 %v2679_v19, 16.0  ;;  %v7650_v2 = vmul.f32 0.70710677, %v7494_v14  ;;  %v2490_v49 = vadd.f32 1.1283791, %v2489_v17  ;;  %v2569_v55 = vmul.f32 %v2568_v60, %v7481_v34 }
 0x1d5   : > { %10078 = vst [vmem:[#allocation30_spill] sm:$0xff] %v7639_v59  ;;  %v2653_v6 = vadd.f32 0.001143296, %v2652_v21  ;;  %v7654_v13 = vmul.f32 0.70710677, %v7501_v40  ;;  %v7659_v1 = vmul.f32 0.5, %v2414_v31  ;;  %v2607_v40 = vmul.f32 %v2606_v50, %v7483_v52 }
 0x1d6   : > { %10079 = vst [vmem:[#allocation12_spill] sm:$0xff] %v7644_v62  ;;  %v2642_v25 = vadd.f32 0.00028619796, %v2641_v43  ;;  %v2681_v8 = vmul.f32 2.1237322e-06, %v7647_v51  ;;  %v7657_v5 = vpop.eup %4336  ;;  %v7664_v14 = vadd.f32 1.0, %v2620_v57  ;;  %v2719_v17 = vmul.f32 %v7547_v22, %v7547_v22 }
 0x1d7   : > { %10080 = vst [vmem:[#allocation48_spill] sm:$0xff] %v7650_v2  ;;  %v7662_v24 = vmul.f32 0.70710677, %v7505_v53  ;;  %v2530_v44 = vadd.f32 1.1283791, %v2529_v3  ;;  %v7666_v19 = vpop.eup %4338  ;;  %v7675_v60 = vmul.f32 %v7554_v54, %v7554_v54  ;;  %v7678_v29 = vmul.f32 %v2490_v49, %v7386_v20 }
 0x1d8   : > { %10081 = vst [vmem:[#allocation31_spill] sm:$0xff] %v7654_v13  ;;  %v7668_v34 = vmul.f32 0.70710677, %v2414_v31  ;;  %v2511_v53 = vand.u32 2147483647, %v7598_v38  ;;  %v2654_v21 = vmul.f32 %v2653_v6, %v7610_v11  ;;  %v2503_v31 = vmul.f32 %v7657_v5, %v7598_v38 }
 0x1d9   : > { %10082 = vst [vmem:[#allocation13_spill] sm:$0xff] %v7659_v1  ;;  %v2570_v43 = vadd.f32 1.1283791, %v2569_v55  ;;  %v7682_v3 = vpop.eup %4340  ;;  %v2513_v57 = vand.u32 2147483648, %v7598_v38  ;;  %v2643_v50 = vmul.f32 %v2642_v25, %v7610_v11  ;;  %v2682_v1 = vadd.f32 0.00028619796, %v2681_v8 }
 0x1da   : > { %10083 = vst [vmem:[#allocation49_spill] sm:$0xff] %v7662_v24  ;;  %v7689_v42 = vmul.f32 %v2530_v44, %v7388_v33  ;;  %v2543_v20 = vmul.f32 %v7666_v19, %v7608_v7  ;;  %4342 = vrcp.f32 %v7664_v14  ;;  %v2655_v49 = vadd.f32 0.014752088, %v2654_v21 }
 0x1db   : > { %10084 = vst [vmem:[#allocation32_spill] sm:$0xff] %v7668_v34  ;;  %vm2507_vm3 = vweird.f32 %v7598_v38  ;;  %v2551_v55 = vand.u32 2147483647, %v7608_v7  ;;  %v2553_v6 = vand.u32 2147483648, %v7608_v7  ;;  %v2593_v56 = vand.u32 2147483648, %v7622_v46 }
 0x1dc   : > { %v2608_v30 = vadd.f32 0.18741608, %v2607_v40  ;;  %vm2547_vm4 = vweird.f32 %v7608_v7  ;;  %v7700_v33 = vmul.f32 %v2570_v43, %v7394_v47  ;;  %v2583_v25 = vmul.f32 %v7682_v3, %v7622_v46 }
 0x1dd   : > { %v2656_v8 = vmul.f32 %v2655_v49, %v7610_v11  ;;  %v2692_v44 = vmul.f32 3.8918573e-05, %v7647_v51  ;;  %v2504_v21 = vsub.f32 1.0, %v2503_v31  ;;  %v2644_v0 = vadd.f32 0.0036580483, %v2643_v50 }
 0x1de   : > { %v2683_v28 = vmul.f32 %v2682_v1, %v7647_v51  ;;  %v7707_v34 = vmin.f32 %v2719_v17, 16.0  ;;  %v7709_v24 = vor.u32 1.1754944e-38, %v2513_v57  ;;  %v2544_v40 = vsub.f32 1.0, %v2543_v20 }
 0x1df   : > { %vm2587_vm5 = vweird.f32 %v7622_v46  ;;  %v2657_v47 = vadd.f32 0.112945676, %v2656_v8  ;;  %v7712_v43 = vor.u32 1.1754944e-38, %v2553_v6  ;;  %v2591_v13 = vand.u32 2147483647, %v7622_v46 }
 0x1e0   : > { %v7715_v2 = vor.u32 1.1754944e-38, %v2593_v56  ;;  %v2609_v49 = vmul.f32 %v2608_v30, %v7483_v52  ;;  %v7718_v31 = vpop.eup %4342  ;;  %v2584_v50 = vsub.f32 1.0, %v2583_v25  ;;  %v2693_v17 = vadd.f32 0.001143296, %v2692_v44 }
 0x1e1   : > { %v2658_v1 = vmul.f32 %v2657_v47, %v7610_v11  ;;  %v2721_v57 = vmul.f32 2.1237322e-06, %v7707_v34  ;;  %v2505_v20 = vmul.f32 %v7657_v5, %v2504_v21  ;;  %v2645_v8 = vmul.f32 %v2644_v0, %v7610_v11 }
 0x1e2   : > { %v2684_v6 = vadd.f32 0.0036580483, %v2683_v28  ;;  %v2732_v62 = vmul.f32 3.8918573e-05, %v7707_v34  ;;  %vm2508_vm6 = vweird.f32 %v7657_v5  ;;  %v2545_v56 = vmul.f32 %v7666_v19, %v2544_v40 }
 0x1e3   : > { %v2659_v30 = vadd.f32 0.4994258, %v2658_v1  ;;  %v2694_v52 = vmul.f32 %v2693_v17, %v7647_v51  ;;  %vm7728_vm7 = vcmp.eq.f32.partialorder %v2511_v53, 8.507059e+37  ;;  %vm2548_vm8 = vweird.f32 %v7666_v19  ;;  %vm7753_vm12 = vmor %vm2507_vm3, %vm2508_vm6 }
 0x1e4   : > { %vm7733_vm9 = vcmp.eq.f32.partialorder %v2551_v55, 8.507059e+37  ;;  %v2623_v28 = vmul.f32 %v7718_v31, %v7664_v14  ;;  %v2722_v0 = vadd.f32 0.00028619796, %v2721_v57  ;;  %v2733_v21 = vadd.f32 0.001143296, %v2732_v62  ;;  %vm7766_vm13 = vmor %vm2547_vm4, %vm2548_vm8 }
 0x1e5   : > { %v2585_v40 = vmul.f32 %v7682_v3, %v2584_v50  ;;  %vm2588_vm10 = vweird.f32 %v7682_v3  ;;  %vm7741_vm11 = vcmp.eq.f32.partialorder %v2591_v13, 8.507059e+37  ;;  %v2660_v47 = vmul.f32 %v2659_v30, %v7610_v11 }
 0x1e6   : > { %v2695_v1 = vadd.f32 0.014752088, %v2694_v52  ;;  %v2506_v55 = vadd.f32 %v7657_v5, %v2505_v20  ;;  %v2646_v17 = vadd.f32 0.05243302, %v2645_v8  ;;  %v2685_v59 = vmul.f32 %v2684_v6, %v7647_v51  ;;  %vm7784_vm15 = vmor %vm2587_vm5, %vm2588_vm10 }
 0x1e7   : > { %v2734_v15 = vmul.f32 %v2733_v21, %v7707_v34  ;;  %v2546_v13 = vadd.f32 %v7666_v19, %v2545_v56  ;;  %v2631_v50 = vand.u32 2147483647, %v7664_v14  ;;  %v7759_v57 = vadd.f32 1.0, %v2660_v47 }
 0x1e8   : > { %v2696_v20 = vmul.f32 %v2695_v1, %v7647_v51  ;;  %v2624_v38 = vsub.f32 1.0, %v2623_v28  ;;  %v2723_v6 = vmul.f32 %v2722_v0, %v7707_v34  ;;  %v7772_v56 = vmin.f32 %v7675_v60, 16.0 }
 0x1e9   : > { %v2735_v30 = vadd.f32 0.014752088, %v2734_v15  ;;  %v2586_v52 = vadd.f32 %v7682_v3, %v2585_v40  ;;  %v2610_v21 = vadd.f32 1.1283791, %v2609_v49  ;;  %vm2627_vm14 = vweird.f32 %v7664_v14 }
 0x1ea   : > { %v2633_v47 = vand.u32 2147483648, %v7664_v14  ;;  %v2510_v7 = vsel %vm7753_vm12, %v7657_v5, %v2506_v55  ;;  %v2647_v60 = vmul.f32 %v2646_v17, %v7610_v11  ;;  %v2686_v28 = vadd.f32 0.05243302, %v2685_v59 }
 0x1eb   : > { %v2697_v49 = vadd.f32 0.112945676, %v2696_v20  ;;  %v2550_v0 = vsel %vm7766_vm13, %v7666_v19, %v2546_v13  ;;  %4344 = vrcp.f32 %v7759_v57  ;;  %v2736_v5 = vmul.f32 %v2735_v30, %v7707_v34 }
 0x1ec   : > { %v2761_v40 = vmul.f32 2.1237322e-06, %v7772_v56  ;;  %v2625_v46 = vmul.f32 %v7718_v31, %v2624_v38  ;;  %vm7796_vm0 = vcmp.eq.f32.partialorder %v2631_v50, 8.507059e+37  ;;  %v2724_v59 = vadd.f32 0.0036580483, %v2723_v6 }
 0x1ed   : > { %v2698_v55 = vmul.f32 %v2697_v49, %v7647_v51  ;;  %v2772_v17 = vmul.f32 3.8918573e-05, %v7772_v56  ;;  %v2590_v19 = vsel %vm7784_vm15, %v7682_v3, %v2586_v52  ;;  %vm2628_vm1 = vweird.f32 %v7718_v31 }
 0x1ee   : > { %v2737_v62 = vadd.f32 0.112945676, %v2736_v5  ;;  %v2799_v13 = vmul.f32 %v7557_v36, %v7557_v36  ;;  %v2648_v20 = vadd.f32 0.18741608, %v2647_v60  ;;  %v2687_v50 = vmul.f32 %v2686_v28, %v7647_v51  ;;  %vm7828_vm2 = vmor %vm2627_vm14, %vm2628_vm1 }
 0x1ef   : > { %v2699_v8 = vadd.f32 0.4994258, %v2698_v55  ;;  %v2773_v38 = vadd.f32 0.001143296, %v2772_v17  ;;  %v2515_v6 = vsel %vm7728_vm7, %v7709_v24, %v2510_v7  ;;  %v2555_v30 = vsel %vm7733_vm9, %v7712_v43, %v2550_v0 }
 0x1f0   : > { %v2738_v3 = vmul.f32 %v2737_v62, %v7707_v34  ;;  %v2762_v52 = vadd.f32 0.00028619796, %v2761_v40  ;;  %v2595_v15 = vsel %vm7741_vm11, %v7715_v2, %v2590_v19  ;;  %v2626_v60 = vadd.f32 %v7718_v31, %v2625_v46 }
 0x1f1   : > { %v2700_v28 = vmul.f32 %v2699_v8, %v7647_v51  ;;  %v2725_v49 = vmul.f32 %v2724_v59, %v7707_v34  ;;  %v7822_v5 = vpop.eup %4344  ;;  %v2634_v43 = vor.u32 1.1754944e-38, %v2633_v47  ;;  %v2774_v2 = vmul.f32 %v2773_v38, %v7772_v56 }
 0x1f2   : > { %v2739_v25 = vadd.f32 0.4994258, %v2738_v3  ;;  %v7833_v44 = vmin.f32 %v2799_v13, 16.0  ;;  %v7836_v53 = vmul.f32 %v2515_v6, %v7678_v29  ;;  %v2649_v7 = vmul.f32 %v2648_v20, %v7610_v11 }
 0x1f3   : > { %v2688_v0 = vadd.f32 0.18741608, %v2687_v50  ;;  %v7839_v40 = vadd.f32 1.0, %v2700_v28  ;;  %v7842_v14 = vmul.f32 %v2555_v30, %v7689_v42  ;;  %v7845_v46 = vmul.f32 %v2595_v15, %v7700_v33 }
 0x1f4   : > { %v2763_v47 = vmul.f32 %v2762_v52, %v7772_v56  ;;  %v2775_v55 = vadd.f32 0.014752088, %v2774_v2  ;;  %v2630_v59 = vsel %vm7828_vm2, %v7718_v31, %v2626_v60  ;;  %v2663_v29 = vmul.f32 %v7822_v5, %v7759_v57 }
 0x1f5   : > { %v2726_v11 = vadd.f32 0.05243302, %v2725_v49  ;;  %v2740_v17 = vmul.f32 %v2739_v25, %v7707_v34  ;;  %v2611_v19 = vmul.f32 %v2610_v21, %v7396_v58  ;;  %4346 = vrcp.f32 %v7839_v40 }
 0x1f6   : > { %v2801_v42 = vmul.f32 2.1237322e-06, %v7833_v44  ;;  %v2812_v33 = vmul.f32 3.8918573e-05, %v7833_v44  ;;  %v2650_v13 = vadd.f32 1.1283791, %v2649_v7  ;;  %v2689_v20 = vmul.f32 %v2688_v0, %v7647_v51 }
 0x1f7   : > { %v2776_v31 = vmul.f32 %v2775_v55, %v7772_v56  ;;  %v2635_v8 = vsel %vm7796_vm0, %v2634_v43, %v2630_v59  ;;  %v2764_v38 = vadd.f32 0.0036580483, %v2763_v47  ;;  %v2839_v58 = vmul.f32 %v7560_v4, %v7560_v4 }
 0x1f8   : > { %v2664_v6 = vsub.f32 1.0, %v2663_v29  ;;  %v2727_v30 = vmul.f32 %v2726_v11, %v7707_v34  ;;  %v7868_v3 = vadd.f32 1.0, %v2740_v17  ;;  %v2802_v51 = vadd.f32 0.00028619796, %v2801_v42 }
 0x1f9   : > { %v2777_v52 = vadd.f32 0.112945676, %v2776_v31  ;;  %v2813_v15 = vadd.f32 0.001143296, %v2812_v33  ;;  %v7870_v60 = vmul.f32 %v2635_v8, %v2611_v19  ;;  %v7873_v28 = vmul.f32 %v2650_v13, %v7539_v16 }
 0x1fa   : > { %vm2667_vm3 = vweird.f32 %v7759_v57  ;;  %v2690_v1 = vadd.f32 1.1283791, %v2689_v20  ;;  %v2671_v24 = vand.u32 2147483647, %v7759_v57  ;;  %v2765_v43 = vmul.f32 %v2764_v38, %v7772_v56 }
 0x1fb   : > { %v7876_v49 = vpop.eup %4346  ;;  %v2778_v25 = vmul.f32 %v2777_v52, %v7772_v56  ;;  %v7881_v2 = vmin.f32 %v2839_v58, 16.0  ;;  %v2665_v7 = vmul.f32 %v7822_v5, %v2664_v6  ;;  %v2728_v0 = vadd.f32 0.18741608, %v2727_v30 }
 0x1fc   : > { %4348 = vrcp.f32 %v7868_v3  ;;  %v2814_v16 = vmul.f32 %v2813_v15, %v7833_v44  ;;  %v2673_v47 = vand.u32 2147483648, %v7759_v57  ;;  %v2803_v59 = vmul.f32 %v2802_v51, %v7833_v44 }
 0x1fd   : > { %v2779_v55 = vadd.f32 0.4994258, %v2778_v25  ;;  %v2841_v29 = vmul.f32 2.1237322e-06, %v7881_v2  ;;  %vm2668_vm4 = vweird.f32 %v7822_v5  ;;  %v2703_v17 = vmul.f32 %v7876_v49, %v7839_v40 }
 0x1fe   : > { %v2815_v19 = vadd.f32 0.014752088, %v2814_v16  ;;  %vm7893_vm5 = vcmp.eq.f32.partialorder %v2671_v24, 8.507059e+37  ;;  %v2766_v33 = vadd.f32 0.05243302, %v2765_v43  ;;  %v2879_v20 = vmul.f32 %v7564_v61, %v7564_v61  ;;  %vm7906_vm6 = vmor %vm2667_vm3, %vm2668_vm4 }
 0x1ff   : > { %v2780_v13 = vmul.f32 %v2779_v55, %v7772_v56  ;;  %v2666_v31 = vadd.f32 %v7822_v5, %v2665_v7  ;;  %v2729_v8 = vmul.f32 %v2728_v0, %v7707_v34  ;;  %v2852_v58 = vmul.f32 3.8918573e-05, %v7881_v2 }
 0x200   : > { %v2816_v38 = vmul.f32 %v2815_v19, %v7833_v44  ;;  %v7911_v30 = vmul.f32 %v2690_v1, %v7542_v26  ;;  %v2711_v52 = vand.u32 2147483647, %v7839_v40  ;;  %v2804_v51 = vadd.f32 0.0036580483, %v2803_v59 }
 0x201   : > { %v2842_v15 = vadd.f32 0.00028619796, %v2841_v29  ;;  %v2704_v34 = vsub.f32 1.0, %v2703_v17  ;;  %v7916_v43 = vadd.f32 1.0, %v2780_v13  ;;  %v2853_v7 = vadd.f32 0.001143296, %v2852_v58 }
 0x202   : > { %v7914_v24 = vpop.eup %4348  ;;  %v2817_v25 = vadd.f32 0.112945676, %v2816_v38  ;;  %v2674_v0 = vor.u32 1.1754944e-38, %v2673_v47  ;;  %v2713_v57 = vand.u32 2147483648, %v7839_v40  ;;  %v2767_v16 = vmul.f32 %v2766_v33, %v7772_v56 }
 0x203   : > { %v7920_v55 = vmin.f32 %v2879_v20, 16.0  ;;  %v2670_v26 = vsel %vm7906_vm6, %v7822_v5, %v2666_v31  ;;  %vm2707_vm7 = vweird.f32 %v7839_v40  ;;  %v2730_v1 = vadd.f32 1.1283791, %v2729_v8 }
 0x204   : > { %v2751_v59 = vand.u32 2147483647, %v7868_v3  ;;  %v2743_v29 = vmul.f32 %v7914_v24, %v7868_v3  ;;  %v2805_v47 = vmul.f32 %v2804_v51, %v7833_v44  ;;  %v2818_v17 = vmul.f32 %v2817_v25, %v7833_v44 }
 0x205   : > { %v2919_v19 = vmul.f32 %v7567_v37, %v7567_v37  ;;  %v2705_v33 = vmul.f32 %v7876_v49, %v2704_v34  ;;  %vm7934_vm8 = vcmp.eq.f32.partialorder %v2711_v52, 8.507059e+37  ;;  %4350 = vrcp.f32 %v7916_v43 }
 0x206   : > { %v2843_v5 = vmul.f32 %v2842_v15, %v7881_v2  ;;  %v2854_v20 = vmul.f32 %v2853_v7, %v7881_v2  ;;  %v2714_v31 = vor.u32 1.1754944e-38, %v2713_v57  ;;  %v2753_v8 = vand.u32 2147483648, %v7868_v3 }
 0x207   : > { %v2768_v38 = vadd.f32 0.18741608, %v2767_v16  ;;  %v2819_v58 = vadd.f32 0.4994258, %v2818_v17  ;;  %v2675_v6 = vsel %vm7893_vm5, %v2674_v0, %v2670_v26  ;;  %vm2708_vm9 = vweird.f32 %v7876_v49 }
 0x208   : > { %v2855_v52 = vadd.f32 0.014752088, %v2854_v20  ;;  %v2881_v51 = vmul.f32 2.1237322e-06, %v7920_v55  ;;  %v2744_v34 = vsub.f32 1.0, %v2743_v29  ;;  %v2706_v7 = vadd.f32 %v7876_v49, %v2705_v33  ;;  %vm7957_vm10 = vmor %vm2707_vm7, %vm2708_vm9 }
 0x209   : > { %v2806_v25 = vadd.f32 0.05243302, %v2805_v47  ;;  %v2820_v11 = vmul.f32 %v2819_v58, %v7833_v44  ;;  %v2892_v15 = vmul.f32 3.8918573e-05, %v7920_v55  ;;  %v2844_v57 = vadd.f32 0.0036580483, %v2843_v5 }
 0x20a   : > { %v2856_v16 = vmul.f32 %v2855_v52, %v7881_v2  ;;  %v7950_v17 = vmin.f32 %v2919_v19, 16.0  ;;  %v7953_v42 = vmul.f32 %v2675_v6, %v7873_v28  ;;  %v2769_v26 = vmul.f32 %v2768_v38, %v7772_v56 }
 0x20b   : > { %v7962_v29 = vadd.f32 1.0, %v2820_v11  ;;  %v2893_v47 = vadd.f32 0.001143296, %v2892_v15  ;;  %v7964_v33 = vpop.eup %4350  ;;  %v7967_v5 = vmul.f32 %v2730_v1, %v7547_v22  ;;  %v2882_v20 = vadd.f32 0.00028619796, %v2881_v51 }
 0x20c   : > { %v2857_v19 = vadd.f32 0.112945676, %v2856_v16  ;;  %v2921_v28 = vmul.f32 2.1237322e-06, %v7950_v17  ;;  %vm2747_vm11 = vweird.f32 %v7868_v3  ;;  %v2754_v40 = vor.u32 1.1754944e-38, %v2753_v8 }
 0x20d   : > { %v2807_v58 = vmul.f32 %v2806_v25, %v7833_v44  ;;  %4352 = vrcp.f32 %v7962_v29  ;;  %v2710_v56 = vsel %vm7957_vm10, %v7876_v49, %v2706_v7  ;;  %v2745_v11 = vmul.f32 %v7914_v24, %v2744_v34 }
 0x20e   : > { %v2845_v22 = vmul.f32 %v2844_v57, %v7881_v2  ;;  %v2858_v1 = vmul.f32 %v2857_v19, %v7881_v2  ;;  %vm7980_vm12 = vcmp.eq.f32.partialorder %v2751_v59, 8.507059e+37  ;;  %v2770_v8 = vadd.f32 1.1283791, %v2769_v26 }
 0x20f   : > { %v2783_v52 = vmul.f32 %v7964_v33, %v7916_v43  ;;  %v2894_v51 = vmul.f32 %v2893_v47, %v7920_v55  ;;  %vm2748_vm13 = vweird.f32 %v7914_v24  ;;  %v2883_v34 = vmul.f32 %v2882_v20, %v7920_v55 }
 0x210   : > { %v2859_v49 = vadd.f32 0.4994258, %v2858_v1  ;;  %v2922_v25 = vadd.f32 0.00028619796, %v2921_v28  ;;  %v2715_v15 = vsel %vm7934_vm8, %v2714_v31, %v2710_v56  ;;  %v2808_v7 = vadd.f32 0.18741608, %v2807_v58  ;;  %vm7999_vm14 = vmor %vm2747_vm11, %vm2748_vm13 }
 0x211   : > { %v2895_v59 = vadd.f32 0.014752088, %v2894_v51  ;;  %v2932_v57 = vmul.f32 3.8918573e-05, %v7950_v17  ;;  %v2746_v16 = vadd.f32 %v7914_v24, %v2745_v11  ;;  %v2793_v0 = vand.u32 2147483648, %v7916_v43 }
 0x212   : > { %v2846_v26 = vadd.f32 0.05243302, %v2845_v22  ;;  %v2860_v47 = vmul.f32 %v2859_v49, %v7881_v2  ;;  %v2784_v13 = vsub.f32 1.0, %v2783_v52  ;;  %v2959_v58 = vmul.f32 %v7573_v32, %v7573_v32 }
 0x213   : > { %v7995_v19 = vpop.eup %4352  ;;  %v2896_v31 = vmul.f32 %v2895_v59, %v7920_v55  ;;  %v2933_v28 = vadd.f32 0.001143296, %v2932_v57  ;;  %v8007_v56 = vmul.f32 %v2770_v8, %v7554_v54  ;;  %v2884_v22 = vadd.f32 0.0036580483, %v2883_v34 }
 0x214   : > { %v2823_v11 = vmul.f32 %v7995_v19, %v7962_v29  ;;  %v2923_v3 = vmul.f32 %v2922_v25, %v7950_v17  ;;  %v2791_v1 = vand.u32 2147483647, %v7916_v43  ;;  %v2809_v51 = vmul.f32 %v2808_v7, %v7833_v44 }
 0x215   : > { %v8014_v52 = vadd.f32 1.0, %v2860_v47  ;;  %v2897_v49 = vadd.f32 0.112945676, %v2896_v31  ;;  %v8017_v59 = vmul.f32 %v2715_v15, %v7911_v30  ;;  %v2750_v54 = vsel %vm7999_vm14, %v7914_v24, %v2746_v16 }
 0x216   : > { %v2794_v8 = vor.u32 1.1754944e-38, %v2793_v0  ;;  %v2934_v57 = vmul.f32 %v2933_v28, %v7950_v17  ;;  %v2785_v34 = vmul.f32 %v7964_v33, %v2784_v13  ;;  %v2847_v25 = vmul.f32 %v2846_v26, %v7881_v2 }
 0x217   : > { %4354 = vrcp.f32 %v8014_v52  ;;  %v8026_v44 = vmin.f32 %v2959_v58, 16.0  ;;  %v2824_v7 = vsub.f32 1.0, %v2823_v11  ;;  %v2885_v47 = vmul.f32 %v2884_v22, %v7920_v55 }
 0x218   : > { %v2898_v30 = vmul.f32 %v2897_v49, %v7920_v55  ;;  %v2924_v15 = vadd.f32 0.0036580483, %v2923_v3  ;;  %vm2787_vm15 = vweird.f32 %v7916_v43  ;;  %vm8031_vm0 = vcmp.eq.f32.partialorder %v2791_v1, 8.507059e+37 }
 0x219   : > { %v2810_v16 = vadd.f32 1.1283791, %v2809_v51  ;;  %v2935_v0 = vadd.f32 0.014752088, %v2934_v57  ;;  %v2961_v26 = vmul.f32 2.1237322e-06, %v8026_v44  ;;  %v2755_v13 = vsel %vm7980_vm12, %v2754_v40, %v2750_v54 }
 0x21a   : > { %vm2788_vm1 = vweird.f32 %v7964_v33  ;;  %v2899_v31 = vadd.f32 0.4994258, %v2898_v30  ;;  %v2786_v28 = vadd.f32 %v7964_v33, %v2785_v34  ;;  %v2848_v58 = vadd.f32 0.18741608, %v2847_v25 }
 0x21b   : > { %v2936_v11 = vmul.f32 %v2935_v0, %v7950_v17  ;;  %v2972_v22 = vmul.f32 3.8918573e-05, %v8026_v44  ;;  %v2825_v3 = vmul.f32 %v7995_v19, %v2824_v7  ;;  %v2886_v1 = vadd.f32 0.05243302, %v2885_v47  ;;  %vm8050_vm2 = vmor %vm2787_vm15, %vm2788_vm1 }
 0x21c   : > { %v2900_v51 = vmul.f32 %v2899_v31, %v7920_v55  ;;  %v2925_v49 = vmul.f32 %v2924_v15, %v7950_v17  ;;  %v2962_v54 = vadd.f32 0.00028619796, %v2961_v26  ;;  %v2999_v25 = vmul.f32 %v7576_v41, %v7576_v41 }
 0x21d   : > { %v8046_v57 = vpop.eup %4354  ;;  %v2937_v6 = vadd.f32 0.112945676, %v2936_v11  ;;  %v2973_v34 = vadd.f32 0.001143296, %v2972_v22  ;;  %v8057_v7 = vmul.f32 %v2755_v13, %v7967_v5  ;;  %vm2827_vm3 = vweird.f32 %v7962_v29 }
 0x21e   : > { %v2863_v47 = vmul.f32 %v8046_v57, %v8014_v52  ;;  %v8062_v30 = vadd.f32 1.0, %v2900_v51  ;;  %vm2828_vm4 = vweird.f32 %v7995_v19  ;;  %v2849_v43 = vmul.f32 %v2848_v58, %v7881_v2 }
 0x21f   : > { %v2938_v15 = vmul.f32 %v2937_v6, %v7950_v17  ;;  %v2974_v0 = vmul.f32 %v2973_v34, %v8026_v44  ;;  %v2790_v5 = vsel %vm8050_vm2, %v7964_v33, %v2786_v28  ;;  %v2831_v26 = vand.u32 2147483647, %v7962_v29  ;;  %vm8080_vm5 = vmor %vm2827_vm3, %vm2828_vm4 }
 0x220   : > { %v2833_v13 = vand.u32 2147483648, %v7962_v29  ;;  %v2887_v31 = vmul.f32 %v2886_v1, %v7920_v55  ;;  %v2826_v11 = vadd.f32 %v7995_v19, %v2825_v3  ;;  %v2926_v22 = vadd.f32 0.05243302, %v2925_v49 }
 0x221   : > { %v2963_v51 = vmul.f32 %v2962_v54, %v8026_v44  ;;  %v8076_v2 = vmin.f32 %v2999_v25, 16.0  ;;  %v2864_v33 = vsub.f32 1.0, %v2863_v47  ;;  %4356 = vrcp.f32 %v8062_v30 }
 0x222   : > { %v2939_v28 = vadd.f32 0.4994258, %v2938_v15  ;;  %v2975_v40 = vadd.f32 0.014752088, %v2974_v0  ;;  %v2811_v3 = vmul.f32 %v2810_v16, %v7557_v36  ;;  %v2850_v49 = vadd.f32 1.1283791, %v2849_v43 }
 0x223   : > { %v3001_v6 = vmul.f32 2.1237322e-06, %v8076_v2  ;;  %v2795_v54 = vsel %vm8031_vm0, %v2794_v8, %v2790_v5  ;;  %v2888_v29 = vadd.f32 0.18741608, %v2887_v31  ;;  %v2830_v47 = vsel %vm8080_vm5, %v7995_v19, %v2826_v11 }
 0x224   : > { %v2940_v34 = vmul.f32 %v2939_v28, %v7950_v17  ;;  %v2976_v25 = vmul.f32 %v2975_v40, %v8026_v44  ;;  %vm8095_vm6 = vcmp.eq.f32.partialorder %v2831_v26, 8.507059e+37  ;;  %v2834_v36 = vor.u32 1.1754944e-38, %v2833_v13 }
 0x225   : > { %v2927_v16 = vmul.f32 %v2926_v22, %v7950_v17  ;;  %v2865_v43 = vmul.f32 %v8046_v57, %v2864_v33  ;;  %v2964_v24 = vadd.f32 0.0036580483, %v2963_v51  ;;  %v3012_v0 = vmul.f32 3.8918573e-05, %v8076_v2 }
 0x226   : > { %v2977_v8 = vadd.f32 0.112945676, %v2976_v25  ;;  %v8103_v5 = vmul.f32 %v2795_v54, %v8007_v56  ;;  %v8106_v31 = vmul.f32 %v2850_v49, %v7560_v4  ;;  %v8108_v19 = vadd.f32 1.0, %v2940_v34 }
 0x227   : > { %v3002_v26 = vadd.f32 0.00028619796, %v3001_v6  ;;  %v8110_v11 = vpop.eup %4356  ;;  %vm2867_vm7 = vweird.f32 %v8014_v52  ;;  %v2871_v13 = vand.u32 2147483647, %v8014_v52  ;;  %v2873_v22 = vand.u32 2147483648, %v8014_v52 }
 0x228   : > { %v2889_v51 = vmul.f32 %v2888_v29, %v7920_v55  ;;  %v2835_v56 = vsel %vm8095_vm6, %v2834_v36, %v2830_v47  ;;  %vm2868_vm8 = vweird.f32 %v8046_v57  ;;  %v2928_v4 = vadd.f32 0.18741608, %v2927_v16 }
 0x229   : > { %v2978_v58 = vmul.f32 %v2977_v8, %v8026_v44  ;;  %v2866_v33 = vadd.f32 %v8046_v57, %v2865_v43  ;;  %v2965_v28 = vmul.f32 %v2964_v24, %v8026_v44  ;;  %v3013_v40 = vadd.f32 0.001143296, %v3012_v0  ;;  %vm8131_vm9 = vmor %vm2867_vm7, %vm2868_vm8 }
 0x22a   : > { %v3039_v49 = vmul.f32 %v7582_v45, %v7582_v45  ;;  %v2903_v6 = vmul.f32 %v8110_v11, %v8062_v30  ;;  %4358 = vrcp.f32 %v8108_v19  ;;  %v3003_v54 = vmul.f32 %v3002_v26, %v8076_v2 }
 0x22b   : > { %v2979_v55 = vadd.f32 0.4994258, %v2978_v58  ;;  %v2874_v25 = vor.u32 1.1754944e-38, %v2873_v22  ;;  %v2890_v47 = vadd.f32 1.1283791, %v2889_v51  ;;  %v3014_v15 = vmul.f32 %v3013_v40, %v8076_v2 }
 0x22c   : > { %v8136_v36 = vmul.f32 %v2835_v56, %v2811_v3  ;;  %v2913_v16 = vand.u32 2147483648, %v8062_v30  ;;  %v2929_v43 = vmul.f32 %v2928_v4, %v7950_v17  ;;  %v2966_v8 = vadd.f32 0.05243302, %v2965_v28 }
 0x22d   : > { %v2980_v24 = vmul.f32 %v2979_v55, %v8026_v44  ;;  %v3015_v0 = vadd.f32 0.014752088, %v3014_v15  ;;  %v8141_v26 = vmin.f32 %v3039_v49, 16.0  ;;  %v3079_v52 = vmul.f32 %v7585_v10, %v7585_v10 }
 0x22e   : > { %v2870_v22 = vsel %vm8131_vm9, %v8046_v57, %v2866_v33  ;;  %vm2872_vm10 = vcmp.eq.f32.partialorder %v2871_v13, 8.507059e+37  ;;  %v2904_v3 = vsub.f32 1.0, %v2903_v6  ;;  %v3004_v51 = vadd.f32 0.0036580483, %v3003_v54 }
 0x22f   : > { %v2911_v56 = vand.u32 2147483647, %v8062_v30  ;;  %v8149_v58 = vadd.f32 1.0, %v2980_v24  ;;  %v3016_v17 = vmul.f32 %v3015_v0, %v8076_v2  ;;  %v3041_v4 = vmul.f32 2.1237322e-06, %v8141_v26 }
 0x230   : > { %v8153_v28 = vpop.eup %4358  ;;  %v8157_v49 = vmul.f32 %v2890_v47, %v7564_v61  ;;  %vm2907_vm11 = vweird.f32 %v8062_v30  ;;  %v2930_v57 = vadd.f32 1.1283791, %v2929_v43  ;;  %v2875_v13 = vsel %vm2872_vm10, %v2874_v25, %v2870_v22 }
 0x231   : > { %v2914_v33 = vor.u32 1.1754944e-38, %v2913_v16  ;;  %v2967_v6 = vmul.f32 %v2966_v8, %v8026_v44  ;;  %v8161_v55 = vmin.f32 %v3079_v52, 16.0  ;;  %v2905_v54 = vmul.f32 %v8110_v11, %v2904_v3 }
 0x232   : > { %v3005_v34 = vmul.f32 %v3004_v51, %v8076_v2  ;;  %v3017_v15 = vadd.f32 0.112945676, %v3016_v17  ;;  %v3052_v24 = vmul.f32 3.8918573e-05, %v8141_v26  ;;  %vm8166_vm12 = vcmp.eq.f32.partialorder %v2911_v56, 8.507059e+37 }
 0x233   : > { %v2943_v61 = vmul.f32 %v8153_v28, %v8108_v19  ;;  %4360 = vrcp.f32 %v8149_v58  ;;  %v3042_v25 = vadd.f32 0.00028619796, %v3041_v4  ;;  %v3119_v47 = vmul.f32 %v7588_v48, %v7588_v48 }
 0x234   : > { %vm2908_vm13 = vweird.f32 %v8110_v11  ;;  %v3018_v16 = vmul.f32 %v3017_v15, %v8076_v2  ;;  %v3053_v43 = vadd.f32 0.001143296, %v3052_v24  ;;  %v3081_v8 = vmul.f32 2.1237322e-06, %v8161_v55 }
 0x235   : > { %v8179_v52 = vmul.f32 %v2875_v13, %v8106_v31  ;;  %v8182_v22 = vmul.f32 %v2930_v57, %v7567_v37  ;;  %v2968_v3 = vadd.f32 0.18741608, %v2967_v6  ;;  %v3092_v51 = vmul.f32 3.8918573e-05, %v8161_v55  ;;  %vm8189_vm14 = vmor %vm2907_vm11, %vm2908_vm13 }
 0x236   : > { %v2906_v56 = vadd.f32 %v8110_v11, %v2905_v54  ;;  %v3019_v17 = vadd.f32 0.4994258, %v3018_v16  ;;  %v3054_v4 = vmul.f32 %v3053_v43, %v8141_v26  ;;  %v3082_v40 = vadd.f32 0.00028619796, %v3081_v8 }
 0x237   : > { %v2944_v31 = vsub.f32 1.0, %v2943_v61  ;;  %v3006_v13 = vadd.f32 0.05243302, %v3005_v34  ;;  %v3043_v37 = vmul.f32 %v3042_v25, %v8141_v26  ;;  %v8194_v57 = vmin.f32 %v3119_v47, 16.0 }
 0x238   : > { %vm2947_vm15 = vweird.f32 %v8108_v19  ;;  %v2951_v6 = vand.u32 2147483647, %v8108_v19  ;;  %v3020_v54 = vmul.f32 %v3019_v17, %v8076_v2  ;;  %v3055_v24 = vadd.f32 0.014752088, %v3054_v4 }
 0x239   : > { %v8199_v16 = vpop.eup %4360  ;;  %v2969_v30 = vmul.f32 %v2968_v3, %v8026_v44  ;;  %v3083_v43 = vmul.f32 %v3082_v40, %v8161_v55  ;;  %v3093_v8 = vadd.f32 0.001143296, %v3092_v51  ;;  %v3121_v34 = vmul.f32 2.1237322e-06, %v8194_v57 }
 0x23a   : > { %v2910_v61 = vsel %vm8189_vm14, %v8110_v11, %v2906_v56  ;;  %v2953_v25 = vand.u32 2147483648, %v8108_v19  ;;  %v8208_v47 = vadd.f32 1.0, %v3020_v54  ;;  %v3056_v17 = vmul.f32 %v3055_v24, %v8141_v26 }
 0x23b   : > { %v2945_v4 = vmul.f32 %v8153_v28, %v2944_v31  ;;  %v3007_v29 = vmul.f32 %v3006_v13, %v8076_v2  ;;  %v3044_v44 = vadd.f32 0.0036580483, %v3043_v37  ;;  %v3094_v40 = vmul.f32 %v3093_v8, %v8161_v55 }
 0x23c   : > { %v2983_v51 = vmul.f32 %v8199_v16, %v8149_v58  ;;  %4362 = vrcp.f32 %v8208_v47  ;;  %v3122_v11 = vadd.f32 0.00028619796, %v3121_v34  ;;  %vm2948_vm0 = vweird.f32 %v8153_v28 }
 0x23d   : > { %v2970_v56 = vadd.f32 1.1283791, %v2969_v30  ;;  %v3057_v15 = vadd.f32 0.112945676, %v3056_v17  ;;  %v3084_v54 = vadd.f32 0.0036580483, %v3083_v43  ;;  %v2915_v31 = vsel %vm8166_vm12, %v2914_v33, %v2910_v61  ;;  %vm8232_vm2 = vmor %vm2947_vm15, %vm2948_vm0 }
 0x23e   : > { %vm8221_vm1 = vcmp.eq.f32.partialorder %v2951_v6, 8.507059e+37  ;;  %v3095_v37 = vadd.f32 0.014752088, %v3094_v40  ;;  %v3159_v24 = vmul.f32 %v7592_v18, %v7592_v18  ;;  %v2946_v8 = vadd.f32 %v8153_v28, %v2945_v4 }
 0x23f   : > { %v3008_v3 = vadd.f32 0.18741608, %v3007_v29  ;;  %v3045_v34 = vmul.f32 %v3044_v44, %v8141_v26  ;;  %v3058_v30 = vmul.f32 %v3057_v15, %v8141_v26  ;;  %v2984_v33 = vsub.f32 1.0, %v2983_v51 }
 0x240   : > { %v3096_v6 = vmul.f32 %v3095_v37, %v8161_v55  ;;  %v3123_v43 = vmul.f32 %v3122_v11, %v8194_v57  ;;  %v3132_v61 = vmul.f32 3.8918573e-05, %v8194_v57  ;;  %v2954_v17 = vor.u32 1.1754944e-38, %v2953_v25 }
 0x241   : > { %v8240_v29 = vmul.f32 %v2970_v56, %v7573_v32  ;;  %v3059_v4 = vadd.f32 0.4994258, %v3058_v30  ;;  %v3085_v44 = vmul.f32 %v3084_v54, %v8161_v55  ;;  %v8246_v19 = vmul.f32 %v2915_v31, %v8157_v49 }
 0x242   : > { %v8243_v40 = vpop.eup %4362  ;;  %v3097_v15 = vadd.f32 0.112945676, %v3096_v6  ;;  %v3133_v51 = vadd.f32 0.001143296, %v3132_v61  ;;  %v8248_v1 = vmin.f32 %v3159_v24, 16.0  ;;  %v2950_v11 = vsel %vm8232_vm2, %v8153_v28, %v2946_v8 }
 0x243   : > { %v2991_v25 = vand.u32 2147483647, %v8149_v58  ;;  %v3009_v32 = vmul.f32 %v3008_v3, %v8076_v2  ;;  %v3046_v56 = vadd.f32 0.05243302, %v3045_v34  ;;  %v2985_v54 = vmul.f32 %v8199_v16, %v2984_v33 }
 0x244   : > { %v3060_v37 = vmul.f32 %v3059_v4, %v8141_v26  ;;  %v3098_v49 = vmul.f32 %v3097_v15, %v8161_v55  ;;  %v3124_v31 = vadd.f32 0.0036580483, %v3123_v43  ;;  %v3023_v24 = vmul.f32 %v8243_v40, %v8208_v47 }
 0x245   : > { %v3086_v30 = vadd.f32 0.05243302, %v3085_v44  ;;  %v3134_v6 = vmul.f32 %v3133_v51, %v8194_v57  ;;  %v3172_v28 = vmul.f32 3.8918573e-05, %v8248_v1  ;;  %vm2987_vm3 = vweird.f32 %v8149_v58 }
 0x246   : > { %v8263_v8 = vadd.f32 1.0, %v3060_v37  ;;  %v3099_v2 = vadd.f32 0.4994258, %v3098_v49  ;;  %v3161_v3 = vmul.f32 2.1237322e-06, %v8248_v1  ;;  %vm2988_vm4 = vweird.f32 %v8199_v16 }
 0x247   : > { %v2993_v0 = vand.u32 2147483648, %v8149_v58  ;;  %v3135_v33 = vadd.f32 0.014752088, %v3134_v6  ;;  %v2955_v43 = vsel %vm8221_vm1, %v2954_v17, %v2950_v11  ;;  %v3010_v61 = vadd.f32 1.1283791, %v3009_v32  ;;  %vm8277_vm5 = vmor %vm2987_vm3, %vm2988_vm4 }
 0x248   : > { %v3047_v4 = vmul.f32 %v3046_v56, %v8141_v26  ;;  %v3125_v44 = vmul.f32 %v3124_v31, %v8194_v57  ;;  %v2986_v15 = vadd.f32 %v8199_v16, %v2985_v54  ;;  %v3024_v51 = vsub.f32 1.0, %v3023_v24 }
 0x249   : > { %v3087_v37 = vmul.f32 %v3086_v30, %v8161_v55  ;;  %v3173_v49 = vadd.f32 0.001143296, %v3172_v28  ;;  %4364 = vrcp.f32 %v8263_v8  ;;  %v3100_v13 = vmul.f32 %v3099_v2, %v8161_v55 }
 0x24a   : > { %v3136_v17 = vmul.f32 %v3135_v33, %v8194_v57  ;;  %v3162_v11 = vadd.f32 0.00028619796, %v3161_v3  ;;  %v8285_v32 = vmul.f32 %v2955_v43, %v8182_v22  ;;  %vm8287_vm6 = vcmp.eq.f32.partialorder %v2991_v25, 8.507059e+37 }
 0x24b   : > { %v2994_v54 = vor.u32 1.1754944e-38, %v2993_v0  ;;  %v3031_v58 = vand.u32 2147483647, %v8208_v47  ;;  %v8293_v31 = vmul.f32 %v3010_v61, %v7576_v41  ;;  %v3048_v24 = vadd.f32 0.18741608, %v3047_v4 }
 0x24c   : > { %v3126_v30 = vadd.f32 0.05243302, %v3125_v44  ;;  %v3137_v6 = vadd.f32 0.112945676, %v3136_v17  ;;  %v2990_v28 = vsel %vm8277_vm5, %v8199_v16, %v2986_v15  ;;  %v3025_v22 = vmul.f32 %v8243_v40, %v3024_v51 }
 0x24d   : > { %v3033_v25 = vand.u32 2147483648, %v8208_v47  ;;  %v3174_v2 = vmul.f32 %v3173_v49, %v8248_v1  ;;  %v3088_v3 = vadd.f32 0.18741608, %v3087_v37  ;;  %v8301_v0 = vadd.f32 1.0, %v3100_v13 }
 0x24e   : > { %v3138_v33 = vmul.f32 %v3137_v6, %v8194_v57  ;;  %v3163_v41 = vmul.f32 %v3162_v11, %v8248_v1  ;;  %vm3027_vm7 = vweird.f32 %v8208_v47  ;;  %vm3028_vm8 = vweird.f32 %v8243_v40 }
 0x24f   : > { %vm8308_vm9 = vcmp.eq.f32.partialorder %v3031_v58, 8.507059e+37  ;;  %v8312_v34 = vpop.eup %4364  ;;  %v2995_v61 = vsel %vm8287_vm6, %v2994_v54, %v2990_v28  ;;  %v3049_v4 = vmul.f32 %v3048_v24, %v8141_v26  ;;  %v3127_v44 = vmul.f32 %v3126_v30, %v8194_v57  ;;  %vm8321_vm10 = vmor %vm3027_vm7, %vm3028_vm8 }
 0x250   : > { %v3139_v15 = vadd.f32 0.4994258, %v3138_v33  ;;  %v3026_v51 = vadd.f32 %v8243_v40, %v3025_v22  ;;  %v3034_v37 = vor.u32 1.1754944e-38, %v3033_v25  ;;  %v3175_v47 = vadd.f32 0.014752088, %v3174_v2 }
 0x251   : > { %v3199_v49 = vmul.f32 %v7595_v39, %v7595_v39  ;;  %v3089_v17 = vmul.f32 %v3088_v3, %v8161_v55  ;;  %4366 = vrcp.f32 %v8301_v0  ;;  %v3164_v11 = vadd.f32 0.0036580483, %v3163_v41 }
 0x252   : > { %v3140_v26 = vmul.f32 %v3139_v15, %v8194_v57  ;;  %v8329_v56 = vmul.f32 %v2995_v61, %v8240_v29  ;;  %v3063_v54 = vmul.f32 %v8312_v34, %v8263_v8  ;;  %v3176_v58 = vmul.f32 %v3175_v47, %v8248_v1 }
 0x253   : > { %v8334_v24 = vmin.f32 %v3199_v49, 16.0  ;;  %v3050_v30 = vadd.f32 1.1283791, %v3049_v4  ;;  %v3128_v6 = vadd.f32 0.18741608, %v3127_v44  ;;  %v3239_v55 = vmul.f32 %v7603_v23, %v7603_v23 }
 0x254   : > { %v8336_v28 = vadd.f32 1.0, %v3140_v26  ;;  %v3030_v22 = vsel %vm8321_vm10, %v8243_v40, %v3026_v51  ;;  %v3073_v29 = vand.u32 2147483648, %v8263_v8  ;;  %v3177_v25 = vadd.f32 0.112945676, %v3176_v58 }
 0x255   : > { %v3201_v2 = vmul.f32 2.1237322e-06, %v8334_v24  ;;  %v3090_v3 = vadd.f32 1.1283791, %v3089_v17  ;;  %v3165_v33 = vmul.f32 %v3164_v11, %v8248_v1  ;;  %v3212_v41 = vmul.f32 3.8918573e-05, %v8334_v24 }
 0x256   : > { %4368 = vrcp.f32 %v8336_v28  ;;  %v3064_v4 = vsub.f32 1.0, %v3063_v54  ;;  %v3071_v44 = vand.u32 2147483647, %v8263_v8  ;;  %v3178_v15 = vmul.f32 %v3177_v25, %v8248_v1 }
 0x257   : > { %v8351_v40 = vpop.eup %4366  ;;  %v3035_v51 = vsel %vm8308_vm9, %v3034_v37, %v3030_v22  ;;  %v3129_v47 = vmul.f32 %v3128_v6, %v8194_v57  ;;  %v3202_v49 = vadd.f32 0.00028619796, %v3201_v2  ;;  %v8356_v13 = vmin.f32 %v3239_v55, 16.0 }
 0x258   : > { %v8359_v17 = vmul.f32 %v3050_v30, %v7582_v45  ;;  %vm3067_vm11 = vweird.f32 %v8263_v8  ;;  %v3074_v26 = vor.u32 1.1754944e-38, %v3073_v29  ;;  %v3179_v11 = vadd.f32 0.4994258, %v3178_v15 }
 0x259   : > { %v8363_v54 = vmul.f32 %v3090_v3, %v7585_v10  ;;  %v3166_v58 = vadd.f32 0.05243302, %v3165_v33  ;;  %v3213_v25 = vadd.f32 0.001143296, %v3212_v41  ;;  %v3241_v16 = vmul.f32 2.1237322e-06, %v8356_v13 }
 0x25a   : > { %v8367_v37 = vmul.f32 %v3035_v51, %v8293_v31  ;;  %v3065_v57 = vmul.f32 %v8312_v34, %v3064_v4  ;;  %vm8370_vm12 = vcmp.eq.f32.partialorder %v3071_v44, 8.507059e+37  ;;  %v3103_v45 = vmul.f32 %v8351_v40, %v8301_v0 }
 0x25b   : > { %v3180_v30 = vmul.f32 %v3179_v11, %v8248_v1  ;;  %v3113_v55 = vand.u32 2147483648, %v8301_v0  ;;  %v3130_v22 = vadd.f32 1.1283791, %v3129_v47  ;;  %v3203_v29 = vmul.f32 %v3202_v49, %v8334_v24 }
 0x25c   : > { %v8377_v10 = vpop.eup %4368  ;;  %v3214_v31 = vmul.f32 %v3213_v25, %v8334_v24  ;;  %vm3068_vm13 = vweird.f32 %v8312_v34  ;;  %v3242_v3 = vadd.f32 0.00028619796, %v3241_v16  ;;  %v3252_v33 = vmul.f32 3.8918573e-05, %v8356_v13 }
 0x25d   : > { %v8383_v2 = vadd.f32 1.0, %v3180_v30  ;;  %vm3107_vm14 = vweird.f32 %v8301_v0  ;;  %v3167_v41 = vmul.f32 %v3166_v58, %v8248_v1  ;;  %v3279_v44 = vmul.f32 %v7606_v35, %v7606_v35  ;;  %vm8397_vm15 = vmor %vm3067_vm11, %vm3068_vm13 }
 0x25e   : > { %v3215_v4 = vadd.f32 0.014752088, %v3214_v31  ;;  %v3066_v15 = vadd.f32 %v8312_v34, %v3065_v57  ;;  %v3104_v51 = vsub.f32 1.0, %v3103_v45  ;;  %v3111_v47 = vand.u32 2147483647, %v8301_v0 }
 0x25f   : > { %v3143_v49 = vmul.f32 %v8377_v10, %v8336_v28  ;;  %v8401_v58 = vor.u32 1.1754944e-38, %v3113_v55  ;;  %v3204_v16 = vadd.f32 0.0036580483, %v3203_v29  ;;  %v8405_v57 = vmul.f32 %v3130_v22, %v7588_v48 }
 0x260   : > { %v3216_v30 = vmul.f32 %v3215_v4, %v8334_v24  ;;  %4370 = vrcp.f32 %v8383_v2  ;;  %v3243_v45 = vmul.f32 %v3242_v3, %v8356_v13  ;;  %v3253_v31 = vadd.f32 0.001143296, %v3252_v33 }
 0x261   : > { %v3168_v11 = vadd.f32 0.18741608, %v3167_v41  ;;  %v8409_v8 = vmin.f32 %v3279_v44, 16.0  ;;  %v3319_v43 = vmul.f32 %v7614_v9, %v7614_v9  ;;  %v3070_v55 = vsel %vm8397_vm15, %v8312_v34, %v3066_v15 }
 0x262   : > { %v3217_v61 = vadd.f32 0.112945676, %v3216_v30  ;;  %v3105_v29 = vmul.f32 %v8351_v40, %v3104_v51  ;;  %v3144_v48 = vsub.f32 1.0, %v3143_v49  ;;  %v3254_v22 = vmul.f32 %v3253_v31, %v8356_v13 }
 0x263   : > { %vm8418_vm0 = vcmp.eq.f32.partialorder %v3111_v47, 8.507059e+37  ;;  %v3151_v3 = vand.u32 2147483647, %v8336_v28  ;;  %v3205_v33 = vmul.f32 %v3204_v16, %v8334_v24  ;;  %v3281_v44 = vmul.f32 2.1237322e-06, %v8409_v8 }
 0x264   : > { %v3218_v41 = vmul.f32 %v3217_v61, %v8334_v24  ;;  %vm3108_vm1 = vweird.f32 %v8351_v40  ;;  %vm3147_vm2 = vweird.f32 %v8336_v28  ;;  %v3244_v34 = vadd.f32 0.0036580483, %v3243_v45 }
 0x265   : > { %v3255_v15 = vadd.f32 0.014752088, %v3254_v22  ;;  %v3075_v51 = vsel %vm8370_vm12, %v3074_v26, %v3070_v55  ;;  %v3153_v47 = vand.u32 2147483648, %v8336_v28  ;;  %v3169_v49 = vmul.f32 %v3168_v11, %v8248_v1  ;;  %vm8440_vm3 = vmor %vm3107_vm14, %vm3108_vm1 }
 0x266   : > { %v3292_v25 = vmul.f32 3.8918573e-05, %v8409_v8  ;;  %v8433_v16 = vpop.eup %4370  ;;  %v3106_v61 = vadd.f32 %v8351_v40, %v3105_v29  ;;  %v3145_v30 = vmul.f32 %v8377_v10, %v3144_v48  ;;  %v3219_v31 = vadd.f32 0.4994258, %v3218_v41 }
 0x267   : > { %v3256_v20 = vmul.f32 %v3255_v15, %v8356_v13  ;;  %vm3148_vm4 = vweird.f32 %v8377_v10  ;;  %vm8445_vm5 = vcmp.eq.f32.partialorder %v3151_v3, 8.507059e+37  ;;  %v3206_v26 = vadd.f32 0.05243302, %v3205_v33 }
 0x268   : > { %v3282_v11 = vadd.f32 0.00028619796, %v3281_v44  ;;  %v3220_v45 = vmul.f32 %v3219_v31, %v8334_v24  ;;  %v3245_v55 = vmul.f32 %v3244_v34, %v8356_v13  ;;  %v8451_v48 = vmin.f32 %v3319_v43, 16.0  ;;  %vm8469_vm6 = vmor %vm3147_vm2, %vm3148_vm4 }
 0x269   : > { %v3257_v29 = vadd.f32 0.112945676, %v3256_v20  ;;  %v8454_v0 = vmul.f32 %v3075_v51, %v8359_v17  ;;  %v3170_v22 = vadd.f32 1.1283791, %v3169_v49  ;;  %v3183_v41 = vmul.f32 %v8433_v16, %v8383_v2 }
 0x26a   : > { %v3293_v3 = vadd.f32 0.001143296, %v3292_v25  ;;  %v3110_v33 = vsel %vm8440_vm3, %v8351_v40, %v3106_v61  ;;  %v3146_v44 = vadd.f32 %v8377_v10, %v3145_v30  ;;  %v8462_v15 = vadd.f32 1.0, %v3220_v45 }
 0x26b   : > { %v3258_v20 = vmul.f32 %v3257_v29, %v8356_v13  ;;  %v3207_v17 = vmul.f32 %v3206_v26, %v8334_v24  ;;  %v3283_v34 = vmul.f32 %v3282_v11, %v8409_v8  ;;  %v3321_v51 = vmul.f32 2.1237322e-06, %v8451_v48 }
 0x26c   : > { %v3294_v40 = vmul.f32 %v3293_v3, %v8409_v8  ;;  %v3154_v49 = vor.u32 1.1754944e-38, %v3153_v47  ;;  %4372 = vrcp.f32 %v8462_v15  ;;  %v3246_v25 = vadd.f32 0.05243302, %v3245_v55 }
 0x26d   : > { %v3332_v61 = vmul.f32 3.8918573e-05, %v8451_v48  ;;  %v8481_v30 = vmul.f32 %v3170_v22, %v7592_v18  ;;  %v3184_v31 = vsub.f32 1.0, %v3183_v41  ;;  %v3259_v6 = vadd.f32 0.4994258, %v3258_v20 }
 0x26e   : > { %v3115_v26 = vsel %vm8418_vm0, %v8401_v58, %v3110_v33  ;;  %v3150_v47 = vsel %vm8469_vm6, %v8377_v10, %v3146_v44  ;;  %v3295_v11 = vadd.f32 0.014752088, %v3294_v40  ;;  %v3359_v45 = vmul.f32 %v7617_v63, %v7617_v63 }
 0x26f   : > { %vm3187_vm7 = vweird.f32 %v8383_v2  ;;  %v3208_v55 = vadd.f32 0.18741608, %v3207_v17  ;;  %v3284_v29 = vadd.f32 0.0036580483, %v3283_v34  ;;  %v3322_v18 = vadd.f32 0.00028619796, %v3321_v51 }
 0x270   : > { %v3247_v22 = vmul.f32 %v3246_v25, %v8356_v13  ;;  %v3260_v41 = vmul.f32 %v3259_v6, %v8356_v13  ;;  %v3296_v4 = vmul.f32 %v3295_v11, %v8409_v8  ;;  %v3333_v58 = vadd.f32 0.001143296, %v3332_v61 }
 0x271   : > { %v3155_v3 = vsel %vm8445_vm5, %v3154_v49, %v3150_v47  ;;  %v3185_v10 = vmul.f32 %v8433_v16, %v3184_v31  ;;  %v3191_v33 = vand.u32 2147483647, %v8383_v2  ;;  %v3193_v44 = vand.u32 2147483648, %v8383_v2 }
 0x272   : > { %v8500_v20 = vpop.eup %4372  ;;  %vm3188_vm8 = vweird.f32 %v8433_v16  ;;  %v3297_v43 = vadd.f32 0.112945676, %v3296_v4  ;;  %v3334_v17 = vmul.f32 %v3333_v58, %v8451_v48  ;;  %v8504_v34 = vmin.f32 %v3359_v45, 16.0 }
 0x273   : > { %v3209_v40 = vmul.f32 %v3208_v55, %v8334_v24  ;;  %v3223_v1 = vmul.f32 %v8500_v20, %v8462_v15  ;;  %v3285_v51 = vmul.f32 %v3284_v29, %v8409_v8  ;;  %v3323_v49 = vmul.f32 %v3322_v18, %v8451_v48  ;;  %vm8530_vm10 = vmor %vm3187_vm7, %vm3188_vm8 }
 0x274   : > { %v3248_v25 = vadd.f32 0.18741608, %v3247_v22  ;;  %v8511_v61 = vadd.f32 1.0, %v3260_v41  ;;  %v3298_v31 = vmul.f32 %v3297_v43, %v8409_v8  ;;  %v3361_v6 = vmul.f32 2.1237322e-06, %v8504_v34 }
 0x275   : > { %v8516_v47 = vmul.f32 %v3115_v26, %v8363_v54  ;;  %v3186_v11 = vadd.f32 %v8433_v16, %v3185_v10  ;;  %vm8519_vm9 = vcmp.eq.f32.partialorder %v3191_v33, 8.507059e+37  ;;  %v3335_v45 = vadd.f32 0.014752088, %v3334_v17 }
 0x276   : > { %v8524_v55 = vmul.f32 %v3155_v3, %v8405_v57  ;;  %v3194_v54 = vor.u32 1.1754944e-38, %v3193_v44  ;;  %v3224_v26 = vsub.f32 1.0, %v3223_v1  ;;  %v3299_v18 = vadd.f32 0.4994258, %v3298_v31 }
 0x277   : > { %v3210_v22 = vadd.f32 1.1283791, %v3209_v40  ;;  %v3286_v41 = vadd.f32 0.05243302, %v3285_v51  ;;  %v3324_v4 = vadd.f32 0.0036580483, %v3323_v49  ;;  %v3336_v58 = vmul.f32 %v3335_v45, %v8451_v48 }
 0x278   : > { %v3249_v10 = vmul.f32 %v3248_v25, %v8356_v13  ;;  %4374 = vrcp.f32 %v8511_v61  ;;  %v3300_v57 = vmul.f32 %v3299_v18, %v8409_v8  ;;  %v3362_v3 = vadd.f32 0.00028619796, %v3361_v6 }
 0x279   : > { %v3190_v2 = vsel %vm8530_vm10, %v8433_v16, %v3186_v11  ;;  %vm3227_vm11 = vweird.f32 %v8462_v15  ;;  %v3231_v33 = vand.u32 2147483647, %v8462_v15  ;;  %v3337_v44 = vadd.f32 0.112945676, %v3336_v58 }
 0x27a   : > { %v3225_v43 = vmul.f32 %v8500_v20, %v3224_v26  ;;  %v8544_v17 = vadd.f32 1.0, %v3300_v57  ;;  %v3372_v13 = vmul.f32 3.8918573e-05, %v8504_v34  ;;  %v3399_v40 = vmul.f32 %v7620_v27, %v7620_v27 }
 0x27b   : > { %v3233_v1 = vand.u32 2147483648, %v8462_v15  ;;  %v3287_v51 = vmul.f32 %v3286_v41, %v8409_v8  ;;  %v3325_v16 = vmul.f32 %v3324_v4, %v8451_v48  ;;  %v3338_v49 = vmul.f32 %v3337_v44, %v8451_v48 }
 0x27c   : > { %v3195_v25 = vsel %vm8519_vm9, %v3194_v54, %v3190_v2  ;;  %vm3228_vm12 = vweird.f32 %v8500_v20  ;;  %4376 = vrcp.f32 %v8544_v17  ;;  %v3363_v31 = vmul.f32 %v3362_v3, %v8504_v34 }
 0x27d   : > { %v3211_v45 = vmul.f32 %v3210_v22, %v7595_v39  ;;  %v3250_v29 = vadd.f32 1.1283791, %v3249_v10  ;;  %v3226_v18 = vadd.f32 %v8500_v20, %v3225_v43  ;;  %v3339_v41 = vadd.f32 0.4994258, %v3338_v49  ;;  %vm8571_vm13 = vmor %vm3227_vm11, %vm3228_vm12 }
 0x27e   : > { %v8561_v26 = vpop.eup %4374  ;;  %v3373_v24 = vadd.f32 0.001143296, %v3372_v13  ;;  %v8564_v54 = vmin.f32 %v3399_v40, 16.0  ;;  %v8567_v4 = vmul.f32 %v3195_v25, %v8481_v30  ;;  %vm8575_vm14 = vcmp.eq.f32.partialorder %v3231_v33, 8.507059e+37 }
 0x27f   : > { %v3288_v22 = vadd.f32 0.18741608, %v3287_v51  ;;  %v3326_v10 = vadd.f32 0.05243302, %v3325_v16  ;;  %v3234_v57 = vor.u32 1.1754944e-38, %v3233_v1  ;;  %v3340_v3 = vmul.f32 %v3339_v41, %v8451_v48 }
 0x280   : > { %v3364_v2 = vadd.f32 0.0036580483, %v3363_v31  ;;  %v3374_v44 = vmul.f32 %v3373_v24, %v8504_v34  ;;  %v8582_v30 = vmul.f32 %v3250_v29, %v7603_v23  ;;  %v3263_v15 = vmul.f32 %v8561_v26, %v8511_v61 }
 0x281   : > { %v3273_v43 = vand.u32 2147483648, %v8511_v61  ;;  %v3401_v33 = vmul.f32 2.1237322e-06, %v8564_v54  ;;  %v3230_v40 = vsel %vm8571_vm13, %v8500_v20, %v3226_v18  ;;  %v8593_v1 = vadd.f32 1.0, %v3340_v3 }
 0x282   : > { %v8588_v13 = vpop.eup %4376  ;;  %v3375_v51 = vadd.f32 0.014752088, %v3374_v44  ;;  %v3412_v16 = vmul.f32 3.8918573e-05, %v8564_v54  ;;  %v3289_v49 = vmul.f32 %v3288_v22, %v8409_v8  ;;  %v3327_v25 = vmul.f32 %v3326_v10, %v8451_v48 }
 0x283   : > { %v3402_v31 = vadd.f32 0.00028619796, %v3401_v33  ;;  %vm3267_vm15 = vweird.f32 %v8511_v61  ;;  %4378 = vrcp.f32 %v8593_v1  ;;  %v3365_v29 = vmul.f32 %v3364_v2, %v8504_v34 }
 0x284   : > { %v3439_v20 = vmul.f32 %v7630_v12, %v7630_v12  ;;  %v3235_v18 = vsel %vm8575_vm14, %v3234_v57, %v3230_v40  ;;  %v3264_v41 = vsub.f32 1.0, %v3263_v15  ;;  %v3303_v24 = vmul.f32 %v8588_v13, %v8544_v17 }
 0x285   : > { %v3376_v8 = vmul.f32 %v3375_v51, %v8504_v34  ;;  %v3271_v58 = vand.u32 2147483647, %v8511_v61  ;;  %v8610_v22 = vor.u32 1.1754944e-38, %v3273_v43  ;;  %v3403_v10 = vmul.f32 %v3402_v31, %v8564_v54 }
 0x286   : > { %v3413_v3 = vadd.f32 0.001143296, %v3412_v16  ;;  %vm3268_vm0 = vweird.f32 %v8561_v26  ;;  %v3290_v2 = vadd.f32 1.1283791, %v3289_v49  ;;  %v3328_v44 = vadd.f32 0.18741608, %v3327_v25 }
 0x287   : > { %v3377_v33 = vadd.f32 0.112945676, %v3376_v8  ;;  %v8614_v39 = vmul.f32 %v3235_v18, %v3211_v45  ;;  %vm3307_vm1 = vweird.f32 %v8544_v17  ;;  %v3404_v57 = vadd.f32 0.0036580483, %v3403_v10  ;;  %v10161_v8 = vld [vmem:[#allocation47_spill] sm:$0xff]  ;;  %vm8650_vm3 = vmor %vm3267_vm15, %vm3268_vm0 }
 0x288   : > { %v3414_v15 = vmul.f32 %v3413_v3, %v8564_v54  ;;  %v8618_v40 = vmin.f32 %v3439_v20, 16.0  ;;  %v3265_v43 = vmul.f32 %v8561_v26, %v3264_v41  ;;  %v3304_v51 = vsub.f32 1.0, %v3303_v24 }
 0x289   : > { %v3366_v23 = vadd.f32 0.05243302, %v3365_v29  ;;  %v3378_v16 = vmul.f32 %v3377_v33, %v8504_v34  ;;  %v8622_v31 = vpop.eup %4378  ;;  %vm8624_vm2 = vcmp.eq.f32.partialorder %v3271_v58, 8.507059e+37  ;;  %v3479_v20 = vmul.f32 %v10161_v8, %v10161_v8 }
 0x28a   : > { %v3415_v45 = vadd.f32 0.014752088, %v3414_v15  ;;  %v3441_v25 = vmul.f32 2.1237322e-06, %v8618_v40  ;;  %v3452_v18 = vmul.f32 3.8918573e-05, %v8618_v40  ;;  %v3329_v24 = vmul.f32 %v3328_v44, %v8451_v48 }
 0x28b   : > { %v3311_v41 = vand.u32 2147483647, %v8544_v17  ;;  %v3313_v29 = vand.u32 2147483648, %v8544_v17  ;;  %v3379_v10 = vadd.f32 0.4994258, %v3378_v16  ;;  %v3405_v3 = vmul.f32 %v3404_v57, %v8564_v54 }
 0x28c   : > { %v3416_v33 = vmul.f32 %v3415_v45, %v8564_v54  ;;  %v3442_v15 = vadd.f32 0.00028619796, %v3441_v25  ;;  %v3266_v11 = vadd.f32 %v8561_v26, %v3265_v43  ;;  %v3343_v6 = vmul.f32 %v8622_v31, %v8593_v1 }
 0x28d   : > { %v3380_v28 = vmul.f32 %v3379_v10, %v8504_v34  ;;  %v3453_v38 = vadd.f32 0.001143296, %v3452_v18  ;;  %v3305_v21 = vmul.f32 %v8588_v13, %v3304_v51  ;;  %v3367_v48 = vmul.f32 %v3366_v23, %v8504_v34 }
 0x28e   : > { %v3417_v44 = vadd.f32 0.112945676, %v3416_v33  ;;  %v8644_v16 = vmin.f32 %v3479_v20, 16.0  ;;  %v3330_v43 = vadd.f32 1.1283791, %v3329_v24  ;;  %v3443_v25 = vmul.f32 %v3442_v15, %v8618_v40 }
 0x28f   : > { %v8654_v45 = vadd.f32 1.0, %v3380_v28  ;;  %v3454_v51 = vmul.f32 %v3453_v38, %v8618_v40  ;;  %vm3308_vm4 = vweird.f32 %v8588_v13  ;;  %v3406_v23 = vadd.f32 0.05243302, %v3405_v3 }
 0x290   : > { %v3418_v18 = vmul.f32 %v3417_v44, %v8564_v54  ;;  %v3481_v20 = vmul.f32 2.1237322e-06, %v8644_v16  ;;  %vm8661_vm5 = vcmp.eq.f32.partialorder %v3311_v41, 8.507059e+37  ;;  %v3314_v10 = vor.u32 1.1754944e-38, %v3313_v29  ;;  %vm8673_vm6 = vmor %vm3307_vm1, %vm3308_vm4 }
 0x291   : > { %v3344_v33 = vsub.f32 1.0, %v3343_v6  ;;  %4380 = vrcp.f32 %v8654_v45  ;;  %v3270_v28 = vsel %vm8650_vm3, %v8561_v26, %v3266_v11  ;;  %v3306_v38 = vadd.f32 %v8588_v13, %v3305_v21  ;;  %v10168_v26 = vld [vmem:[#allocation30_spill] sm:$0xff] }
 0x292   : > { %v3368_v24 = vadd.f32 0.18741608, %v3367_v48  ;;  %v3419_v3 = vadd.f32 0.4994258, %v3418_v18  ;;  %v3291_v15 = vmul.f32 %v3290_v2, %v7606_v35  ;;  %v3444_v29 = vadd.f32 0.0036580483, %v3443_v25 }
 0x293   : > { %v3455_v6 = vadd.f32 0.014752088, %v3454_v51  ;;  %v3482_v44 = vadd.f32 0.00028619796, %v3481_v20  ;;  %v8678_v58 = vmul.f32 %v3330_v43, %v7614_v9  ;;  %v3407_v11 = vmul.f32 %v3406_v23, %v8564_v54 }
 0x294   : > { %v3420_v21 = vmul.f32 %v3419_v3, %v8564_v54  ;;  %v3519_v48 = vmul.f32 %v10168_v26, %v10168_v26  ;;  %v3275_v35 = vsel %vm8624_vm2, %v8610_v22, %v3270_v28  ;;  %v3345_v17 = vmul.f32 %v8622_v31, %v3344_v33 }
 0x295   : > { %v3456_v2 = vmul.f32 %v3455_v6, %v8618_v40  ;;  %v3483_v57 = vmul.f32 %v3482_v44, %v8644_v16  ;;  %v3310_v9 = vsel %vm8673_vm6, %v8588_v13, %v3306_v38  ;;  %vm3347_vm7 = vweird.f32 %v8593_v1 }
 0x296   : > { %v3369_v43 = vmul.f32 %v3368_v24, %v8504_v34  ;;  %v3492_v25 = vmul.f32 3.8918573e-05, %v8644_v16  ;;  %vm3348_vm8 = vweird.f32 %v8622_v31  ;;  %v8699_v22 = vadd.f32 1.0, %v3420_v21 }
 0x297   : > { %v8696_v51 = vpop.eup %4380  ;;  %v3445_v49 = vmul.f32 %v3444_v29, %v8618_v40  ;;  %v3457_v23 = vadd.f32 0.112945676, %v3456_v2  ;;  %v3351_v18 = vand.u32 2147483647, %v8593_v1  ;;  %v3353_v20 = vand.u32 2147483648, %v8593_v1  ;;  %vm8715_vm9 = vmor %vm3347_vm7, %vm3348_vm8 }
 0x298   : > { %v3408_v13 = vadd.f32 0.18741608, %v3407_v11  ;;  %v8704_v33 = vmin.f32 %v3519_v48, 16.0  ;;  %v8707_v34 = vmul.f32 %v3275_v35, %v8582_v30  ;;  %v3346_v28 = vadd.f32 %v8622_v31, %v3345_v17 }
 0x299   : > { %v3458_v38 = vmul.f32 %v3457_v23, %v8618_v40  ;;  %v3484_v24 = vadd.f32 0.0036580483, %v3483_v57  ;;  %v3315_v3 = vsel %vm8661_vm5, %v3314_v10, %v3310_v9  ;;  %v3383_v29 = vmul.f32 %v8696_v51, %v8654_v45 }
 0x29a   : > { %v3493_v6 = vadd.f32 0.001143296, %v3492_v25  ;;  %v3521_v30 = vmul.f32 2.1237322e-06, %v8704_v33  ;;  %v3370_v44 = vadd.f32 1.1283791, %v3369_v43  ;;  %4382 = vrcp.f32 %v8699_v22 }
 0x29b   : > { %v3446_v11 = vadd.f32 0.05243302, %v3445_v49  ;;  %v3459_v21 = vadd.f32 0.4994258, %v3458_v38  ;;  %vm8723_vm10 = vcmp.eq.f32.partialorder %v3351_v18, 8.507059e+37  ;;  %v3354_v1 = vor.u32 1.1754944e-38, %v3353_v20 }
 0x29c   : > { %v3409_v10 = vmul.f32 %v3408_v13, %v8564_v54  ;;  %v3494_v48 = vmul.f32 %v3493_v6, %v8644_v16  ;;  %v8729_v35 = vmul.f32 %v3315_v3, %v3291_v15  ;;  %v3350_v17 = vsel %vm8715_vm9, %v8622_v31, %v3346_v28 }
 0x29d   : > { %v3485_v2 = vmul.f32 %v3484_v24, %v8644_v16  ;;  %v3522_v57 = vadd.f32 0.00028619796, %v3521_v30  ;;  %v3384_v9 = vsub.f32 1.0, %v3383_v29  ;;  %v3391_v43 = vand.u32 2147483647, %v8654_v45  ;;  %v10175_v30 = vld [vmem:[#allocation12_spill] sm:$0xff] }
 0x29e   : > { %v3460_v25 = vmul.f32 %v3459_v21, %v8618_v40  ;;  %v3495_v49 = vadd.f32 0.014752088, %v3494_v48  ;;  %v8739_v54 = vmul.f32 %v3370_v44, %v7617_v63  ;;  %v3447_v15 = vmul.f32 %v3446_v11, %v8618_v40 }
 0x29f   : > { %v3532_v18 = vmul.f32 3.8918573e-05, %v8704_v33  ;;  %v3355_v31 = vsel %vm8723_vm10, %v3354_v1, %v3350_v17  ;;  %v3393_v20 = vand.u32 2147483648, %v8654_v45  ;;  %v3410_v13 = vadd.f32 1.1283791, %v3409_v10 }
 0x2a0   : > { %v3496_v28 = vmul.f32 %v3495_v49, %v8644_v16  ;;  %v8747_v38 = vpop.eup %4382  ;;  %vm3387_vm11 = vweird.f32 %v8654_v45  ;;  %v3486_v63 = vadd.f32 0.05243302, %v3485_v2  ;;  %v3523_v3 = vmul.f32 %v3522_v57, %v8704_v33  ;;  %v10176_v49 = vld [vmem:[#allocation48_spill] sm:$0xff] }
 0x2a1   : > { %v3385_v41 = vmul.f32 %v8696_v51, %v3384_v9  ;;  %vm8753_vm12 = vcmp.eq.f32.partialorder %v3391_v43, 8.507059e+37  ;;  %v8757_v6 = vadd.f32 1.0, %v3460_v25  ;;  %v3559_v44 = vmul.f32 %v10175_v30, %v10175_v30 }
 0x2a2   : > { %v8762_v11 = vmul.f32 %v3355_v31, %v8678_v58  ;;  %v3448_v21 = vadd.f32 0.18741608, %v3447_v15  ;;  %v3497_v61 = vadd.f32 0.112945676, %v3496_v28  ;;  %v3533_v1 = vadd.f32 0.001143296, %v3532_v18 }
 0x2a3   : > { %vm3388_vm13 = vweird.f32 %v8696_v51  ;;  %v3394_v10 = vor.u32 1.1754944e-38, %v3393_v20  ;;  %v8766_v48 = vmul.f32 %v3410_v13, %v7620_v27  ;;  %v3423_v17 = vmul.f32 %v8747_v38, %v8699_v22 }
 0x2a4   : > { %v3487_v2 = vmul.f32 %v3486_v63, %v8644_v16  ;;  %v3498_v57 = vmul.f32 %v3497_v61, %v8644_v16  ;;  %v3524_v9 = vadd.f32 0.0036580483, %v3523_v3  ;;  %v3534_v58 = vmul.f32 %v3533_v1, %v8704_v33  ;;  %vm8782_vm14 = vmor %vm3387_vm11, %vm3388_vm13 }
 0x2a5   : > { %v3386_v43 = vadd.f32 %v8696_v51, %v3385_v41  ;;  %4384 = vrcp.f32 %v8757_v6  ;;  %v8775_v25 = vmin.f32 %v3559_v44, 16.0  ;;  %v3599_v27 = vmul.f32 %v10176_v49, %v10176_v49 }
 0x2a6   : > { %v3449_v31 = vmul.f32 %v3448_v21, %v8618_v40  ;;  %v3499_v20 = vadd.f32 0.4994258, %v3498_v57  ;;  %v3535_v13 = vadd.f32 0.014752088, %v3534_v58  ;;  %v3424_v28 = vsub.f32 1.0, %v3423_v17 }
 0x2a7   : > { %v3431_v63 = vand.u32 2147483647, %v8699_v22  ;;  %v3433_v3 = vand.u32 2147483648, %v8699_v22  ;;  %v3561_v41 = vmul.f32 2.1237322e-06, %v8775_v25  ;;  %v3525_v45 = vmul.f32 %v3524_v9, %v8704_v33 }
 0x2a8   : > { %v3488_v44 = vadd.f32 0.18741608, %v3487_v2  ;;  %v3500_v61 = vmul.f32 %v3499_v20, %v8644_v16  ;;  %v3536_v1 = vmul.f32 %v3535_v13, %v8704_v33  ;;  %v3390_v40 = vsel %vm8782_vm14, %v8696_v51, %v3386_v43 }
 0x2a9   : > { %v3562_v21 = vadd.f32 0.00028619796, %v3561_v41  ;;  %v3572_v17 = vmul.f32 3.8918573e-05, %v8775_v25  ;;  %v8797_v57 = vmin.f32 %v3599_v27, 16.0  ;;  %vm3427_vm15 = vweird.f32 %v8699_v22 }
 0x2aa   : > { %v3450_v58 = vadd.f32 1.1283791, %v3449_v31  ;;  %v8800_v15 = vadd.f32 1.0, %v3500_v61  ;;  %v3537_v2 = vadd.f32 0.112945676, %v3536_v1  ;;  %v3425_v9 = vmul.f32 %v8747_v38, %v3424_v28 }
 0x2ab   : > { %v8802_v20 = vpop.eup %4384  ;;  %v3563_v13 = vmul.f32 %v3562_v21, %v8775_v25  ;;  %v3573_v24 = vadd.f32 0.001143296, %v3572_v17  ;;  %v3601_v51 = vmul.f32 2.1237322e-06, %v8797_v57  ;;  %v3395_v43 = vsel %vm8753_vm12, %v3394_v10, %v3390_v40 }
 0x2ac   : > { %vm8809_vm0 = vcmp.eq.f32.partialorder %v3431_v63, 8.507059e+37  ;;  %v3434_v18 = vor.u32 1.1754944e-38, %v3433_v3  ;;  %v3526_v31 = vadd.f32 0.05243302, %v3525_v45  ;;  %vm3428_vm1 = vweird.f32 %v8747_v38 }
 0x2ad   : > { %v3489_v41 = vmul.f32 %v3488_v44, %v8644_v16  ;;  %4386 = vrcp.f32 %v8800_v15  ;;  %v3538_v28 = vmul.f32 %v3537_v2, %v8704_v33  ;;  %v8818_v61 = vmul.f32 %v3450_v58, %v7630_v12  ;;  %vm8829_vm2 = vmor %vm3427_vm15, %vm3428_vm1  ;;  %v10184_v2 = vld [vmem:[#allocation31_spill] sm:$0xff] }
 0x2ae   : > { %v3463_v29 = vmul.f32 %v8802_v20, %v8757_v6  ;;  %v3574_v10 = vmul.f32 %v3573_v24, %v8775_v25  ;;  %v3602_v63 = vadd.f32 0.00028619796, %v3601_v51  ;;  %v8824_v3 = vmul.f32 %v3395_v43, %v8739_v54 }
 0x2af   : > { %v3426_v45 = vadd.f32 %v8747_v38, %v3425_v9  ;;  %v3539_v1 = vadd.f32 0.4994258, %v3538_v28  ;;  %v3564_v16 = vadd.f32 0.0036580483, %v3563_v13  ;;  %vm3467_vm3 = vweird.f32 %v8757_v6 }
 0x2b0   : > { %10181 = vst [vmem:[#allocation14_spill] sm:$0xff] %v8824_v3  ;;  %v3527_v12 = vmul.f32 %v3526_v31, %v8704_v33  ;;  %v3575_v40 = vadd.f32 0.014752088, %v3574_v10  ;;  %v3603_v24 = vmul.f32 %v3602_v63, %v8797_v57  ;;  %v3612_v54 = vmul.f32 3.8918573e-05, %v8797_v57 }
 0x2b1   : > { %v3473_v21 = vand.u32 2147483648, %v8757_v6  ;;  %v3490_v17 = vadd.f32 1.1283791, %v3489_v41  ;;  %v3540_v58 = vmul.f32 %v3539_v1, %v8704_v33  ;;  %v3639_v22 = vmul.f32 %v10184_v2, %v10184_v2 }
 0x2b2   : > { %v3464_v9 = vsub.f32 1.0, %v3463_v29  ;;  %v3471_v13 = vand.u32 2147483647, %v8757_v6  ;;  %v3576_v51 = vmul.f32 %v3575_v40, %v8775_v25  ;;  %v3613_v43 = vadd.f32 0.001143296, %v3612_v54 }
 0x2b3   : > { %v8843_v31 = vpop.eup %4386  ;;  %v3430_v28 = vsel %vm8829_vm2, %v8747_v38, %v3426_v45  ;;  %v8848_v10 = vadd.f32 1.0, %v3540_v58  ;;  %v3565_v41 = vmul.f32 %v3564_v16, %v8775_v25  ;;  %v3604_v63 = vadd.f32 0.0036580483, %v3603_v24  ;;  %v10187_v58 = vld [vmem:[#allocation49_spill] sm:$0xff] }
 0x2b4   : > { %v3528_v23 = vadd.f32 0.18741608, %v3527_v12  ;;  %v3577_v29 = vadd.f32 0.112945676, %v3576_v51  ;;  %v3614_v50 = vmul.f32 %v3613_v43, %v8797_v57  ;;  %v3474_v62 = vor.u32 1.1754944e-38, %v3473_v21 }
 0x2b5   : > { %v8854_v40 = vmul.f32 %v3490_v17, %v10161_v8  ;;  %4388 = vrcp.f32 %v8848_v10  ;;  %v8857_v54 = vmin.f32 %v3639_v22, 16.0  ;;  %v3435_v38 = vsel %vm8809_vm0, %v3434_v18, %v3430_v28 }
 0x2b6   : > { %v3465_v45 = vmul.f32 %v8802_v20, %v3464_v9  ;;  %vm8862_vm4 = vcmp.eq.f32.partialorder %v3471_v13, 8.507059e+37  ;;  %v3503_v44 = vmul.f32 %v8843_v31, %v8800_v15  ;;  %v3578_v12 = vmul.f32 %v3577_v29, %v8775_v25 }
 0x2b7   : > { %v3566_v8 = vadd.f32 0.05243302, %v3565_v41  ;;  %v3605_v24 = vmul.f32 %v3604_v63, %v8797_v57  ;;  %v3615_v21 = vadd.f32 0.014752088, %v3614_v50  ;;  %v3641_v17 = vmul.f32 2.1237322e-06, %v8857_v54 }
 0x2b8   : > { %vm3468_vm5 = vweird.f32 %v8802_v20  ;;  %v3529_v27 = vmul.f32 %v3528_v23, %v8704_v33  ;;  %v3579_v18 = vadd.f32 0.4994258, %v3578_v12  ;;  %v3679_v22 = vmul.f32 %v10187_v58, %v10187_v58 }
 0x2b9   : > { %v3511_v9 = vand.u32 2147483647, %v8800_v15  ;;  %v3616_v13 = vmul.f32 %v3615_v21, %v8797_v57  ;;  %v3642_v51 = vadd.f32 0.00028619796, %v3641_v17  ;;  %v3652_v43 = vmul.f32 3.8918573e-05, %v8857_v54  ;;  %vm8885_vm6 = vmor %vm3467_vm3, %vm3468_vm5 }
 0x2ba   : > { %v3466_v28 = vadd.f32 %v8802_v20, %v3465_v45  ;;  %v3504_v50 = vsub.f32 1.0, %v3503_v44  ;;  %v3513_v41 = vand.u32 2147483648, %v8800_v15  ;;  %v3580_v63 = vmul.f32 %v3579_v18, %v8775_v25 }
 0x2bb   : > { %v8881_v29 = vpop.eup %4388  ;;  %v3567_v23 = vmul.f32 %v3566_v8, %v8775_v25  ;;  %v3606_v12 = vadd.f32 0.05243302, %v3605_v24  ;;  %v3617_v21 = vadd.f32 0.112945676, %v3616_v13  ;;  %v3653_v17 = vadd.f32 0.001143296, %v3652_v43 }
 0x2bc   : > { %v8891_v45 = vmul.f32 %v3435_v38, %v8766_v48  ;;  %vm3507_vm7 = vweird.f32 %v8800_v15  ;;  %v3643_v44 = vmul.f32 %v3642_v51, %v8857_v54  ;;  %v8895_v18 = vmin.f32 %v3679_v22, 16.0 }
 0x2bd   : > { %v3530_v1 = vadd.f32 1.1283791, %v3529_v27  ;;  %v3543_v6 = vmul.f32 %v8881_v29, %v8848_v10  ;;  %v8899_v3 = vadd.f32 1.0, %v3580_v63  ;;  %v3618_v8 = vmul.f32 %v3617_v21, %v8797_v57 }
 0x2be   : > { %v3470_v24 = vsel %vm8885_vm6, %v8802_v20, %v3466_v28  ;;  %v3505_v48 = vmul.f32 %v8843_v31, %v3504_v50  ;;  %vm8906_vm8 = vcmp.eq.f32.partialorder %v3511_v9, 8.507059e+37  ;;  %v3654_v22 = vmul.f32 %v3653_v17, %v8857_v54 }
 0x2bf   : > { %v3681_v27 = vmul.f32 2.1237322e-06, %v8895_v18  ;;  %v3514_v13 = vor.u32 1.1754944e-38, %v3513_v41  ;;  %v3568_v51 = vadd.f32 0.18741608, %v3567_v23  ;;  %4390 = vrcp.f32 %v8899_v3 }
 0x2c0   : > { %v3607_v43 = vmul.f32 %v3606_v12, %v8797_v57  ;;  %vm3508_vm9 = vweird.f32 %v8843_v31  ;;  %v3551_v20 = vand.u32 2147483647, %v8848_v10  ;;  %v3619_v28 = vadd.f32 0.4994258, %v3618_v8 }
 0x2c1   : > { %v3644_v50 = vadd.f32 0.0036580483, %v3643_v44  ;;  %v3475_v9 = vsel %vm8862_vm4, %v3474_v62, %v3470_v24  ;;  %v3544_v63 = vsub.f32 1.0, %v3543_v6  ;;  %v3655_v33 = vadd.f32 0.014752088, %v3654_v22  ;;  %vm8926_vm10 = vmor %vm3507_vm7, %vm3508_vm9 }
 0x2c2   : > { %v3682_v21 = vadd.f32 0.00028619796, %v3681_v27  ;;  %v3506_v17 = vadd.f32 %v8843_v31, %v3505_v48  ;;  %v8920_v41 = vmul.f32 %v3530_v1, %v10168_v26  ;;  %v3553_v23 = vand.u32 2147483648, %v8848_v10 }
 0x2c3   : > { %v3620_v12 = vmul.f32 %v3619_v28, %v8797_v57  ;;  %v3569_v62 = vmul.f32 %v3568_v51, %v8775_v25  ;;  %v3608_v16 = vadd.f32 0.18741608, %v3607_v43  ;;  %v3656_v44 = vmul.f32 %v3655_v33, %v8857_v54  ;;  %v10196_v28 = vld [vmem:[#allocation32_spill] sm:$0xff] }
 0x2c4   : > { %v3683_v6 = vmul.f32 %v3682_v21, %v8895_v18  ;;  %v8934_v26 = vmul.f32 %v3475_v9, %v8818_v61  ;;  %vm3547_vm11 = vweird.f32 %v8848_v10  ;;  %v3645_v15 = vmul.f32 %v3644_v50, %v8857_v54 }
 0x2c5   : > { %v8937_v1 = vadd.f32 1.0, %v3620_v12  ;;  %v8940_v24 = vpop.eup %4390  ;;  %v3545_v48 = vmul.f32 %v8881_v29, %v3544_v63  ;;  %vm8943_vm12 = vcmp.eq.f32.partialorder %v3551_v20, 8.507059e+37  ;;  %v3657_v22 = vadd.f32 0.112945676, %v3656_v44 }
 0x2c6   : > { %v3684_v27 = vadd.f32 0.0036580483, %v3683_v6  ;;  %v3692_v51 = vmul.f32 3.8918573e-05, %v8895_v18  ;;  %v3510_v61 = vsel %vm8926_vm10, %v8843_v31, %v3506_v17  ;;  %v3583_v43 = vmul.f32 %v8940_v24, %v8899_v3 }
 0x2c7   : > { %4392 = vrcp.f32 %v8937_v1  ;;  %v3719_v50 = vmul.f32 %v10196_v28, %v10196_v28  ;;  %vm3548_vm13 = vweird.f32 %v8881_v29  ;;  %v3554_v20 = vor.u32 1.1754944e-38, %v3553_v23 }
 0x2c8   : > { %v3570_v9 = vadd.f32 1.1283791, %v3569_v62  ;;  %v3609_v63 = vmul.f32 %v3608_v16, %v8797_v57  ;;  %v3584_v33 = vsub.f32 1.0, %v3583_v43  ;;  %v3646_v21 = vadd.f32 0.05243302, %v3645_v15  ;;  %vm8966_vm14 = vmor %vm3547_vm11, %vm3548_vm13 }
 0x2c9   : > { %v3658_v12 = vmul.f32 %v3657_v22, %v8857_v54  ;;  %v3685_v31 = vmul.f32 %v3684_v27, %v8895_v18  ;;  %v3515_v17 = vsel %vm8906_vm8, %v3514_v13, %v3510_v61  ;;  %v3546_v8 = vadd.f32 %v8881_v29, %v3545_v48 }
 0x2ca   : > { %v3591_v44 = vand.u32 2147483647, %v8899_v3  ;;  %v3693_v6 = vadd.f32 0.001143296, %v3692_v51  ;;  %v3585_v57 = vmul.f32 %v8940_v24, %v3584_v33  ;;  %v3593_v62 = vand.u32 2147483648, %v8899_v3 }
 0x2cb   : > { %v3659_v16 = vadd.f32 0.4994258, %v3658_v12  ;;  %v8972_v15 = vmin.f32 %v3719_v50, 16.0  ;;  %vm3587_vm15 = vweird.f32 %v8899_v3  ;;  %v3610_v38 = vadd.f32 1.1283791, %v3609_v63 }
 0x2cc   : > { %v3686_v13 = vadd.f32 0.05243302, %v3685_v31  ;;  %v3694_v48 = vmul.f32 %v3693_v6, %v8895_v18  ;;  %vm3588_vm0 = vweird.f32 %v8940_v24  ;;  %v3647_v10 = vmul.f32 %v3646_v21, %v8857_v54 }
 0x2cd   : > { %v4393_v22 = vpop.eup %4392  ;;  %v3660_v27 = vmul.f32 %v3659_v16, %v8857_v54  ;;  %v3721_v51 = vmul.f32 2.1237322e-06, %v8972_v15  ;;  %v3550_v61 = vsel %vm8966_vm14, %v8881_v29, %v3546_v8  ;;  %vm8983_vm1 = vcmp.eq.f32.partialorder %v3591_v44, 8.507059e+37  ;;  %vm8993_vm2 = vmor %vm3587_vm15, %vm3588_vm0 }
 0x2ce   : > { %v3623_v50 = vmul.f32 %v4393_v22, %v8937_v1  ;;  %v3695_v63 = vadd.f32 0.014752088, %v3694_v48  ;;  %v3586_v33 = vadd.f32 %v8940_v24, %v3585_v57  ;;  %v3594_v12 = vor.u32 1.1754944e-38, %v3593_v62 }
 0x2cf   : > { %v8989_v31 = vadd.f32 1.0, %v3660_v27  ;;  %v3722_v21 = vadd.f32 0.00028619796, %v3721_v51  ;;  %v3687_v8 = vmul.f32 %v3686_v13, %v8895_v18  ;;  %v3732_v23 = vmul.f32 3.8918573e-05, %v8972_v15 }
 0x2d0   : > { %v3624_v29 = vsub.f32 1.0, %v3623_v50  ;;  %v3696_v44 = vmul.f32 %v3695_v63, %v8895_v18  ;;  %v3555_v57 = vsel %vm8943_vm12, %v3554_v20, %v3550_v61  ;;  %vm3627_vm3 = vweird.f32 %v8937_v1 }
 0x2d1   : > { %v3648_v62 = vadd.f32 0.18741608, %v3647_v10  ;;  %4394 = vrcp.f32 %v8989_v31  ;;  %vm3628_vm4 = vweird.f32 %v4393_v22  ;;  %v3631_v16 = vand.u32 2147483647, %v8937_v1 }
 0x2d2   : > { %v3625_v3 = vmul.f32 %v4393_v22, %v3624_v29  ;;  %v3697_v48 = vadd.f32 0.112945676, %v3696_v44  ;;  %v3590_v13 = vsel %vm8993_vm2, %v8940_v24, %v3586_v33  ;;  %v3633_v27 = vand.u32 2147483648, %v8937_v1  ;;  %vm9017_vm5 = vmor %vm3627_vm3, %vm3628_vm4 }
 0x2d3   : > { %v3723_v51 = vmul.f32 %v3722_v21, %v8972_v15  ;;  %v3733_v25 = vadd.f32 0.001143296, %v3732_v23  ;;  %v3571_v20 = vmul.f32 %v3570_v9, %v10175_v30  ;;  %v3688_v10 = vadd.f32 0.18741608, %v3687_v8 }
 0x2d4   : > { %v3626_v61 = vadd.f32 %v4393_v22, %v3625_v3  ;;  %v3698_v50 = vmul.f32 %v3697_v48, %v8895_v18  ;;  %v9013_v63 = vmul.f32 %v3515_v17, %v8854_v40  ;;  %v3649_v24 = vmul.f32 %v3648_v62, %v8857_v54 }
 0x2d5   : > { %v3724_v33 = vadd.f32 0.0036580483, %v3723_v51  ;;  %v3734_v21 = vmul.f32 %v3733_v25, %v8972_v15  ;;  %v9024_v30 = vmul.f32 %v3555_v57, %v8920_v41  ;;  %v3595_v9 = vsel %vm8983_vm1, %v3594_v12, %v3590_v13 }
 0x2d6   : > { %v3611_v40 = vmul.f32 %v3610_v38, %v10176_v49  ;;  %v3699_v17 = vadd.f32 0.4994258, %v3698_v50  ;;  %vm9029_vm6 = vcmp.eq.f32.partialorder %v3631_v16, 8.507059e+37  ;;  %v3634_v8 = vor.u32 1.1754944e-38, %v3633_v27 }
 0x2d7   : > { %v4395_v6 = vpop.eup %4394  ;;  %v3725_v54 = vmul.f32 %v3724_v33, %v8972_v15  ;;  %v3735_v44 = vadd.f32 0.014752088, %v3734_v21  ;;  %v3630_v23 = vsel %vm9017_vm5, %v4393_v22, %v3626_v61  ;;  %v3689_v43 = vmul.f32 %v3688_v10, %v8895_v18 }
 0x2d8   : > { %v3663_v41 = vmul.f32 %v4395_v6, %v8989_v31  ;;  %v3700_v12 = vmul.f32 %v3699_v17, %v8895_v18  ;;  %v9039_v49 = vmul.f32 %v3595_v9, %v3571_v20  ;;  %v3650_v38 = vadd.f32 1.1283791, %v3649_v24 }
 0x2d9   : > { %v3726_v57 = vadd.f32 0.05243302, %v3725_v54  ;;  %v3736_v62 = vmul.f32 %v3735_v44, %v8972_v15  ;;  %vm3667_vm7 = vweird.f32 %v8989_v31  ;;  %vm3668_vm8 = vweird.f32 %v4395_v6 }
 0x2da   : > { %v3664_v3 = vsub.f32 1.0, %v3663_v41  ;;  %v3701_v16 = vadd.f32 1.0, %v3700_v12  ;;  %v3635_v22 = vsel %vm9029_vm6, %v3634_v8, %v3630_v23  ;;  %v3673_v48 = vand.u32 2147483648, %v8989_v31  ;;  %vm9050_vm9 = vmor %vm3667_vm7, %vm3668_vm8 }
 0x2db   : > { %v3727_v13 = vmul.f32 %v3726_v57, %v8972_v15  ;;  %v3737_v27 = vadd.f32 0.112945676, %v3736_v62  ;;  %v3671_v51 = vand.u32 2147483647, %v8989_v31  ;;  %v3690_v25 = vadd.f32 1.1283791, %v3689_v43 }
 0x2dc   : > { %v3665_v18 = vmul.f32 %v4395_v6, %v3664_v3  ;;  %4396 = vrcp.f32 %v3701_v16  ;;  %v4112_v20 = vclamps-f32 %v8891_v45, 1.0  ;;  %v4113_v61 = vclamps-f32 %v8934_v26, 1.0 }
 0x2dd   : > { %v3728_v50 = vadd.f32 0.18741608, %v3727_v13  ;;  %v3738_v29 = vmul.f32 %v3737_v27, %v8972_v15  ;;  %v4114_v24 = vclamps-f32 %v9013_v63, 1.0  ;;  %v4115_v33 = vclamps-f32 %v9024_v30, 1.0  ;;  %v10245_v30 = vld [vmem:[#allocation57_spill] sm:$0xff]  ;;  %v10263_v63 = vld [vmem:[#allocation44_spill] sm:$0xff] }
 0x2de   : > { %v9057_v21 = vmul.f32 %v3635_v22, %v3611_v40  ;;  %v3666_v31 = vadd.f32 %v4395_v6, %v3665_v18  ;;  %v4116_v9 = vclamps-f32 %v9039_v49, 1.0  ;;  %v3651_v17 = vmul.f32 %v3650_v38, %v10184_v2  ;;  %v10246_v49 = vld [vmem:[#allocation77_spill] sm:$0xff] }
 0x2df   : > { %v3674_v1 = vor.u32 1.1754944e-38, %v3673_v48  ;;  %v3739_v8 = vadd.f32 0.4994258, %v3738_v29  ;;  %vm3672_vm10 = vcmp.eq.f32.partialorder %v3671_v51, 8.507059e+37  ;;  %v3691_v44 = vmul.f32 %v3690_v25, %v10187_v58 }
 0x2e0   : > { %v3670_v54 = vsel %vm9050_vm9, %v4395_v6, %v3666_v31  ;;  %v3711_v23 = vand.u32 2147483647, %v3701_v16  ;;  %v3729_v41 = vmul.f32 %v3728_v50, %v8972_v15  ;;  %v10209_v40 = vclamps-f32 %v7836_v53, 1.0 }
 0x2e1   : > { %v3740_v43 = vmul.f32 %v3739_v8, %v8972_v15  ;;  %v10210_v57 = vclamps-f32 %v7842_v14, 1.0  ;;  %v4117_v38 = vclamps-f32 %v9057_v21, 1.0  ;;  %v3713_v3 = vand.u32 2147483648, %v3701_v16 }
 0x2e2   : > { %v3759_v12 = vadd.f32 1.0, %v10209_v40  ;;  %v4397_v2 = vpop.eup %4396  ;;  %v10211_v6 = vclamps-f32 %v7845_v46, 1.0  ;;  %v10212_v58 = vclamps-f32 %v7870_v60, 1.0  ;;  %v3675_v13 = vsel %vm3672_vm10, %v3674_v1, %v3670_v54 }
 0x2e3   : > { %v3760_v62 = vadd.f32 1.0, %v10210_v57  ;;  %v3703_v27 = vmul.f32 %v4397_v2, %v3701_v16  ;;  %v3741_v18 = vadd.f32 1.0, %v3740_v43  ;;  %v10213_v15 = vclamps-f32 %v7953_v42, 1.0 }
 0x2e4   : > { %v3761_v22 = vadd.f32 1.0, %v10211_v6  ;;  %v3762_v48 = vadd.f32 1.0, %v10212_v58  ;;  %vm3707_vm11 = vweird.f32 %v3701_v16  ;;  %vm9077_vm12 = vcmp.eq.f32.partialorder %v3711_v23, 8.507059e+37 }
 0x2e5   : > { %v3763_v53 = vadd.f32 1.0, %v10213_v15  ;;  %v10216_v51 = vclamps-f32 %v8017_v59, 1.0  ;;  %v10217_v46 = vclamps-f32 %v8057_v7, 1.0  ;;  %v3704_v50 = vsub.f32 1.0, %v3703_v27 }
 0x2e6   : > { %vm3708_vm13 = vweird.f32 %v4397_v2  ;;  %v3730_v60 = vadd.f32 1.1283791, %v3729_v41  ;;  %4398 = vrcp.f32 %v3741_v18  ;;  %v9085_v29 = vmul.f32 %v3675_v13, %v3651_v17 }
 0x2e7   : > { %v3764_v25 = vadd.f32 1.0, %v10216_v51  ;;  %v3765_v10 = vadd.f32 1.0, %v10217_v46  ;;  %v3714_v21 = vor.u32 1.1754944e-38, %v3713_v3  ;;  %v10218_v42 = vclamps-f32 %v8103_v5, 1.0  ;;  %vm9098_vm14 = vmor %vm3707_vm11, %vm3708_vm13 }
 0x2e8   : > { %v10219_v1 = vclamps-f32 %v8136_v36, 1.0  ;;  %v3705_v54 = vmul.f32 %v4397_v2, %v3704_v50  ;;  %v10220_v59 = vclamps-f32 %v8179_v52, 1.0  ;;  %v10221_v7 = vclamps-f32 %v8246_v19, 1.0 }
 0x2e9   : > { %v3766_v31 = vadd.f32 1.0, %v10218_v42  ;;  %v10222_v40 = vclamps-f32 %v8285_v32, 1.0  ;;  %v3751_v5 = vand.u32 2147483647, %v3741_v18  ;;  %v10225_v57 = vclamps-f32 %v8329_v56, 1.0 }
 0x2ea   : > { %v3767_v8 = vadd.f32 1.0, %v10219_v1  ;;  %v3768_v23 = vadd.f32 1.0, %v10220_v59  ;;  %v3769_v43 = vadd.f32 1.0, %v10221_v7  ;;  %v10226_v3 = vclamps-f32 %v8367_v37, 1.0 }
 0x2eb   : > { %v3770_v41 = vadd.f32 1.0, %v10222_v40  ;;  %v3771_v36 = vadd.f32 1.0, %v10225_v57  ;;  %v10227_v52 = vclamps-f32 %v8454_v0, 1.0  ;;  %v3706_v19 = vadd.f32 %v4397_v2, %v3705_v54 }
 0x2ec   : > { %v3772_v6 = vadd.f32 1.0, %v10226_v3  ;;  %v3731_v13 = vmul.f32 %v3730_v60, %v10196_v28  ;;  %v3753_v32 = vand.u32 2147483648, %v3741_v18  ;;  %v10228_v16 = vclamps-f32 %v8516_v47, 1.0  ;;  %v4399_v0 = vpop.eup %4398 }
 0x2ed   : > { %v3773_v58 = vadd.f32 1.0, %v10227_v52  ;;  %v4118_v15 = vclamps-f32 %v9085_v29, 1.0  ;;  %v10229_v51 = vclamps-f32 %v8524_v55, 1.0  ;;  %v10230_v56 = vclamps-f32 %v8567_v4, 1.0  ;;  %v10239_v52 = vld [vmem:[#allocation73_spill] sm:$0xff] }
 0x2ee   : > { %v3774_v27 = vadd.f32 1.0, %v10228_v16  ;;  %v10231_v37 = vclamps-f32 %v8614_v39, 1.0  ;;  %v3710_v1 = vsel %vm9098_vm14, %v4397_v2, %v3706_v19  ;;  %vm3747_vm15 = vweird.f32 %v3741_v18  ;;  %v10237_v2 = vld [vmem:[#allocation14_spill] sm:$0xff]  ;;  %v10242_v16 = vld [vmem:[#allocation76_spill] sm:$0xff] }
 0x2ef   : > { %v3775_v46 = vadd.f32 1.0, %v10229_v51  ;;  %v3776_v50 = vadd.f32 1.0, %v10230_v56  ;;  %v10232_v28 = vclamps-f32 %v8707_v34, 1.0  ;;  %v10233_v60 = vclamps-f32 %v8729_v35, 1.0  ;;  %v10240_v19 = vld [vmem:[#allocation74_spill] sm:$0xff] }
 0x2f0   : > { %v3777_v42 = vadd.f32 1.0, %v10231_v37  ;;  %v3715_v55 = vsel %vm9077_vm12, %v3714_v21, %v3710_v1  ;;  %v3743_v54 = vmul.f32 %v4399_v0, %v3741_v18  ;;  %vm9126_vm0 = vcmp.eq.f32.partialorder %v3751_v5, 8.507059e+37  ;;  %v10249_v37 = vld [vmem:[#allocation22_spill] sm:$0xff]  ;;  %v10250_v1 = vld [vmem:[#allocation4_spill] sm:$0xff] }
 0x2f1   : > { %v3778_v47 = vadd.f32 1.0, %v10232_v28  ;;  %v3779_v29 = vadd.f32 1.0, %v10233_v60  ;;  %v10236_v39 = vclamps-f32 %v8762_v11, 1.0  ;;  %v3754_v7 = vor.u32 1.1754944e-38, %v3753_v32  ;;  %v10251_v28 = vld [vmem:[#allocation40_spill] sm:$0xff]  ;;  %v10253_v60 = vld [vmem:[#allocation5_spill] sm:$0xff] }
 0x2f2   : > { %v10238_v40 = vclamps-f32 %v10237_v2, 1.0  ;;  %v3782_v34 = vadd.f32 1.0, %v4112_v20  ;;  %v3783_v35 = vadd.f32 1.0, %v4113_v61  ;;  %v3744_v14 = vsub.f32 1.0, %v3743_v54  ;;  %v10241_v61 = vld [vmem:[#allocation75_spill] sm:$0xff]  ;;  %v10255_v54 = vld [vmem:[#allocation24_spill] sm:$0xff] }
 0x2f3   : > { %v3780_v59 = vadd.f32 1.0, %v10236_v39  ;;  %vm3748_vm1 = vweird.f32 %v4399_v0  ;;  %v3784_v21 = vadd.f32 1.0, %v4114_v24  ;;  %v3785_v5 = vadd.f32 1.0, %v4115_v33 }
 0x2f4   : > { %v3781_v17 = vadd.f32 1.0, %v10238_v40  ;;  %v3716_v11 = vmul.f32 %v3715_v55, %v3691_v44  ;;  %v3786_v57 = vadd.f32 1.0, %v4116_v9  ;;  %v3787_v3 = vadd.f32 1.0, %v4117_v38  ;;  %vm9149_vm2 = vmor %vm3747_vm15, %vm3748_vm1  ;;  %v10247_v9 = vld [vmem:[#allocation78_spill] sm:$0xff]  ;;  %v10248_v38 = vld [vmem:[#allocation56_spill] sm:$0xff] }
 0x2f5   : > { %v3791_v45 = vmul.f32 %v3759_v12, %v10239_v52  ;;  %v3745_v20 = vmul.f32 %v4399_v0, %v3744_v14  ;;  %v3792_v26 = vmul.f32 %v3760_v62, %v10240_v19  ;;  %v3793_v32 = vmul.f32 %v3761_v22, %v10241_v61  ;;  %v10254_v55 = vld [vmem:[#allocation41_spill] sm:$0xff]  ;;  %v10256_v40 = vld [vmem:[#allocation6_spill] sm:$0xff] }
 0x2f6   : > { %v3794_v51 = vmul.f32 %v3762_v48, %v10242_v16  ;;  %v3795_v24 = vmul.f32 %v3763_v53, %v10245_v30  ;;  %v3796_v33 = vmul.f32 %v3764_v25, %v10246_v49  ;;  %v3797_v44 = vmul.f32 %v3765_v10, %v10247_v9  ;;  %v10252_v53 = vld [vmem:[#allocation23_spill] sm:$0xff]  ;;  %v10265_v49 = vld [vmem:[#allocation9_spill] sm:$0xff] }
 0x2f7   : > { %v3798_v12 = vmul.f32 %v3766_v31, %v10248_v38  ;;  %v3746_v56 = vadd.f32 %v4399_v0, %v3745_v20  ;;  %v3799_v62 = vmul.f32 %v3767_v8, %v10249_v37  ;;  %v3800_v22 = vmul.f32 %v3768_v23, %v10250_v1  ;;  %v10266_v9 = vld [vmem:[#allocation45_spill] sm:$0xff] }
 0x2f8   : > { %v3801_v48 = vmul.f32 %v3769_v43, %v10251_v28  ;;  %v4119_v18 = vclamps-f32 %v3716_v11, 1.0  ;;  %v3802_v25 = vmul.f32 %v3770_v41, %v10252_v53  ;;  %v3803_v10 = vmul.f32 %v3771_v36, %v10253_v60  ;;  %v10257_v36 = vld [vmem:[#allocation42_spill] sm:$0xff]  ;;  %v10272_v28 = vld [vmem:[#allocation13_spill] sm:$0xff] }
 0x2f9   : > { %v3804_v31 = vmul.f32 %v3772_v6, %v10254_v55  ;;  %v3750_v8 = vsel %vm9149_vm2, %v4399_v0, %v3746_v56  ;;  %v3805_v23 = vmul.f32 %v3773_v58, %v10255_v54  ;;  %v4203_v43 = vpack.c.bf16 %v3792_v26, %v3791_v45  ;;  %v10258_v6 = vld [vmem:[#allocation25_spill] sm:$0xff]  ;;  %v10259_v58 = vld [vmem:[#allocation7_spill] sm:$0xff] }
 0x2fa   : > { %v4208_v39 = vpack.c.bf16 %v3794_v51, %v3793_v32  ;;  %v3755_v2 = vsel %vm9126_vm0, %v3754_v7, %v3750_v8  ;;  %v3806_v14 = vmul.f32 %v3774_v27, %v10256_v40  ;;  %v4213_v11 = vpack.c.bf16 %v3796_v33, %v3795_v24  ;;  %v10260_v26 = vld [vmem:[#allocation43_spill] sm:$0xff]  ;;  %v10261_v7 = vld [vmem:[#allocation26_spill] sm:$0xff]  ;;  %v10262_v51 = vld [vmem:[#allocation8_spill] sm:$0xff] }
 0x2fb   : > { %v4218_v41 = vpack.c.bf16 %v3798_v12, %v3797_v44  ;;  %v3756_v52 = vmul.f32 %v3755_v2, %v3731_v13  ;;  %v3807_v20 = vmul.f32 %v3775_v46, %v10257_v36  ;;  %v3808_v19 = vmul.f32 %v3776_v50, %v10258_v6  ;;  %4204 = vst [vmem:[%s9164_s28] sm:$0xff] %v4203_v43   ;;  %v10267_v44 = vld [vmem:[#allocation28_spill] sm:$0xff]  ;;  %v10268_v12 = vld [vmem:[#allocation10_spill] sm:$0xff] }
 0x2fc   : > { %v4223_v0 = vpack.c.bf16 %v3800_v22, %v3799_v62  ;;  %v3788_v61 = vadd.f32 1.0, %v4118_v15  ;;  %v3809_v45 = vmul.f32 %v3777_v42, %v10259_v58  ;;  %v3810_v32 = vmul.f32 %v3778_v47, %v10260_v26  ;;  %4296 = vst [vmem:[%s9164_s28 + $0x8] sm:$0xff] %v4208_v39   ;;  %v10264_v15 = vld [vmem:[#allocation27_spill] sm:$0xff]  ;;  %v10270_v62 = vld [vmem:[#allocation29_spill] sm:$0xff] }
 0x2fd   : > { %v4228_v4 = vpack.c.bf16 %v3802_v25, %v3801_v48  ;;  %v4120_v27 = vclamps-f32 %v3756_v52, 1.0  ;;  %v3811_v16 = vmul.f32 %v3779_v29, %v10261_v7  ;;  %v3812_v13 = vmul.f32 %v3780_v59, %v10262_v51  ;;  %4297 = vst [vmem:[%s9164_s28 + $0x10] sm:$0xff] %v4213_v11  }
 0x2fe   : > { %v4233_v46 = vpack.c.bf16 %v3804_v31, %v3803_v10  ;;  %v3789_v50 = vadd.f32 1.0, %v4119_v18  ;;  %v3813_v30 = vmul.f32 %v3781_v17, %v10263_v63  ;;  %v3814_v24 = vmul.f32 %v3782_v34, %v10264_v15  ;;  %4298 = vst [vmem:[%s9164_s28 + $0x18] sm:$0xff] %v4218_v41   ;;  %v10269_v34 = vld [vmem:[#allocation46_spill] sm:$0xff] }
 0x2ff   : > { %v4238_v42 = vpack.c.bf16 %v3806_v14, %v3805_v23  ;;  %v3790_v47 = vadd.f32 1.0, %v4120_v27  ;;  %v3815_v33 = vmul.f32 %v3783_v35, %v10265_v49  ;;  %v3816_v29 = vmul.f32 %v3784_v21, %v10266_v9  ;;  %4299 = vst [vmem:[%s9164_s28 + $0x20] sm:$0xff] %v4223_v0   ;;  %v10271_v21 = vld [vmem:[#allocation11_spill] sm:$0xff] }
 0x300   : > { %v4243_v59 = vpack.c.bf16 %v3808_v19, %v3807_v20  ;;  %v3817_v38 = vmul.f32 %v3785_v5, %v10267_v44  ;;  %v3818_v56 = vmul.f32 %v3786_v57, %v10268_v12  ;;  %4300 = vst [vmem:[%s9164_s28 + $0x28] sm:$0xff] %v4228_v4   ;;  %v4248_v17 = vpack.c.bf16 %v3810_v32, %v3809_v45 }
 0x301   : > { %v3819_v37 = vmul.f32 %v3787_v3, %v10269_v34  ;;  %v3820_v1 = vmul.f32 %v3788_v61, %v10270_v62  ;;  %4301 = vst [vmem:[%s9164_s28 + $0x30] sm:$0xff] %v4233_v46   ;;  %v4253_v35 = vpack.c.bf16 %v3812_v13, %v3811_v16  ;;  %v3821_v22 = vmul.f32 %v3789_v50, %v10271_v21 }
 0x302   : > { %v3822_v5 = vmul.f32 %v3790_v47, %v10272_v28  ;;  %4302 = vst [vmem:[%s9164_s28 + $0x38] sm:$0xff] %v4238_v42   ;;  %v4258_v48 = vpack.c.bf16 %v3814_v24, %v3813_v30  ;;  %v4263_v57 = vpack.c.bf16 %v3816_v29, %v3815_v33  ;;  %v4268_v18 = vpack.c.bf16 %v3818_v56, %v3817_v38 }
 0x303   : > { %4303 = vst [vmem:[%s9164_s28 + $0x40] sm:$0xff] %v4243_v59   ;;  %v4273_v3 = vpack.c.bf16 %v3820_v1, %v3819_v37 }
 0x304   : > { %4304 = vst [vmem:[%s9164_s28 + $0x48] sm:$0xff] %v4248_v17   ;;  %v4278_v53 = vpack.c.bf16 %v3822_v5, %v3821_v22 }
 0x305   : > { %4305 = vst [vmem:[%s9164_s28 + $0x50] sm:$0xff] %v4253_v35  }
 0x306   : > { %4306 = vst [vmem:[%s9164_s28 + $0x58] sm:$0xff] %v4258_v48  }
 0x307   : > { %4307 = vst [vmem:[%s9164_s28 + $0x60] sm:$0xff] %v4263_v57  }
 0x308   : > { %4308 = vst [vmem:[%s9164_s28 + $0x68] sm:$0xff] %v4268_v18  }
 0x309   : > { %4309 = vst [vmem:[%s9164_s28 + $0x70] sm:$0xff] %v4273_v3  }
 0x30a   : > { %4310 = vst [vmem:[%s9164_s28 + $0x78] sm:$0xff] %v4278_v53  }
 0x30b PF: > { %s15_s20 = sadd.s32 1, %s4425_s20   ;;  %s10273_s18 = smov %s4421_s19 }
 0x30c   : > { %p12_p5 = scmp.ge.s32.totalorder %s15_s20, 4   ;;  %s10274_s19 = smov %s10276_s21 }
 0x30e   :  { %14 = sbr.rel (!%p12_p5) target bundleno = 2 (0x2), region = 82 }

</bundles_post_ra>
